<compile_context>
chip_gen: v5e
topology: v5e:2x2
jax: 0.10.0
libtpu: 0.0.40
codegen_flags: <defaults>
</compile_context>

<pallas_src>
import jax
import jax.numpy as jnp
from jax import lax
from jax.experimental import pallas as pl
from jax.experimental.pallas import tpu as pltpu


LANES = 128        # channel / output-channel dims padded to full lane width
NEG_SLOPE = 0.1    # LeakyReLU negative slope used by the module
BN_EPS = 1e-5


def _round_up(v, m):
    return (v + m - 1) // m * m


def _make_resblock_kernel(Wp, M_out, M_ext, H, W, magic, shift):
    """Fused ResBlock kernel for one batch element (flattened padded grid)."""
    margin = Wp                       # halo rows above/below the center block

    def conv3x3(src_ref, w_ref):
        # One 3x3 conv as 3 aligned slab loads x 3 kx matmuls; the +/-1 kx row
        # offset is applied afterwards with an f32 sublane roll (XLU).
        # slab_ky[m] = grid row (m + (ky-1)*Wp);  all starts are multiples of 8.
        slab = src_ref[pl.ds(0, M_out), :]                      # ky = 0
        pL = jnp.dot(slab, w_ref[0], preferred_element_type=jnp.float32)
        pC = jnp.dot(slab, w_ref[1], preferred_element_type=jnp.float32)
        pR = jnp.dot(slab, w_ref[2], preferred_element_type=jnp.float32)
        for ky in (1, 2):
            slab = src_ref[pl.ds(ky * Wp, M_out), :]
            pL = pL + jnp.dot(slab, w_ref[3 * ky + 0], preferred_element_type=jnp.float32)
            pC = pC + jnp.dot(slab, w_ref[3 * ky + 1], preferred_element_type=jnp.float32)
            pR = pR + jnp.dot(slab, w_ref[3 * ky + 2], preferred_element_type=jnp.float32)
        # out[m] = pL[m-1] + pC[m] + pR[m+1]; the cyclic wrap rows land on
        # spatial-padding output rows which the wrapper slices away.
        return (pC
                + pltpu.roll(pL, shift=1, axis=0)
                + pltpu.roll(pR, shift=M_out - 1, axis=0))

    def kernel(x_ref, w1_ref, b1_ref, w2_ref, b2_ref, o_ref, a1_ref):
        # Zero the scratch halo bands once; the per-step center write never
        # touches them, and they only ever feed output rows that are sliced
        # away, so stale values on other cores are harmless.
        @pl.when(pl.program_id(0) == 0)
        def _():
            a1_ref[pl.ds(0, margin), :] = jnp.zeros((margin, LANES), jnp.bfloat16)
            a1_ref[pl.ds(margin + M_out, M_ext - margin - M_out), :] = jnp.zeros(
                (M_ext - margin - M_out, LANES), jnp.bfloat16)

        # ---- conv1 (BN1 scale folded into w1) + bias + LeakyReLU ------------
        a1 = conv3x3(x_ref, w1_ref) + b1_ref[...]
        a1 = jnp.maximum(a1, NEG_SLOPE * a1)                    # LeakyReLU(0.1)

        # In-kernel border mask: zero spatial-padding rows so conv2 sees true
        # zero padding.  yy = m // Wp via magic multiply + shift (no vector
        # integer division); xx = m - yy*Wp.
        m = lax.broadcasted_iota(jnp.int32, (M_out, LANES), 0)
        yy = (m * magic) >> shift
        xx = m - yy * Wp
        valid = (yy >= 1) & (yy <= H) & (xx >= 1) & (xx <= W)
        a1 = jnp.where(valid, a1, 0.0)

        # Stage conv2's input (center rows only) in the persistent VMEM scratch.
        a1_ref[pl.ds(margin, M_out), :] = a1.astype(jnp.bfloat16)

        # ---- conv2 (BN2 scale folded into w2) + bias + residual + LeakyReLU -
        out = conv3x3(a1_ref, w2_ref) + b2_ref[...]
        # Residual read from the bf16 staged input (output is bf16 anyway).
        out = out + x_ref[pl.ds(margin, M_out), :].astype(jnp.float32)
        o_ref[...] = jnp.maximum(out, NEG_SLOPE * out).astype(o_ref.dtype)

    return kernel


def resblock_forward(x_nchw, params):
    """ResBlock forward, NCHW in / NCHW out (eval-mode BN). Returns bf16."""
    N, C, H, W = x_nchw.shape
    assert C <= LANES
    Hp = H + 2
    Wp = _round_up(W + 2, 8)            # width padded so flattened rows align to sublanes
    M_grid = Hp * Wp                    # multiple of 8 since Wp % 8 == 0
    M_out = M_grid
    margin = Wp                         # halo so every ky slab start is aligned
    M_ext = M_out + 2 * Wp

    # Magic constants for exact in-kernel floor-division by Wp.
    shift = (M_out * (Wp - 1)).bit_length()
    magic = ((1 << shift) + Wp - 1) // Wp
    assert (M_out - 1) * (Wp - 1) < (1 << shift)
    assert (M_out - 1) * magic < 2**31

    # NCHW -> zero-padded (conv halo + width round-up + lane-dense channels),
    # row-flattened NHWC, bf16, plus `margin` halo rows top/bottom.
    x = jnp.transpose(x_nchw, (0, 2, 3, 1))                               # (N,H,W,C)
    xp = jnp.pad(x, ((0, 0), (1, 1), (1, Wp - W - 1), (0, LANES - C)))    # (N,Hp,Wp,128)
    flat = xp.reshape(N, M_grid, LANES)
    x_ext = jnp.pad(flat, ((0, 0), (margin, M_ext - margin - M_grid), (0, 0)))
    x_ext = x_ext.astype(jnp.bfloat16)

    # Fold eval-mode BN scale into the conv weights; per-tap (Cin,Cout) -> 128x128.
    def fold(w_oihw, gamma, beta, mean, var):
        scale = gamma / jnp.sqrt(var + BN_EPS)                            # (Cout,)
        bias = beta - mean * scale
        w = jnp.transpose(w_oihw, (2, 3, 1, 0))                           # OIHW -> (3,3,Cin,Cout)
        w = w * scale[None, None, None, :]
        w = w.reshape(9, w.shape[2], w.shape[3])                          # t = ky*3 + kx
        w = jnp.pad(w, ((0, 0), (0, LANES - w.shape[1]), (0, LANES - w.shape[2])))
        b = jnp.pad(bias, (0, LANES - bias.shape[0])).reshape(1, LANES)
        return w.astype(jnp.bfloat16), b.astype(jnp.float32)

    w1, b1 = fold(params["w1_oihw"], params["bn1_gamma"], params["bn1_beta"],
                  params["bn1_mean"], params["bn1_var"])
    w2, b2 = fold(params["w2_oihw"], params["bn2_gamma"], params["bn2_beta"],
                  params["bn2_mean"], params["bn2_var"])

    kernel = _make_resblock_kernel(Wp, M_out, M_ext, H, W, magic, shift)
    out = pl.pallas_call(
        kernel,
        out_shape=jax.ShapeDtypeStruct((N, M_out, LANES), jnp.bfloat16),
        grid_spec=pltpu.PrefetchScalarGridSpec(
            num_scalar_prefetch=0,
            grid=(N,),
            in_specs=[
                pl.BlockSpec((pl.Squeezed(), M_ext, LANES), lambda n: (n, 0, 0)),
                pl.BlockSpec((9, LANES, LANES), lambda n: (0, 0, 0)),
                pl.BlockSpec((1, LANES), lambda n: (0, 0)),
                pl.BlockSpec((9, LANES, LANES), lambda n: (0, 0, 0)),
                pl.BlockSpec((1, LANES), lambda n: (0, 0)),
            ],
            out_specs=pl.BlockSpec((pl.Squeezed(), M_out, LANES), lambda n: (n, 0, 0)),
            scratch_shapes=[pltpu.VMEM((M_ext, LANES), jnp.bfloat16)],
        ),
        compiler_params=pltpu.CompilerParams(
            dimension_semantics=("parallel",)),
    )(x_ext, w1, b1, w2, b2)

    # Drop padded rows / channels and return NCHW (bf16).
    out = out.reshape(N, Hp, Wp, LANES)[:, 1:1 + H, 1:1 + W, :C]
    return jnp.transpose(out, (0, 3, 1, 2))


def init_params(key, channels):
    ks = jax.random.split(key, 8)
    return {
        "w1_oihw": 0.1 * jax.random.normal(ks[0], (channels, channels, 3, 3), jnp.float32),
        "w2_oihw": 0.1 * jax.random.normal(ks[1], (channels, channels, 3, 3), jnp.float32),
        "bn1_gamma": 1.0 + 0.1 * jax.random.normal(ks[2], (channels,), jnp.float32),
        "bn1_beta": 0.1 * jax.random.normal(ks[3], (channels,), jnp.float32),
        "bn1_mean": 0.1 * jax.random.normal(ks[4], (channels,), jnp.float32),
        "bn1_var": jax.random.uniform(ks[5], (channels,), jnp.float32, 0.5, 1.5),
        "bn2_gamma": 1.0 + 0.1 * jax.random.normal(ks[6], (channels,), jnp.float32),
        "bn2_beta": 0.1 * jax.random.normal(ks[7], (channels,), jnp.float32),
        "bn2_mean": jnp.zeros((channels,), jnp.float32),
        "bn2_var": jnp.ones((channels,), jnp.float32),
    }


# ----------------------------------------------------------------------------
# Pure-JAX (f32, lax conv) reference used only to sanity-check the kernel.
# ----------------------------------------------------------------------------
def _ref_forward(x_nchw, params):
    x = jnp.transpose(x_nchw, (0, 2, 3, 1))

    def conv(inp, w_oihw):
        w = jnp.transpose(w_oihw, (2, 3, 1, 0))
        return lax.conv_general_dilated(
            inp, w, (1, 1), ((1, 1), (1, 1)),
            dimension_numbers=("NHWC", "HWIO", "NHWC"))

    def bn(v, g, b, m, var):
        return (v - m) * (g / jnp.sqrt(var + BN_EPS)) + b

    y = conv(x, params["w1_oihw"])
    y = bn(y, params["bn1_gamma"], params["bn1_beta"], params["bn1_mean"], params["bn1_var"])
    y = jnp.maximum(y, NEG_SLOPE * y)
    y = conv(y, params["w2_oihw"])
    y = bn(y, params["bn2_gamma"], params["bn2_beta"], params["bn2_mean"], params["bn2_var"])
    y = y + x
    y = jnp.maximum(y, NEG_SLOPE * y)
    return jnp.transpose(y, (0, 3, 1, 2))


if __name__ == "__main__":
    key = jax.random.PRNGKey(0)
    kx, kp = jax.random.split(key)

    N, C, H, W = 2, 8, 16, 16     # in_channel == out_channel (residual add, no downsample)
    x = jax.random.normal(kx, (N, C, H, W), jnp.float32)
    params = init_params(kp, C)

    fwd = jax.jit(resblock_forward)
    out = jax.block_until_ready(fwd(x, params))
    ref = jax.block_until_ready(_ref_forward(x, params))

    assert out.shape == (N, C, H, W)
    # bf16 operands + bf16 output with f32 accumulation -> loosened tolerance
    # vs. the f32 reference.
    assert jnp.allclose(out.astype(jnp.float32), ref, atol=1e-1, rtol=5e-2)

    print("KERNEL_OK")
</pallas_src>

<mosaic_0001>
module attributes {stable_mosaic.version = 11 : i64} {
  func.func @kernel(%arg0: i32, %arg1: memref<1x480x128xbf16, #tpu.memory_space<vmem>>, %arg2: memref<9x128x128xbf16, #tpu.memory_space<vmem>>, %arg3: memref<1x128xf32, #tpu.memory_space<vmem>>, %arg4: memref<9x128x128xbf16, #tpu.memory_space<vmem>>, %arg5: memref<1x128xf32, #tpu.memory_space<vmem>>, %arg6: memref<1x432x128xbf16, #tpu.memory_space<vmem>>, %arg7: memref<480x128xbf16, #tpu.memory_space<vmem>>) attributes {dimension_semantics = [#tpu.dimension_semantics<parallel>], iteration_bounds = array<i64: 2>, scalar_prefetch = 0 : i64, scratch_operands = 1 : i64, tpu.core_type = #tpu.core_type<tc>, window_params = [{transform_indices = @transform_0, window_bounds = array<i64: 1, 480, 128>}, {pipeline_mode = #tpu.pipeline_mode<synchronous>, transform_indices = @transform_1, window_bounds = array<i64: 9, 128, 128>}, {pipeline_mode = #tpu.pipeline_mode<synchronous>, transform_indices = @transform_2, window_bounds = array<i64: 1, 128>}, {pipeline_mode = #tpu.pipeline_mode<synchronous>, transform_indices = @transform_3, window_bounds = array<i64: 9, 128, 128>}, {pipeline_mode = #tpu.pipeline_mode<synchronous>, transform_indices = @transform_4, window_bounds = array<i64: 1, 128>}, {transform_indices = @transform_5, window_bounds = array<i64: 1, 432, 128>}]} {
    %c0_i32 = arith.constant 0 : i32
    %0 = arith.cmpi eq, %arg0, %c0_i32 : i32
    %1 = arith.extui %0 : i1 to i32
    %c0_i32_0 = arith.constant 0 : i32
    %2 = arith.cmpi ne, %1, %c0_i32_0 : i32
    scf.if %2 {
      %cst_96 = arith.constant 0.000000e+00 : bf16
      %129 = vector.broadcast %cst_96 : bf16 to vector<24x128xbf16>
      %c0_97 = arith.constant 0 : index
      %c0_98 = arith.constant 0 : index
      %130 = vector.load %arg7[%c0_97, %c0_98] : memref<480x128xbf16, #tpu.memory_space<vmem>>, vector<24x128xbf16>
      tpu.vector_store %arg7[%c0_97, %c0_98], %129 {strides = array<i32>} : memref<480x128xbf16, #tpu.memory_space<vmem>>, vector<24x128xbf16>,
      %cst_99 = arith.constant 0.000000e+00 : bf16
      %131 = vector.broadcast %cst_99 : bf16 to vector<24x128xbf16>
      %c456 = arith.constant 456 : index
      %c0_100 = arith.constant 0 : index
      %132 = vector.load %arg7[%c456, %c0_100] : memref<480x128xbf16, #tpu.memory_space<vmem>>, vector<24x128xbf16>
      tpu.vector_store %arg7[%c456, %c0_100], %131 {strides = array<i32>} : memref<480x128xbf16, #tpu.memory_space<vmem>>, vector<24x128xbf16>,
    } else {
    }
    %c0 = arith.constant 0 : index
    %c0_1 = arith.constant 0 : index
    %c0_2 = arith.constant 0 : index
    %3 = vector.load %arg1[%c0, %c0_1, %c0_2] : memref<1x480x128xbf16, #tpu.memory_space<vmem>>, vector<1x432x128xbf16>
    %4 = vector.shape_cast %3 : vector<1x432x128xbf16> to vector<432x128xbf16>
    %c0_3 = arith.constant 0 : index
    %c0_4 = arith.constant 0 : index
    %c0_5 = arith.constant 0 : index
    %5 = vector.load %arg2[%c0_3, %c0_4, %c0_5] : memref<9x128x128xbf16, #tpu.memory_space<vmem>>, vector<1x128x128xbf16>
    %6 = vector.shape_cast %5 : vector<1x128x128xbf16> to vector<128x128xbf16>
    %cst = arith.constant dense<0.000000e+00> : vector<432x128xf32>
    %7 = tpu.matmul %4, %6, %cst {dimension_numbers = #tpu.dot_dimension_numbers<[1], [0], [0], [1], [0, 0, 1, 1], [], []>} : vector<432x128xbf16>, vector<128x128xbf16>, vector<432x128xf32> -> vector<432x128xf32>
    %c1 = arith.constant 1 : index
    %c0_6 = arith.constant 0 : index
    %c0_7 = arith.constant 0 : index
    %8 = vector.load %arg2[%c1, %c0_6, %c0_7] : memref<9x128x128xbf16, #tpu.memory_space<vmem>>, vector<1x128x128xbf16>
    %9 = vector.shape_cast %8 : vector<1x128x128xbf16> to vector<128x128xbf16>
    %cst_8 = arith.constant dense<0.000000e+00> : vector<432x128xf32>
    %10 = tpu.matmul %4, %9, %cst_8 {dimension_numbers = #tpu.dot_dimension_numbers<[1], [0], [0], [1], [0, 0, 1, 1], [], []>} : vector<432x128xbf16>, vector<128x128xbf16>, vector<432x128xf32> -> vector<432x128xf32>
    %c2 = arith.constant 2 : index
    %c0_9 = arith.constant 0 : index
    %c0_10 = arith.constant 0 : index
    %11 = vector.load %arg2[%c2, %c0_9, %c0_10] : memref<9x128x128xbf16, #tpu.memory_space<vmem>>, vector<1x128x128xbf16>
    %12 = vector.shape_cast %11 : vector<1x128x128xbf16> to vector<128x128xbf16>
    %cst_11 = arith.constant dense<0.000000e+00> : vector<432x128xf32>
    %13 = tpu.matmul %4, %12, %cst_11 {dimension_numbers = #tpu.dot_dimension_numbers<[1], [0], [0], [1], [0, 0, 1, 1], [], []>} : vector<432x128xbf16>, vector<128x128xbf16>, vector<432x128xf32> -> vector<432x128xf32>
    %c0_12 = arith.constant 0 : index
    %c24 = arith.constant 24 : index
    %c0_13 = arith.constant 0 : index
    %14 = vector.load %arg1[%c0_12, %c24, %c0_13] : memref<1x480x128xbf16, #tpu.memory_space<vmem>>, vector<1x432x128xbf16>
    %15 = vector.shape_cast %14 : vector<1x432x128xbf16> to vector<432x128xbf16>
    %c3 = arith.constant 3 : index
    %c0_14 = arith.constant 0 : index
    %c0_15 = arith.constant 0 : index
    %16 = vector.load %arg2[%c3, %c0_14, %c0_15] : memref<9x128x128xbf16, #tpu.memory_space<vmem>>, vector<1x128x128xbf16>
    %17 = vector.shape_cast %16 : vector<1x128x128xbf16> to vector<128x128xbf16>
    %cst_16 = arith.constant dense<0.000000e+00> : vector<432x128xf32>
    %18 = tpu.matmul %15, %17, %cst_16 {dimension_numbers = #tpu.dot_dimension_numbers<[1], [0], [0], [1], [0, 0, 1, 1], [], []>} : vector<432x128xbf16>, vector<128x128xbf16>, vector<432x128xf32> -> vector<432x128xf32>
    %19 = arith.addf %7, %18 : vector<432x128xf32>
    %c4 = arith.constant 4 : index
    %c0_17 = arith.constant 0 : index
    %c0_18 = arith.constant 0 : index
    %20 = vector.load %arg2[%c4, %c0_17, %c0_18] : memref<9x128x128xbf16, #tpu.memory_space<vmem>>, vector<1x128x128xbf16>
    %21 = vector.shape_cast %20 : vector<1x128x128xbf16> to vector<128x128xbf16>
    %cst_19 = arith.constant dense<0.000000e+00> : vector<432x128xf32>
    %22 = tpu.matmul %15, %21, %cst_19 {dimension_numbers = #tpu.dot_dimension_numbers<[1], [0], [0], [1], [0, 0, 1, 1], [], []>} : vector<432x128xbf16>, vector<128x128xbf16>, vector<432x128xf32> -> vector<432x128xf32>
    %23 = arith.addf %10, %22 : vector<432x128xf32>
    %c5 = arith.constant 5 : index
    %c0_20 = arith.constant 0 : index
    %c0_21 = arith.constant 0 : index
    %24 = vector.load %arg2[%c5, %c0_20, %c0_21] : memref<9x128x128xbf16, #tpu.memory_space<vmem>>, vector<1x128x128xbf16>
    %25 = vector.shape_cast %24 : vector<1x128x128xbf16> to vector<128x128xbf16>
    %cst_22 = arith.constant dense<0.000000e+00> : vector<432x128xf32>
    %26 = tpu.matmul %15, %25, %cst_22 {dimension_numbers = #tpu.dot_dimension_numbers<[1], [0], [0], [1], [0, 0, 1, 1], [], []>} : vector<432x128xbf16>, vector<128x128xbf16>, vector<432x128xf32> -> vector<432x128xf32>
    %27 = arith.addf %13, %26 : vector<432x128xf32>
    %c0_23 = arith.constant 0 : index
    %c48 = arith.constant 48 : index
    %c0_24 = arith.constant 0 : index
    %28 = vector.load %arg1[%c0_23, %c48, %c0_24] : memref<1x480x128xbf16, #tpu.memory_space<vmem>>, vector<1x432x128xbf16>
    %29 = vector.shape_cast %28 : vector<1x432x128xbf16> to vector<432x128xbf16>
    %c6 = arith.constant 6 : index
    %c0_25 = arith.constant 0 : index
    %c0_26 = arith.constant 0 : index
    %30 = vector.load %arg2[%c6, %c0_25, %c0_26] : memref<9x128x128xbf16, #tpu.memory_space<vmem>>, vector<1x128x128xbf16>
    %31 = vector.shape_cast %30 : vector<1x128x128xbf16> to vector<128x128xbf16>
    %cst_27 = arith.constant dense<0.000000e+00> : vector<432x128xf32>
    %32 = tpu.matmul %29, %31, %cst_27 {dimension_numbers = #tpu.dot_dimension_numbers<[1], [0], [0], [1], [0, 0, 1, 1], [], []>} : vector<432x128xbf16>, vector<128x128xbf16>, vector<432x128xf32> -> vector<432x128xf32>
    %33 = arith.addf %19, %32 : vector<432x128xf32>
    %c7 = arith.constant 7 : index
    %c0_28 = arith.constant 0 : index
    %c0_29 = arith.constant 0 : index
    %34 = vector.load %arg2[%c7, %c0_28, %c0_29] : memref<9x128x128xbf16, #tpu.memory_space<vmem>>, vector<1x128x128xbf16>
    %35 = vector.shape_cast %34 : vector<1x128x128xbf16> to vector<128x128xbf16>
    %cst_30 = arith.constant dense<0.000000e+00> : vector<432x128xf32>
    %36 = tpu.matmul %29, %35, %cst_30 {dimension_numbers = #tpu.dot_dimension_numbers<[1], [0], [0], [1], [0, 0, 1, 1], [], []>} : vector<432x128xbf16>, vector<128x128xbf16>, vector<432x128xf32> -> vector<432x128xf32>
    %37 = arith.addf %23, %36 : vector<432x128xf32>
    %c8 = arith.constant 8 : index
    %c0_31 = arith.constant 0 : index
    %c0_32 = arith.constant 0 : index
    %38 = vector.load %arg2[%c8, %c0_31, %c0_32] : memref<9x128x128xbf16, #tpu.memory_space<vmem>>, vector<1x128x128xbf16>
    %39 = vector.shape_cast %38 : vector<1x128x128xbf16> to vector<128x128xbf16>
    %cst_33 = arith.constant dense<0.000000e+00> : vector<432x128xf32>
    %40 = tpu.matmul %29, %39, %cst_33 {dimension_numbers = #tpu.dot_dimension_numbers<[1], [0], [0], [1], [0, 0, 1, 1], [], []>} : vector<432x128xbf16>, vector<128x128xbf16>, vector<432x128xf32> -> vector<432x128xf32>
    %41 = arith.addf %27, %40 : vector<432x128xf32>
    %c1_i32 = arith.constant 1 : i32
    %42 = tpu.dynamic_rotate %33 by %c1_i32 dim 0 : vector<432x128xf32>, i32 -> vector<432x128xf32>
    %43 = arith.addf %37, %42 : vector<432x128xf32>
    %c431_i32 = arith.constant 431 : i32
    %44 = tpu.dynamic_rotate %41 by %c431_i32 dim 0 : vector<432x128xf32>, i32 -> vector<432x128xf32>
    %45 = arith.addf %43, %44 : vector<432x128xf32>
    %c0_34 = arith.constant 0 : index
    %c0_35 = arith.constant 0 : index
    %46 = vector.load %arg3[%c0_34, %c0_35] : memref<1x128xf32, #tpu.memory_space<vmem>>, vector<1x128xf32>
    %47 = vector.broadcast %46 : vector<1x128xf32> to vector<432x128xf32>
    %48 = arith.addf %45, %47 : vector<432x128xf32>
    %cst_36 = arith.constant 1.000000e-01 : f32
    %49 = vector.broadcast %cst_36 : f32 to vector<432x128xf32>
    %50 = arith.mulf %49, %48 : vector<432x128xf32>
    %51 = arith.maximumf %48, %50 : vector<432x128xf32>
    %52 = tpu.iota {dimensions = array<i32: 0>} : vector<432x128xi32>
    %c683_i32 = arith.constant 683 : i32
    %53 = vector.broadcast %c683_i32 : i32 to vector<432x128xi32>
    %54 = arith.muli %52, %53 : vector<432x128xi32>
    %c14_i32 = arith.constant 14 : i32
    %55 = vector.broadcast %c14_i32 : i32 to vector<432x128xi32>
    %56 = arith.shrsi %54, %55 : vector<432x128xi32>
    %c24_i32 = arith.constant 24 : i32
    %57 = vector.broadcast %c24_i32 : i32 to vector<432x128xi32>
    %58 = arith.muli %56, %57 : vector<432x128xi32>
    %59 = arith.subi %52, %58 : vector<432x128xi32>
    %c1_i32_37 = arith.constant 1 : i32
    %60 = vector.broadcast %c1_i32_37 : i32 to vector<432x128xi32>
    %61 = arith.cmpi sge, %56, %60 : vector<432x128xi32>
    %c16_i32 = arith.constant 16 : i32
    %62 = vector.broadcast %c16_i32 : i32 to vector<432x128xi32>
    %63 = arith.cmpi sle, %56, %62 : vector<432x128xi32>
    %64 = arith.andi %61, %63 : vector<432x128xi1>
    %c1_i32_38 = arith.constant 1 : i32
    %65 = vector.broadcast %c1_i32_38 : i32 to vector<432x128xi32>
    %66 = arith.cmpi sge, %59, %65 : vector<432x128xi32>
    %67 = arith.andi %64, %66 : vector<432x128xi1>
    %c16_i32_39 = arith.constant 16 : i32
    %68 = vector.broadcast %c16_i32_39 : i32 to vector<432x128xi32>
    %69 = arith.cmpi sle, %59, %68 : vector<432x128xi32>
    %70 = arith.andi %67, %69 : vector<432x128xi1>
    %cst_40 = arith.constant 0.000000e+00 : f32
    %71 = vector.broadcast %cst_40 : f32 to vector<432x128xf32>
    %72 = arith.select %70, %51, %71 : vector<432x128xi1>, vector<432x128xf32>
    %73 = arith.truncf %72 : vector<432x128xf32> to vector<432x128xbf16>
    %c24_41 = arith.constant 24 : index
    %c0_42 = arith.constant 0 : index
    %74 = vector.load %arg7[%c24_41, %c0_42] : memref<480x128xbf16, #tpu.memory_space<vmem>>, vector<432x128xbf16>
    tpu.vector_store %arg7[%c24_41, %c0_42], %73 {strides = array<i32>} : memref<480x128xbf16, #tpu.memory_space<vmem>>, vector<432x128xbf16>,
    %c0_43 = arith.constant 0 : index
    %c0_44 = arith.constant 0 : index
    %75 = vector.load %arg7[%c0_43, %c0_44] : memref<480x128xbf16, #tpu.memory_space<vmem>>, vector<432x128xbf16>
    %c0_45 = arith.constant 0 : index
    %c0_46 = arith.constant 0 : index
    %c0_47 = arith.constant 0 : index
    %76 = vector.load %arg4[%c0_45, %c0_46, %c0_47] : memref<9x128x128xbf16, #tpu.memory_space<vmem>>, vector<1x128x128xbf16>
    %77 = vector.shape_cast %76 : vector<1x128x128xbf16> to vector<128x128xbf16>
    %cst_48 = arith.constant dense<0.000000e+00> : vector<432x128xf32>
    %78 = tpu.matmul %75, %77, %cst_48 {dimension_numbers = #tpu.dot_dimension_numbers<[1], [0], [0], [1], [0, 0, 1, 1], [], []>} : vector<432x128xbf16>, vector<128x128xbf16>, vector<432x128xf32> -> vector<432x128xf32>
    %c1_49 = arith.constant 1 : index
    %c0_50 = arith.constant 0 : index
    %c0_51 = arith.constant 0 : index
    %79 = vector.load %arg4[%c1_49, %c0_50, %c0_51] : memref<9x128x128xbf16, #tpu.memory_space<vmem>>, vector<1x128x128xbf16>
    %80 = vector.shape_cast %79 : vector<1x128x128xbf16> to vector<128x128xbf16>
    %cst_52 = arith.constant dense<0.000000e+00> : vector<432x128xf32>
    %81 = tpu.matmul %75, %80, %cst_52 {dimension_numbers = #tpu.dot_dimension_numbers<[1], [0], [0], [1], [0, 0, 1, 1], [], []>} : vector<432x128xbf16>, vector<128x128xbf16>, vector<432x128xf32> -> vector<432x128xf32>
    %c2_53 = arith.constant 2 : index
    %c0_54 = arith.constant 0 : index
    %c0_55 = arith.constant 0 : index
    %82 = vector.load %arg4[%c2_53, %c0_54, %c0_55] : memref<9x128x128xbf16, #tpu.memory_space<vmem>>, vector<1x128x128xbf16>
    %83 = vector.shape_cast %82 : vector<1x128x128xbf16> to vector<128x128xbf16>
    %cst_56 = arith.constant dense<0.000000e+00> : vector<432x128xf32>
    %84 = tpu.matmul %75, %83, %cst_56 {dimension_numbers = #tpu.dot_dimension_numbers<[1], [0], [0], [1], [0, 0, 1, 1], [], []>} : vector<432x128xbf16>, vector<128x128xbf16>, vector<432x128xf32> -> vector<432x128xf32>
    %c24_57 = arith.constant 24 : index
    %c0_58 = arith.constant 0 : index
    %85 = vector.load %arg7[%c24_57, %c0_58] : memref<480x128xbf16, #tpu.memory_space<vmem>>, vector<432x128xbf16>
    %c3_59 = arith.constant 3 : index
    %c0_60 = arith.constant 0 : index
    %c0_61 = arith.constant 0 : index
    %86 = vector.load %arg4[%c3_59, %c0_60, %c0_61] : memref<9x128x128xbf16, #tpu.memory_space<vmem>>, vector<1x128x128xbf16>
    %87 = vector.shape_cast %86 : vector<1x128x128xbf16> to vector<128x128xbf16>
    %cst_62 = arith.constant dense<0.000000e+00> : vector<432x128xf32>
    %88 = tpu.matmul %85, %87, %cst_62 {dimension_numbers = #tpu.dot_dimension_numbers<[1], [0], [0], [1], [0, 0, 1, 1], [], []>} : vector<432x128xbf16>, vector<128x128xbf16>, vector<432x128xf32> -> vector<432x128xf32>
    %89 = arith.addf %78, %88 : vector<432x128xf32>
    %c4_63 = arith.constant 4 : index
    %c0_64 = arith.constant 0 : index
    %c0_65 = arith.constant 0 : index
    %90 = vector.load %arg4[%c4_63, %c0_64, %c0_65] : memref<9x128x128xbf16, #tpu.memory_space<vmem>>, vector<1x128x128xbf16>
    %91 = vector.shape_cast %90 : vector<1x128x128xbf16> to vector<128x128xbf16>
    %cst_66 = arith.constant dense<0.000000e+00> : vector<432x128xf32>
    %92 = tpu.matmul %85, %91, %cst_66 {dimension_numbers = #tpu.dot_dimension_numbers<[1], [0], [0], [1], [0, 0, 1, 1], [], []>} : vector<432x128xbf16>, vector<128x128xbf16>, vector<432x128xf32> -> vector<432x128xf32>
    %93 = arith.addf %81, %92 : vector<432x128xf32>
    %c5_67 = arith.constant 5 : index
    %c0_68 = arith.constant 0 : index
    %c0_69 = arith.constant 0 : index
    %94 = vector.load %arg4[%c5_67, %c0_68, %c0_69] : memref<9x128x128xbf16, #tpu.memory_space<vmem>>, vector<1x128x128xbf16>
    %95 = vector.shape_cast %94 : vector<1x128x128xbf16> to vector<128x128xbf16>
    %cst_70 = arith.constant dense<0.000000e+00> : vector<432x128xf32>
    %96 = tpu.matmul %85, %95, %cst_70 {dimension_numbers = #tpu.dot_dimension_numbers<[1], [0], [0], [1], [0, 0, 1, 1], [], []>} : vector<432x128xbf16>, vector<128x128xbf16>, vector<432x128xf32> -> vector<432x128xf32>
    %97 = arith.addf %84, %96 : vector<432x128xf32>
    %c48_71 = arith.constant 48 : index
    %c0_72 = arith.constant 0 : index
    %98 = vector.load %arg7[%c48_71, %c0_72] : memref<480x128xbf16, #tpu.memory_space<vmem>>, vector<432x128xbf16>
    %c6_73 = arith.constant 6 : index
    %c0_74 = arith.constant 0 : index
    %c0_75 = arith.constant 0 : index
    %99 = vector.load %arg4[%c6_73, %c0_74, %c0_75] : memref<9x128x128xbf16, #tpu.memory_space<vmem>>, vector<1x128x128xbf16>
    %100 = vector.shape_cast %99 : vector<1x128x128xbf16> to vector<128x128xbf16>
    %cst_76 = arith.constant dense<0.000000e+00> : vector<432x128xf32>
    %101 = tpu.matmul %98, %100, %cst_76 {dimension_numbers = #tpu.dot_dimension_numbers<[1], [0], [0], [1], [0, 0, 1, 1], [], []>} : vector<432x128xbf16>, vector<128x128xbf16>, vector<432x128xf32> -> vector<432x128xf32>
    %102 = arith.addf %89, %101 : vector<432x128xf32>
    %c7_77 = arith.constant 7 : index
    %c0_78 = arith.constant 0 : index
    %c0_79 = arith.constant 0 : index
    %103 = vector.load %arg4[%c7_77, %c0_78, %c0_79] : memref<9x128x128xbf16, #tpu.memory_space<vmem>>, vector<1x128x128xbf16>
    %104 = vector.shape_cast %103 : vector<1x128x128xbf16> to vector<128x128xbf16>
    %cst_80 = arith.constant dense<0.000000e+00> : vector<432x128xf32>
    %105 = tpu.matmul %98, %104, %cst_80 {dimension_numbers = #tpu.dot_dimension_numbers<[1], [0], [0], [1], [0, 0, 1, 1], [], []>} : vector<432x128xbf16>, vector<128x128xbf16>, vector<432x128xf32> -> vector<432x128xf32>
    %106 = arith.addf %93, %105 : vector<432x128xf32>
    %c8_81 = arith.constant 8 : index
    %c0_82 = arith.constant 0 : index
    %c0_83 = arith.constant 0 : index
    %107 = vector.load %arg4[%c8_81, %c0_82, %c0_83] : memref<9x128x128xbf16, #tpu.memory_space<vmem>>, vector<1x128x128xbf16>
    %108 = vector.shape_cast %107 : vector<1x128x128xbf16> to vector<128x128xbf16>
    %cst_84 = arith.constant dense<0.000000e+00> : vector<432x128xf32>
    %109 = tpu.matmul %98, %108, %cst_84 {dimension_numbers = #tpu.dot_dimension_numbers<[1], [0], [0], [1], [0, 0, 1, 1], [], []>} : vector<432x128xbf16>, vector<128x128xbf16>, vector<432x128xf32> -> vector<432x128xf32>
    %110 = arith.addf %97, %109 : vector<432x128xf32>
    %c1_i32_85 = arith.constant 1 : i32
    %111 = tpu.dynamic_rotate %102 by %c1_i32_85 dim 0 : vector<432x128xf32>, i32 -> vector<432x128xf32>
    %112 = arith.addf %106, %111 : vector<432x128xf32>
    %c431_i32_86 = arith.constant 431 : i32
    %113 = tpu.dynamic_rotate %110 by %c431_i32_86 dim 0 : vector<432x128xf32>, i32 -> vector<432x128xf32>
    %114 = arith.addf %112, %113 : vector<432x128xf32>
    %c0_87 = arith.constant 0 : index
    %c0_88 = arith.constant 0 : index
    %115 = vector.load %arg5[%c0_87, %c0_88] : memref<1x128xf32, #tpu.memory_space<vmem>>, vector<1x128xf32>
    %116 = vector.broadcast %115 : vector<1x128xf32> to vector<432x128xf32>
    %117 = arith.addf %114, %116 : vector<432x128xf32>
    %c0_89 = arith.constant 0 : index
    %c24_90 = arith.constant 24 : index
    %c0_91 = arith.constant 0 : index
    %118 = vector.load %arg1[%c0_89, %c24_90, %c0_91] : memref<1x480x128xbf16, #tpu.memory_space<vmem>>, vector<1x432x128xbf16>
    %119 = vector.shape_cast %118 : vector<1x432x128xbf16> to vector<432x128xbf16>
    %120 = arith.extf %119 : vector<432x128xbf16> to vector<432x128xf32>
    %121 = arith.addf %117, %120 : vector<432x128xf32>
    %cst_92 = arith.constant 1.000000e-01 : f32
    %122 = vector.broadcast %cst_92 : f32 to vector<432x128xf32>
    %123 = arith.mulf %122, %121 : vector<432x128xf32>
    %124 = arith.maximumf %121, %123 : vector<432x128xf32>
    %125 = arith.truncf %124 : vector<432x128xf32> to vector<432x128xbf16>
    %c0_93 = arith.constant 0 : index
    %c0_94 = arith.constant 0 : index
    %c0_95 = arith.constant 0 : index
    %126 = vector.load %arg6[%c0_93, %c0_94, %c0_95] : memref<1x432x128xbf16, #tpu.memory_space<vmem>>, vector<1x432x128xbf16>
    %127 = vector.shape_cast %126 : vector<1x432x128xbf16> to vector<432x128xbf16>
    %128 = vector.shape_cast %125 : vector<432x128xbf16> to vector<1x432x128xbf16>
    tpu.vector_store %arg6[%c0_93, %c0_94, %c0_95], %128 {strides = array<i32>} : memref<1x432x128xbf16, #tpu.memory_space<vmem>>, vector<1x432x128xbf16>,
    return
  }
  func.func @transform_0(%arg0: i32) -> (i32, i32, i32) {
    %c0_i32 = arith.constant 0 : i32
    %c0_i32_0 = arith.constant 0 : i32
    %c0_i32_1 = arith.constant 0 : i32
    return %arg0, %c0_i32, %c0_i32_0 : i32, i32, i32
  }
  func.func @transform_1(%arg0: i32) -> (i32, i32, i32) {
    %c0_i32 = arith.constant 0 : i32
    %c0_i32_0 = arith.constant 0 : i32
    %c0_i32_1 = arith.constant 0 : i32
    %c0_i32_2 = arith.constant 0 : i32
    return %c0_i32, %c0_i32_0, %c0_i32_1 : i32, i32, i32
  }
  func.func @transform_2(%arg0: i32) -> (i32, i32) {
    %c0_i32 = arith.constant 0 : i32
    %c0_i32_0 = arith.constant 0 : i32
    %c0_i32_1 = arith.constant 0 : i32
    return %c0_i32, %c0_i32_0 : i32, i32
  }
  func.func @transform_3(%arg0: i32) -> (i32, i32, i32) {
    %c0_i32 = arith.constant 0 : i32
    %c0_i32_0 = arith.constant 0 : i32
    %c0_i32_1 = arith.constant 0 : i32
    %c0_i32_2 = arith.constant 0 : i32
    return %c0_i32, %c0_i32_0, %c0_i32_1 : i32, i32, i32
  }
  func.func @transform_4(%arg0: i32) -> (i32, i32) {
    %c0_i32 = arith.constant 0 : i32
    %c0_i32_0 = arith.constant 0 : i32
    %c0_i32_1 = arith.constant 0 : i32
    return %c0_i32, %c0_i32_0 : i32, i32
  }
  func.func @transform_5(%arg0: i32) -> (i32, i32, i32) {
    %c0_i32 = arith.constant 0 : i32
    %c0_i32_0 = arith.constant 0 : i32
    %c0_i32_1 = arith.constant 0 : i32
    return %arg0, %c0_i32, %c0_i32_0 : i32, i32, i32
  }
}

</mosaic_0001>

<bundles_post_ra>
// kernel: resblock_forward.1
= control target key start
LH: loop header
LB: loop body
LE: loop exit
PB: predicated region body
PF: predicated region fallthrough
CT: control target
= control target key end

     0   :  { %s9931_s18 = smov 0   ;;  %s13562_s0 = inlined_call_operand.vmem [shape: bf16[2,480,128], index: 0, kind: input, shape index: {}]   ;;  %s13563_s1 = inlined_call_operand.vmem [shape: bf16[9,128,128], index: 1, kind: input, shape index: {}]   ;;  %s13564_s2 = inlined_call_operand.vmem [shape: f32[1,128], index: 2, kind: input, shape index: {}]   ;;  %s13565_s3 = inlined_call_operand.vmem [shape: bf16[9,128,128], index: 3, kind: input, shape index: {}]   ;;  %s13566_s4 = inlined_call_operand.vmem [shape: f32[1,128], index: 4, kind: input, shape index: {}]   ;;  %s13567_s5 = inlined_call_operand.vmem [shape: bf16[2,432,128], index: 5, kind: output, shape index: {}]  }
   0x1 LB: > { %s7428_s19 = sadd.s32 4294967295, %s9898_s18   ;;  %p7432_p0 = scmp.ge.s32.totalorder %s9898_s18, 1  ;;  %s9898_s18 = sphi %s9931_s18, %s15_s18  }
   0x2   : > { %p187_p1 = scmp.lt.s32.totalorder %s9898_s18, 3 }
   0x4   : > { %p188_p2 = pnand %p7432_p0, %p187_p1 }
   0x6   : > { %191 = sbr.rel (%p188_p2) target bundleno = 2713 (0xa99), region = 40 }
   0xb   : > { %p215_p3 = scmp.lt.s32.totalorder %s7428_s19, 1  ;;  %p7435_p4 = scmp.ne.s32.totalorder %s7428_s19, 0 }
   0xd   : > { %s216_s20 = scalar_select %p215_p3, %s7428_s19, 1 }
   0xe   : > { %229 = sbr.rel (%p7435_p4) target bundleno = 26 (0x1a), region = 44 }
   0xf   : > { %s9791_s21 = smul.u32 240, %s216_s20 }
  0x10   : > { %s9792_s22 = smul.u32 216, %s216_s20 }
  0x11   : > { %s9942_s25 = scalar_lea.vmem %s13562_s0, %s9791_s21 }
  0x12   : > { %s9947_s28 = scalar_lea.vmem %s13567_s5, %s9792_s22 }
  0x13   : > { %v9900_v0 = vmov 0  }
  0x14   : > { %230 = vst [vmem:[#allocation2] sm:$0xf] %v9900_v0 }
  0x15   : > { %231 = vst [vmem:[#allocation2 + $0x4] sm:$0xf] %v9900_v0 }
  0x16   : > { %232 = vst [vmem:[#allocation2 + $0x8] sm:$0xf] %v9900_v0 }
  0x17   : > { %233 = vst [vmem:[#allocation2 + $0xe4] sm:$0xf] %v9900_v0 }
  0x18   : > { %234 = vst [vmem:[#allocation2 + $0xe8] sm:$0xf] %v9900_v0 }
  0x19   : > { %235 = vst [vmem:[#allocation2 + $0xec] sm:$0xf] %v9900_v0 }
  0x1a PF: > { %v8535_v1 = vld [vmem:[%s13563_s1 + $0xf8] sm:$0xff]  ;;  %v8534_v3 = vld [vmem:[%s13563_s1 + $0xf0] sm:$0xff]  ;;  %v8533_v5 = vld [vmem:[%s13563_s1 + $0xe8] sm:$0xff] }
  0x1b   : > { %v8510_v2 = vld [vmem:[%s13563_s1 + $0x38] sm:$0xff]  ;;  %570 = vmatpush.bf16.msra.mxu0 %v8535_v1  ;;  %9671 = vmatpush.bf16.msra.mxu2 %v8535_v1  ;;  %v8509_v4 = vld [vmem:[%s13563_s1 + $0x30] sm:$0xff]  ;;  %v8508_v6 = vld [vmem:[%s13563_s1 + $0x28] sm:$0xff] }
  0x1c   : > { %9679 = vmatpush.bf16.msra.mxu3 %v8510_v2  ;;  %822 = vmatpush.bf16.msra.mxu1 %v8510_v2  ;;  %v8532_v7 = vld [vmem:[%s13563_s1 + $0xe0] sm:$0xff]  ;;  %v8531_v9 = vld [vmem:[%s13563_s1 + $0xd8] sm:$0xff]  ;;  %v8530_v11 = vld [vmem:[%s13563_s1 + $0xd0] sm:$0xff] }
  0x1d   : > { %v8507_v8 = vld [vmem:[%s13563_s1 + $0x20] sm:$0xff]  ;;  %v8506_v10 = vld [vmem:[%s13563_s1 + $0x18] sm:$0xff]  ;;  %v8505_v12 = vld [vmem:[%s13563_s1 + $0x10] sm:$0xff] }
  0x1e   : > { %v8529_v13 = vld [vmem:[%s13563_s1 + $0xc8] sm:$0xff]  ;;  %v8528_v15 = vld [vmem:[%s13563_s1 + $0xc0] sm:$0xff]  ;;  %v8543_v17 = vld [vmem:[%s13563_s1 + $0x138] sm:$0xff] }
  0x1f   : > { %571 = vmatpush.bf16.msra.mxu0 %v8534_v3  ;;  %9672 = vmatpush.bf16.msra.mxu2 %v8534_v3  ;;  %v8504_v14 = vld [vmem:[%s13563_s1 + $0x8] sm:$0xff]  ;;  %v8503_v16 = vld [vmem:[%s13563_s1] sm:$0xff]  ;;  %v10007_v20 = vld [vmem:[%s9942_s25 + $0x70] sm:$0xff]  }
  0x20   : > { %9680 = vmatpush.bf16.msra.mxu3 %v8509_v4  ;;  %823 = vmatpush.bf16.msra.mxu1 %v8509_v4  ;;  %v10001_v18 = vld [vmem:[%s9942_s25 + $0xc] sm:$0xff]   ;;  %v10004_v19 = vld [vmem:[%s9942_s25 + $0x7c] sm:$0xff]   ;;  %v10016_v22 = vld [vmem:[%s9942_s25 + $0x14] sm:$0xff]  }
  0x21   : > { %v8542_v21 = vld [vmem:[%s13563_s1 + $0x130] sm:$0xff]  ;;  %v10019_v23 = vld [vmem:[%s9942_s25 + $0x84] sm:$0xff]   ;;  %v10022_v24 = vld [vmem:[%s9942_s25 + $0x78] sm:$0xff]  }
  0x22   : > { %v8541_v25 = vld [vmem:[%s13563_s1 + $0x128] sm:$0xff]  ;;  %v10031_v26 = vld [vmem:[%s9942_s25 + $0x1c] sm:$0xff]   ;;  %v10049_v31 = vld [vmem:[%s9942_s25 + $0x94] sm:$0xff]  }
  0x23   : > { %572 = vmatpush.bf16.msra.mxu0 %v8533_v5  ;;  %9673 = vmatpush.bf16.msra.mxu2 %v8533_v5  ;;  %v10034_v27 = vld [vmem:[%s9942_s25 + $0x8c] sm:$0xff]   ;;  %v10037_v28 = vld [vmem:[%s9942_s25 + $0x80] sm:$0xff]   ;;  %v8539_v36 = vld [vmem:[%s13563_s1 + $0x118] sm:$0xff] }
  0x24   : > { %9681 = vmatpush.bf16.msra.mxu3 %v8508_v6  ;;  %824 = vmatpush.bf16.msra.mxu1 %v8508_v6  ;;  %v8540_v29 = vld [vmem:[%s13563_s1 + $0x120] sm:$0xff]  ;;  %v10052_v32 = vld [vmem:[%s9942_s25 + $0x88] sm:$0xff]   ;;  %v10064_v35 = vld [vmem:[%s9942_s25 + $0x90] sm:$0xff]  }
  0x25   : > { %v10046_v30 = vld [vmem:[%s9942_s25 + $0x24] sm:$0xff]   ;;  %v10058_v33 = vld [vmem:[%s9942_s25 + $0x2c] sm:$0xff]   ;;  %v10061_v34 = vld [vmem:[%s9942_s25 + $0x9c] sm:$0xff]  }
  0x26   : > { %v10073_v37 = vld [vmem:[%s9942_s25 + $0x34] sm:$0xff]   ;;  %v10076_v38 = vld [vmem:[%s9942_s25 + $0xa4] sm:$0xff]   ;;  %v10085_v40 = vld [vmem:[%s9942_s25 + $0x3c] sm:$0xff]  }
  0x27   : > { %573 = vmatpush.bf16.msra.mxu0 %v8532_v7  ;;  %9674 = vmatpush.bf16.msra.mxu2 %v8532_v7  ;;  %v10079_v39 = vld [vmem:[%s9942_s25 + $0x98] sm:$0xff]   ;;  %v10088_v41 = vld [vmem:[%s9942_s25 + $0xac] sm:$0xff]   ;;  %v10091_v42 = vld [vmem:[%s9942_s25 + $0xa0] sm:$0xff]  }
  0x28   : > { %9682 = vmatpush.bf16.msra.mxu3 %v8507_v8  ;;  %825 = vmatpush.bf16.msra.mxu1 %v8507_v8  ;;  %v8538_v43 = vld [vmem:[%s13563_s1 + $0x110] sm:$0xff]  ;;  %v10100_v44 = vld [vmem:[%s9942_s25 + $0x44] sm:$0xff]   ;;  %v10115_v48 = vld [vmem:[%s9942_s25 + $0xbc] sm:$0xff]  }
  0x29   : > { %v10103_v45 = vld [vmem:[%s9942_s25 + $0xb4] sm:$0xff]   ;;  %v10106_v46 = vld [vmem:[%s9942_s25 + $0xa8] sm:$0xff]   ;;  %v8536_v5 = vld [vmem:[%s13563_s1 + $0x100] sm:$0xff] }
  0x2a   : > { %v10112_v47 = vld [vmem:[%s9942_s25 + $0x4c] sm:$0xff]   ;;  %v10133_v58 = vld [vmem:[%s9942_s25 + $0x54] sm:$0xff]   ;;  %v10136_v59 = vld [vmem:[%s9942_s25 + $0xc4] sm:$0xff]  }
  0x2b   : > { %574 = vmatpush.bf16.msra.mxu0 %v8531_v9  ;;  %9675 = vmatpush.bf16.msra.mxu2 %v8531_v9  ;;  %v8537_v50 = vld [vmem:[%s13563_s1 + $0x108] sm:$0xff]  ;;  %v10123_v51 = vld [vmem:[%s9942_s25 + $0xb0] sm:$0xff]   ;;  %v10143_v62 = vld [vmem:[%s9942_s25 + $0xb8] sm:$0xff]  }
  0x2c   : > { %9683 = vmatpush.bf16.msra.mxu3 %v8506_v10  ;;  %826 = vmatpush.bf16.msra.mxu1 %v8506_v10  ;;  %v8518_v63 = vld [vmem:[%s13563_s1 + $0x78] sm:$0xff]  ;;  %v8517_v2 = vld [vmem:[%s13563_s1 + $0x70] sm:$0xff]  ;;  %v8516_v6 = vld [vmem:[%s13563_s1 + $0x68] sm:$0xff] }
  0x2d   : > { %v10165_v9 = vld [vmem:[%s9942_s25 + $0x5c] sm:$0xff]   ;;  %v10168_v10 = vld [vmem:[%s9942_s25 + $0xcc] sm:$0xff]  }
  0x2f   : > { %575 = vmatpush.bf16.msra.mxu0 %v8530_v11  ;;  %9676 = vmatpush.bf16.msra.mxu2 %v8530_v11  ;;  %v8515_v11 = vld [vmem:[%s13563_s1 + $0x60] sm:$0xff] }
  0x30   : > { %9684 = vmatpush.bf16.msra.mxu3 %v8505_v12  ;;  %827 = vmatpush.bf16.msra.mxu1 %v8505_v12 }
  0x33   : > { %576 = vmatpush.bf16.msra.mxu0 %v8529_v13  ;;  %9677 = vmatpush.bf16.msra.mxu2 %v8529_v13 }
  0x34   : > { %9685 = vmatpush.bf16.msra.mxu3 %v8504_v14  ;;  %828 = vmatpush.bf16.msra.mxu1 %v8504_v14  ;;  %v10178_v14 = vld [vmem:[%s9942_s25 + $0xc0] sm:$0xff]  }
  0x37   : > { %577 = vmatpush.bf16.msra.mxu0 %v8528_v15  ;;  %9678 = vmatpush.bf16.msra.mxu2 %v8528_v15  ;;  %v8514_v15 = vld [vmem:[%s13563_s1 + $0x58] sm:$0xff] }
  0x38   : > { %9686 = vmatpush.bf16.msra.mxu3 %v8503_v16  ;;  %829 = vmatpush.bf16.msra.mxu1 %v8503_v16  ;;  %v8551_v16 = vld [vmem:[%s13563_s1 + $0x178] sm:$0xff] }
  0x3a   : > { %578 = vmatmul.bf16.vlgmr.msra.gmra.mxu0 %v10001_v18  ;;  %648 = vmatmul.bf16.vlgmr.msra.gmra.mxu2 %v10004_v19 }
  0x3b   : > { %1031 = vmatpush.bf16.msrb.mxu2 %v8543_v17  ;;  %900 = vmatmul.bf16.vlgmr.msra.gmra.mxu3 %v10007_v20 }
  0x3c   : > { %1223 = vmatpush.bf16.msrb.mxu3 %v8518_v63  ;;  %1432 = vmatpush.bf16.msrb.mxu0 %v8551_v16  ;;  %v10209_v63 = vld [vmem:[%s9942_s25 + $0xd4] sm:$0xff] }
  0x3f   : > { %1032 = vmatpush.bf16.msrb.mxu2 %v8542_v21 }
  0x40   : > { %1224 = vmatpush.bf16.msrb.mxu3 %v8517_v2 }
  0x43   : > { %1033 = vmatpush.bf16.msrb.mxu2 %v8541_v25  ;;  %v8513_v25 = vld [vmem:[%s13563_s1 + $0x50] sm:$0xff] }
  0x44   : > { %1225 = vmatpush.bf16.msrb.mxu3 %v8516_v6  ;;  %v10222_v6 = vld [vmem:[%s9942_s25 + $0xc8] sm:$0xff]  }
  0x47   : > { %1034 = vmatpush.bf16.msrb.mxu2 %v8540_v29  ;;  %v8550_v29 = vld [vmem:[%s13563_s1 + $0x170] sm:$0xff] }
  0x48   : > { %1226 = vmatpush.bf16.msrb.mxu3 %v8515_v11  ;;  %1433 = vmatpush.bf16.msrb.mxu0 %v8550_v29  ;;  %v8586_v11 = vld [vmem:[%s13563_s1 + $0x1b8] sm:$0xff]  ;;  %v8545_v29 = vld [vmem:[%s13563_s1 + $0x148] sm:$0xff] }
  0x4a   : > { %583 = vmatmul.bf16.gmra.mxu0 %v10016_v22  ;;  %653 = vmatmul.bf16.gmra.mxu2 %v10019_v23 }
  0x4b   : > { %905 = vmatmul.bf16.gmra.mxu3 %v10022_v24  ;;  %1035 = vmatpush.bf16.msrb.mxu2 %v8539_v36 }
  0x4c   : > { %1227 = vmatpush.bf16.msrb.mxu3 %v8514_v15 }
  0x4f   : > { %1036 = vmatpush.bf16.msrb.mxu2 %v8538_v43 }
  0x50   : > { %1228 = vmatpush.bf16.msrb.mxu3 %v8513_v25 }
  0x53   : > { %1037 = vmatpush.bf16.msrb.mxu2 %v8537_v50  ;;  %v8512_v50 = vld [vmem:[%s13563_s1 + $0x48] sm:$0xff] }
  0x54   : > { %1229 = vmatpush.bf16.msrb.mxu3 %v8512_v50 }
  0x57   : > { %1038 = vmatpush.bf16.msrb.mxu2 %v8536_v5 }
  0x5a   : > { %588 = vmatmul.bf16.gmra.mxu0 %v10031_v26  ;;  %658 = vmatmul.bf16.gmra.mxu2 %v10034_v27 }
  0x5b   : > { %910 = vmatmul.bf16.gmra.mxu3 %v10037_v28  ;;  %2049 = vmatpush.bf16.msra.mxu2 %v8586_v11  ;;  %v10261_v11 = vld [vmem:[%s9942_s25 + $0xd0] sm:$0xff]  }
  0x6a   : > { %593 = vmatmul.bf16.gmra.mxu0 %v10046_v30  ;;  %663 = vmatmul.bf16.gmra.mxu2 %v10049_v31 }
  0x6b   : > { %915 = vmatmul.bf16.gmra.mxu3 %v10052_v32 }
  0x7a   : > { %598 = vmatmul.bf16.gmra.mxu0 %v10058_v33  ;;  %668 = vmatmul.bf16.gmra.mxu2 %v10061_v34 }
  0x7b   : > { %920 = vmatmul.bf16.gmra.mxu3 %v10064_v35 }
  0x8a   : > { %603 = vmatmul.bf16.gmra.mxu0 %v10073_v37  ;;  %673 = vmatmul.bf16.gmra.mxu2 %v10076_v38 }
  0x8b   : > { %925 = vmatmul.bf16.gmra.mxu3 %v10079_v39 }
  0x9a   : > { %608 = vmatmul.bf16.gmra.mxu0 %v10085_v40  ;;  %678 = vmatmul.bf16.gmra.mxu2 %v10088_v41 }
  0x9b   : > { %930 = vmatmul.bf16.gmra.mxu3 %v10091_v42 }
  0xaa   : > { %613 = vmatmul.bf16.gmra.mxu0 %v10100_v44  ;;  %683 = vmatmul.bf16.gmra.mxu2 %v10103_v45 }
  0xab   : > { %935 = vmatmul.bf16.gmra.mxu3 %v10106_v46 }
  0xb7   : > { %v10117_v49 = vpop.f32.mrf.mxu0 }
  0xba   : > { %618 = vmatmul.bf16.gmra.mxu0 %v10112_v47  ;;  %688 = vmatmul.bf16.gmra.mxu2 %v10115_v48 }
  0xbb   : > { %940 = vmatmul.bf16.gmra.mxu3 %v10123_v51 }
  0xbd   : > { %v649_v52 = vpop.f32.mrf.mxu2 }
  0xbe   : > { %v901_v53 = vpop.f32.mrf.mxu3 }
  0xbf   : > { %v10128_v54 = vadd.f32 %v901_v53, %v649_v52  ;;  %v10130_v55 = vpop.f32.mrf.mxu0  ;;  %v8549_v52 = vld [vmem:[%s13563_s1 + $0x168] sm:$0xff] }
  0xc0   : > { %1434 = vmatpush.bf16.msrb.mxu0 %v8549_v52 }
  0xc1   : > { %13576 = vst [vmem:[#allocation3_spill] sm:$0xff] %v10128_v54 }
  0xc5   : > { %v651_v56 = vpop.f32.mrf.mxu2 }
  0xc6   : > { %v903_v57 = vpop.f32.mrf.mxu3 }
  0xc7   : > { %v10138_v60 = vadd.f32 %v903_v57, %v651_v56  ;;  %v10140_v61 = vpop.f32.mrf.mxu0  ;;  %v10206_v56 = vld [vmem:[%s9942_s25 + $0x64] sm:$0xff]  }
  0xc9   : > { %13577 = vst [vmem:[#allocation4_spill] sm:$0xff] %v10138_v60  ;;  %v10299_v60 = vld [vmem:[%s9942_s25 + $0x18] sm:$0xff]  }
  0xca   : > { %623 = vmatmul.bf16.gmra.mxu0 %v10133_v58  ;;  %693 = vmatmul.bf16.gmra.mxu2 %v10136_v59 }
  0xcb   : > { %945 = vmatmul.bf16.gmra.mxu3 %v10143_v62 }
  0xcd   : > { %v654_v0 = vpop.f32.mrf.mxu2 }
  0xce   : > { %v906_v1 = vpop.f32.mrf.mxu3 }
  0xcf   : > { %v10154_v3 = vadd.f32 %v906_v1, %v654_v0  ;;  %v10156_v4 = vpop.f32.mrf.mxu0  ;;  %v8511_v0 = vld [vmem:[%s13563_s1 + $0x40] sm:$0xff] }
  0xd0   : > { %v8548_v1 = vld [vmem:[%s13563_s1 + $0x160] sm:$0xff]  ;;  %1230 = vmatpush.bf16.msrb.mxu3 %v8511_v0 }
  0xd1   : > { %13578 = vst [vmem:[#allocation5_spill] sm:$0xff] %v10154_v3  ;;  %1435 = vmatpush.bf16.msrb.mxu0 %v8548_v1  ;;  %v8544_v0 = vld [vmem:[%s13563_s1 + $0x140] sm:$0xff] }
  0xd5   : > { %v656_v7 = vpop.f32.mrf.mxu2 }
  0xd6   : > { %v908_v8 = vpop.f32.mrf.mxu3 }
  0xd7   : > { %v10173_v12 = vadd.f32 %v908_v8, %v656_v7  ;;  %v10175_v13 = vpop.f32.mrf.mxu0  ;;  %v10225_v7 = vld [vmem:[%s9942_s25] sm:$0xff]  ;;  %v8547_v8 = vld [vmem:[%s13563_s1 + $0x158] sm:$0xff] }
  0xd8   : > { %13580 = vst [vmem:[#allocation7_spill] sm:$0xff] %v10175_v13  ;;  %830 = vmatmul.bf16.vlgmr.msra.gmra.mxu1 %v10225_v7  ;;  %1436 = vmatpush.bf16.msrb.mxu0 %v8547_v8 }
  0xd9   : > { %13579 = vst [vmem:[#allocation6_spill] sm:$0xff] %v10173_v12 }
  0xda   : > { %628 = vmatmul.bf16.gmra.mxu0 %v10165_v9  ;;  %698 = vmatmul.bf16.gmra.mxu2 %v10168_v10 }
  0xdb   : > { %950 = vmatmul.bf16.gmra.mxu3 %v10178_v14 }
  0xdd   : > { %v659_v17 = vpop.f32.mrf.mxu2 }
  0xde   : > { %v911_v21 = vpop.f32.mrf.mxu3 }
  0xdf   : > { %v10195_v36 = vadd.f32 %v911_v21, %v659_v17  ;;  %v10197_v43 = vpop.f32.mrf.mxu0  ;;  %v8546_v17 = vld [vmem:[%s13563_s1 + $0x150] sm:$0xff] }
  0xe0   : > { %13582 = vst [vmem:[#allocation9_spill] sm:$0xff] %v10197_v43  ;;  %1437 = vmatpush.bf16.msrb.mxu0 %v8546_v17 }
  0xe1   : > { %13581 = vst [vmem:[#allocation8_spill] sm:$0xff] %v10195_v36  ;;  %v10284_v36 = vld [vmem:[%s9942_s25 + $0x10] sm:$0xff]  }
  0xe4   : > { %1438 = vmatpush.bf16.msrb.mxu0 %v8545_v29 }
  0xe5   : > { %v661_v53 = vpop.f32.mrf.mxu2 }
  0xe6   : > { %v913_v57 = vpop.f32.mrf.mxu3 }
  0xe7   : > { %v10217_v2 = vadd.f32 %v913_v57, %v661_v53  ;;  %v10219_v5 = vpop.f32.mrf.mxu0  ;;  %v10248_v53 = vld [vmem:[%s9942_s25 + $0x6c] sm:$0xff]   ;;  %v10251_v57 = vld [vmem:[%s9942_s25 + $0xdc] sm:$0xff] }
  0xe8   : > { %13584 = vst [vmem:[#allocation11_spill] sm:$0xff] %v10219_v5  ;;  %1439 = vmatpush.bf16.msrb.mxu0 %v8544_v0  ;;  %v10275_v0 = vld [vmem:[%s9942_s25 + $0x74] sm:$0xff]  }
  0xe9   : > { %13583 = vst [vmem:[#allocation10_spill] sm:$0xff] %v10217_v2 }
  0xea   : > { %633 = vmatmul.bf16.gmra.mxu0 %v10206_v56  ;;  %703 = vmatmul.bf16.gmra.mxu2 %v10209_v63 }
  0xeb   : > { %955 = vmatmul.bf16.gmra.mxu3 %v10222_v6 }
  0xed   : > { %v664_v15 = vpop.f32.mrf.mxu2 }
  0xee   : > { %v916_v16 = vpop.f32.mrf.mxu3 }
  0xef   : > { %v10240_v21 = vadd.f32 %v916_v16, %v664_v15  ;;  %v10242_v25 = vpop.f32.mrf.mxu0  ;;  %v10266_v15 = vld [vmem:[%s9942_s25 + $0x8] sm:$0xff]  }
  0xf0   : > { %13586 = vst [vmem:[#allocation13_spill] sm:$0xff] %v10242_v25  ;;  %835 = vmatmul.bf16.gmra.mxu1 %v10266_v15 }
  0xf1   : > { %13585 = vst [vmem:[#allocation12_spill] sm:$0xff] %v10240_v21 }
  0xf5   : > { %v666_v50 = vpop.f32.mrf.mxu2 }
  0xf6   : > { %v918_v52 = vpop.f32.mrf.mxu3 }
  0xf7   : > { %v10256_v1 = vadd.f32 %v918_v52, %v666_v50  ;;  %v10258_v8 = vpop.f32.mrf.mxu0 }
  0xf8   : > { %13588 = vst [vmem:[#allocation15_spill] sm:$0xff] %v10258_v8 }
  0xf9   : > { %13587 = vst [vmem:[#allocation14_spill] sm:$0xff] %v10256_v1 }
  0xfa   : > { %638 = vmatmul.bf16.gmra.mxu0 %v10248_v53  ;;  %708 = vmatmul.bf16.gmra.mxu2 %v10251_v57 }
  0xfb   : > { %960 = vmatmul.bf16.gmra.mxu3 %v10261_v11 }
  0xfd   : > { %v669_v16 = vpop.f32.mrf.mxu2 }
  0xfe   : > { %v921_v17 = vpop.f32.mrf.mxu3 }
  0xff   : > { %v10270_v29 = vadd.f32 %v921_v17, %v669_v16  ;;  %v10272_v50 = vpop.f32.mrf.mxu0 }
 0x100   : > { %13590 = vst [vmem:[#allocation17_spill] sm:$0xff] %v10272_v50  ;;  %840 = vmatmul.bf16.gmra.mxu1 %v10284_v36 }
 0x101   : > { %13589 = vst [vmem:[#allocation16_spill] sm:$0xff] %v10270_v29 }
 0x105   : > { %v671_v52 = vpop.f32.mrf.mxu2 }
 0x106   : > { %v923_v1 = vpop.f32.mrf.mxu3 }
 0x107   : > { %v10277_v21 = vadd.f32 %v923_v1, %v671_v52  ;;  %v10279_v2 = vpop.f32.mrf.mxu0 }
 0x108   : > { %13592 = vst [vmem:[#allocation19_spill] sm:$0xff] %v10279_v2 }
 0x109   : > { %13591 = vst [vmem:[#allocation18_spill] sm:$0xff] %v10277_v21 }
 0x10a   : > { %643 = vmatmul.bf16.gmra.mxu0 %v10275_v0  ;;  %1039 = vmatmul.bf16.vlgmr.msrb.gmra.mxu2 %v10001_v18 }
 0x10b   : > { %1231 = vmatmul.bf16.vlgmr.msrb.gmra.mxu3 %v10225_v7 }
 0x10d   : > { %v674_v16 = vpop.f32.mrf.mxu2 }
 0x10e   : > { %v926_v17 = vpop.f32.mrf.mxu3 }
 0x10f   : > { %v10288_v29 = vadd.f32 %v926_v17, %v674_v16  ;;  %v10290_v12 = vpop.f32.mrf.mxu0 }
 0x110   : > { %13594 = vst [vmem:[#allocation21_spill] sm:$0xff] %v10290_v12  ;;  %845 = vmatmul.bf16.gmra.mxu1 %v10299_v60  ;;  %v10428_v12 = vld [vmem:[%s9942_s25 + $0x58] sm:$0xff]  }
 0x111   : > { %13593 = vst [vmem:[#allocation20_spill] sm:$0xff] %v10288_v29 }
 0x115   : > { %v676_v1 = vpop.f32.mrf.mxu2 }
 0x116   : > { %v928_v52 = vpop.f32.mrf.mxu3 }
 0x117   : > { %v10292_v21 = vadd.f32 %v928_v52, %v676_v1  ;;  %v10294_v3 = vpop.f32.mrf.mxu0  ;;  %v8585_v1 = vld [vmem:[%s13563_s1 + $0x1b0] sm:$0xff] }
 0x118   : > { %13596 = vst [vmem:[#allocation23_spill] sm:$0xff] %v10294_v3  ;;  %2050 = vmatpush.bf16.msra.mxu2 %v8585_v1 }
 0x119   : > { %13595 = vst [vmem:[#allocation22_spill] sm:$0xff] %v10292_v21 }
 0x11a   : > { %1044 = vmatmul.bf16.gmra.mxu2 %v10016_v22  ;;  %1440 = vmatmul.bf16.vlgmr.msrb.gmra.mxu0 %v10001_v18 }
 0x11b   : > { %1236 = vmatmul.bf16.gmra.mxu3 %v10266_v15 }
 0x11d   : > { %v679_v16 = vpop.f32.mrf.mxu2 }
 0x11e   : > { %v931_v17 = vpop.f32.mrf.mxu3 }
 0x11f   : > { %v10303_v29 = vadd.f32 %v931_v17, %v679_v16  ;;  %v10305_v54 = vpop.f32.mrf.mxu0  ;;  %v10317_v16 = vld [vmem:[%s9942_s25 + $0x20] sm:$0xff]  }
 0x120   : > { %13598 = vst [vmem:[#allocation25_spill] sm:$0xff] %v10305_v54  ;;  %850 = vmatmul.bf16.gmra.mxu1 %v10317_v16 }
 0x121   : > { %13597 = vst [vmem:[#allocation24_spill] sm:$0xff] %v10303_v29 }
 0x125   : > { %v681_v52 = vpop.f32.mrf.mxu2 }
 0x126   : > { %v933_v18 = vpop.f32.mrf.mxu3 }
 0x127   : > { %v10310_v21 = vadd.f32 %v933_v18, %v681_v52  ;;  %v10312_v3 = vpop.f32.mrf.mxu0 }
 0x128   : > { %13600 = vst [vmem:[#allocation27_spill] sm:$0xff] %v10312_v3 }
 0x129   : > { %13599 = vst [vmem:[#allocation26_spill] sm:$0xff] %v10310_v21 }
 0x12a   : > { %1049 = vmatmul.bf16.gmra.mxu2 %v10031_v26  ;;  %1445 = vmatmul.bf16.gmra.mxu0 %v10016_v22  ;;  %v10332_v22 = vld [vmem:[%s9942_s25 + $0x28] sm:$0xff]  }
 0x12b   : > { %1241 = vmatmul.bf16.gmra.mxu3 %v10284_v36 }
 0x12d   : > { %v684_v17 = vpop.f32.mrf.mxu2 }
 0x12e   : > { %v936_v29 = vpop.f32.mrf.mxu3 }
 0x12f   : > { %v10321_v1 = vadd.f32 %v936_v29, %v684_v17  ;;  %v10323_v54 = vpop.f32.mrf.mxu0 }
 0x130   : > { %13602 = vst [vmem:[#allocation29_spill] sm:$0xff] %v10323_v54  ;;  %855 = vmatmul.bf16.gmra.mxu1 %v10332_v22 }
 0x131   : > { %13601 = vst [vmem:[#allocation28_spill] sm:$0xff] %v10321_v1 }
 0x135   : > { %v686_v52 = vpop.f32.mrf.mxu2 }
 0x136   : > { %v938_v18 = vpop.f32.mrf.mxu3 }
 0x137   : > { %v10325_v21 = vadd.f32 %v938_v18, %v686_v52  ;;  %v10327_v3 = vpop.f32.mrf.mxu0 }
 0x138   : > { %13604 = vst [vmem:[#allocation31_spill] sm:$0xff] %v10327_v3 }
 0x139   : > { %13603 = vst [vmem:[#allocation30_spill] sm:$0xff] %v10325_v21 }
 0x13a   : > { %1054 = vmatmul.bf16.gmra.mxu2 %v10046_v30  ;;  %1450 = vmatmul.bf16.gmra.mxu0 %v10031_v26  ;;  %v10347_v26 = vld [vmem:[%s9942_s25 + $0x30] sm:$0xff]  }
 0x13b   : > { %1246 = vmatmul.bf16.gmra.mxu3 %v10299_v60 }
 0x13d   : > { %v689_v29 = vpop.f32.mrf.mxu2 }
 0x13e   : > { %v941_v17 = vpop.f32.mrf.mxu3 }
 0x13f   : > { %v10336_v1 = vadd.f32 %v941_v17, %v689_v29  ;;  %v10338_v54 = vpop.f32.mrf.mxu0 }
 0x140   : > { %13606 = vst [vmem:[#allocation33_spill] sm:$0xff] %v10338_v54  ;;  %860 = vmatmul.bf16.gmra.mxu1 %v10347_v26 }
 0x141   : > { %13605 = vst [vmem:[#allocation32_spill] sm:$0xff] %v10336_v1 }
 0x145   : > { %v691_v52 = vpop.f32.mrf.mxu2 }
 0x146   : > { %v943_v18 = vpop.f32.mrf.mxu3 }
 0x147   : > { %v10340_v21 = vadd.f32 %v943_v18, %v691_v52  ;;  %v10342_v3 = vpop.f32.mrf.mxu0 }
 0x148   : > { %13608 = vst [vmem:[#allocation35_spill] sm:$0xff] %v10342_v3 }
 0x149   : > { %13607 = vst [vmem:[#allocation34_spill] sm:$0xff] %v10340_v21 }
 0x14a   : > { %1059 = vmatmul.bf16.gmra.mxu2 %v10058_v33  ;;  %1455 = vmatmul.bf16.gmra.mxu0 %v10046_v30  ;;  %v8584_v30 = vld [vmem:[%s13563_s1 + $0x1a8] sm:$0xff] }
 0x14b   : > { %1251 = vmatmul.bf16.gmra.mxu3 %v10317_v16  ;;  %2051 = vmatpush.bf16.msra.mxu2 %v8584_v30 }
 0x14d   : > { %v694_v29 = vpop.f32.mrf.mxu2 }
 0x14e   : > { %v946_v17 = vpop.f32.mrf.mxu3 }
 0x14f   : > { %v10351_v1 = vadd.f32 %v946_v17, %v694_v29  ;;  %v10353_v54 = vpop.f32.mrf.mxu0  ;;  %v10365_v29 = vld [vmem:[%s9942_s25 + $0x38] sm:$0xff]  }
 0x150   : > { %13610 = vst [vmem:[#allocation37_spill] sm:$0xff] %v10353_v54  ;;  %865 = vmatmul.bf16.gmra.mxu1 %v10365_v29 }
 0x151   : > { %13609 = vst [vmem:[#allocation36_spill] sm:$0xff] %v10351_v1 }
 0x155   : > { %v696_v52 = vpop.f32.mrf.mxu2 }
 0x156   : > { %v948_v18 = vpop.f32.mrf.mxu3 }
 0x157   : > { %v10355_v21 = vadd.f32 %v948_v18, %v696_v52  ;;  %v10357_v3 = vpop.f32.mrf.mxu0 }
 0x158   : > { %13612 = vst [vmem:[#allocation39_spill] sm:$0xff] %v10357_v3 }
 0x159   : > { %13611 = vst [vmem:[#allocation38_spill] sm:$0xff] %v10355_v21 }
 0x15a   : > { %1064 = vmatmul.bf16.gmra.mxu2 %v10073_v37  ;;  %1460 = vmatmul.bf16.gmra.mxu0 %v10058_v33  ;;  %v10380_v33 = vld [vmem:[%s9942_s25 + $0x40] sm:$0xff]  }
 0x15b   : > { %1256 = vmatmul.bf16.gmra.mxu3 %v10332_v22 }
 0x15d   : > { %v699_v17 = vpop.f32.mrf.mxu2 }
 0x15e   : > { %v951_v52 = vpop.f32.mrf.mxu3 }
 0x15f   : > { %v10369_v18 = vadd.f32 %v951_v52, %v699_v17  ;;  %v10371_v21 = vpop.f32.mrf.mxu0 }
 0x160   : > { %13614 = vst [vmem:[#allocation41_spill] sm:$0xff] %v10371_v21  ;;  %870 = vmatmul.bf16.gmra.mxu1 %v10380_v33 }
 0x161   : > { %13613 = vst [vmem:[#allocation40_spill] sm:$0xff] %v10369_v18 }
 0x165   : > { %v701_v1 = vpop.f32.mrf.mxu2 }
 0x166   : > { %v953_v3 = vpop.f32.mrf.mxu3 }
 0x167   : > { %v10373_v30 = vadd.f32 %v953_v3, %v701_v1  ;;  %v10375_v54 = vpop.f32.mrf.mxu0 }
 0x168   : > { %13616 = vst [vmem:[#allocation43_spill] sm:$0xff] %v10375_v54 }
 0x169   : > { %13615 = vst [vmem:[#allocation42_spill] sm:$0xff] %v10373_v30 }
 0x16a   : > { %1069 = vmatmul.bf16.gmra.mxu2 %v10085_v40  ;;  %1465 = vmatmul.bf16.gmra.mxu0 %v10073_v37  ;;  %v10395_v37 = vld [vmem:[%s9942_s25 + $0x48] sm:$0xff]  }
 0x16b   : > { %1261 = vmatmul.bf16.gmra.mxu3 %v10347_v26 }
 0x16d   : > { %v704_v17 = vpop.f32.mrf.mxu2 }
 0x16e   : > { %v956_v52 = vpop.f32.mrf.mxu3 }
 0x16f   : > { %v10384_v18 = vadd.f32 %v956_v52, %v704_v17  ;;  %v10386_v21 = vpop.f32.mrf.mxu0 }
 0x170   : > { %13618 = vst [vmem:[#allocation45_spill] sm:$0xff] %v10386_v21  ;;  %875 = vmatmul.bf16.gmra.mxu1 %v10395_v37 }
 0x171   : > { %13617 = vst [vmem:[#allocation44_spill] sm:$0xff] %v10384_v18 }
 0x175   : > { %v706_v3 = vpop.f32.mrf.mxu2 }
 0x176   : > { %v958_v1 = vpop.f32.mrf.mxu3 }
 0x177   : > { %v10388_v30 = vadd.f32 %v958_v1, %v706_v3  ;;  %v10390_v54 = vpop.f32.mrf.mxu0 }
 0x178   : > { %13620 = vst [vmem:[#allocation47_spill] sm:$0xff] %v10390_v54 }
 0x179   : > { %13619 = vst [vmem:[#allocation46_spill] sm:$0xff] %v10388_v30 }
 0x17a   : > { %1074 = vmatmul.bf16.gmra.mxu2 %v10100_v44  ;;  %1470 = vmatmul.bf16.gmra.mxu0 %v10085_v40  ;;  %v10410_v40 = vld [vmem:[%s9942_s25 + $0x50] sm:$0xff]  }
 0x17b   : > { %1266 = vmatmul.bf16.gmra.mxu3 %v10365_v29 }
 0x17d   : > { %v709_v17 = vpop.f32.mrf.mxu2 }
 0x17e   : > { %v961_v52 = vpop.f32.mrf.mxu3 }
 0x17f   : > { %v10399_v18 = vadd.f32 %v961_v52, %v709_v17  ;;  %v10401_v21 = vpop.f32.mrf.mxu0  ;;  %v8583_v17 = vld [vmem:[%s13563_s1 + $0x1a0] sm:$0xff] }
 0x180   : > { %13622 = vst [vmem:[#allocation49_spill] sm:$0xff] %v10401_v21  ;;  %880 = vmatmul.bf16.gmra.mxu1 %v10410_v40  ;;  %2052 = vmatpush.bf16.msra.mxu2 %v8583_v17 }
 0x181   : > { %13621 = vst [vmem:[#allocation48_spill] sm:$0xff] %v10399_v18 }
 0x185   : > { %v711_v3 = vpop.f32.mrf.mxu2 }
 0x186   : > { %v963_v1 = vpop.f32.mrf.mxu3 }
 0x187   : > { %v10403_v30 = vadd.f32 %v963_v1, %v711_v3  ;;  %v10405_v54 = vpop.f32.mrf.mxu0 }
 0x188   : > { %13624 = vst [vmem:[#allocation51_spill] sm:$0xff] %v10405_v54 }
 0x189   : > { %13623 = vst [vmem:[#allocation50_spill] sm:$0xff] %v10403_v30 }
 0x18a   : > { %1079 = vmatmul.bf16.gmra.mxu2 %v10112_v47  ;;  %1475 = vmatmul.bf16.gmra.mxu0 %v10100_v44 }
 0x18b   : > { %1271 = vmatmul.bf16.gmra.mxu3 %v10380_v33 }
 0x18d   : > { %v1040_v52 = vpop.f32.mrf.mxu2 }
 0x18e   : > { %v1232_v3 = vpop.f32.mrf.mxu3 }
 0x18f   : > { %v10417_v1 = vadd.f32 %v1232_v3, %v1040_v52  ;;  %v10419_v30 = vpop.f32.mrf.mxu0 }
 0x190   : > { %13625 = vst [vmem:[#allocation52_spill] sm:$0xff] %v10419_v30  ;;  %885 = vmatmul.bf16.gmra.mxu1 %v10428_v12 }
 0x195   : > { %v1042_v18 = vpop.f32.mrf.mxu2 }
 0x196   : > { %v1234_v44 = vpop.f32.mrf.mxu3 }
 0x197   : > { %v10421_v54 = vadd.f32 %v1234_v44, %v1042_v18  ;;  %v10423_v21 = vpop.f32.mrf.mxu0 }
 0x19a   : > { %1084 = vmatmul.bf16.gmra.mxu2 %v10133_v58  ;;  %1480 = vmatmul.bf16.gmra.mxu0 %v10112_v47 }
 0x19b   : > { %1276 = vmatmul.bf16.gmra.mxu3 %v10395_v37 }
 0x19d   : > { %v1045_v17 = vpop.f32.mrf.mxu2 }
 0x19e   : > { %v1237_v52 = vpop.f32.mrf.mxu3 }
 0x19f   : > { %v10432_v3 = vadd.f32 %v1237_v52, %v1045_v17  ;;  %v10434_v30 = vpop.f32.mrf.mxu0 }
 0x1a5   : > { %v1047_v18 = vpop.f32.mrf.mxu2 }
 0x1a6   : > { %v1239_v44 = vpop.f32.mrf.mxu3 }
 0x1a7   : > { %v10436_v2 = vadd.f32 %v1239_v44, %v1047_v18  ;;  %v10438_v50 = vpop.f32.mrf.mxu0 }
 0x1aa   : > { %1089 = vmatmul.bf16.gmra.mxu2 %v10165_v9  ;;  %1485 = vmatmul.bf16.gmra.mxu0 %v10133_v58 }
 0x1ab   : > { %1281 = vmatmul.bf16.gmra.mxu3 %v10410_v40 }
 0x1ad   : > { %v1050_v47 = vpop.f32.mrf.mxu2 }
 0x1ae   : > { %v1242_v8 = vpop.f32.mrf.mxu3 }
 0x1af   : > { %v10443_v25 = vadd.f32 %v1242_v8, %v1050_v47  ;;  %v10445_v17 = vpop.f32.mrf.mxu0  ;;  %v8582_v47 = vld [vmem:[%s13563_s1 + $0x198] sm:$0xff] }
 0x1b0   : > { %2053 = vmatpush.bf16.msra.mxu2 %v8582_v47 }
 0x1b1   : > { %13626 = vst [vmem:[#allocation53_spill] sm:$0xff] %v10443_v25 }
 0x1b5   : > { %v1052_v52 = vpop.f32.mrf.mxu2 }
 0x1b6   : > { %v1244_v5 = vpop.f32.mrf.mxu3 }
 0x1b7   : > { %v10447_v43 = vadd.f32 %v1244_v5, %v1052_v52  ;;  %v10449_v18 = vpop.f32.mrf.mxu0 }
 0x1b8   : > { %13628 = vst [vmem:[#allocation55_spill] sm:$0xff] %v10449_v18 }
 0x1b9   : > { %13627 = vst [vmem:[#allocation54_spill] sm:$0xff] %v10447_v43 }
 0x1ba   : > { %1094 = vmatmul.bf16.gmra.mxu2 %v10206_v56  ;;  %1490 = vmatmul.bf16.gmra.mxu0 %v10165_v9  ;;  %v10466_v9 = vld [vmem:[%s9942_s25 + $0x60] sm:$0xff]  }
 0x1bb   : > { %1286 = vmatmul.bf16.gmra.mxu3 %v10428_v12 }
 0x1bd   : > { %v1055_v58 = vpop.f32.mrf.mxu2 }
 0x1be   : > { %v1247_v44 = vpop.f32.mrf.mxu3 }
 0x1bf   : > { %v10454_v13 = vadd.f32 %v1247_v44, %v1055_v58  ;;  %v10456_v8 = vpop.f32.mrf.mxu0 }
 0x1c0   : > { %13630 = vst [vmem:[#allocation57_spill] sm:$0xff] %v10456_v8 }
 0x1c1   : > { %13629 = vst [vmem:[#allocation56_spill] sm:$0xff] %v10454_v13 }
 0x1c5   : > { %v1057_v5 = vpop.f32.mrf.mxu2 }
 0x1c6   : > { %v1249_v52 = vpop.f32.mrf.mxu3 }
 0x1c7   : > { %v10461_v43 = vadd.f32 %v1249_v52, %v1057_v5  ;;  %v10463_v18 = vpop.f32.mrf.mxu0 }
 0x1c8   : > { %13632 = vst [vmem:[#allocation59_spill] sm:$0xff] %v10463_v18 }
 0x1c9   : > { %13631 = vst [vmem:[#allocation58_spill] sm:$0xff] %v10461_v43  ;;  %v10480_v43 = vld [vmem:[%s9942_s25 + $0x68] sm:$0xff]  }
 0x1ca   : > { %1099 = vmatmul.bf16.gmra.mxu2 %v10248_v53  ;;  %1495 = vmatmul.bf16.gmra.mxu0 %v10206_v56 }
 0x1cb   : > { %1291 = vmatmul.bf16.gmra.mxu3 %v10466_v9 }
 0x1cd   : > { %v1060_v58 = vpop.f32.mrf.mxu2 }
 0x1ce   : > { %v1252_v44 = vpop.f32.mrf.mxu3 }
 0x1cf   : > { %v10471_v13 = vadd.f32 %v1252_v44, %v1060_v58  ;;  %v10473_v47 = vpop.f32.mrf.mxu0 }
 0x1d0   : > { %13634 = vst [vmem:[#allocation61_spill] sm:$0xff] %v10473_v47 }
 0x1d1   : > { %13633 = vst [vmem:[#allocation60_spill] sm:$0xff] %v10471_v13 }
 0x1d5   : > { %v1062_v8 = vpop.f32.mrf.mxu2 }
 0x1d6   : > { %v1254_v25 = vpop.f32.mrf.mxu3 }
 0x1d7   : > { %v10475_v5 = vadd.f32 %v1254_v25, %v1062_v8  ;;  %v10477_v52 = vpop.f32.mrf.mxu0 }
 0x1d8   : > { %13636 = vst [vmem:[#allocation63_spill] sm:$0xff] %v10477_v52 }
 0x1d9   : > { %13635 = vst [vmem:[#allocation62_spill] sm:$0xff] %v10475_v5 }
 0x1da   : > { %1104 = vmatmul.bf16.gmra.mxu2 %v10275_v0  ;;  %1500 = vmatmul.bf16.gmra.mxu0 %v10248_v53 }
 0x1db   : > { %1296 = vmatmul.bf16.gmra.mxu3 %v10480_v43 }
 0x1dd   : > { %v1065_v56 = vpop.f32.mrf.mxu2 }
 0x1de   : > { %v1257_v18 = vpop.f32.mrf.mxu3 }
 0x1df   : > { %v10485_v58 = vadd.f32 %v1257_v18, %v1065_v56  ;;  %v10487_v44 = vpop.f32.mrf.mxu0 }
 0x1e0   : > { %13638 = vst [vmem:[#allocation65_spill] sm:$0xff] %v10487_v44 }
 0x1e1   : > { %13637 = vst [vmem:[#allocation64_spill] sm:$0xff] %v10485_v58 }
 0x1e5   : > { %v1067_v13 = vpop.f32.mrf.mxu2 }
 0x1e6   : > { %v1259_v47 = vpop.f32.mrf.mxu3 }
 0x1e7   : > { %v10489_v25 = vadd.f32 %v1259_v47, %v1067_v13  ;;  %v10491_v8 = vpop.f32.mrf.mxu0  ;;  %v8581_v47 = vld [vmem:[%s13563_s1 + $0x190] sm:$0xff] }
 0x1e8   : > { %2054 = vmatpush.bf16.msra.mxu2 %v8581_v47 }
 0x1ea   : > { %1109 = vmatmul.bf16.gmra.mxu2 %v10004_v19  ;;  %1505 = vmatmul.bf16.gmra.mxu0 %v10275_v0 }
 0x1eb   : > { %1301 = vmatmul.bf16.gmra.mxu3 %v10007_v20 }
 0x1ed   : > { %v1070_v53 = vpop.f32.mrf.mxu2 }
 0x1ee   : > { %v1262_v5 = vpop.f32.mrf.mxu3 }
 0x1ef   : > { %v10496_v52 = vadd.f32 %v1262_v5, %v1070_v53  ;;  %v10498_v18 = vpop.f32.mrf.mxu0 }
 0x1f5   : > { %v1072_v56 = vpop.f32.mrf.mxu2 }
 0x1f6   : > { %v1264_v58 = vpop.f32.mrf.mxu3 }
 0x1f7   : > { %v10500_v44 = vadd.f32 %v1264_v58, %v1072_v56  ;;  %v10502_v13 = vpop.f32.mrf.mxu0 }
 0x1f8   : > { %13640 = vst [vmem:[#allocation67_spill] sm:$0xff] %v10502_v13 }
 0x1f9   : > { %13639 = vst [vmem:[#allocation66_spill] sm:$0xff] %v10500_v44 }
 0x1fa   : > { %1114 = vmatmul.bf16.gmra.mxu2 %v10019_v23  ;;  %1510 = vmatmul.bf16.gmra.mxu0 %v10004_v19 }
 0x1fb   : > { %1306 = vmatmul.bf16.gmra.mxu3 %v10022_v24 }
 0x1fd   : > { %v1075_v20 = vpop.f32.mrf.mxu2 }
 0x1fe   : > { %v1267_v0 = vpop.f32.mrf.mxu3 }
 0x1ff   : > { %v10510_v5 = vadd.f32 %v1267_v0, %v1075_v20  ;;  %v10512_v53 = vpop.f32.mrf.mxu0 }
 0x200   : > { %13642 = vst [vmem:[#allocation69_spill] sm:$0xff] %v10512_v53 }
 0x201   : > { %13641 = vst [vmem:[#allocation68_spill] sm:$0xff] %v10510_v5 }
 0x205   : > { %v1077_v58 = vpop.f32.mrf.mxu2 }
 0x206   : > { %v1269_v56 = vpop.f32.mrf.mxu3 }
 0x207   : > { %v10514_v44 = vadd.f32 %v1269_v56, %v1077_v58  ;;  %v10516_v13 = vpop.f32.mrf.mxu0  ;;  %v10529_v56 = vpop.f32.mrf.mxu1 }
 0x20a   : > { %1119 = vmatmul.bf16.gmra.mxu2 %v10034_v27  ;;  %1515 = vmatmul.bf16.gmra.mxu0 %v10019_v23 }
 0x20b   : > { %1311 = vmatmul.bf16.gmra.mxu3 %v10037_v28 }
 0x20d   : > { %v1080_v19 = vpop.f32.mrf.mxu2 }
 0x20e   : > { %v1272_v24 = vpop.f32.mrf.mxu3 }
 0x20f   : > { %v10521_v47 = vadd.f32 %v1272_v24, %v1080_v19  ;;  %v10523_v20 = vpop.f32.mrf.mxu0 }
 0x210   : > { %13644 = vst [vmem:[#allocation71_spill] sm:$0xff] %v10523_v20 }
 0x211   : > { %13643 = vst [vmem:[#allocation70_spill] sm:$0xff] %v10521_v47  ;;  %v10538_v47 = vpop.f32.mrf.mxu1  ;;  %890 = vmatmul.bf16.gmra.mxu1 %v10466_v9 }
 0x215   : > { %v1082_v0 = vpop.f32.mrf.mxu2 }
 0x216   : > { %v1274_v5 = vpop.f32.mrf.mxu3 }
 0x217   : > { %v10525_v53 = vadd.f32 %v1274_v5, %v1082_v0  ;;  %v10527_v58 = vpop.f32.mrf.mxu0 }
 0x218   : > { %13646 = vst [vmem:[#allocation73_spill] sm:$0xff] %v10527_v58 }
 0x219   : > { %13645 = vst [vmem:[#allocation72_spill] sm:$0xff] %v10525_v53  ;;  %v10545_v20 = vpop.f32.mrf.mxu1 }
 0x21a   : > { %1124 = vmatmul.bf16.gmra.mxu2 %v10049_v31  ;;  %1520 = vmatmul.bf16.gmra.mxu0 %v10034_v27 }
 0x21b   : > { %1316 = vmatmul.bf16.gmra.mxu3 %v10052_v32 }
 0x21d   : > { %v1085_v23 = vpop.f32.mrf.mxu2 }
 0x21e   : > { %v1277_v28 = vpop.f32.mrf.mxu3 }
 0x21f   : > { %v10534_v19 = vadd.f32 %v1277_v28, %v1085_v23  ;;  %v10536_v24 = vpop.f32.mrf.mxu0 }
 0x220   : > { %13648 = vst [vmem:[#allocation75_spill] sm:$0xff] %v10536_v24 }
 0x221   : > { %13647 = vst [vmem:[#allocation74_spill] sm:$0xff] %v10534_v19 }
 0x225   : > { %v1087_v5 = vpop.f32.mrf.mxu2 }
 0x226   : > { %v1279_v0 = vpop.f32.mrf.mxu3 }
 0x227   : > { %v10541_v53 = vadd.f32 %v1279_v0, %v1087_v5  ;;  %v10543_v58 = vpop.f32.mrf.mxu0  ;;  %v8580_v5 = vld [vmem:[%s13563_s1 + $0x188] sm:$0xff]  ;;  %v10557_v0 = vpop.f32.mrf.mxu1  ;;  %895 = vmatmul.bf16.gmra.mxu1 %v10480_v43 }
 0x228   : > { %13650 = vst [vmem:[#allocation77_spill] sm:$0xff] %v10543_v58  ;;  %2055 = vmatpush.bf16.msra.mxu2 %v8580_v5 }
 0x229   : > { %13649 = vst [vmem:[#allocation76_spill] sm:$0xff] %v10541_v53 }
 0x22a   : > { %1129 = vmatmul.bf16.gmra.mxu2 %v10061_v34  ;;  %1525 = vmatmul.bf16.gmra.mxu0 %v10049_v31 }
 0x22b   : > { %1321 = vmatmul.bf16.gmra.mxu3 %v10064_v35 }
 0x22d   : > { %v1090_v27 = vpop.f32.mrf.mxu2 }
 0x22e   : > { %v1282_v32 = vpop.f32.mrf.mxu3 }
 0x22f   : > { %v10550_v23 = vadd.f32 %v1282_v32, %v1090_v27  ;;  %v10552_v28 = vpop.f32.mrf.mxu0  ;;  %v10564_v19 = vpop.f32.mrf.mxu1 }
 0x230   : > { %13652 = vst [vmem:[#allocation79_spill] sm:$0xff] %v10552_v28 }
 0x231   : > { %13651 = vst [vmem:[#allocation78_spill] sm:$0xff] %v10550_v23 }
 0x235   : > { %v1092_v53 = vpop.f32.mrf.mxu2 }
 0x236   : > { %v1284_v58 = vpop.f32.mrf.mxu3 }
 0x237   : > { %v10560_v31 = vadd.f32 %v1284_v58, %v1092_v53  ;;  %v10562_v35 = vpop.f32.mrf.mxu0  ;;  %v10573_v5 = vpop.f32.mrf.mxu1 }
 0x238   : > { %13654 = vst [vmem:[#allocation81_spill] sm:$0xff] %v10562_v35 }
 0x239   : > { %13653 = vst [vmem:[#allocation80_spill] sm:$0xff] %v10560_v31 }
 0x23a   : > { %1134 = vmatmul.bf16.gmra.mxu2 %v10076_v38  ;;  %1530 = vmatmul.bf16.gmra.mxu0 %v10061_v34 }
 0x23b   : > { %1326 = vmatmul.bf16.gmra.mxu3 %v10079_v39 }
 0x23d   : > { %v1095_v27 = vpop.f32.mrf.mxu2 }
 0x23e   : > { %v1287_v32 = vpop.f32.mrf.mxu3 }
 0x23f   : > { %v10569_v23 = vadd.f32 %v1287_v32, %v1095_v27  ;;  %v10571_v28 = vpop.f32.mrf.mxu0  ;;  %v10579_v24 = vpop.f32.mrf.mxu1 }
 0x240   : > { %13656 = vst [vmem:[#allocation83_spill] sm:$0xff] %v10571_v28 }
 0x241   : > { %13655 = vst [vmem:[#allocation82_spill] sm:$0xff] %v10569_v23 }
 0x245   : > { %v1097_v53 = vpop.f32.mrf.mxu2 }
 0x246   : > { %v1289_v58 = vpop.f32.mrf.mxu3 }
 0x247   : > { %v10575_v31 = vadd.f32 %v1289_v58, %v1097_v53  ;;  %v10577_v35 = vpop.f32.mrf.mxu0  ;;  %v10588_v23 = vpop.f32.mrf.mxu1  ;;  %v8526_v53 = vld [vmem:[%s13563_s1 + $0xb8] sm:$0xff] }
 0x248   : > { %13658 = vst [vmem:[#allocation85_spill] sm:$0xff] %v10577_v35  ;;  %1624 = vmatpush.bf16.msrb.mxu1 %v8526_v53  ;;  %v8525_v53 = vld [vmem:[%s13563_s1 + $0xb0] sm:$0xff] }
 0x249   : > { %13657 = vst [vmem:[#allocation84_spill] sm:$0xff] %v10575_v31 }
 0x24a   : > { %1139 = vmatmul.bf16.gmra.mxu2 %v10088_v41  ;;  %1535 = vmatmul.bf16.gmra.mxu0 %v10076_v38 }
 0x24b   : > { %1331 = vmatmul.bf16.gmra.mxu3 %v10091_v42 }
 0x24c   : > { %1625 = vmatpush.bf16.msrb.mxu1 %v8525_v53 }
 0x24d   : > { %v1100_v34 = vpop.f32.mrf.mxu2 }
 0x24e   : > { %v1292_v39 = vpop.f32.mrf.mxu3 }
 0x24f   : > { %v10584_v27 = vadd.f32 %v1292_v39, %v1100_v34  ;;  %v10586_v32 = vpop.f32.mrf.mxu0  ;;  %v10597_v42 = vpop.f32.mrf.mxu1 }
 0x250   : > { %13660 = vst [vmem:[#allocation87_spill] sm:$0xff] %v10586_v32 }
 0x251   : > { %13659 = vst [vmem:[#allocation86_spill] sm:$0xff] %v10584_v27 }
 0x255   : > { %v1102_v58 = vpop.f32.mrf.mxu2 }
 0x256   : > { %v1294_v31 = vpop.f32.mrf.mxu3 }
 0x257   : > { %v10593_v35 = vadd.f32 %v1294_v31, %v1102_v58  ;;  %v10595_v38 = vpop.f32.mrf.mxu0  ;;  %v10609_v58 = vpop.f32.mrf.mxu1 }
 0x258   : > { %13662 = vst [vmem:[#allocation89_spill] sm:$0xff] %v10595_v38 }
 0x259   : > { %13661 = vst [vmem:[#allocation88_spill] sm:$0xff] %v10593_v35  ;;  %v8579_v35 = vld [vmem:[%s13563_s1 + $0x180] sm:$0xff] }
 0x25a   : > { %1144 = vmatmul.bf16.gmra.mxu2 %v10103_v45  ;;  %1540 = vmatmul.bf16.gmra.mxu0 %v10088_v41  ;;  %v8524_v41 = vld [vmem:[%s13563_s1 + $0xa8] sm:$0xff] }
 0x25b   : > { %1336 = vmatmul.bf16.gmra.mxu3 %v10106_v46  ;;  %2056 = vmatpush.bf16.msra.mxu2 %v8579_v35  ;;  %v8522_v35 = vld [vmem:[%s13563_s1 + $0x98] sm:$0xff] }
 0x25c   : > { %1626 = vmatpush.bf16.msrb.mxu1 %v8524_v41 }
 0x25d   : > { %v1105_v34 = vpop.f32.mrf.mxu2 }
 0x25e   : > { %v1297_v39 = vpop.f32.mrf.mxu3 }
 0x25f   : > { %v10605_v27 = vadd.f32 %v1297_v39, %v1105_v34  ;;  %v10607_v31 = vpop.f32.mrf.mxu0  ;;  %v8523_v34 = vld [vmem:[%s13563_s1 + $0xa0] sm:$0xff] }
 0x260   : > { %13664 = vst [vmem:[#allocation91_spill] sm:$0xff] %v10607_v31  ;;  %v10624_v31 = vpop.f32.mrf.mxu1  ;;  %1627 = vmatpush.bf16.msrb.mxu1 %v8523_v34 }
 0x261   : > { %13663 = vst [vmem:[#allocation90_spill] sm:$0xff] %v10605_v27 }
 0x264   : > { %1628 = vmatpush.bf16.msrb.mxu1 %v8522_v35 }
 0x265   : > { %v1107_v46 = vpop.f32.mrf.mxu2 }
 0x266   : > { %v1299_v38 = vpop.f32.mrf.mxu3 }
 0x267   : > { %v10620_v39 = vadd.f32 %v1299_v38, %v1107_v46  ;;  %v10622_v27 = vpop.f32.mrf.mxu0  ;;  %v8521_v38 = vld [vmem:[%s13563_s1 + $0x90] sm:$0xff] }
 0x268   : > { %13666 = vst [vmem:[#allocation93_spill] sm:$0xff] %v10622_v27  ;;  %1629 = vmatpush.bf16.msrb.mxu1 %v8521_v38  ;;  %v8519_v27 = vld [vmem:[%s13563_s1 + $0x80] sm:$0xff]  ;;  %v8594_v38 = vld [vmem:[%s13563_s1 + $0x1f8] sm:$0xff] }
 0x269   : > { %13665 = vst [vmem:[#allocation92_spill] sm:$0xff] %v10620_v39  ;;  %v10639_v39 = vpop.f32.mrf.mxu1  ;;  %2312 = vmatpush.bf16.msra.mxu3 %v8594_v38 }
 0x26a   : > { %1149 = vmatmul.bf16.gmra.mxu2 %v10115_v48  ;;  %1545 = vmatmul.bf16.gmra.mxu0 %v10103_v45  ;;  %v8520_v45 = vld [vmem:[%s13563_s1 + $0x88] sm:$0xff] }
 0x26b   : > { %1341 = vmatmul.bf16.gmra.mxu3 %v10123_v51 }
 0x26c   : > { %1630 = vmatpush.bf16.msrb.mxu1 %v8520_v45 }
 0x26d   : > { %v1110_v53 = vpop.f32.mrf.mxu2 }
 0x26e   : > { %v1302_v41 = vpop.f32.mrf.mxu3 }
 0x26f   : > { %v10635_v46 = vadd.f32 %v1302_v41, %v1110_v53  ;;  %v10637_v34 = vpop.f32.mrf.mxu0 }
 0x270   : > { %13668 = vst [vmem:[#allocation95_spill] sm:$0xff] %v10637_v34  ;;  %1631 = vmatpush.bf16.msrb.mxu1 %v8519_v27 }
 0x271   : > { %13667 = vst [vmem:[#allocation94_spill] sm:$0xff] %v10635_v46  ;;  %v10651_v41 = vpop.f32.mrf.mxu1 }
 0x273   : > { %1632 = vmatmul.bf16.vlgmr.msrb.gmra.mxu1 %v10225_v7 }
 0x275   : > { %v1112_v51 = vpop.f32.mrf.mxu2 }
 0x276   : > { %v1304_v35 = vpop.f32.mrf.mxu3 }
 0x277   : > { %v10647_v32 = vadd.f32 %v1304_v35, %v1112_v51  ;;  %v10649_v53 = vpop.f32.mrf.mxu0  ;;  %v8593_v35 = vld [vmem:[%s13563_s1 + $0x1f0] sm:$0xff] }
 0x278   : > { %13670 = vst [vmem:[#allocation97_spill] sm:$0xff] %v10649_v53  ;;  %v8602_v53 = vld [vmem:[%s13563_s1 + $0x238] sm:$0xff]  ;;  %2313 = vmatpush.bf16.msra.mxu3 %v8593_v35 }
 0x279   : > { %13669 = vst [vmem:[#allocation96_spill] sm:$0xff] %v10647_v32  ;;  %2575 = vmatpush.bf16.msra.mxu0 %v8602_v53  ;;  %v8590_v53 = vld [vmem:[%s13563_s1 + $0x1d8] sm:$0xff] }
 0x27a   : > { %1154 = vmatmul.bf16.gmra.mxu2 %v10136_v59  ;;  %1550 = vmatmul.bf16.gmra.mxu0 %v10115_v48  ;;  %v10667_v48 = vpop.f32.mrf.mxu1 }
 0x27b   : > { %1346 = vmatmul.bf16.gmra.mxu3 %v10143_v62  ;;  %v8592_v62 = vld [vmem:[%s13563_s1 + $0x1e8] sm:$0xff] }
 0x27c   : > { %2314 = vmatpush.bf16.msra.mxu3 %v8592_v62 }
 0x27d   : > { %v1115_v45 = vpop.f32.mrf.mxu2 }
 0x27e   : > { %v1307_v51 = vpop.f32.mrf.mxu3 }
 0x27f   : > { %v10663_v27 = vadd.f32 %v1307_v51, %v1115_v45  ;;  %v10665_v32 = vpop.f32.mrf.mxu0  ;;  %v8591_v45 = vld [vmem:[%s13563_s1 + $0x1e0] sm:$0xff] }
 0x280   : > { %13672 = vst [vmem:[#allocation99_spill] sm:$0xff] %v10665_v32  ;;  %2315 = vmatpush.bf16.msra.mxu3 %v8591_v45 }
 0x281   : > { %13671 = vst [vmem:[#allocation98_spill] sm:$0xff] %v10663_v27 }
 0x282   : > { %v10682_v32 = vpop.f32.mrf.mxu1 }
 0x283   : > { %1637 = vmatmul.bf16.gmra.mxu1 %v10266_v15  ;;  %v8600_v15 = vld [vmem:[%s13563_s1 + $0x228] sm:$0xff] }
 0x284   : > { %2316 = vmatpush.bf16.msra.mxu3 %v8590_v53 }
 0x285   : > { %v1117_v7 = vpop.f32.mrf.mxu2 }
 0x286   : > { %v1309_v38 = vpop.f32.mrf.mxu3 }
 0x287   : > { %v10678_v51 = vadd.f32 %v1309_v38, %v1117_v7  ;;  %v10680_v27 = vpop.f32.mrf.mxu0  ;;  %v8589_v7 = vld [vmem:[%s13563_s1 + $0x1d0] sm:$0xff] }
 0x288   : > { %13674 = vst [vmem:[#allocation101_spill] sm:$0xff] %v10680_v27  ;;  %v8601_v38 = vld [vmem:[%s13563_s1 + $0x230] sm:$0xff]  ;;  %2317 = vmatpush.bf16.msra.mxu3 %v8589_v7 }
 0x289   : > { %13673 = vst [vmem:[#allocation100_spill] sm:$0xff] %v10678_v51  ;;  %2576 = vmatpush.bf16.msra.mxu0 %v8601_v38 }
 0x28a   : > { %1159 = vmatmul.bf16.gmra.mxu2 %v10168_v10  ;;  %1555 = vmatmul.bf16.gmra.mxu0 %v10136_v59  ;;  %v10701_v51 = vpop.f32.mrf.mxu1 }
 0x28b   : > { %1351 = vmatmul.bf16.gmra.mxu3 %v10178_v14  ;;  %v8588_v14 = vld [vmem:[%s13563_s1 + $0x1c8] sm:$0xff] }
 0x28c   : > { %2318 = vmatpush.bf16.msra.mxu3 %v8588_v14  ;;  %v8598_v14 = vld [vmem:[%s13563_s1 + $0x218] sm:$0xff] }
 0x28d   : > { %v1120_v35 = vpop.f32.mrf.mxu2  ;;  %2577 = vmatpush.bf16.msra.mxu0 %v8600_v15 }
 0x28e   : > { %v1312_v62 = vpop.f32.mrf.mxu3 }
 0x28f   : > { %v10697_v59 = vadd.f32 %v1312_v62, %v1120_v35  ;;  %v10699_v45 = vpop.f32.mrf.mxu0  ;;  %v8587_v35 = vld [vmem:[%s13563_s1 + $0x1c0] sm:$0xff] }
 0x290   : > { %13676 = vst [vmem:[#allocation103_spill] sm:$0xff] %v10699_v45  ;;  %v8599_v62 = vld [vmem:[%s13563_s1 + $0x220] sm:$0xff]  ;;  %2319 = vmatpush.bf16.msra.mxu3 %v8587_v35 }
 0x291   : > { %13675 = vst [vmem:[#allocation102_spill] sm:$0xff] %v10697_v59  ;;  %2578 = vmatpush.bf16.msra.mxu0 %v8599_v62 }
 0x292   : > { %v10719_v59 = vpop.f32.mrf.mxu1 }
 0x293   : > { %1642 = vmatmul.bf16.gmra.mxu1 %v10284_v36 }
 0x295   : > { %v1122_v53 = vpop.f32.mrf.mxu2  ;;  %2579 = vmatpush.bf16.msra.mxu0 %v8598_v14 }
 0x296   : > { %v1314_v27 = vpop.f32.mrf.mxu3 }
 0x297   : > { %v10715_v7 = vadd.f32 %v1314_v27, %v1122_v53  ;;  %v10717_v38 = vpop.f32.mrf.mxu0  ;;  %v8597_v53 = vld [vmem:[%s13563_s1 + $0x210] sm:$0xff] }
 0x298   : > { %13678 = vst [vmem:[#allocation105_spill] sm:$0xff] %v10717_v38 }
 0x299   : > { %13677 = vst [vmem:[#allocation104_spill] sm:$0xff] %v10715_v7  ;;  %2580 = vmatpush.bf16.msra.mxu0 %v8597_v53  ;;  %v8595_v7 = vld [vmem:[%s13563_s1 + $0x200] sm:$0xff] }
 0x29a   : > { %1164 = vmatmul.bf16.gmra.mxu2 %v10209_v63  ;;  %1560 = vmatmul.bf16.gmra.mxu0 %v10168_v10  ;;  %v10735_v10 = vpop.f32.mrf.mxu1 }
 0x29b   : > { %1356 = vmatmul.bf16.gmra.mxu3 %v10222_v6  ;;  %v8596_v6 = vld [vmem:[%s13563_s1 + $0x208] sm:$0xff] }
 0x29d   : > { %v1125_v27 = vpop.f32.mrf.mxu2  ;;  %2581 = vmatpush.bf16.msra.mxu0 %v8596_v6 }
 0x29e   : > { %v1317_v15 = vpop.f32.mrf.mxu3 }
 0x29f   : > { %v10731_v35 = vadd.f32 %v1317_v15, %v1125_v27  ;;  %v10733_v62 = vpop.f32.mrf.mxu0 }
 0x2a0   : > { %13680 = vst [vmem:[#allocation107_spill] sm:$0xff] %v10733_v62 }
 0x2a1   : > { %13679 = vst [vmem:[#allocation106_spill] sm:$0xff] %v10731_v35  ;;  %2582 = vmatpush.bf16.msra.mxu0 %v8595_v7  ;;  %v8552_v7 = vld [vmem:[%s9942_s25 + $0x18] sm:$0xff] }
 0x2a2   : > { %v10747_v15 = vpop.f32.mrf.mxu1 }
 0x2a3   : > { %1647 = vmatmul.bf16.gmra.mxu1 %v10299_v60 }
 0x2a5   : > { %v1127_v36 = vpop.f32.mrf.mxu2 }
 0x2a6   : > { %v1319_v14 = vpop.f32.mrf.mxu3 }
 0x2a7   : > { %v10743_v38 = vadd.f32 %v1319_v14, %v1127_v36  ;;  %v10745_v27 = vpop.f32.mrf.mxu0 }
 0x2a8   : > { %13682 = vst [vmem:[#allocation109_spill] sm:$0xff] %v10745_v27 }
 0x2a9   : > { %13681 = vst [vmem:[#allocation108_spill] sm:$0xff] %v10743_v38 }
 0x2aa   : > { %1169 = vmatmul.bf16.gmra.mxu2 %v10251_v57  ;;  %1565 = vmatmul.bf16.gmra.mxu0 %v10209_v63  ;;  %v10757_v36 = vpop.f32.mrf.mxu1 }
 0x2ab   : > { %1361 = vmatmul.bf16.gmra.mxu3 %v10261_v11 }
 0x2ad   : > { %v1130_v53 = vpop.f32.mrf.mxu2 }
 0x2ae   : > { %v1322_v6 = vpop.f32.mrf.mxu3 }
 0x2af   : > { %v10753_v35 = vadd.f32 %v1322_v6, %v1130_v53  ;;  %v10755_v62 = vpop.f32.mrf.mxu0 }
 0x2b0   : > { %13684 = vst [vmem:[#allocation111_spill] sm:$0xff] %v10755_v62 }
 0x2b1   : > { %13683 = vst [vmem:[#allocation110_spill] sm:$0xff] %v10753_v35 }
 0x2b2   : > { %v10764_v63 = vpop.f32.mrf.mxu1 }
 0x2b3   : > { %1652 = vmatmul.bf16.gmra.mxu1 %v10317_v16 }
 0x2b5   : > { %v1132_v14 = vpop.f32.mrf.mxu2 }
 0x2b6   : > { %v1324_v38 = vpop.f32.mrf.mxu3 }
 0x2b7   : > { %v10760_v27 = vadd.f32 %v1324_v38, %v1132_v14  ;;  %v10762_v45 = vpop.f32.mrf.mxu0 }
 0x2b8   : > { %13686 = vst [vmem:[#allocation113_spill] sm:$0xff] %v10762_v45 }
 0x2b9   : > { %13685 = vst [vmem:[#allocation112_spill] sm:$0xff] %v10760_v27  ;;  %v8553_v27 = vld [vmem:[%s9942_s25 + $0x20] sm:$0xff] }
 0x2ba   : > { %1570 = vmatmul.bf16.gmra.mxu0 %v10251_v57  ;;  %2057 = vmatmul.bf16.vlgmr.msra.gmra.mxu2 %v8552_v7  ;;  %v10772_v35 = vpop.f32.mrf.mxu1 }
 0x2bb   : > { %2320 = vmatmul.bf16.vlgmr.msra.gmra.mxu3 %v8552_v7 }
 0x2bd   : > { %v1135_v60 = vpop.f32.mrf.mxu2 }
 0x2be   : > { %v1327_v11 = vpop.f32.mrf.mxu3 }
 0x2bf   : > { %v10768_v53 = vadd.f32 %v1327_v11, %v1135_v60  ;;  %v10770_v6 = vpop.f32.mrf.mxu0 }
 0x2c0   : > { %13688 = vst [vmem:[#allocation115_spill] sm:$0xff] %v10770_v6 }
 0x2c1   : > { %13687 = vst [vmem:[#allocation114_spill] sm:$0xff] %v10768_v53 }
 0x2c2   : > { %v10779_v57 = vpop.f32.mrf.mxu1 }
 0x2c3   : > { %13691 = vst [vmem:[#allocation118_spill] sm:$0xff] %v10779_v57  ;;  %1657 = vmatmul.bf16.gmra.mxu1 %v10332_v22 }
 0x2c5   : > { %v1137_v38 = vpop.f32.mrf.mxu2 }
 0x2c6   : > { %v1329_v14 = vpop.f32.mrf.mxu3 }
 0x2c7   : > { %v10775_v45 = vadd.f32 %v1329_v14, %v1137_v38  ;;  %v10777_v62 = vpop.f32.mrf.mxu0  ;;  %v8554_v14 = vld [vmem:[%s9942_s25 + $0x28] sm:$0xff] }
 0x2c8   : > { %13690 = vst [vmem:[#allocation117_spill] sm:$0xff] %v10777_v62 }
 0x2c9   : > { %13689 = vst [vmem:[#allocation116_spill] sm:$0xff] %v10775_v45 }
 0x2ca   : > { %2062 = vmatmul.bf16.gmra.mxu2 %v8553_v27  ;;  %2583 = vmatmul.bf16.vlgmr.msra.gmra.mxu0 %v8552_v7  ;;  %v10786_v6 = vpop.f32.mrf.mxu1 }
 0x2cb   : > { %2325 = vmatmul.bf16.gmra.mxu3 %v8553_v27  ;;  %13694 = vst [vmem:[#allocation121_spill] sm:$0xff] %v10786_v6 }
 0x2cd   : > { %v1140_v16 = vpop.f32.mrf.mxu2 }
 0x2ce   : > { %v1332_v60 = vpop.f32.mrf.mxu3 }
 0x2cf   : > { %v10782_v11 = vadd.f32 %v1332_v60, %v1140_v16  ;;  %v10784_v53 = vpop.f32.mrf.mxu0 }
 0x2d0   : > { %13693 = vst [vmem:[#allocation120_spill] sm:$0xff] %v10784_v53 }
 0x2d1   : > { %13692 = vst [vmem:[#allocation119_spill] sm:$0xff] %v10782_v11 }
 0x2d2   : > { %v10793_v7 = vpop.f32.mrf.mxu1 }
 0x2d3   : > { %13697 = vst [vmem:[#allocation124_spill] sm:$0xff] %v10793_v7  ;;  %1662 = vmatmul.bf16.gmra.mxu1 %v10347_v26 }
 0x2d5   : > { %v1142_v46 = vpop.f32.mrf.mxu2 }
 0x2d6   : > { %v1334_v38 = vpop.f32.mrf.mxu3 }
 0x2d7   : > { %v10789_v45 = vadd.f32 %v1334_v38, %v1142_v46  ;;  %v10791_v62 = vpop.f32.mrf.mxu0  ;;  %v8555_v38 = vld [vmem:[%s9942_s25 + $0x30] sm:$0xff] }
 0x2d8   : > { %13696 = vst [vmem:[#allocation123_spill] sm:$0xff] %v10791_v62 }
 0x2d9   : > { %13695 = vst [vmem:[#allocation122_spill] sm:$0xff] %v10789_v45 }
 0x2da   : > { %2067 = vmatmul.bf16.gmra.mxu2 %v8554_v14  ;;  %2588 = vmatmul.bf16.gmra.mxu0 %v8553_v27  ;;  %v10800_v53 = vpop.f32.mrf.mxu1 }
 0x2db   : > { %2330 = vmatmul.bf16.gmra.mxu3 %v8554_v14  ;;  %13700 = vst [vmem:[#allocation127_spill] sm:$0xff] %v10800_v53 }
 0x2dd   : > { %v1145_v22 = vpop.f32.mrf.mxu2 }
 0x2de   : > { %v1337_v16 = vpop.f32.mrf.mxu3 }
 0x2df   : > { %v10796_v60 = vadd.f32 %v1337_v16, %v1145_v22  ;;  %v10798_v11 = vpop.f32.mrf.mxu0 }
 0x2e0   : > { %13699 = vst [vmem:[#allocation126_spill] sm:$0xff] %v10798_v11 }
 0x2e1   : > { %13698 = vst [vmem:[#allocation125_spill] sm:$0xff] %v10796_v60 }
 0x2e2   : > { %v10807_v27 = vpop.f32.mrf.mxu1 }
 0x2e3   : > { %13703 = vst [vmem:[#allocation130_spill] sm:$0xff] %v10807_v27  ;;  %1667 = vmatmul.bf16.gmra.mxu1 %v10365_v29 }
 0x2e5   : > { %v1147_v34 = vpop.f32.mrf.mxu2 }
 0x2e6   : > { %v1339_v46 = vpop.f32.mrf.mxu3 }
 0x2e7   : > { %v10803_v45 = vadd.f32 %v1339_v46, %v1147_v34  ;;  %v10805_v62 = vpop.f32.mrf.mxu0  ;;  %v8556_v46 = vld [vmem:[%s9942_s25 + $0x38] sm:$0xff] }
 0x2e8   : > { %13702 = vst [vmem:[#allocation129_spill] sm:$0xff] %v10805_v62 }
 0x2e9   : > { %13701 = vst [vmem:[#allocation128_spill] sm:$0xff] %v10803_v45 }
 0x2ea   : > { %2072 = vmatmul.bf16.gmra.mxu2 %v8555_v38  ;;  %2593 = vmatmul.bf16.gmra.mxu0 %v8554_v14  ;;  %v10814_v11 = vpop.f32.mrf.mxu1 }
 0x2eb   : > { %2335 = vmatmul.bf16.gmra.mxu3 %v8555_v38  ;;  %13706 = vst [vmem:[#allocation133_spill] sm:$0xff] %v10814_v11 }
 0x2ed   : > { %v1150_v26 = vpop.f32.mrf.mxu2 }
 0x2ee   : > { %v1342_v22 = vpop.f32.mrf.mxu3 }
 0x2ef   : > { %v10810_v16 = vadd.f32 %v1342_v22, %v1150_v26  ;;  %v10812_v60 = vpop.f32.mrf.mxu0 }
 0x2f0   : > { %13705 = vst [vmem:[#allocation132_spill] sm:$0xff] %v10812_v60 }
 0x2f1   : > { %13704 = vst [vmem:[#allocation131_spill] sm:$0xff] %v10810_v16 }
 0x2f2   : > { %v10821_v14 = vpop.f32.mrf.mxu1 }
 0x2f3   : > { %1672 = vmatmul.bf16.gmra.mxu1 %v10380_v33 }
 0x2f5   : > { %v1152_v53 = vpop.f32.mrf.mxu2 }
 0x2f6   : > { %v1344_v34 = vpop.f32.mrf.mxu3 }
 0x2f7   : > { %v10817_v45 = vadd.f32 %v1344_v34, %v1152_v53  ;;  %v10819_v62 = vpop.f32.mrf.mxu0  ;;  %v8557_v34 = vld [vmem:[%s9942_s25 + $0x40] sm:$0xff] }
 0x2f8   : > { %13708 = vst [vmem:[#allocation135_spill] sm:$0xff] %v10819_v62 }
 0x2f9   : > { %13707 = vst [vmem:[#allocation134_spill] sm:$0xff] %v10817_v45 }
 0x2fa   : > { %2077 = vmatmul.bf16.gmra.mxu2 %v8556_v46  ;;  %2598 = vmatmul.bf16.gmra.mxu0 %v8555_v38  ;;  %v10828_v60 = vpop.f32.mrf.mxu1 }
 0x2fb   : > { %2340 = vmatmul.bf16.gmra.mxu3 %v8556_v46 }
 0x2fd   : > { %v1155_v29 = vpop.f32.mrf.mxu2 }
 0x2fe   : > { %v1347_v26 = vpop.f32.mrf.mxu3 }
 0x2ff   : > { %v10824_v22 = vadd.f32 %v1347_v26, %v1155_v29  ;;  %v10826_v16 = vpop.f32.mrf.mxu0 }
 0x300   : > { %13710 = vst [vmem:[#allocation137_spill] sm:$0xff] %v10826_v16 }
 0x301   : > { %13709 = vst [vmem:[#allocation136_spill] sm:$0xff] %v10824_v22 }
 0x302   : > { %v10835_v38 = vpop.f32.mrf.mxu1 }
 0x303   : > { %1677 = vmatmul.bf16.gmra.mxu1 %v10395_v37 }
 0x305   : > { %v1157_v11 = vpop.f32.mrf.mxu2 }
 0x306   : > { %v1349_v53 = vpop.f32.mrf.mxu3 }
 0x307   : > { %v10831_v45 = vadd.f32 %v1349_v53, %v1157_v11  ;;  %v10833_v62 = vpop.f32.mrf.mxu0  ;;  %v8558_v53 = vld [vmem:[%s9942_s25 + $0x48] sm:$0xff] }
 0x308   : > { %13712 = vst [vmem:[#allocation139_spill] sm:$0xff] %v10833_v62 }
 0x309   : > { %13711 = vst [vmem:[#allocation138_spill] sm:$0xff] %v10831_v45 }
 0x30a   : > { %2082 = vmatmul.bf16.gmra.mxu2 %v8557_v34  ;;  %2603 = vmatmul.bf16.gmra.mxu0 %v8556_v46  ;;  %v10842_v16 = vpop.f32.mrf.mxu1 }
 0x30b   : > { %2345 = vmatmul.bf16.gmra.mxu3 %v8557_v34 }
 0x30d   : > { %v1160_v33 = vpop.f32.mrf.mxu2 }
 0x30e   : > { %v1352_v29 = vpop.f32.mrf.mxu3 }
 0x30f   : > { %v10838_v26 = vadd.f32 %v1352_v29, %v1160_v33  ;;  %v10840_v22 = vpop.f32.mrf.mxu0 }
 0x310   : > { %13714 = vst [vmem:[#allocation141_spill] sm:$0xff] %v10840_v22 }
 0x311   : > { %13713 = vst [vmem:[#allocation140_spill] sm:$0xff] %v10838_v26 }
 0x312   : > { %v10849_v46 = vpop.f32.mrf.mxu1 }
 0x313   : > { %1682 = vmatmul.bf16.gmra.mxu1 %v10410_v40 }
 0x315   : > { %v1162_v27 = vpop.f32.mrf.mxu2 }
 0x316   : > { %v1354_v11 = vpop.f32.mrf.mxu3 }
 0x317   : > { %v10845_v45 = vadd.f32 %v1354_v11, %v1162_v27  ;;  %v10847_v62 = vpop.f32.mrf.mxu0  ;;  %v8559_v11 = vld [vmem:[%s9942_s25 + $0x50] sm:$0xff] }
 0x318   : > { %13716 = vst [vmem:[#allocation143_spill] sm:$0xff] %v10847_v62 }
 0x319   : > { %13715 = vst [vmem:[#allocation142_spill] sm:$0xff] %v10845_v45 }
 0x31a   : > { %2087 = vmatmul.bf16.gmra.mxu2 %v8558_v53  ;;  %2608 = vmatmul.bf16.gmra.mxu0 %v8557_v34  ;;  %v10856_v22 = vpop.f32.mrf.mxu1 }
 0x31b   : > { %2350 = vmatmul.bf16.gmra.mxu3 %v8558_v53 }
 0x31d   : > { %v1165_v37 = vpop.f32.mrf.mxu2 }
 0x31e   : > { %v1357_v33 = vpop.f32.mrf.mxu3 }
 0x31f   : > { %v10852_v29 = vadd.f32 %v1357_v33, %v1165_v37  ;;  %v10854_v26 = vpop.f32.mrf.mxu0 }
 0x320   : > { %13718 = vst [vmem:[#allocation145_spill] sm:$0xff] %v10854_v26 }
 0x321   : > { %13717 = vst [vmem:[#allocation144_spill] sm:$0xff] %v10852_v29 }
 0x322   : > { %v10863_v34 = vpop.f32.mrf.mxu1 }
 0x323   : > { %1687 = vmatmul.bf16.gmra.mxu1 %v10428_v12 }
 0x325   : > { %v1167_v7 = vpop.f32.mrf.mxu2 }
 0x326   : > { %v1359_v27 = vpop.f32.mrf.mxu3 }
 0x327   : > { %v10859_v45 = vadd.f32 %v1359_v27, %v1167_v7  ;;  %v10861_v62 = vpop.f32.mrf.mxu0  ;;  %v8636_v7 = vld [vmem:[%s13565_s3 + $0xf8] sm:$0xff] }
 0x328   : > { %13720 = vst [vmem:[#allocation147_spill] sm:$0xff] %v10861_v62  ;;  %v8560_v62 = vld [vmem:[%s9942_s25 + $0x58] sm:$0xff]  ;;  %4410 = vmatpush.bf16.msra.mxu1 %v8636_v7  ;;  %v2827_v7 = vlaneseq }
 0x329   : > { %13719 = vst [vmem:[#allocation146_spill] sm:$0xff] %v10859_v45 }
 0x32a   : > { %2092 = vmatmul.bf16.gmra.mxu2 %v8559_v11  ;;  %2613 = vmatmul.bf16.gmra.mxu0 %v8558_v53  ;;  %v10870_v26 = vpop.f32.mrf.mxu1 }
 0x32b   : > { %2355 = vmatmul.bf16.gmra.mxu3 %v8559_v11 }
 0x32d   : > { %v1170_v40 = vpop.f32.mrf.mxu2 }
 0x32e   : > { %v1362_v37 = vpop.f32.mrf.mxu3 }
 0x32f   : > { %v10866_v33 = vadd.f32 %v1362_v37, %v1170_v40  ;;  %v10868_v29 = vpop.f32.mrf.mxu0 }
 0x330   : > { %13722 = vst [vmem:[#allocation149_spill] sm:$0xff] %v10868_v29 }
 0x331   : > { %13721 = vst [vmem:[#allocation148_spill] sm:$0xff] %v10866_v33 }
 0x332   : > { %v10880_v12 = vpop.f32.mrf.mxu1 }
 0x333   : > { %1692 = vmatmul.bf16.gmra.mxu1 %v10466_v9 }
 0x335   : > { %v1172_v27 = vpop.f32.mrf.mxu2 }
 0x336   : > { %v1364_v45 = vpop.f32.mrf.mxu3 }
 0x337   : > { %v10876_v53 = vadd.f32 %v1364_v45, %v1172_v27  ;;  %v10878_v6 = vpop.f32.mrf.mxu0  ;;  %v832_v27 = vadd.f32 %v10529_v56, %v10117_v49 }
 0x338   : > { %13724 = vst [vmem:[#allocation151_spill] sm:$0xff] %v10878_v6 }
 0x339   : > { %13723 = vst [vmem:[#allocation150_spill] sm:$0xff] %v10876_v53  ;;  %v10892_v53 = vshrl.u32 %v2827_v7, 7 }
 0x33a   : > { %2097 = vmatmul.bf16.gmra.mxu2 %v8560_v62  ;;  %2618 = vmatmul.bf16.gmra.mxu0 %v8559_v11  ;;  %v10888_v45 = vpop.f32.mrf.mxu1  ;;  %v834_v11 = vadd.f32 %v10538_v47, %v10130_v55 }
 0x33b   : > { %2360 = vmatmul.bf16.gmra.mxu3 %v8560_v62  ;;  %vm13571_vm0 = vcmp.lt.s32.totalorder %v10892_v53, 1  ;;  %vm13572_vm1 = vcmp.lt.s32.totalorder %v10892_v53, 7 }
 0x33d   : > { %v2058_v40 = vpop.f32.mrf.mxu2 }
 0x33e   : > { %v2321_v37 = vpop.f32.mrf.mxu3  ;;  %v10896_v6 = vadd.f32 %v2058_v40, %v832_v27  ;;  %v1636_v40 = vadd.f32 %v10828_v60, %v10434_v30 }
 0x33f   : > { %v10884_v33 = vadd.f32 %v2321_v37, %v10417_v1  ;;  %v10886_v29 = vpop.f32.mrf.mxu0  ;;  %v1634_v1 = vadd.f32 %v10821_v14, %v10423_v21  ;;  %v837_v14 = vadd.f32 %v10545_v20, %v10140_v61 }
 0x340   : > { %13726 = vst [vmem:[#allocation153_spill] sm:$0xff] %v10886_v29  ;;  %v8561_v29 = vld [vmem:[%s9942_s25 + $0x60] sm:$0xff]  ;;  %v13569_v57 = vrot.slane %v10896_v6, 7 }
 0x341   : > { %13725 = vst [vmem:[#allocation152_spill] sm:$0xff] %v10884_v33 }
 0x342   : > { %v10905_v7 = vpop.f32.mrf.mxu1 }
 0x343   : > { %1697 = vmatmul.bf16.gmra.mxu1 %v10480_v43 }
 0x345   : > { %v2060_v9 = vpop.f32.mrf.mxu2 }
 0x346   : > { %v2194_v37 = vadd.f32 %v2060_v9, %v834_v11  ;;  %v2323_v33 = vpop.f32.mrf.mxu3  ;;  %v3267_v11 = vadd.s32 8, %v10892_v53 }
 0x347   : > { %v2584_v28 = vpop.f32.mrf.mxu0  ;;  %v2457_v55 = vadd.f32 %v2323_v33, %v10421_v54 }
 0x348   : > { %v2774_v49 = vrot.slane %v2194_v37, 7  ;;  %v10903_v56 = vadd.f32 %v2584_v28, %v1634_v1 }
 0x34a   : > { %13727 = vst [vmem:[#allocation154_spill] sm:$0xff] %v10903_v56  ;;  %v2882_v21 = vsel %vm13571_vm0, %v13569_v57, %v2774_v49  ;;  %2102 = vmatmul.bf16.gmra.mxu2 %v8561_v29  ;;  %2623 = vmatmul.bf16.gmra.mxu0 %v8560_v62  ;;  %v3268_v62 = vadd.s32 16, %v10892_v53  ;;  %v10919_v37 = vpop.f32.mrf.mxu1  ;;  %v13568_v61 = vrot.slane %v10903_v56, 1 }
 0x34b   : > { %v2885_v47 = vadd.f32 %v2882_v21, %v2457_v55  ;;  %2365 = vmatmul.bf16.gmra.mxu3 %v8561_v29  ;;  %v3321_v55 = vmul.u32 683, %v3267_v11  ;;  %v839_v21 = vadd.f32 %v10557_v0, %v10156_v4 }
 0x34d   : > { %v2063_v28 = vpop.f32.mrf.mxu2 }
 0x34e   : > { %v2195_v27 = vadd.f32 %v2063_v28, %v837_v14  ;;  %v2326_v54 = vpop.f32.mrf.mxu3 }
 0x34f   : > { %v2586_v33 = vpop.f32.mrf.mxu0  ;;  %v2458_v43 = vadd.f32 %v2326_v54, %v10432_v3  ;;  %v3322_v3 = vmul.u32 683, %v3268_v62 }
 0x350   : > { %v2775_v9 = vrot.slane %v2195_v27, 7  ;;  %v2720_v1 = vadd.f32 %v2586_v33, %v1636_v40  ;;  %v1639_v40 = vadd.f32 %v10835_v38, %v10438_v50 }
 0x351   : > { %v3376_v0 = vshra.s32 %v3322_v3, 14 }
 0x352   : > { %v2881_v30 = vsel %vm13571_vm0, %v2774_v49, %v2775_v9  ;;  %v2939_v20 = vrot.slane %v2720_v1, 1  ;;  %v10937_v49 = vld [vmem:[%s9942_s25 + $0x68] sm:$0xff]  ;;  %v3375_v1 = vshra.s32 %v3321_v55, 14  ;;  %v9804_v55 = vld [vmem:[%s9942_s25 + $0x70] sm:$0xff]  }
 0x353   : > { %v2886_v60 = vadd.f32 %v2881_v30, %v2458_v43  ;;  %v10939_v30 = vpop.f32.mrf.mxu1  ;;  %1702 = vmatmul.bf16.gmra.mxu1 %v9804_v55  ;;  %v10964_v55 = vadd.s32 32, %v10892_v53  ;;  %vm3538_vm4 = vcmp.ge.s32.totalorder %v3376_v0, 1  ;;  %vm3592_vm5 = vcmp.le.s32.totalorder %v3376_v0, 16 }
 0x354   : > { %v10932_v14 = vsel %vm13572_vm1, %v13568_v61, %v2939_v20  ;;  %v3429_v38 = vmul.u32 24, %v3375_v1  ;;  %vm3537_vm2 = vcmp.ge.s32.totalorder %v3375_v1, 1  ;;  %vm3591_vm3 = vcmp.le.s32.totalorder %v3375_v1, 16  ;;  %vm3646_vm8 = vmand %vm3538_vm4, %vm3592_vm5 }
 0x355   : > { %13728 = vst [vmem:[#allocation155_spill] sm:$0xff] %v10932_v14  ;;  %v2065_v28 = vpop.f32.mrf.mxu2  ;;  %vm3645_vm6 = vmand %vm3537_vm2, %vm3591_vm3 }
 0x356   : > { %v2196_v27 = vadd.f32 %v2065_v28, %v839_v21  ;;  %v2328_v54 = vpop.f32.mrf.mxu3  ;;  %v13729_v21 = vld [vmem:[#allocation7_spill] sm:$0xff]  ;;  %v3430_v28 = vmul.u32 24, %v3376_v0  ;;  %v3324_v0 = vmul.u32 683, %v10964_v55 }
 0x357   : > { %v2589_v33 = vpop.f32.mrf.mxu0  ;;  %v2459_v61 = vadd.f32 %v2328_v54, %v10436_v2  ;;  %v842_v3 = vadd.f32 %v10564_v19, %v13729_v21  ;;  %v3483_v54 = vsub.s32 %v3267_v11, %v3429_v38 }
 0x358   : > { %v2776_v43 = vrot.slane %v2196_v27, 7  ;;  %v2721_v4 = vadd.f32 %v2589_v33, %v1639_v40  ;;  %v10961_v33 = vadd.s32 24, %v10892_v53 }
 0x359   : > { %vm3699_vm7 = vcmp.ge.s32.totalorder %v3483_v54, 1  ;;  %vm3807_vm11 = vcmp.le.s32.totalorder %v3483_v54, 16 }
 0x35a   : > { %v2880_v57 = vsel %vm13571_vm0, %v2775_v9, %v2776_v43  ;;  %v2940_v56 = vrot.slane %v2721_v4, 1  ;;  %2107 = vmatmul.bf16.gmra.mxu2 %v10937_v49  ;;  %2628 = vmatmul.bf16.gmra.mxu0 %v8561_v29  ;;  %v10956_v9 = vld [vmem:[%s13564_s2] ss:$0 sm:$0xff]  ;;  %v1641_v29 = vadd.f32 %v10842_v16, %v10445_v17  ;;  %v3484_v4 = vsub.s32 %v3268_v62, %v3430_v28  ;;  %vm10983_vm10 = vmand %vm3645_vm6, %vm3699_vm7 }
 0x35b   : > { %v10945_v50 = vadd.f32 %v2880_v57, %v2459_v61  ;;  %2370 = vmatmul.bf16.gmra.mxu3 %v10937_v49  ;;  %v10966_v21 = vpop.f32.mrf.mxu1  ;;  %v13730_v17 = vld [vmem:[#allocation53_spill] sm:$0xff]  ;;  %vm10995_vm14 = vmand %vm10983_vm10, %vm3807_vm11 }
 0x35c   : > { %v3044_v2 = vsel %vm13572_vm1, %v2939_v20, %v2940_v56  ;;  %v13731_v28 = vld [vmem:[#allocation9_spill] sm:$0xff]  ;;  %vm3700_vm9 = vcmp.ge.s32.totalorder %v3484_v4, 1  ;;  %vm3808_vm13 = vcmp.le.s32.totalorder %v3484_v4, 16 }
 0x35d   : > { %v3048_v40 = vadd.f32 %v3044_v2, %v2885_v47  ;;  %v2068_v57 = vpop.f32.mrf.mxu2  ;;  %vm3754_vm12 = vmand %vm3646_vm8, %vm3700_vm9 }
 0x35e   : > { %v2197_v61 = vadd.f32 %v2068_v57, %v842_v3  ;;  %v2331_v27 = vpop.f32.mrf.mxu3  ;;  %v3323_v3 = vmul.u32 683, %v10961_v33  ;;  %v844_v57 = vadd.f32 %v10573_v5, %v13731_v28  ;;  %vm3862_vm15 = vmand %vm3754_vm12, %vm3808_vm13 }
 0x35f   : > { %v2591_v19 = vpop.f32.mrf.mxu0  ;;  %v3106_v2 = vadd.f32 %v10956_v9, %v3048_v40  ;;  %v2460_v16 = vadd.f32 %v2331_v27, %v13730_v17  ;;  %v10988_v17 = vld [vmem:[%s9942_s25 + $0x70] sm:$0xff] }
 0x360   : > { %v2777_v20 = vrot.slane %v2197_v61, 7  ;;  %v2722_v47 = vadd.f32 %v2591_v19, %v1641_v29  ;;  %v13732_v61 = vld [vmem:[#allocation55_spill] sm:$0xff] }
 0x361   : > { %v1644_v27 = vadd.f32 %v10849_v46, %v13732_v61  ;;  %v13738_v19 = vld [vmem:[#allocation11_spill] sm:$0xff] }
 0x362   : > { %v2879_v11 = vsel %vm13571_vm0, %v2776_v43, %v2777_v20  ;;  %v2941_v38 = vrot.slane %v2722_v47, 1  ;;  %v3160_v43 = vmul.f32 0.1, %v3106_v2 }
 0x363   : > { %v10973_v62 = vadd.f32 %v2879_v11, %v2460_v16  ;;  %v3377_v11 = vshra.s32 %v3323_v3, 14  ;;  %v10991_v46 = vpop.f32.mrf.mxu1 }
 0x364   : > { %v3043_v40 = vsel %vm13572_vm1, %v2940_v56, %v2941_v38  ;;  %v3214_v61 = vmax.f32 %v3106_v2, %v3160_v43 }
 0x365   : > { %v3049_v29 = vadd.f32 %v3043_v40, %v2886_v60  ;;  %v2070_v1 = vpop.f32.mrf.mxu2  ;;  %v3378_v40 = vshra.s32 %v3324_v0, 14  ;;  %v3431_v43 = vmul.u32 24, %v3377_v11  ;;  %vm3539_vm2 = vcmp.ge.s32.totalorder %v3377_v11, 1 }
 0x366   : > { %v2198_v47 = vadd.f32 %v2070_v1, %v844_v57  ;;  %v2333_v5 = vpop.f32.mrf.mxu3  ;;  %v13737_v1 = vld [vmem:[#allocation54_spill] sm:$0xff]  ;;  %vm3593_vm3 = vcmp.le.s32.totalorder %v3377_v11, 16 }
 0x367   : > { %v3107_v56 = vadd.f32 %v10956_v9, %v3049_v29  ;;  %v2594_v16 = vpop.f32.mrf.mxu0  ;;  %v2461_v29 = vadd.f32 %v2333_v5, %v13737_v1  ;;  %v3485_v14 = vsub.s32 %v10961_v33, %v3431_v43  ;;  %vm3540_vm4 = vcmp.ge.s32.totalorder %v3378_v40, 1  ;;  %vm3647_vm6 = vmand %vm3539_vm2, %vm3593_vm3 }
 0x368   : > { %v2778_v60 = vrot.slane %v2198_v47, 7  ;;  %v2723_v28 = vadd.f32 %v2594_v16, %v1644_v27  ;;  %v9805_v27 = vld [vmem:[%s9942_s25 + $0x78] sm:$0xff]   ;;  %v847_v47 = vadd.f32 %v10579_v24, %v13738_v19  ;;  %v3915_v16 = vsel %vm10995_vm14, %v3214_v61, 0.0 }
 0x369   : > { %v3161_v57 = vmul.f32 0.1, %v3107_v56  ;;  %1707 = vmatmul.bf16.gmra.mxu1 %v9805_v27  ;;  %vm3594_vm5 = vcmp.le.s32.totalorder %v3378_v40, 16  ;;  %vm3701_vm7 = vcmp.ge.s32.totalorder %v3485_v14, 1  ;;  %vm3809_vm11 = vcmp.le.s32.totalorder %v3485_v14, 16 }
 0x36a   : > { %v2878_v4 = vsel %vm13571_vm0, %v2777_v20, %v2778_v60  ;;  %v2942_v3 = vrot.slane %v2723_v28, 1  ;;  %2112 = vmatmul.bf16.gmra.mxu2 %v10988_v17  ;;  %2633 = vmatmul.bf16.gmra.mxu0 %v10937_v49  ;;  %v3432_v20 = vmul.u32 24, %v3378_v40  ;;  %vm3648_vm8 = vmand %vm3540_vm4, %vm3594_vm5 }
 0x36b   : > { %v3215_v0 = vmax.f32 %v3107_v56, %v3161_v57  ;;  %v11004_v2 = vadd.f32 %v2878_v4, %v2461_v29  ;;  %2375 = vmatmul.bf16.gmra.mxu3 %v10988_v17  ;;  %v13739_v57 = vld [vmem:[#allocation57_spill] sm:$0xff]  ;;  %vm11047_vm10 = vmand %vm3647_vm6, %vm3701_vm7 }
 0x36c   : > { %v3042_v5 = vsel %vm13572_vm1, %v2941_v38, %v2942_v3  ;;  %v1646_v1 = vadd.f32 %v10856_v22, %v13739_v57  ;;  %v11019_v38 = vadd.s32 40, %v10892_v53  ;;  %v11025_v22 = vpop.f32.mrf.mxu1  ;;  %v8635_v57 = vld [vmem:[%s13565_s3 + $0xf0] sm:$0xff]  ;;  %vm11057_vm14 = vmand %vm11047_vm10, %vm3809_vm11 }
 0x36d   : > { %v3916_v28 = vsel %vm3862_vm15, %v3215_v0, 0.0  ;;  %v3050_v49 = vadd.f32 %v3042_v5, %v10945_v50  ;;  %v2073_v56 = vpop.f32.mrf.mxu2  ;;  %v3486_v50 = vsub.s32 %v10964_v55, %v3432_v20  ;;  %v11023_v0 = vadd.s32 48, %v10892_v53  ;;  %4411 = vmatpush.bf16.msra.mxu1 %v8635_v57  ;;  %v13748_v57 = vld [vmem:[#allocation15_spill] sm:$0xff] }
 0x36e   : > { %v8811_v29 = vpack.c.bf16 %v3916_v28, %v3915_v16  ;;  %v2199_v4 = vadd.f32 %v2073_v56, %v847_v47  ;;  %v2336_v27 = vpop.f32.mrf.mxu3  ;;  %v13740_v47 = vld [vmem:[#allocation56_spill] sm:$0xff]  ;;  %v3325_v20 = vmul.u32 683, %v11019_v38  ;;  %v13741_v16 = vld [vmem:[#allocation13_spill] sm:$0xff] }
 0x36f   : > { %v2596_v24 = vpop.f32.mrf.mxu0  ;;  %v3108_v19 = vadd.f32 %v10956_v9, %v3050_v49  ;;  %v2462_v33 = vadd.f32 %v2336_v27, %v13740_v47  ;;  %v849_v28 = vadd.f32 %v10588_v23, %v13741_v16  ;;  %vm3702_vm9 = vcmp.ge.s32.totalorder %v3486_v50, 1  ;;  %v11052_v27 = vld [vmem:[%s9942_s25 + $0x78] sm:$0xff] }
 0x370   : > { %9307 = vst [vmem:[#allocation2 + $0x10] sm:$0xff] %v8811_v29   ;;  %v2779_v61 = vrot.slane %v2199_v4, 7  ;;  %v2724_v54 = vadd.f32 %v2596_v24, %v1646_v1  ;;  %v13742_v1 = vld [vmem:[#allocation59_spill] sm:$0xff]  ;;  %vm3756_vm12 = vmand %vm3648_vm8, %vm3702_vm9  ;;  %vm3810_vm13 = vcmp.le.s32.totalorder %v3486_v50, 16 }
 0x371   : > { %v3162_v40 = vmul.f32 0.1, %v3108_v19  ;;  %v1649_v29 = vadd.f32 %v10863_v34, %v13742_v1  ;;  %vm3864_vm15 = vmand %vm3756_vm12, %vm3810_vm13  ;;  %v852_v1 = vadd.f32 %v10597_v42, %v13748_v57 }
 0x372   : > { %v2877_v43 = vsel %vm13571_vm0, %v2778_v60, %v2779_v61  ;;  %v2943_v5 = vrot.slane %v2724_v54, 1  ;;  %v3326_v60 = vmul.u32 683, %v11023_v0  ;;  %v3379_v54 = vshra.s32 %v3325_v20, 14 }
 0x373   : > { %v11033_v55 = vadd.f32 %v2877_v43, %v2462_v33  ;;  %v3216_v43 = vmax.f32 %v3108_v19, %v3162_v40 }
 0x374   : > { %v3041_v49 = vsel %vm13572_vm1, %v2942_v3, %v2943_v5  ;;  %v3380_v34 = vshra.s32 %v3326_v60, 14  ;;  %v3433_v40 = vmul.u32 24, %v3379_v54  ;;  %vm3541_vm2 = vcmp.ge.s32.totalorder %v3379_v54, 1 }
 0x375   : > { %v3051_v11 = vadd.f32 %v3041_v49, %v10973_v62  ;;  %v2075_v56 = vpop.f32.mrf.mxu2  ;;  %v3917_v23 = vsel %vm11057_vm14, %v3216_v43, 0.0  ;;  %vm3595_vm3 = vcmp.le.s32.totalorder %v3379_v54, 16 }
 0x376   : > { %v2200_v3 = vadd.f32 %v2075_v56, %v849_v28  ;;  %v2338_v4 = vpop.f32.mrf.mxu3  ;;  %v13747_v28 = vld [vmem:[#allocation58_spill] sm:$0xff]  ;;  %v9806_v56 = vld [vmem:[%s9942_s25 + $0x80] sm:$0xff]   ;;  %vm3542_vm4 = vcmp.ge.s32.totalorder %v3380_v34, 1  ;;  %vm3596_vm5 = vcmp.le.s32.totalorder %v3380_v34, 16  ;;  %vm3649_vm6 = vmand %vm3541_vm2, %vm3595_vm3 }
 0x377   : > { %v3109_v24 = vadd.f32 %v10956_v9, %v3051_v11  ;;  %v2599_v62 = vpop.f32.mrf.mxu0  ;;  %v2463_v49 = vadd.f32 %v2338_v4, %v13747_v28  ;;  %v11062_v11 = vpop.f32.mrf.mxu1  ;;  %vm3650_vm8 = vmand %vm3542_vm4, %vm3596_vm5 }
 0x378   : > { %v2780_v47 = vrot.slane %v2200_v3, 7  ;;  %v2725_v33 = vadd.f32 %v2599_v62, %v1649_v29 }
 0x379   : > { %v3163_v16 = vmul.f32 0.1, %v3109_v24  ;;  %1712 = vmatmul.bf16.gmra.mxu1 %v9806_v56 }
 0x37a   : > { %v2876_v50 = vsel %vm13571_vm0, %v2779_v61, %v2780_v47  ;;  %v2944_v20 = vrot.slane %v2725_v33, 1  ;;  %2117 = vmatmul.bf16.gmra.mxu2 %v11052_v27  ;;  %2638 = vmatmul.bf16.gmra.mxu0 %v10988_v17  ;;  %v3434_v61 = vmul.u32 24, %v3380_v34 }
 0x37b   : > { %v3217_v19 = vmax.f32 %v3109_v24, %v3163_v16  ;;  %v11068_v60 = vadd.f32 %v2876_v50, %v2463_v49  ;;  %2380 = vmatmul.bf16.gmra.mxu3 %v11052_v27  ;;  %v13749_v24 = vld [vmem:[#allocation61_spill] sm:$0xff]  ;;  %v3487_v49 = vsub.s32 %v11019_v38, %v3433_v40  ;;  %v11087_v50 = vadd.s32 64, %v10892_v53 }
 0x37c   : > { %v3040_v29 = vsel %vm13572_vm1, %v2943_v5, %v2944_v20  ;;  %v1651_v62 = vadd.f32 %v10870_v26, %v13749_v24  ;;  %v11083_v5 = vadd.s32 56, %v10892_v53 }
 0x37d   : > { %v3918_v3 = vsel %vm3864_vm15, %v3217_v19, 0.0  ;;  %v3052_v17 = vadd.f32 %v3040_v29, %v11004_v2  ;;  %v2078_v4 = vpop.f32.mrf.mxu2  ;;  %v3488_v2 = vsub.s32 %v11023_v0, %v3434_v61  ;;  %v13750_v19 = vld [vmem:[#allocation60_spill] sm:$0xff]  ;;  %vm3703_vm7 = vcmp.ge.s32.totalorder %v3487_v49, 1  ;;  %v13751_v29 = vld [vmem:[#allocation17_spill] sm:$0xff] }
 0x37e   : > { %v8816_v33 = vpack.c.bf16 %v3918_v3, %v3917_v23  ;;  %v2201_v16 = vadd.f32 %v2078_v4, %v852_v1  ;;  %v2341_v28 = vpop.f32.mrf.mxu3  ;;  %v3327_v0 = vmul.u32 683, %v11083_v5  ;;  %v854_v61 = vadd.f32 %v10609_v58, %v13751_v29  ;;  %vm3757_vm10 = vmand %vm3649_vm6, %vm3703_vm7 }
 0x37f   : > { %v2601_v42 = vpop.f32.mrf.mxu0  ;;  %v3110_v26 = vadd.f32 %v10956_v9, %v3052_v17  ;;  %v2464_v56 = vadd.f32 %v2341_v28, %v13750_v19  ;;  %v11097_v1 = vpop.f32.mrf.mxu1  ;;  %vm3704_vm9 = vcmp.ge.s32.totalorder %v3488_v2, 1  ;;  %v13752_v17 = vld [vmem:[#allocation63_spill] sm:$0xff]  ;;  %vm3811_vm11 = vcmp.le.s32.totalorder %v3487_v49, 16  ;;  %v13755_v49 = vld [vmem:[#allocation62_spill] sm:$0xff] }
 0x380   : > { %9308 = vst [vmem:[#allocation2 + $0x18] sm:$0xff] %v8816_v33   ;;  %v2781_v43 = vrot.slane %v2201_v16, 7  ;;  %v2726_v14 = vadd.f32 %v2601_v42, %v1651_v62  ;;  %v1654_v4 = vadd.f32 %v10880_v12, %v13752_v17  ;;  %v11108_v33 = vld [vmem:[%s9942_s25 + $0x80] sm:$0xff]  ;;  %vm3758_vm12 = vmand %vm3650_vm8, %vm3704_vm9  ;;  %vm3812_vm13 = vcmp.le.s32.totalorder %v3488_v2, 16 }
 0x381   : > { %v3164_v54 = vmul.f32 0.1, %v3110_v26  ;;  %v3381_v16 = vshra.s32 %v3327_v0, 14  ;;  %vm11111_vm14 = vmand %vm3757_vm10, %vm3811_vm11  ;;  %v11137_v19 = vadd.s32 72, %v10892_v53 }
 0x382   : > { %v2875_v38 = vsel %vm13571_vm0, %v2780_v47, %v2781_v43  ;;  %v2945_v40 = vrot.slane %v2726_v14, 1  ;;  %v3328_v47 = vmul.u32 683, %v11087_v50  ;;  %vm3866_vm15 = vmand %vm3758_vm12, %vm3812_vm13 }
 0x383   : > { %v11094_v57 = vadd.f32 %v2875_v38, %v2464_v56  ;;  %v3218_v14 = vmax.f32 %v3110_v26, %v3164_v54  ;;  %v3435_v26 = vmul.u32 24, %v3381_v16  ;;  %vm3543_vm2 = vcmp.ge.s32.totalorder %v3381_v16, 1 }
 0x384   : > { %v3039_v34 = vsel %vm13572_vm1, %v2944_v20, %v2945_v40  ;;  %vm3597_vm3 = vcmp.le.s32.totalorder %v3381_v16, 16 }
 0x385   : > { %v3053_v23 = vadd.f32 %v3039_v34, %v11033_v55  ;;  %v2080_v3 = vpop.f32.mrf.mxu2  ;;  %v3382_v55 = vshra.s32 %v3328_v47, 14  ;;  %v13756_v34 = vld [vmem:[#allocation19_spill] sm:$0xff]  ;;  %vm3651_vm6 = vmand %vm3543_vm2, %vm3597_vm3 }
 0x386   : > { %v2202_v24 = vadd.f32 %v2080_v3, %v854_v61  ;;  %v2343_v62 = vpop.f32.mrf.mxu3  ;;  %v9807_v61 = vld [vmem:[%s9942_s25 + $0x88] sm:$0xff]   ;;  %v857_v47 = vadd.f32 %v10624_v31, %v13756_v34  ;;  %v3489_v31 = vsub.s32 %v11083_v5, %v3435_v26 }
 0x387   : > { %v3111_v58 = vadd.f32 %v10956_v9, %v3053_v23  ;;  %v2604_v20 = vpop.f32.mrf.mxu0  ;;  %v2465_v56 = vadd.f32 %v2343_v62, %v13755_v49  ;;  %v3919_v23 = vsel %vm11111_vm14, %v3218_v14, 0.0  ;;  %v11141_v49 = vadd.s32 80, %v10892_v53 }
 0x388   : > { %v2782_v28 = vrot.slane %v2202_v24, 7  ;;  %v2727_v42 = vadd.f32 %v2604_v20, %v1654_v4  ;;  %v11131_v4 = vpop.f32.mrf.mxu1  ;;  %v13757_v24 = vld [vmem:[#allocation65_spill] sm:$0xff]  ;;  %vm3544_vm4 = vcmp.ge.s32.totalorder %v3382_v55, 1  ;;  %vm3598_vm5 = vcmp.le.s32.totalorder %v3382_v55, 16 }
 0x389   : > { %v3165_v12 = vmul.f32 0.1, %v3111_v58  ;;  %1717 = vmatmul.bf16.gmra.mxu1 %v9807_v61  ;;  %v1656_v62 = vadd.f32 %v10888_v45, %v13757_v24  ;;  %vm3705_vm7 = vcmp.ge.s32.totalorder %v3489_v31, 1  ;;  %v13759_v61 = vld [vmem:[#allocation21_spill] sm:$0xff]  ;;  %vm3652_vm8 = vmand %vm3544_vm4, %vm3598_vm5  ;;  %vm3813_vm11 = vcmp.le.s32.totalorder %v3489_v31, 16 }
 0x38a   : > { %v2874_v38 = vsel %vm13571_vm0, %v2781_v43, %v2782_v28  ;;  %v2946_v29 = vrot.slane %v2727_v42, 1  ;;  %2122 = vmatmul.bf16.gmra.mxu2 %v11108_v33  ;;  %2643 = vmatmul.bf16.gmra.mxu0 %v11052_v27  ;;  %v3436_v43 = vmul.u32 24, %v3382_v55  ;;  %v859_v34 = vadd.f32 %v10639_v39, %v13759_v61  ;;  %vm11159_vm10 = vmand %vm3651_vm6, %vm3705_vm7 }
 0x38b   : > { %v3219_v2 = vmax.f32 %v3111_v58, %v3165_v12  ;;  %v11120_v0 = vadd.f32 %v2874_v38, %v2465_v56  ;;  %2385 = vmatmul.bf16.gmra.mxu3 %v11108_v33  ;;  %v13758_v56 = vld [vmem:[#allocation64_spill] sm:$0xff]  ;;  %v3330_v55 = vmul.u32 683, %v11141_v49  ;;  %vm11171_vm14 = vmand %vm11159_vm10, %vm3813_vm11 }
 0x38c   : > { %v3038_v54 = vsel %vm13572_vm1, %v2945_v40, %v2946_v29  ;;  %v3490_v12 = vsub.s32 %v11087_v50, %v3436_v43  ;;  %v3329_v50 = vmul.u32 683, %v11137_v19  ;;  %v1659_v43 = vadd.f32 %v10905_v7, %v10491_v8 }
 0x38d   : > { %v3920_v3 = vsel %vm3866_vm15, %v3219_v2, 0.0  ;;  %v3054_v27 = vadd.f32 %v3038_v54, %v11068_v60  ;;  %v2083_v17 = vpop.f32.mrf.mxu2  ;;  %v3384_v7 = vshra.s32 %v3330_v55, 14  ;;  %v1661_v55 = vadd.f32 %v10919_v37, %v10498_v18 }
 0x38e   : > { %v8821_v58 = vpack.c.bf16 %v3920_v3, %v3919_v23  ;;  %v2203_v20 = vadd.f32 %v2083_v17, %v857_v47  ;;  %v2346_v42 = vpop.f32.mrf.mxu3  ;;  %vm3706_vm9 = vcmp.ge.s32.totalorder %v3490_v12, 1  ;;  %vm3814_vm13 = vcmp.le.s32.totalorder %v3490_v12, 16 }
 0x38f   : > { %v2606_v40 = vpop.f32.mrf.mxu0  ;;  %v3112_v45 = vadd.f32 %v10956_v9, %v3054_v27  ;;  %v2466_v38 = vadd.f32 %v2346_v42, %v13758_v56  ;;  %v11164_v27 = vld [vmem:[%s9942_s25 + $0x88] sm:$0xff]  ;;  %vm3760_vm12 = vmand %vm3652_vm8, %vm3706_vm9  ;;  %v3383_v24 = vshra.s32 %v3329_v50, 14  ;;  %vm3546_vm4 = vcmp.ge.s32.totalorder %v3384_v7, 1 }
 0x390   : > { %9309 = vst [vmem:[#allocation2 + $0x20] sm:$0xff] %v8821_v58   ;;  %v2783_v14 = vrot.slane %v2203_v20, 7  ;;  %v2728_v60 = vadd.f32 %v2606_v40, %v1656_v62  ;;  %vm3868_vm15 = vmand %vm3760_vm12, %vm3814_vm13  ;;  %vm3600_vm5 = vcmp.le.s32.totalorder %v3384_v7, 16 }
 0x391   : > { %v3437_v56 = vmul.u32 24, %v3383_v24  ;;  %vm3545_vm2 = vcmp.ge.s32.totalorder %v3383_v24, 1  ;;  %vm3599_vm3 = vcmp.le.s32.totalorder %v3383_v24, 16  ;;  %vm3654_vm8 = vmand %vm3546_vm4, %vm3600_vm5 }
 0x392   : > { %v2873_v5 = vsel %vm13571_vm0, %v2782_v28, %v2783_v14  ;;  %v2947_v2 = vrot.slane %v2728_v60, 1  ;;  %v3166_v28 = vmul.f32 0.1, %v3112_v45  ;;  %vm3653_vm6 = vmand %vm3545_vm2, %vm3599_vm3 }
 0x393   : > { %v11148_v26 = vadd.f32 %v2873_v5, %v2466_v38  ;;  %v9808_v38 = vld [vmem:[%s9942_s25 + $0x90] sm:$0xff]  }
 0x394   : > { %v3037_v47 = vsel %vm13572_vm1, %v2946_v29, %v2947_v2  ;;  %v3220_v58 = vmax.f32 %v3112_v45, %v3166_v28  ;;  %v13764_v5 = vld [vmem:[#allocation23_spill] sm:$0xff] }
 0x395   : > { %v3055_v16 = vadd.f32 %v3037_v47, %v11094_v57  ;;  %v2085_v54 = vpop.f32.mrf.mxu2  ;;  %v11167_v57 = vpop.f32.mrf.mxu1 }
 0x396   : > { %v2204_v39 = vadd.f32 %v2085_v54, %v859_v34  ;;  %v2348_v3 = vpop.f32.mrf.mxu3  ;;  %v3921_v61 = vsel %vm11171_vm14, %v3220_v58, 0.0  ;;  %v13765_v58 = vld [vmem:[#allocation25_spill] sm:$0xff] }
 0x397   : > { %v3113_v29 = vadd.f32 %v10956_v9, %v3055_v16  ;;  %v2609_v17 = vpop.f32.mrf.mxu0  ;;  %v2467_v31 = vadd.f32 %v2348_v3, %v10489_v25  ;;  %v862_v25 = vadd.f32 %v10651_v41, %v13764_v5  ;;  %v11199_v3 = vadd.s32 96, %v10892_v53 }
 0x398   : > { %v2784_v62 = vrot.slane %v2204_v39, 7  ;;  %v2729_v8 = vadd.f32 %v2609_v17, %v1659_v43  ;;  %v3491_v43 = vsub.s32 %v11137_v19, %v3437_v56 }
 0x399   : > { %v3167_v42 = vmul.f32 0.1, %v3113_v29  ;;  %1722 = vmatmul.bf16.gmra.mxu1 %v9808_v38  ;;  %v11228_v38 = vld [vmem:[%s9942_s25 + $0x90] sm:$0xff] }
 0x39a   : > { %v2872_v40 = vsel %vm13571_vm0, %v2783_v14, %v2784_v62  ;;  %v2948_v60 = vrot.slane %v2729_v8, 1  ;;  %2127 = vmatmul.bf16.gmra.mxu2 %v11164_v27  ;;  %2648 = vmatmul.bf16.gmra.mxu0 %v11108_v33  ;;  %v3438_v14 = vmul.u32 24, %v3384_v7  ;;  %vm3707_vm7 = vcmp.ge.s32.totalorder %v3491_v43, 1 }
 0x39b   : > { %v3221_v12 = vmax.f32 %v3113_v29, %v3167_v42  ;;  %v11180_v45 = vadd.f32 %v2872_v40, %v2467_v31  ;;  %2390 = vmatmul.bf16.gmra.mxu3 %v11164_v27  ;;  %v8634_v31 = vld [vmem:[%s13565_s3 + $0xe8] sm:$0xff]  ;;  %v13766_v40 = vld [vmem:[#allocation67_spill] sm:$0xff]  ;;  %vm11223_vm10 = vmand %vm3653_vm6, %vm3707_vm7  ;;  %vm3815_vm11 = vcmp.le.s32.totalorder %v3491_v43, 16 }
 0x39c   : > { %v3036_v50 = vsel %vm13572_vm1, %v2947_v2, %v2948_v60  ;;  %v11195_v2 = vadd.s32 88, %v10892_v53  ;;  %4412 = vmatpush.bf16.msra.mxu1 %v8634_v31  ;;  %vm11233_vm14 = vmand %vm11223_vm10, %vm3815_vm11 }
 0x39d   : > { %v3922_v34 = vsel %vm3868_vm15, %v3221_v12, 0.0  ;;  %v3056_v33 = vadd.f32 %v3036_v50, %v11120_v0  ;;  %v2088_v47 = vpop.f32.mrf.mxu2  ;;  %v3492_v0 = vsub.s32 %v11141_v49, %v3438_v14  ;;  %v11203_v19 = vpop.f32.mrf.mxu1  ;;  %v1664_v12 = vadd.f32 %v10939_v30, %v13766_v40 }
 0x39e   : > { %v8826_v28 = vpack.c.bf16 %v3922_v34, %v3921_v61  ;;  %v2205_v16 = vadd.f32 %v2088_v47, %v862_v25  ;;  %v2351_v54 = vpop.f32.mrf.mxu3  ;;  %v3331_v8 = vmul.u32 683, %v11195_v2  ;;  %v13771_v47 = vld [vmem:[#allocation66_spill] sm:$0xff]  ;;  %v11265_v40 = vadd.s32 104, %v10892_v53 }
 0x39f   : > { %v2611_v41 = vpop.f32.mrf.mxu0  ;;  %v3114_v18 = vadd.f32 %v10956_v9, %v3056_v33  ;;  %v2468_v37 = vadd.f32 %v2351_v54, %v10496_v52  ;;  %v864_v52 = vadd.f32 %v10667_v48, %v13765_v58  ;;  %vm3708_vm9 = vcmp.ge.s32.totalorder %v3492_v0, 1 }
 0x3a0   : > { %9310 = vst [vmem:[#allocation2 + $0x28] sm:$0xff] %v8826_v28   ;;  %v2785_v23 = vrot.slane %v2205_v16, 7  ;;  %v2730_v39 = vadd.f32 %v2611_v41, %v1661_v55  ;;  %vm3762_vm12 = vmand %vm3654_vm8, %vm3708_vm9  ;;  %vm3816_vm13 = vcmp.le.s32.totalorder %v3492_v0, 16  ;;  %v3385_v25 = vshra.s32 %v3331_v8, 14 }
 0x3a1   : > { %v3168_v20 = vmul.f32 0.1, %v3114_v18  ;;  %vm11238_vm15 = vmand %vm3762_vm12, %vm3816_vm13  ;;  %v1669_v28 = vadd.f32 %v10991_v46, %v10516_v13 }
 0x3a2   : > { %v2871_v29 = vsel %vm13571_vm0, %v2784_v62, %v2785_v23  ;;  %v2949_v17 = vrot.slane %v2730_v39, 1  ;;  %v3332_v62 = vmul.u32 683, %v11199_v3  ;;  %v3439_v39 = vmul.u32 24, %v3385_v25 }
 0x3a3   : > { %v11209_v49 = vadd.f32 %v2871_v29, %v2468_v37  ;;  %v3222_v61 = vmax.f32 %v3114_v18, %v3168_v20  ;;  %v9809_v18 = vld [vmem:[%s9942_s25 + $0x98] sm:$0xff]   ;;  %v13774_v37 = vld [vmem:[#allocation27_spill] sm:$0xff]  ;;  %vm3547_vm2 = vcmp.ge.s32.totalorder %v3385_v25, 1  ;;  %vm3601_vm3 = vcmp.le.s32.totalorder %v3385_v25, 16 }
 0x3a4   : > { %v3035_v7 = vsel %vm13572_vm1, %v2948_v60, %v2949_v17  ;;  %v3386_v30 = vshra.s32 %v3332_v62, 14  ;;  %v867_v29 = vadd.f32 %v10682_v32, %v13774_v37  ;;  %v13775_v62 = vld [vmem:[#allocation69_spill] sm:$0xff]  ;;  %v3493_v32 = vsub.s32 %v11195_v2, %v3439_v39  ;;  %vm3655_vm6 = vmand %vm3547_vm2, %vm3601_vm3 }
 0x3a5   : > { %v3057_v24 = vadd.f32 %v3035_v7, %v11148_v26  ;;  %v2090_v42 = vpop.f32.mrf.mxu2  ;;  %v11249_v0 = vpop.f32.mrf.mxu1  ;;  %v1666_v20 = vadd.f32 %v10966_v21, %v13775_v62 }
 0x3a6   : > { %v2206_v60 = vadd.f32 %v2090_v42, %v864_v52  ;;  %v2353_v56 = vpop.f32.mrf.mxu3  ;;  %v3440_v8 = vmul.u32 24, %v3386_v30  ;;  %vm3548_vm4 = vcmp.ge.s32.totalorder %v3386_v30, 1  ;;  %vm3602_vm5 = vcmp.le.s32.totalorder %v3386_v30, 16 }
 0x3a7   : > { %v3115_v5 = vadd.f32 %v10956_v9, %v3057_v24  ;;  %v2614_v26 = vpop.f32.mrf.mxu0  ;;  %v2469_v55 = vadd.f32 %v2353_v56, %v13771_v47  ;;  %v13776_v56 = vld [vmem:[#allocation68_spill] sm:$0xff]  ;;  %vm3709_vm7 = vcmp.ge.s32.totalorder %v3493_v32, 1  ;;  %vm3656_vm8 = vmand %vm3548_vm4, %vm3602_vm5  ;;  %vm3817_vm11 = vcmp.le.s32.totalorder %v3493_v32, 16 }
 0x3a8   : > { %v2786_v50 = vrot.slane %v2206_v60, 7  ;;  %v2731_v14 = vadd.f32 %v2614_v26, %v1664_v12  ;;  %v11269_v60 = vadd.s32 112, %v10892_v53  ;;  %vm3763_vm10 = vmand %vm3655_vm6, %vm3709_vm7 }
 0x3a9   : > { %v3169_v33 = vmul.f32 0.1, %v3115_v5  ;;  %1727 = vmatmul.bf16.gmra.mxu1 %v9809_v18 }
 0x3aa   : > { %v2870_v16 = vsel %vm13571_vm0, %v2785_v23, %v2786_v50  ;;  %v2950_v54 = vrot.slane %v2731_v14, 1  ;;  %2132 = vmatmul.bf16.gmra.mxu2 %v11228_v38  ;;  %2653 = vmatmul.bf16.gmra.mxu0 %v11164_v27  ;;  %v3923_v27 = vsel %vm11233_vm14, %v3222_v61, 0.0  ;;  %v13777_v61 = vld [vmem:[#allocation29_spill] sm:$0xff]  ;;  %v3334_v30 = vmul.u32 683, %v11269_v60  ;;  %vm11293_vm14 = vmand %vm3763_vm10, %vm3817_vm11 }
 0x3ab   : > { %v3223_v43 = vmax.f32 %v3115_v5, %v3169_v33  ;;  %v11246_v41 = vadd.f32 %v2870_v16, %v2469_v55  ;;  %2395 = vmatmul.bf16.gmra.mxu3 %v11228_v38  ;;  %v869_v34 = vadd.f32 %v10701_v51, %v13777_v61 }
 0x3ac   : > { %v3034_v23 = vsel %vm13572_vm1, %v2949_v17, %v2950_v54 }
 0x3ad   : > { %v3924_v58 = vsel %vm11238_vm15, %v3223_v43, 0.0  ;;  %v3058_v52 = vadd.f32 %v3034_v23, %v11180_v45  ;;  %v2093_v7 = vpop.f32.mrf.mxu2  ;;  %v3494_v45 = vsub.s32 %v11199_v3, %v3440_v8  ;;  %v3333_v3 = vmul.u32 683, %v11265_v40  ;;  %v11285_v55 = vpop.f32.mrf.mxu1  ;;  %v11290_v43 = vld [vmem:[%s9942_s25 + $0x98] sm:$0xff] }
 0x3ae   : > { %v8831_v24 = vpack.c.bf16 %v3924_v58, %v3923_v27  ;;  %v2207_v42 = vadd.f32 %v2093_v7, %v867_v29  ;;  %v2356_v31 = vpop.f32.mrf.mxu3  ;;  %v3388_v29 = vshra.s32 %v3334_v30, 14  ;;  %v13782_v30 = vld [vmem:[#allocation70_spill] sm:$0xff] }
 0x3af   : > { %v2616_v17 = vpop.f32.mrf.mxu0  ;;  %v3116_v21 = vadd.f32 %v10956_v9, %v3058_v52  ;;  %v2470_v5 = vadd.f32 %v2356_v31, %v13776_v56  ;;  %vm3710_vm9 = vcmp.ge.s32.totalorder %v3494_v45, 1  ;;  %vm3818_vm13 = vcmp.le.s32.totalorder %v3494_v45, 16 }
 0x3b0   : > { %9311 = vst [vmem:[#allocation2 + $0x30] sm:$0xff] %v8831_v24   ;;  %v2787_v12 = vrot.slane %v2207_v42, 7  ;;  %v2732_v48 = vadd.f32 %v2616_v17, %v1666_v20  ;;  %vm3764_vm12 = vmand %vm3656_vm8, %vm3710_vm9  ;;  %v3387_v18 = vshra.s32 %v3333_v3, 14  ;;  %v9810_v20 = vld [vmem:[%s9942_s25 + $0xa0] sm:$0xff]   ;;  %v13780_v24 = vld [vmem:[#allocation31_spill] sm:$0xff]  ;;  %v3442_v31 = vmul.u32 24, %v3388_v29 }
 0x3b1   : > { %vm3872_vm15 = vmand %vm3764_vm12, %vm3818_vm13  ;;  %vm3550_vm4 = vcmp.ge.s32.totalorder %v3388_v29, 1  ;;  %vm3604_vm5 = vcmp.le.s32.totalorder %v3388_v29, 16 }
 0x3b2   : > { %v2869_v2 = vsel %vm13571_vm0, %v2786_v50, %v2787_v12  ;;  %v2951_v26 = vrot.slane %v2732_v48, 1  ;;  %v3170_v50 = vmul.f32 0.1, %v3116_v21  ;;  %v3441_v62 = vmul.u32 24, %v3387_v18  ;;  %v13781_v48 = vld [vmem:[#allocation71_spill] sm:$0xff]  ;;  %vm3658_vm8 = vmand %vm3550_vm4, %vm3604_vm5 }
 0x3b3   : > { %v11276_v14 = vadd.f32 %v2869_v2, %v2470_v5  ;;  %v1671_v45 = vadd.f32 %v11025_v22, %v13781_v48  ;;  %vm3549_vm2 = vcmp.ge.s32.totalorder %v3387_v18, 1  ;;  %vm3603_vm3 = vcmp.le.s32.totalorder %v3387_v18, 16  ;;  %v9811_v48 = vld [vmem:[%s9942_s25 + $0xa8] sm:$0xff]  }
 0x3b4   : > { %v3033_v33 = vsel %vm13572_vm1, %v2950_v54, %v2951_v26  ;;  %v3224_v23 = vmax.f32 %v3116_v21, %v3170_v50  ;;  %v3495_v2 = vsub.s32 %v11265_v40, %v3441_v62  ;;  %v11323_v22 = vadd.s32 128, %v10892_v53  ;;  %vm3657_vm6 = vmand %vm3549_vm2, %vm3603_vm3 }
 0x3b5   : > { %v3059_v25 = vadd.f32 %v3033_v33, %v11209_v49  ;;  %v2095_v47 = vpop.f32.mrf.mxu2  ;;  %v11319_v3 = vpop.f32.mrf.mxu1 }
 0x3b6   : > { %v2208_v16 = vadd.f32 %v2095_v47, %v869_v34  ;;  %v2358_v51 = vpop.f32.mrf.mxu3  ;;  %v3925_v32 = vsel %vm11293_vm14, %v3224_v23, 0.0  ;;  %v3496_v34 = vsub.s32 %v11269_v60, %v3442_v31  ;;  %vm3711_vm7 = vcmp.ge.s32.totalorder %v3495_v2, 1 }
 0x3b7   : > { %v3117_v54 = vadd.f32 %v10956_v9, %v3059_v25  ;;  %v2619_v39 = vpop.f32.mrf.mxu0  ;;  %v2471_v46 = vadd.f32 %v2358_v51, %v10514_v44  ;;  %v872_v44 = vadd.f32 %v10719_v59, %v13780_v24  ;;  %vm3765_vm10 = vmand %vm3657_vm6, %vm3711_vm7  ;;  %vm3819_vm11 = vcmp.le.s32.totalorder %v3495_v2, 16  ;;  %v13787_v24 = vld [vmem:[#allocation72_spill] sm:$0xff] }
 0x3b8   : > { %v2788_v37 = vrot.slane %v2208_v16, 7  ;;  %v2733_v49 = vadd.f32 %v2619_v39, %v1669_v28  ;;  %v13783_v28 = vld [vmem:[#allocation33_spill] sm:$0xff]  ;;  %vm3712_vm9 = vcmp.ge.s32.totalorder %v3496_v34, 1  ;;  %vm3820_vm13 = vcmp.le.s32.totalorder %v3496_v34, 16  ;;  %vm11346_vm14 = vmand %vm3765_vm10, %vm3819_vm11 }
 0x3b9   : > { %v3171_v13 = vmul.f32 0.1, %v3117_v54  ;;  %1732 = vmatmul.bf16.gmra.mxu1 %v9810_v20  ;;  %v874_v16 = vadd.f32 %v10735_v10, %v13783_v28  ;;  %vm3766_vm12 = vmand %vm3658_vm8, %vm3712_vm9  ;;  %v11406_v20 = vld [vmem:[%s13564_s2] ss:$0 sm:$0xff] }
 0x3ba   : > { %v2868_v27 = vsel %vm13571_vm0, %v2787_v12, %v2788_v37  ;;  %v2952_v58 = vrot.slane %v2733_v49, 1  ;;  %2137 = vmatmul.bf16.gmra.mxu2 %v11290_v43  ;;  %2658 = vmatmul.bf16.gmra.mxu0 %v11228_v38  ;;  %v13784_v49 = vld [vmem:[#allocation73_spill] sm:$0xff] }
 0x3bb   : > { %v3225_v52 = vmax.f32 %v3117_v54, %v3171_v13  ;;  %v11302_v7 = vadd.f32 %v2868_v27, %v2471_v46  ;;  %2400 = vmatmul.bf16.gmra.mxu3 %v11290_v43  ;;  %v3336_v54 = vmul.u32 683, %v11323_v22  ;;  %v1674_v29 = vadd.f32 %v11062_v11, %v13784_v49  ;;  %v11343_v13 = vld [vmem:[%s9942_s25 + $0xa0] sm:$0xff] }
 0x3bc   : > { %v3032_v42 = vsel %vm13572_vm1, %v2951_v26, %v2952_v58  ;;  %v11317_v26 = vadd.s32 120, %v10892_v53  ;;  %v13791_v49 = vld [vmem:[#allocation37_spill] sm:$0xff] }
 0x3bd   : > { %v3926_v17 = vsel %vm3872_vm15, %v3225_v52, 0.0  ;;  %v3060_v38 = vadd.f32 %v3032_v42, %v11246_v41  ;;  %v2098_v12 = vpop.f32.mrf.mxu2  ;;  %v11351_v42 = vpop.f32.mrf.mxu1  ;;  %vm3874_vm15 = vmand %vm3766_vm12, %vm3820_vm13 }
 0x3be   : > { %v8836_v21 = vpack.c.bf16 %v3926_v17, %v3925_v32  ;;  %v2209_v56 = vadd.f32 %v2098_v12, %v872_v44  ;;  %v2361_v5 = vpop.f32.mrf.mxu3  ;;  %v3335_v60 = vmul.u32 683, %v11317_v26 }
 0x3bf   : > { %v2621_v59 = vpop.f32.mrf.mxu0  ;;  %v3118_v33 = vadd.f32 %v10956_v9, %v3060_v38  ;;  %v2472_v40 = vadd.f32 %v2361_v5, %v13782_v30 }
 0x3c0   : > { %9312 = vst [vmem:[#allocation2 + $0x38] sm:$0xff] %v8836_v21   ;;  %v2789_v61 = vrot.slane %v2209_v56, 7  ;;  %v2734_v41 = vadd.f32 %v2621_v59, %v1671_v45  ;;  %v3389_v27 = vshra.s32 %v3335_v60, 14  ;;  %v13788_v45 = vld [vmem:[#allocation35_spill] sm:$0xff] }
 0x3c1   : > { %v3172_v39 = vmul.f32 0.1, %v3118_v33  ;;  %v877_v21 = vadd.f32 %v10747_v15, %v13788_v45 }
 0x3c2   : > { %v2867_v50 = vsel %vm13571_vm0, %v2788_v37, %v2789_v61  ;;  %v2953_v25 = vrot.slane %v2734_v41, 1  ;;  %v3443_v12 = vmul.u32 24, %v3389_v27  ;;  %v13789_v41 = vld [vmem:[#allocation75_spill] sm:$0xff]  ;;  %vm3551_vm2 = vcmp.ge.s32.totalorder %v3389_v27, 1 }
 0x3c3   : > { %v11331_v47 = vadd.f32 %v2867_v50, %v2472_v40  ;;  %v3226_v62 = vmax.f32 %v3118_v33, %v3172_v39  ;;  %v1676_v34 = vadd.f32 %v11097_v1, %v13789_v41  ;;  %vm3605_vm3 = vcmp.le.s32.totalorder %v3389_v27, 16  ;;  %v13792_v27 = vld [vmem:[#allocation77_spill] sm:$0xff] }
 0x3c4   : > { %v3031_v51 = vsel %vm13572_vm1, %v2952_v58, %v2953_v25  ;;  %v3497_v50 = vsub.s32 %v11317_v26, %v3443_v12  ;;  %vm3659_vm6 = vmand %vm3551_vm2, %vm3605_vm3 }
 0x3c5   : > { %v3061_v18 = vadd.f32 %v3031_v51, %v11276_v14  ;;  %v2100_v37 = vpop.f32.mrf.mxu2  ;;  %v3390_v14 = vshra.s32 %v3336_v54, 14  ;;  %v3927_v2 = vsel %vm11346_vm14, %v3226_v62, 0.0  ;;  %v13790_v51 = vld [vmem:[#allocation74_spill] sm:$0xff] }
 0x3c6   : > { %v2210_v23 = vadd.f32 %v2100_v37, %v874_v16  ;;  %v2363_v8 = vpop.f32.mrf.mxu3  ;;  %v11376_v16 = vadd.s32 144, %v10892_v53  ;;  %vm3713_vm7 = vcmp.ge.s32.totalorder %v3497_v50, 1  ;;  %v11386_v37 = vpop.f32.mrf.mxu1  ;;  %vm3821_vm11 = vcmp.le.s32.totalorder %v3497_v50, 16  ;;  %v11401_v62 = vld [vmem:[%s9942_s25 + $0xa8] sm:$0xff] }
 0x3c7   : > { %v3119_v10 = vadd.f32 %v10956_v9, %v3061_v18  ;;  %v2624_v46 = vpop.f32.mrf.mxu0  ;;  %v2473_v44 = vadd.f32 %v2363_v8, %v13787_v24  ;;  %v3444_v5 = vmul.u32 24, %v3390_v14  ;;  %vm3552_vm4 = vcmp.ge.s32.totalorder %v3390_v14, 1  ;;  %vm11396_vm10 = vmand %vm3659_vm6, %vm3713_vm7 }
 0x3c8   : > { %v2790_v58 = vrot.slane %v2210_v23, 7  ;;  %v2735_v52 = vadd.f32 %v2624_v46, %v1674_v29  ;;  %vm3606_vm5 = vcmp.le.s32.totalorder %v3390_v14, 16  ;;  %v3338_v23 = vmul.u32 683, %v11376_v16  ;;  %vm11411_vm14 = vmand %vm11396_vm10, %vm3821_vm11 }
 0x3c9   : > { %v3173_v11 = vmul.f32 0.1, %v3119_v10  ;;  %1737 = vmatmul.bf16.gmra.mxu1 %v9811_v48  ;;  %vm3660_vm8 = vmand %vm3552_vm4, %vm3606_vm5  ;;  %v13797_v48 = vld [vmem:[#allocation76_spill] sm:$0xff] }
 0x3ca   : > { %v2866_v31 = vsel %vm13571_vm0, %v2789_v61, %v2790_v58  ;;  %v2954_v32 = vrot.slane %v2735_v52, 1  ;;  %2142 = vmatmul.bf16.gmra.mxu2 %v11343_v13  ;;  %2663 = vmatmul.bf16.gmra.mxu0 %v11290_v43 }
 0x3cb   : > { %v3227_v17 = vmax.f32 %v3119_v10, %v3173_v11  ;;  %v11357_v38 = vadd.f32 %v2866_v31, %v2473_v44  ;;  %2405 = vmatmul.bf16.gmra.mxu3 %v11343_v13  ;;  %v3392_v31 = vshra.s32 %v3338_v23, 14 }
 0x3cc   : > { %v3030_v56 = vsel %vm13572_vm1, %v2953_v25, %v2954_v32  ;;  %v11372_v25 = vadd.s32 136, %v10892_v53 }
 0x3cd   : > { %v3928_v59 = vsel %vm3874_vm15, %v3227_v17, 0.0  ;;  %v3062_v43 = vadd.f32 %v3030_v56, %v11302_v7  ;;  %v2103_v61 = vpop.f32.mrf.mxu2  ;;  %v3498_v7 = vsub.s32 %v11323_v22, %v3444_v5  ;;  %vm3554_vm4 = vcmp.ge.s32.totalorder %v3392_v31, 1 }
 0x3ce   : > { %v8841_v33 = vpack.c.bf16 %v3928_v59, %v3927_v2  ;;  %v2211_v30 = vadd.f32 %v2103_v61, %v877_v21  ;;  %v2366_v40 = vpop.f32.mrf.mxu3  ;;  %v3337_v22 = vmul.u32 683, %v11372_v25  ;;  %v13798_v61 = vld [vmem:[#allocation39_spill] sm:$0xff]  ;;  %vm3608_vm5 = vcmp.le.s32.totalorder %v3392_v31, 16 }
 0x3cf   : > { %v2626_v15 = vpop.f32.mrf.mxu0  ;;  %v3120_v1 = vadd.f32 %v10956_v9, %v3062_v43  ;;  %v2474_v54 = vadd.f32 %v2366_v40, %v13790_v51  ;;  %v879_v9 = vadd.f32 %v10757_v36, %v13791_v49  ;;  %vm3714_vm9 = vcmp.ge.s32.totalorder %v3498_v7, 1  ;;  %v9813_v43 = vld [vmem:[%s9942_s25 + $0xb0] sm:$0xff]  }
 0x3d0   : > { %9313 = vst [vmem:[#allocation2 + $0x40] sm:$0xff] %v8841_v33   ;;  %v2791_v60 = vrot.slane %v2211_v30, 7  ;;  %v2736_v28 = vadd.f32 %v2626_v15, %v1676_v34  ;;  %vm3768_vm12 = vmand %vm3660_vm8, %vm3714_vm9  ;;  %vm3822_vm13 = vcmp.le.s32.totalorder %v3498_v7, 16  ;;  %v882_v41 = vadd.f32 %v10764_v63, %v13798_v61  ;;  %v11431_v15 = vpop.f32.mrf.mxu1 }
 0x3d1   : > { %v3174_v8 = vmul.f32 0.1, %v3120_v1  ;;  %vm3876_vm15 = vmand %vm3768_vm12, %vm3822_vm13  ;;  %v3446_v33 = vmul.u32 24, %v3392_v31  ;;  %v11441_v49 = vadd.s32 160, %v10892_v53  ;;  %v11468_v31 = vld [vmem:[%s9942_s25 + $0xb0] sm:$0xff] }
 0x3d2   : > { %v2865_v26 = vsel %vm13571_vm0, %v2790_v58, %v2791_v60  ;;  %v2955_v39 = vrot.slane %v2736_v28, 1  ;;  %v1679_v58 = vadd.f32 %v11131_v4, %v13792_v27  ;;  %v3391_v4 = vshra.s32 %v3337_v22, 14  ;;  %vm3662_vm8 = vmand %vm3554_vm4, %vm3608_vm5 }
 0x3d3   : > { %v11383_v18 = vadd.f32 %v2865_v26, %v2474_v54  ;;  %v11437_v26 = vadd.s32 152, %v10892_v53  ;;  %v3500_v22 = vsub.s32 %v11376_v16, %v3446_v33  ;;  %v3340_v52 = vmul.u32 683, %v11441_v49 }
 0x3d4   : > { %v3029_v29 = vsel %vm13572_vm1, %v2954_v32, %v2955_v39  ;;  %v3228_v32 = vmax.f32 %v3120_v1, %v3174_v8  ;;  %v3445_v59 = vmul.u32 24, %v3391_v4  ;;  %vm3553_vm2 = vcmp.ge.s32.totalorder %v3391_v4, 1 }
 0x3d5   : > { %v3063_v10 = vadd.f32 %v3029_v29, %v11331_v47  ;;  %v2105_v46 = vpop.f32.mrf.mxu2  ;;  %vm3607_vm3 = vcmp.le.s32.totalorder %v3391_v4, 16  ;;  %vm3716_vm9 = vcmp.ge.s32.totalorder %v3500_v22, 1  ;;  %vm3824_vm13 = vcmp.le.s32.totalorder %v3500_v22, 16 }
 0x3d6   : > { %v2212_v36 = vadd.f32 %v2105_v46, %v879_v9  ;;  %v2368_v14 = vpop.f32.mrf.mxu3  ;;  %v3929_v30 = vsel %vm11411_vm14, %v3228_v32, 0.0  ;;  %v3499_v63 = vsub.s32 %v11372_v25, %v3445_v59  ;;  %v13800_v9 = vld [vmem:[#allocation78_spill] sm:$0xff]  ;;  %vm3661_vm6 = vmand %vm3553_vm2, %vm3607_vm3  ;;  %v13801_v46 = vld [vmem:[#allocation41_spill] sm:$0xff] }
 0x3d7   : > { %v3121_v47 = vadd.f32 %v11406_v20, %v3063_v10  ;;  %v2629_v11 = vpop.f32.mrf.mxu0  ;;  %v2475_v45 = vadd.f32 %v2368_v14, %v13797_v48  ;;  %v3339_v10 = vmul.u32 683, %v11437_v26  ;;  %v884_v27 = vadd.f32 %v10772_v35, %v13801_v46  ;;  %vm3770_vm12 = vmand %vm3662_vm8, %vm3716_vm9  ;;  %v13807_v59 = vld [vmem:[#allocation80_spill] sm:$0xff]  ;;  %v13811_v46 = vld [vmem:[#allocation82_spill] sm:$0xff] }
 0x3d8   : > { %v2792_v24 = vrot.slane %v2212_v36, 7  ;;  %v2737_v44 = vadd.f32 %v2629_v11, %v1679_v58  ;;  %vm3715_vm7 = vcmp.ge.s32.totalorder %v3499_v63, 1  ;;  %v13802_v11 = vld [vmem:[#allocation81_spill] sm:$0xff]  ;;  %vm3823_vm11 = vcmp.le.s32.totalorder %v3499_v63, 16 }
 0x3d9   : > { %v3175_v12 = vmul.f32 0.1, %v3121_v47  ;;  %1742 = vmatmul.bf16.gmra.mxu1 %v9813_v43  ;;  %v1684_v4 = vadd.f32 %v11203_v19, %v13802_v11  ;;  %vm11463_vm10 = vmand %vm3661_vm6, %vm3715_vm7 }
 0x3da   : > { %v2864_v21 = vsel %vm13571_vm0, %v2791_v60, %v2792_v24  ;;  %v2956_v56 = vrot.slane %v2737_v44, 1  ;;  %2147 = vmatmul.bf16.gmra.mxu2 %v11401_v62  ;;  %2668 = vmatmul.bf16.gmra.mxu0 %v11343_v13  ;;  %v13799_v60 = vld [vmem:[#allocation79_spill] sm:$0xff]  ;;  %vm11475_vm14 = vmand %vm11463_vm10, %vm3823_vm11 }
 0x3db   : > { %v3229_v5 = vmax.f32 %v3121_v47, %v3175_v12  ;;  %v11420_v2 = vadd.f32 %v2864_v21, %v2475_v45  ;;  %2410 = vmatmul.bf16.gmra.mxu3 %v11401_v62  ;;  %v1681_v28 = vadd.f32 %v11167_v57, %v13799_v60  ;;  %v8633_v57 = vld [vmem:[%s13565_s3 + $0xe0] sm:$0xff]  ;;  %v3393_v12 = vshra.s32 %v3339_v10, 14 }
 0x3dc   : > { %v3028_v34 = vsel %vm13572_vm1, %v2955_v39, %v2956_v56  ;;  %4413 = vmatpush.bf16.msra.mxu1 %v8633_v57  ;;  %v3394_v45 = vshra.s32 %v3340_v52, 14  ;;  %v11503_v10 = vadd.s32 176, %v10892_v53 }
 0x3dd   : > { %v3930_v40 = vsel %vm3876_vm15, %v3229_v5, 0.0  ;;  %v3064_v13 = vadd.f32 %v3028_v34, %v11357_v38  ;;  %v2108_v50 = vpop.f32.mrf.mxu2  ;;  %vm3878_vm15 = vmand %vm3770_vm12, %vm3824_vm13  ;;  %vm3555_vm2 = vcmp.ge.s32.totalorder %v3393_v12, 1  ;;  %vm3609_vm3 = vcmp.le.s32.totalorder %v3393_v12, 16 }
 0x3de   : > { %v8846_v7 = vpack.c.bf16 %v3930_v40, %v3929_v30  ;;  %v2213_v1 = vadd.f32 %v2108_v50, %v882_v41  ;;  %v2371_v51 = vpop.f32.mrf.mxu3  ;;  %v3447_v30 = vmul.u32 24, %v3393_v12  ;;  %v9814_v40 = vld [vmem:[%s9942_s25 + $0xb8] sm:$0xff]   ;;  %v13809_v50 = vld [vmem:[#allocation118_spill] sm:$0xff]  ;;  %vm3556_vm4 = vcmp.ge.s32.totalorder %v3394_v45, 1  ;;  %vm3663_vm6 = vmand %vm3555_vm2, %vm3609_vm3 }
 0x3df   : > { %v2631_v54 = vpop.f32.mrf.mxu0  ;;  %v3122_v25 = vadd.f32 %v11406_v20, %v3064_v13  ;;  %v2476_v29 = vadd.f32 %v2371_v51, %v13800_v9  ;;  %v13808_v13 = vld [vmem:[#allocation43_spill] sm:$0xff]  ;;  %vm3610_vm5 = vcmp.le.s32.totalorder %v3394_v45, 16 }
 0x3e0   : > { %9314 = vst [vmem:[#allocation2 + $0x48] sm:$0xff] %v8846_v7   ;;  %v2793_v39 = vrot.slane %v2213_v1, 7  ;;  %v2738_v38 = vadd.f32 %v2631_v54, %v1681_v28  ;;  %v887_v60 = vadd.f32 %v13809_v50, %v13808_v13  ;;  %v3448_v7 = vmul.u32 24, %v3394_v45  ;;  %v13810_v54 = vld [vmem:[#allocation83_spill] sm:$0xff]  ;;  %vm3664_vm8 = vmand %vm3556_vm4, %vm3610_vm5  ;;  %v11525_v45 = vld [vmem:[%s9942_s25 + $0xb8] sm:$0xff] }
 0x3e1   : > { %v3176_v36 = vmul.f32 0.1, %v3122_v25 }
 0x3e2   : > { %v2863_v23 = vsel %vm13571_vm0, %v2792_v24, %v2793_v39  ;;  %v2957_v8 = vrot.slane %v2738_v38, 1  ;;  %v3342_v24 = vmul.u32 683, %v11503_v10 }
 0x3e3   : > { %v11452_v16 = vadd.f32 %v2863_v23, %v2476_v29  ;;  %v3230_v21 = vmax.f32 %v3122_v25, %v3176_v36  ;;  %v3501_v25 = vsub.s32 %v11437_v26, %v3447_v30  ;;  %v11499_v29 = vadd.s32 168, %v10892_v53 }
 0x3e4   : > { %v3027_v58 = vsel %vm13572_vm1, %v2956_v56, %v2957_v8 }
 0x3e5   : > { %v3065_v14 = vadd.f32 %v3027_v58, %v11383_v18  ;;  %v2110_v47 = vpop.f32.mrf.mxu2  ;;  %v11471_v18 = vpop.f32.mrf.mxu1  ;;  %v3931_v1 = vsel %vm11475_vm14, %v3230_v21, 0.0  ;;  %vm3717_vm7 = vcmp.ge.s32.totalorder %v3501_v25, 1  ;;  %v3341_v36 = vmul.u32 683, %v11499_v29 }
 0x3e6   : > { %v2214_v35 = vadd.f32 %v2110_v47, %v884_v27  ;;  %v2373_v44 = vpop.f32.mrf.mxu3  ;;  %v13813_v47 = vld [vmem:[#allocation121_spill] sm:$0xff]  ;;  %vm3771_vm10 = vmand %vm3663_vm6, %vm3717_vm7  ;;  %vm3825_vm11 = vcmp.le.s32.totalorder %v3501_v25, 16 }
 0x3e7   : > { %v3123_v32 = vadd.f32 %v11406_v20, %v3065_v14  ;;  %v2634_v17 = vpop.f32.mrf.mxu0  ;;  %v2477_v43 = vadd.f32 %v2373_v44, %v13807_v59  ;;  %v13812_v14 = vld [vmem:[#allocation45_spill] sm:$0xff]  ;;  %vm11528_vm14 = vmand %vm3771_vm10, %vm3825_vm11 }
 0x3e8   : > { %v2794_v48 = vrot.slane %v2214_v35, 7  ;;  %v2739_v19 = vadd.f32 %v2634_v17, %v1684_v4  ;;  %v889_v11 = vadd.f32 %v13813_v47, %v13812_v14  ;;  %v13814_v17 = vld [vmem:[#allocation85_spill] sm:$0xff]  ;;  %v11564_v14 = vadd.s32 192, %v10892_v53  ;;  %v13823_v47 = vld [vmem:[#allocation86_spill] sm:$0xff] }
 0x3e9   : > { %v3177_v5 = vmul.f32 0.1, %v3123_v32  ;;  %1747 = vmatmul.bf16.gmra.mxu1 %v9814_v40  ;;  %v1689_v12 = vadd.f32 %v11285_v55, %v13814_v17 }
 0x3ea   : > { %v2862_v61 = vsel %vm13571_vm0, %v2793_v39, %v2794_v48  ;;  %v2958_v41 = vrot.slane %v2739_v19, 1  ;;  %2152 = vmatmul.bf16.gmra.mxu2 %v11468_v31  ;;  %2673 = vmatmul.bf16.gmra.mxu0 %v11401_v62  ;;  %v1686_v39 = vadd.f32 %v11249_v0, %v13810_v54 }
 0x3eb   : > { %v3231_v34 = vmax.f32 %v3123_v32, %v3177_v5  ;;  %v11484_v33 = vadd.f32 %v2862_v61, %v2477_v43  ;;  %2415 = vmatmul.bf16.gmra.mxu3 %v11468_v31  ;;  %v3395_v5 = vshra.s32 %v3341_v36, 14 }
 0x3ec   : > { %v3026_v28 = vsel %vm13572_vm1, %v2957_v8, %v2958_v41 }
 0x3ed   : > { %v3932_v51 = vsel %vm3878_vm15, %v3231_v34, 0.0  ;;  %v3066_v62 = vadd.f32 %v3026_v28, %v11420_v2  ;;  %v2113_v63 = vpop.f32.mrf.mxu2  ;;  %v3502_v2 = vsub.s32 %v11441_v49, %v3448_v7  ;;  %v11507_v26 = vpop.f32.mrf.mxu1  ;;  %v13817_v34 = vld [vmem:[#allocation84_spill] sm:$0xff]  ;;  %v3449_v7 = vmul.u32 24, %v3395_v5 }
 0x3ee   : > { %v8851_v38 = vpack.c.bf16 %v3932_v51, %v3931_v1  ;;  %v2215_v22 = vadd.f32 %v2113_v63, %v887_v60  ;;  %v2376_v57 = vpop.f32.mrf.mxu3  ;;  %v9815_v51 = vld [vmem:[%s9942_s25 + $0xc0] sm:$0xff]   ;;  %v13821_v63 = vld [vmem:[#allocation124_spill] sm:$0xff]  ;;  %vm3557_vm2 = vcmp.ge.s32.totalorder %v3395_v5, 1  ;;  %vm3611_vm3 = vcmp.le.s32.totalorder %v3395_v5, 16 }
 0x3ef   : > { %v2636_v9 = vpop.f32.mrf.mxu0  ;;  %v3124_v0 = vadd.f32 %v11406_v20, %v3066_v62  ;;  %v2478_v27 = vadd.f32 %v2376_v57, %v13811_v46  ;;  %vm3718_vm9 = vcmp.ge.s32.totalorder %v3502_v2, 1  ;;  %vm3826_vm13 = vcmp.le.s32.totalorder %v3502_v2, 16  ;;  %v13820_v62 = vld [vmem:[#allocation47_spill] sm:$0xff]  ;;  %vm3665_vm6 = vmand %vm3557_vm2, %vm3611_vm3  ;;  %v13826_v5 = vld [vmem:[#allocation89_spill] sm:$0xff] }
 0x3f0   : > { %9315 = vst [vmem:[#allocation2 + $0x50] sm:$0xff] %v8851_v38   ;;  %v2795_v23 = vrot.slane %v2215_v22, 7  ;;  %v2740_v8 = vadd.f32 %v2636_v9, %v1686_v39  ;;  %vm3772_vm12 = vmand %vm3664_vm8, %vm3718_vm9  ;;  %v892_v54 = vadd.f32 %v13821_v63, %v13820_v62  ;;  %v13822_v9 = vld [vmem:[#allocation87_spill] sm:$0xff]  ;;  %v3503_v46 = vsub.s32 %v11499_v29, %v3449_v7 }
 0x3f1   : > { %v3178_v35 = vmul.f32 0.1, %v3124_v0  ;;  %vm11533_vm15 = vmand %vm3772_vm12, %vm3826_vm13 }
 0x3f2   : > { %v2861_v58 = vsel %vm13571_vm0, %v2794_v48, %v2795_v23  ;;  %v2959_v52 = vrot.slane %v2740_v8, 1  ;;  %vm3719_vm7 = vcmp.ge.s32.totalorder %v3503_v46, 1  ;;  %vm3827_vm11 = vcmp.le.s32.totalorder %v3503_v46, 16 }
 0x3f3   : > { %v11513_v49 = vadd.f32 %v2861_v58, %v2478_v27  ;;  %v3232_v61 = vmax.f32 %v3124_v0, %v3178_v35  ;;  %v11560_v58 = vadd.s32 184, %v10892_v53  ;;  %v13824_v35 = vld [vmem:[#allocation49_spill] sm:$0xff]  ;;  %vm3773_vm10 = vmand %vm3665_vm6, %vm3719_vm7 }
 0x3f4   : > { %v3025_v4 = vsel %vm13572_vm1, %v2958_v41, %v2959_v52 }
 0x3f5   : > { %v3067_v44 = vadd.f32 %v3025_v4, %v11452_v16  ;;  %v2115_v32 = vpop.f32.mrf.mxu2  ;;  %v3396_v16 = vshra.s32 %v3342_v24, 14  ;;  %v11544_v1 = vpop.f32.mrf.mxu1 }
 0x3f6   : > { %v2216_v48 = vadd.f32 %v2115_v32, %v889_v11  ;;  %v2378_v19 = vpop.f32.mrf.mxu3 }
 0x3f7   : > { %v3125_v21 = vadd.f32 %v11406_v20, %v3067_v44  ;;  %v2639_v56 = vpop.f32.mrf.mxu0  ;;  %v2479_v30 = vadd.f32 %v2378_v19, %v13817_v34  ;;  %v3450_v38 = vmul.u32 24, %v3396_v16  ;;  %vm3558_vm4 = vcmp.ge.s32.totalorder %v3396_v16, 1  ;;  %v13825_v44 = vld [vmem:[#allocation127_spill] sm:$0xff] }
 0x3f8   : > { %v2796_v59 = vrot.slane %v2216_v48, 7  ;;  %v2741_v43 = vadd.f32 %v2639_v56, %v1689_v12  ;;  %vm3612_vm5 = vcmp.le.s32.totalorder %v3396_v16, 16  ;;  %v894_v32 = vadd.f32 %v13825_v44, %v13824_v35  ;;  %v13833_v35 = vld [vmem:[#allocation90_spill] sm:$0xff] }
 0x3f9   : > { %v3179_v55 = vmul.f32 0.1, %v3125_v21  ;;  %1752 = vmatmul.bf16.gmra.mxu1 %v9815_v51  ;;  %vm3666_vm8 = vmand %vm3558_vm4, %vm3612_vm5  ;;  %v3344_v12 = vmul.u32 683, %v11564_v14 }
 0x3fa   : > { %v2860_v13 = vsel %vm13571_vm0, %v2795_v23, %v2796_v59  ;;  %v2960_v50 = vrot.slane %v2741_v43, 1  ;;  %2157 = vmatmul.bf16.gmra.mxu2 %v11525_v45  ;;  %2678 = vmatmul.bf16.gmra.mxu0 %v11468_v31  ;;  %v3933_v31 = vsel %vm11528_vm14, %v3232_v61, 0.0  ;;  %v1691_v23 = vadd.f32 %v11319_v3, %v13822_v9  ;;  %v11585_v61 = vld [vmem:[%s9942_s25 + $0xc0] sm:$0xff]  ;;  %vm11588_vm14 = vmand %vm3773_vm10, %vm3827_vm11 }
 0x3fb   : > { %v3233_v60 = vmax.f32 %v3125_v21, %v3179_v55  ;;  %v11541_v28 = vadd.f32 %v2860_v13, %v2479_v30  ;;  %2420 = vmatmul.bf16.gmra.mxu3 %v11525_v45  ;;  %v3398_v40 = vshra.s32 %v3344_v12, 14  ;;  %v13834_v12 = vld [vmem:[#allocation52_spill] sm:$0xff] }
 0x3fc   : > { %v3024_v39 = vsel %vm13572_vm1, %v2959_v52, %v2960_v50 }
 0x3fd   : > { %v3934_v22 = vsel %vm11533_vm15, %v3233_v60, 0.0  ;;  %v3068_v57 = vadd.f32 %v3024_v39, %v11484_v33  ;;  %v2118_v25 = vpop.f32.mrf.mxu2  ;;  %v3504_v33 = vsub.s32 %v11503_v10, %v3450_v38  ;;  %v3343_v10 = vmul.u32 683, %v11560_v58  ;;  %v11580_v56 = vpop.f32.mrf.mxu1  ;;  %v13829_v60 = vld [vmem:[#allocation88_spill] sm:$0xff]  ;;  %v9816_v38 = vld [vmem:[%s9942_s25 + $0xc8] sm:$0xff]  }
 0x3fe   : > { %v8856_v8 = vpack.c.bf16 %v3934_v22, %v3933_v31  ;;  %v2217_v2 = vadd.f32 %v2118_v25, %v892_v54  ;;  %v2381_v0 = vpop.f32.mrf.mxu3  ;;  %v13830_v31 = vld [vmem:[#allocation51_spill] sm:$0xff]  ;;  %v13831_v22 = vld [vmem:[#allocation130_spill] sm:$0xff]  ;;  %v3452_v9 = vmul.u32 24, %v3398_v40  ;;  %vm3560_vm4 = vcmp.ge.s32.totalorder %v3398_v40, 1 }
 0x3ff   : > { %v2641_v27 = vpop.f32.mrf.mxu0  ;;  %v3126_v3 = vadd.f32 %v11406_v20, %v3068_v57  ;;  %v2480_v11 = vadd.f32 %v2381_v0, %v13823_v47  ;;  %vm3720_vm9 = vcmp.ge.s32.totalorder %v3504_v33, 1  ;;  %vm3828_vm13 = vcmp.le.s32.totalorder %v3504_v33, 16  ;;  %v13832_v0 = vld [vmem:[#allocation91_spill] sm:$0xff] }
 0x400   : > { %9316 = vst [vmem:[#allocation2 + $0x58] sm:$0xff] %v8856_v8   ;;  %v2797_v52 = vrot.slane %v2217_v2, 7  ;;  %v2742_v36 = vadd.f32 %v2641_v27, %v1691_v23  ;;  %vm3774_vm12 = vmand %vm3666_vm8, %vm3720_vm9  ;;  %v3397_v34 = vshra.s32 %v3343_v10, 14  ;;  %v897_v57 = vadd.f32 %v13831_v22, %v13830_v31 }
 0x401   : > { %v3180_v48 = vmul.f32 0.1, %v3126_v3  ;;  %vm3882_vm15 = vmand %vm3774_vm12, %vm3828_vm13  ;;  %v1696_v46 = vadd.f32 %v11386_v37, %v13832_v0  ;;  %v11618_v37 = vadd.s32 208, %v10892_v53  ;;  %vm3614_vm5 = vcmp.le.s32.totalorder %v3398_v40, 16 }
 0x402   : > { %v2859_v29 = vsel %vm13571_vm0, %v2796_v59, %v2797_v52  ;;  %v2961_v4 = vrot.slane %v2742_v36, 1  ;;  %v1694_v59 = vadd.f32 %v11351_v42, %v13826_v5  ;;  %v3451_v39 = vmul.u32 24, %v3397_v34  ;;  %vm3668_vm8 = vmand %vm3560_vm4, %vm3614_vm5 }
 0x403   : > { %v11571_v24 = vadd.f32 %v2859_v29, %v2480_v11  ;;  %v3234_v13 = vmax.f32 %v3126_v3, %v3180_v48  ;;  %vm3559_vm2 = vcmp.ge.s32.totalorder %v3397_v34, 1  ;;  %vm3613_vm3 = vcmp.le.s32.totalorder %v3397_v34, 16  ;;  %v13835_v48 = vld [vmem:[#allocation133_spill] sm:$0xff] }
 0x404   : > { %v3023_v17 = vsel %vm13572_vm1, %v2960_v50, %v2961_v4  ;;  %v3505_v33 = vsub.s32 %v11560_v58, %v3451_v39  ;;  %v11614_v11 = vadd.s32 200, %v10892_v53  ;;  %vm3667_vm6 = vmand %vm3559_vm2, %vm3613_vm3  ;;  %v3346_v5 = vmul.u32 683, %v11618_v37  ;;  %v13841_v39 = vld [vmem:[#allocation92_spill] sm:$0xff] }
 0x405   : > { %v3069_v19 = vadd.f32 %v3023_v17, %v11513_v49  ;;  %v2120_v21 = vpop.f32.mrf.mxu2  ;;  %v3935_v23 = vsel %vm11588_vm14, %v3234_v13, 0.0  ;;  %v11611_v3 = vpop.f32.mrf.mxu1  ;;  %v11645_v13 = vld [vmem:[%s9942_s25 + $0xc8] sm:$0xff] }
 0x406   : > { %v2218_v43 = vadd.f32 %v2120_v21, %v894_v32  ;;  %v2383_v16 = vpop.f32.mrf.mxu3  ;;  %vm3721_vm7 = vcmp.ge.s32.totalorder %v3505_v33, 1  ;;  %vm3829_vm11 = vcmp.le.s32.totalorder %v3505_v33, 16 }
 0x407   : > { %v3127_v41 = vadd.f32 %v11406_v20, %v3069_v19  ;;  %v2644_v55 = vpop.f32.mrf.mxu0  ;;  %v2481_v7 = vadd.f32 %v2383_v16, %v13829_v60  ;;  %v899_v19 = vadd.f32 %v13835_v48, %v13834_v12  ;;  %vm11640_vm10 = vmand %vm3667_vm6, %vm3721_vm7 }
 0x408   : > { %v2798_v30 = vrot.slane %v2218_v43, 7  ;;  %v2743_v49 = vadd.f32 %v2644_v55, %v1694_v59  ;;  %v13836_v55 = vld [vmem:[#allocation93_spill] sm:$0xff]  ;;  %vm11650_vm14 = vmand %vm11640_vm10, %vm3829_vm11 }
 0x409   : > { %v3181_v42 = vmul.f32 0.1, %v3127_v41  ;;  %1757 = vmatmul.bf16.gmra.mxu1 %v9816_v38  ;;  %v1699_v34 = vadd.f32 %v11431_v15, %v13836_v55  ;;  %v3400_v15 = vshra.s32 %v3346_v5, 14  ;;  %v13845_v55 = vld [vmem:[#allocation97_spill] sm:$0xff] }
 0x40a   : > { %v2858_v51 = vsel %vm13571_vm0, %v2797_v52, %v2798_v30  ;;  %v2962_v62 = vrot.slane %v2743_v49, 1  ;;  %2162 = vmatmul.bf16.gmra.mxu2 %v11585_v61  ;;  %2683 = vmatmul.bf16.gmra.mxu0 %v11525_v45 }
 0x40b   : > { %v3235_v63 = vmax.f32 %v3127_v41, %v3181_v42  ;;  %v11597_v54 = vadd.f32 %v2858_v51, %v2481_v7  ;;  %2425 = vmatmul.bf16.gmra.mxu3 %v11585_v61  ;;  %v8632_v41 = vld [vmem:[%s13565_s3 + $0xd8] sm:$0xff]  ;;  %vm3562_vm4 = vcmp.ge.s32.totalorder %v3400_v15, 1  ;;  %vm3616_vm5 = vcmp.le.s32.totalorder %v3400_v15, 16 }
 0x40c   : > { %v3022_v25 = vsel %vm13572_vm1, %v2961_v4, %v2962_v62  ;;  %v3506_v4 = vsub.s32 %v11564_v14, %v3452_v9  ;;  %v3345_v14 = vmul.u32 683, %v11614_v11  ;;  %4414 = vmatpush.bf16.msra.mxu1 %v8632_v41 }
 0x40d   : > { %v3936_v8 = vsel %vm3882_vm15, %v3235_v63, 0.0  ;;  %v3070_v45 = vadd.f32 %v3022_v25, %v11541_v28  ;;  %v2123_v2 = vpop.f32.mrf.mxu2  ;;  %v11655_v31 = vpop.f32.mrf.mxu1 }
 0x40e   : > { %v8861_v27 = vpack.c.bf16 %v3936_v8, %v3935_v23  ;;  %v2219_v52 = vadd.f32 %v2123_v2, %v897_v57  ;;  %v2386_v36 = vpop.f32.mrf.mxu3  ;;  %vm3722_vm9 = vcmp.ge.s32.totalorder %v3506_v4, 1  ;;  %vm3830_vm13 = vcmp.le.s32.totalorder %v3506_v4, 16  ;;  %v9817_v8 = vld [vmem:[%s9942_s25 + $0xd0] sm:$0xff]  }
 0x40f   : > { %v2646_v47 = vpop.f32.mrf.mxu0  ;;  %v3128_v10 = vadd.f32 %v11406_v20, %v3070_v45  ;;  %v2482_v58 = vadd.f32 %v2386_v36, %v13833_v35  ;;  %vm3776_vm12 = vmand %vm3668_vm8, %vm3722_vm9  ;;  %v3399_v42 = vshra.s32 %v3345_v14, 14  ;;  %v3454_v2 = vmul.u32 24, %v3400_v15  ;;  %v13844_v14 = vld [vmem:[#allocation94_spill] sm:$0xff] }
 0x410   : > { %9317 = vst [vmem:[#allocation2 + $0x60] sm:$0xff] %v8861_v27   ;;  %v2799_v29 = vrot.slane %v2219_v52, 7  ;;  %v2744_v28 = vadd.f32 %v2646_v47, %v1696_v46  ;;  %vm3884_vm15 = vmand %vm3776_vm12, %vm3830_vm13  ;;  %v13843_v47 = vld [vmem:[#allocation3_spill] sm:$0xff]  ;;  %v3293_v35 = vadd.s32 216, %v10892_v53 }
 0x411   : > { %v3182_v59 = vmul.f32 0.1, %v3128_v10  ;;  %v3453_v23 = vmul.u32 24, %v3399_v42  ;;  %vm3561_vm2 = vcmp.ge.s32.totalorder %v3399_v42, 1  ;;  %vm3615_vm3 = vcmp.le.s32.totalorder %v3399_v42, 16  ;;  %vm3670_vm8 = vmand %vm3562_vm4, %vm3616_vm5 }
 0x412   : > { %v2857_v44 = vsel %vm13571_vm0, %v2798_v30, %v2799_v29  ;;  %v2963_v32 = vrot.slane %v2744_v28, 1  ;;  %vm3669_vm6 = vmand %vm3561_vm2, %vm3615_vm3  ;;  %v13846_v30 = vld [vmem:[#allocation4_spill] sm:$0xff] }
 0x413   : > { %v11626_v17 = vadd.f32 %v2857_v44, %v2482_v58  ;;  %v3236_v51 = vmax.f32 %v3128_v10, %v3182_v59  ;;  %v3507_v4 = vsub.s32 %v11614_v11, %v3453_v23 }
 0x414   : > { %v3021_v21 = vsel %vm13572_vm1, %v2962_v62, %v2963_v32 }
 0x415   : > { %v3071_v43 = vadd.f32 %v3021_v21, %v11571_v24  ;;  %v2125_v16 = vpop.f32.mrf.mxu2  ;;  %v3937_v0 = vsel %vm11650_vm14, %v3236_v51, 0.0  ;;  %vm3723_vm7 = vcmp.ge.s32.totalorder %v3507_v4, 1  ;;  %v3347_v21 = vmul.u32 683, %v3293_v35 }
 0x416   : > { %v2220_v49 = vadd.f32 %v2125_v16, %v899_v19  ;;  %v2388_v40 = vpop.f32.mrf.mxu3  ;;  %vm3777_vm10 = vmand %vm3669_vm6, %vm3723_vm7  ;;  %vm3831_vm11 = vcmp.le.s32.totalorder %v3507_v4, 16  ;;  %v3295_v4 = vadd.s32 232, %v10892_v53 }
 0x417   : > { %v3129_v50 = vadd.f32 %v11406_v20, %v3071_v43  ;;  %v2649_v24 = vpop.f32.mrf.mxu0  ;;  %v2483_v38 = vadd.f32 %v2388_v40, %v13841_v39  ;;  %vm3885_vm14 = vmand %vm3777_vm10, %vm3831_vm11 }
 0x418   : > { %v2800_v60 = vrot.slane %v2220_v49, 7  ;;  %v2745_v7 = vadd.f32 %v2649_v24, %v1699_v34  ;;  %v1704_v34 = vadd.f32 %v11507_v26, %v13845_v55  ;;  %v13847_v26 = vld [vmem:[#allocation96_spill] sm:$0xff]  ;;  %v13854_v55 = vld [vmem:[#allocation6_spill] sm:$0xff] }
 0x419   : > { %v3183_v63 = vmul.f32 0.1, %v3129_v50  ;;  %1762 = vmatmul.bf16.gmra.mxu1 %v9817_v8 }
 0x41a   : > { %v2856_v22 = vsel %vm13571_vm0, %v2799_v29, %v2800_v60  ;;  %v2964_v57 = vrot.slane %v2745_v7, 1  ;;  %2167 = vmatmul.bf16.gmra.mxu2 %v11645_v13  ;;  %2688 = vmatmul.bf16.gmra.mxu0 %v11585_v61  ;;  %v13842_v61 = vld [vmem:[#allocation95_spill] sm:$0xff] }
 0x41b   : > { %v3237_v25 = vmax.f32 %v3129_v50, %v3183_v63  ;;  %v11661_v9 = vadd.f32 %v2856_v22, %v2483_v38  ;;  %2430 = vmatmul.bf16.gmra.mxu3 %v11645_v13  ;;  %v1701_v36 = vadd.f32 %v11471_v18, %v13842_v61  ;;  %v11696_v50 = vld [vmem:[%s9942_s25 + $0xd0] sm:$0xff] }
 0x41c   : > { %v3020_v45 = vsel %vm13572_vm1, %v2963_v32, %v2964_v57  ;;  %v11677_v32 = vadd.s32 224, %v10892_v53 }
 0x41d   : > { %v3938_v46 = vsel %vm3884_vm15, %v3237_v25, 0.0  ;;  %v3072_v27 = vadd.f32 %v3020_v45, %v11597_v54  ;;  %v2128_v52 = vpop.f32.mrf.mxu2  ;;  %v3508_v54 = vsub.s32 %v11618_v37, %v3454_v2  ;;  %v11686_v37 = vpop.f32.mrf.mxu1 }
 0x41e   : > { %v8866_v33 = vpack.c.bf16 %v3938_v46, %v3937_v0  ;;  %v2221_v29 = vadd.f32 %v2128_v52, %v13843_v47  ;;  %v2391_v28 = vpop.f32.mrf.mxu3  ;;  %v3348_v59 = vmul.u32 683, %v11677_v32  ;;  %v13848_v52 = vld [vmem:[#allocation99_spill] sm:$0xff] }
 0x41f   : > { %v2651_v10 = vpop.f32.mrf.mxu0  ;;  %v3130_v18 = vadd.f32 %v11406_v20, %v3072_v27  ;;  %v2484_v12 = vadd.f32 %v2391_v28, %v13844_v14  ;;  %vm3724_vm9 = vcmp.ge.s32.totalorder %v3508_v54, 1  ;;  %vm3832_vm13 = vcmp.le.s32.totalorder %v3508_v54, 16  ;;  %v13850_v54 = vld [vmem:[#allocation98_spill] sm:$0xff] }
 0x420   : > { %9318 = vst [vmem:[#allocation2 + $0x68] sm:$0xff] %v8866_v33   ;;  %v2801_v58 = vrot.slane %v2221_v29, 7  ;;  %v2746_v44 = vadd.f32 %v2651_v10, %v1701_v36  ;;  %vm3778_vm12 = vmand %vm3670_vm8, %vm3724_vm9  ;;  %v13849_v36 = vld [vmem:[#allocation5_spill] sm:$0xff] }
 0x421   : > { %v3184_v43 = vmul.f32 0.1, %v3130_v18  ;;  %vm3886_vm15 = vmand %vm3778_vm12, %vm3832_vm13 }
 0x422   : > { %v2855_v11 = vsel %vm13571_vm0, %v2800_v60, %v2801_v58  ;;  %v2965_v48 = vrot.slane %v2746_v44, 1  ;;  %v3401_v60 = vshra.s32 %v3347_v21, 14 }
 0x423   : > { %v11684_v19 = vadd.f32 %v2855_v11, %v2484_v12  ;;  %v3238_v51 = vmax.f32 %v3130_v18, %v3184_v43  ;;  %v13851_v43 = vld [vmem:[#allocation101_spill] sm:$0xff] }
 0x424   : > { %v3019_v5 = vsel %vm13572_vm1, %v2964_v57, %v2965_v48  ;;  %v3455_v25 = vmul.u32 24, %v3401_v60  ;;  %vm3563_vm2 = vcmp.ge.s32.totalorder %v3401_v60, 1  ;;  %vm3617_vm3 = vcmp.le.s32.totalorder %v3401_v60, 16 }
 0x425   : > { %v3073_v16 = vadd.f32 %v3019_v5, %v11626_v17  ;;  %v2130_v41 = vpop.f32.mrf.mxu2  ;;  %v3402_v17 = vshra.s32 %v3348_v59, 14  ;;  %v3939_v45 = vsel %vm3885_vm14, %v3238_v51, 0.0  ;;  %v11709_v0 = vpop.f32.mrf.mxu1  ;;  %vm3671_vm6 = vmand %vm3563_vm2, %vm3617_vm3  ;;  %v13855_v51 = vld [vmem:[#allocation100_spill] sm:$0xff] }
 0x426   : > { %v2222_v49 = vadd.f32 %v2130_v41, %v13846_v30  ;;  %v2393_v40 = vpop.f32.mrf.mxu3  ;;  %v3509_v29 = vsub.s32 %v3293_v35, %v3455_v25 }
 0x427   : > { %v3131_v24 = vadd.f32 %v11406_v20, %v3073_v16  ;;  %v2654_v42 = vpop.f32.mrf.mxu0  ;;  %v2485_v63 = vadd.f32 %v2393_v40, %v13847_v26  ;;  %v3456_v8 = vmul.u32 24, %v3402_v17  ;;  %vm3564_vm4 = vcmp.ge.s32.totalorder %v3402_v17, 1 }
 0x428   : > { %v2802_v7 = vrot.slane %v2222_v49, 7  ;;  %v2747_v15 = vadd.f32 %v2654_v42, %v1704_v34  ;;  %vm3618_vm5 = vcmp.le.s32.totalorder %v3402_v17, 16  ;;  %vm3725_vm7 = vcmp.ge.s32.totalorder %v3509_v29, 1  ;;  %v11739_v49 = vld [vmem:[%s9942_s25 + $0xd8] sm:$0xff] }
 0x429   : > { %v3185_v62 = vmul.f32 0.1, %v3131_v24  ;;  %v3510_v44 = vsub.s32 %v11677_v32, %v3456_v8  ;;  %v3349_v32 = vmul.u32 683, %v3295_v4  ;;  %vm3672_vm8 = vmand %vm3564_vm4, %vm3618_vm5  ;;  %v1709_v16 = vadd.f32 %v11580_v56, %v13851_v43  ;;  %v13860_v43 = vld [vmem:[#allocation10_spill] sm:$0xff] }
 0x42a   : > { %v2854_v39 = vsel %vm13571_vm0, %v2801_v58, %v2802_v7  ;;  %v2966_v38 = vrot.slane %v2747_v15, 1  ;;  %2172 = vmatmul.bf16.gmra.mxu2 %v11696_v50  ;;  %2693 = vmatmul.bf16.gmra.mxu0 %v11645_v13  ;;  %v1706_v13 = vadd.f32 %v11544_v1, %v13848_v52  ;;  %vm11733_vm10 = vmand %vm3671_vm6, %vm3725_vm7  ;;  %vm3833_vm11 = vcmp.le.s32.totalorder %v3509_v29, 16 }
 0x42b   : > { %v3239_v22 = vmax.f32 %v3131_v24, %v3185_v62  ;;  %v11704_v57 = vadd.f32 %v2854_v39, %v2485_v63  ;;  %2435 = vmatmul.bf16.gmra.mxu3 %v11696_v50  ;;  %vm3726_vm9 = vcmp.ge.s32.totalorder %v3510_v44, 1  ;;  %vm3834_vm13 = vcmp.le.s32.totalorder %v3510_v44, 16  ;;  %vm3887_vm14 = vmand %vm11733_vm10, %vm3833_vm11 }
 0x42c   : > { %v3018_v23 = vsel %vm13572_vm1, %v2965_v48, %v2966_v38  ;;  %vm3780_vm12 = vmand %vm3672_vm8, %vm3726_vm9  ;;  %v3403_v42 = vshra.s32 %v3349_v32, 14  ;;  %v3297_v29 = vadd.s32 248, %v10892_v53 }
 0x42d   : > { %v3940_v2 = vsel %vm3886_vm15, %v3239_v22, 0.0  ;;  %v3074_v46 = vadd.f32 %v3018_v23, %v11661_v9  ;;  %v2133_v27 = vpop.f32.mrf.mxu2  ;;  %v11718_v9 = vadd.s32 240, %v10892_v53  ;;  %v11741_v40 = vpop.f32.mrf.mxu1  ;;  %vm3888_vm15 = vmand %vm3780_vm12, %vm3834_vm13 }
 0x42e   : > { %v8871_v61 = vpack.c.bf16 %v3940_v2, %v3939_v45  ;;  %v2223_v33 = vadd.f32 %v2133_v27, %v13849_v36  ;;  %v2396_v47 = vpop.f32.mrf.mxu3  ;;  %v3457_v22 = vmul.u32 24, %v3403_v42  ;;  %v13856_v27 = vld [vmem:[#allocation103_spill] sm:$0xff]  ;;  %vm3565_vm2 = vcmp.ge.s32.totalorder %v3403_v42, 1 }
 0x42f   : > { %v2656_v28 = vpop.f32.mrf.mxu0  ;;  %v3132_v1 = vadd.f32 %v11406_v20, %v3074_v46  ;;  %v2486_v18 = vadd.f32 %v2396_v47, %v13850_v54  ;;  %v3350_v48 = vmul.u32 683, %v11718_v9  ;;  %v1711_v52 = vadd.f32 %v11611_v3, %v13856_v27 }
 0x430   : > { %9319 = vst [vmem:[#allocation2 + $0x70] sm:$0xff] %v8871_v61   ;;  %v2803_v10 = vrot.slane %v2223_v33, 7  ;;  %v2748_v58 = vadd.f32 %v2656_v28, %v1706_v13  ;;  %v3511_v33 = vsub.s32 %v3295_v4, %v3457_v22  ;;  %vm3619_vm3 = vcmp.le.s32.totalorder %v3403_v42, 16 }
 0x431   : > { %v3186_v21 = vmul.f32 0.1, %v3132_v1  ;;  %vm3673_vm6 = vmand %vm3565_vm2, %vm3619_vm3 }
 0x432   : > { %v2853_v35 = vsel %vm13571_vm0, %v2802_v7, %v2803_v10  ;;  %v2967_v14 = vrot.slane %v2748_v58, 1  ;;  %v3404_v7 = vshra.s32 %v3350_v48, 14  ;;  %vm3727_vm7 = vcmp.ge.s32.totalorder %v3511_v33, 1 }
 0x433   : > { %v11725_v12 = vadd.f32 %v2853_v35, %v2486_v18  ;;  %v3240_v15 = vmax.f32 %v3132_v1, %v3186_v21  ;;  %v13858_v1 = vld [vmem:[#allocation102_spill] sm:$0xff]  ;;  %v3351_v35 = vmul.u32 683, %v3297_v29  ;;  %vm3781_vm10 = vmand %vm3673_vm6, %vm3727_vm7  ;;  %vm3835_vm11 = vcmp.le.s32.totalorder %v3511_v33, 16 }
 0x434   : > { %v3017_v11 = vsel %vm13572_vm1, %v2966_v38, %v2967_v14  ;;  %v3458_v23 = vmul.u32 24, %v3404_v7  ;;  %vm3566_vm4 = vcmp.ge.s32.totalorder %v3404_v7, 1  ;;  %vm3620_vm5 = vcmp.le.s32.totalorder %v3404_v7, 16 }
 0x435   : > { %v3075_v5 = vadd.f32 %v3017_v11, %v11684_v19  ;;  %v2135_v59 = vpop.f32.mrf.mxu2  ;;  %v3941_v8 = vsel %vm3887_vm14, %v3240_v15, 0.0  ;;  %v11765_v44 = vpop.f32.mrf.mxu1  ;;  %vm3674_vm8 = vmand %vm3566_vm4, %vm3620_vm5 }
 0x436   : > { %v2224_v34 = vadd.f32 %v2135_v59, %v13854_v55  ;;  %v2398_v30 = vpop.f32.mrf.mxu3  ;;  %v3512_v58 = vsub.s32 %v11718_v9, %v3458_v23  ;;  %v11783_v55 = vld [vmem:[%s9942_s25 + $0xe0] sm:$0xff]  ;;  %vm3889_vm14 = vmand %vm3781_vm10, %vm3835_vm11 }
 0x437   : > { %v3133_v24 = vadd.f32 %v11406_v20, %v3075_v5  ;;  %v2659_v19 = vpop.f32.mrf.mxu0  ;;  %v2487_v62 = vadd.f32 %v2398_v30, %v13855_v51  ;;  %v13859_v5 = vld [vmem:[#allocation105_spill] sm:$0xff] }
 0x438   : > { %v2804_v60 = vrot.slane %v2224_v34, 7  ;;  %v2749_v56 = vadd.f32 %v2659_v19, %v1709_v16  ;;  %vm3728_vm9 = vcmp.ge.s32.totalorder %v3512_v58, 1  ;;  %v1714_v59 = vadd.f32 %v11655_v31, %v13859_v5  ;;  %v13861_v31 = vld [vmem:[#allocation104_spill] sm:$0xff]  ;;  %v13866_v5 = vld [vmem:[#allocation14_spill] sm:$0xff] }
 0x439   : > { %v3187_v17 = vmul.f32 0.1, %v3133_v24  ;;  %vm3782_vm12 = vmand %vm3674_vm8, %vm3728_vm9  ;;  %vm3836_vm13 = vcmp.le.s32.totalorder %v3512_v58, 16 }
 0x43a   : > { %v2852_v26 = vsel %vm13571_vm0, %v2803_v10, %v2804_v60  ;;  %v2968_v63 = vrot.slane %v2749_v56, 1  ;;  %2177 = vmatmul.bf16.gmra.mxu2 %v11739_v49  ;;  %2698 = vmatmul.bf16.gmra.mxu0 %v11696_v50  ;;  %v13857_v50 = vld [vmem:[#allocation8_spill] sm:$0xff] }
 0x43b   : > { %v3241_v39 = vmax.f32 %v3133_v24, %v3187_v17  ;;  %v11751_v38 = vadd.f32 %v2852_v26, %v2487_v62  ;;  %2440 = vmatmul.bf16.gmra.mxu3 %v11739_v49  ;;  %v3405_v24 = vshra.s32 %v3351_v35, 14 }
 0x43c   : > { %v3016_v25 = vsel %vm13572_vm1, %v2967_v14, %v2968_v63 }
 0x43d   : > { %v3942_v45 = vsel %vm3888_vm15, %v3241_v39, 0.0  ;;  %v3076_v2 = vadd.f32 %v3016_v25, %v11704_v57  ;;  %v2138_v46 = vpop.f32.mrf.mxu2  ;;  %v11763_v57 = vadd.s32 256, %v10892_v53  ;;  %vm3890_vm15 = vmand %vm3782_vm12, %vm3836_vm13  ;;  %v3459_v26 = vmul.u32 24, %v3405_v24 }
 0x43e   : > { %v8876_v13 = vpack.c.bf16 %v3942_v45, %v3941_v8  ;;  %v2225_v61 = vadd.f32 %v2138_v46, %v13857_v50  ;;  %v2401_v36 = vpop.f32.mrf.mxu3  ;;  %v13862_v45 = vld [vmem:[#allocation107_spill] sm:$0xff]  ;;  %v13863_v46 = vld [vmem:[#allocation12_spill] sm:$0xff]  ;;  %vm3567_vm2 = vcmp.ge.s32.totalorder %v3405_v24, 1  ;;  %vm3621_vm3 = vcmp.le.s32.totalorder %v3405_v24, 16 }
 0x43f   : > { %v2661_v47 = vpop.f32.mrf.mxu0  ;;  %v3134_v3 = vadd.f32 %v11406_v20, %v3076_v2  ;;  %v2488_v54 = vadd.f32 %v2401_v36, %v13858_v1  ;;  %v3352_v32 = vmul.u32 683, %v11763_v57  ;;  %vm3675_vm6 = vmand %vm3567_vm2, %vm3621_vm3 }
 0x440   : > { %9320 = vst [vmem:[#allocation2 + $0x78] sm:$0xff] %v8876_v13   ;;  %v2805_v28 = vrot.slane %v2225_v61, 7  ;;  %v2750_v10 = vadd.f32 %v2661_v47, %v1711_v52  ;;  %v3513_v13 = vsub.s32 %v3297_v29, %v3459_v26  ;;  %v11803_v61 = vadd.s32 264, %v10892_v53  ;;  %v11815_v29 = vld [vmem:[%s13564_s2] ss:$0 sm:$0xff] }
 0x441   : > { %v3188_v11 = vmul.f32 0.1, %v3134_v3  ;;  %v11807_v47 = vadd.s32 272, %v10892_v53 }
 0x442   : > { %v2851_v4 = vsel %vm13571_vm0, %v2804_v60, %v2805_v28  ;;  %v2969_v18 = vrot.slane %v2750_v10, 1  ;;  %v13864_v10 = vld [vmem:[#allocation106_spill] sm:$0xff]  ;;  %vm3729_vm7 = vcmp.ge.s32.totalorder %v3513_v13, 1  ;;  %vm3837_vm11 = vcmp.le.s32.totalorder %v3513_v13, 16 }
 0x443   : > { %v11773_v9 = vadd.f32 %v2851_v4, %v2488_v54  ;;  %v3242_v60 = vmax.f32 %v3134_v3, %v3188_v11  ;;  %v3353_v54 = vmul.u32 683, %v11803_v61  ;;  %vm3783_vm10 = vmand %vm3675_vm6, %vm3729_vm7  ;;  %v3301_v13 = vadd.s32 280, %v10892_v53 }
 0x444   : > { %v3015_v14 = vsel %vm13572_vm1, %v2968_v63, %v2969_v18 }
 0x445   : > { %v3077_v48 = vadd.f32 %v3015_v14, %v11725_v12  ;;  %v2140_v21 = vpop.f32.mrf.mxu2  ;;  %v3406_v12 = vshra.s32 %v3352_v32, 14  ;;  %v3943_v22 = vsel %vm3889_vm14, %v3242_v60, 0.0  ;;  %vm3891_vm14 = vmand %vm3783_vm10, %vm3837_vm11 }
 0x446   : > { %v2226_v16 = vadd.f32 %v2140_v21, %v13860_v43  ;;  %v2403_v41 = vpop.f32.mrf.mxu3 }
 0x447   : > { %v3135_v34 = vadd.f32 %v11406_v20, %v3077_v48  ;;  %v2664_v30 = vpop.f32.mrf.mxu0  ;;  %v2489_v7 = vadd.f32 %v2403_v41, %v13861_v31  ;;  %v11791_v20 = vpop.f32.mrf.mxu1  ;;  %v3460_v39 = vmul.u32 24, %v3406_v12  ;;  %vm3568_vm4 = vcmp.ge.s32.totalorder %v3406_v12, 1  ;;  %v13865_v48 = vld [vmem:[#allocation109_spill] sm:$0xff] }
 0x448   : > { %v2806_v19 = vrot.slane %v2226_v16, 7  ;;  %v2751_v42 = vadd.f32 %v2664_v30, %v1714_v59  ;;  %vm3622_vm5 = vcmp.le.s32.totalorder %v3406_v12, 16  ;;  %v1719_v21 = vadd.f32 %v11709_v0, %v13865_v48  ;;  %v11836_v16 = vld [vmem:[%s9942_s25 + $0xe8] sm:$0xff]  ;;  %v13867_v0 = vld [vmem:[#allocation108_spill] sm:$0xff] }
 0x449   : > { %v3189_v56 = vmul.f32 0.1, %v3135_v34  ;;  %vm3676_vm8 = vmand %vm3568_vm4, %vm3622_vm5  ;;  %v3407_v30 = vshra.s32 %v3353_v54, 14 }
 0x44a   : > { %v2850_v15 = vsel %vm13571_vm0, %v2805_v28, %v2806_v19  ;;  %v2970_v17 = vrot.slane %v2751_v42, 1  ;;  %2182 = vmatmul.bf16.gmra.mxu2 %v11783_v55  ;;  %2703 = vmatmul.bf16.gmra.mxu0 %v11739_v49  ;;  %v1716_v49 = vadd.f32 %v11686_v37, %v13862_v45  ;;  %v8631_v37 = vld [vmem:[%s13565_s3 + $0xd0] sm:$0xff] }
 0x44b   : > { %v3243_v51 = vmax.f32 %v3135_v34, %v3189_v56  ;;  %v11793_v62 = vadd.f32 %v2850_v15, %v2489_v7  ;;  %2445 = vmatmul.bf16.gmra.mxu3 %v11783_v55  ;;  %4415 = vmatpush.bf16.msra.mxu1 %v8631_v37  ;;  %vm3569_vm2 = vcmp.ge.s32.totalorder %v3407_v30, 1  ;;  %vm3623_vm3 = vcmp.le.s32.totalorder %v3407_v30, 16 }
 0x44c   : > { %v3014_v63 = vsel %vm13572_vm1, %v2969_v18, %v2970_v17  ;;  %v3354_v18 = vmul.u32 683, %v11807_v47  ;;  %vm3677_vm6 = vmand %vm3569_vm2, %vm3623_vm3 }
 0x44d   : > { %v3944_v25 = vsel %vm3890_vm15, %v3243_v51, 0.0  ;;  %v3078_v23 = vadd.f32 %v3014_v63, %v11751_v38  ;;  %v2143_v8 = vpop.f32.mrf.mxu2  ;;  %v3514_v38 = vsub.s32 %v11763_v57, %v3460_v39 }
 0x44e   : > { %v8881_v2 = vpack.c.bf16 %v3944_v25, %v3943_v22  ;;  %v2227_v27 = vadd.f32 %v2143_v8, %v13863_v46  ;;  %v2406_v52 = vpop.f32.mrf.mxu3 }
 0x44f   : > { %v2666_v50 = vpop.f32.mrf.mxu0  ;;  %v3136_v28 = vadd.f32 %v11815_v29, %v3078_v23  ;;  %v2490_v58 = vadd.f32 %v2406_v52, %v13864_v10  ;;  %vm3730_vm9 = vcmp.ge.s32.totalorder %v3514_v38, 1  ;;  %v11829_v35 = vpop.f32.mrf.mxu1  ;;  %vm3838_vm13 = vcmp.le.s32.totalorder %v3514_v38, 16  ;;  %v13868_v23 = vld [vmem:[#allocation111_spill] sm:$0xff]  ;;  %v13870_v38 = vld [vmem:[#allocation110_spill] sm:$0xff] }
 0x450   : > { %9321 = vst [vmem:[#allocation2 + $0x80] sm:$0xff] %v8881_v2   ;;  %v2807_v36 = vrot.slane %v2227_v27, 7  ;;  %v2752_v33 = vadd.f32 %v2666_v50, %v1716_v49  ;;  %vm3784_vm12 = vmand %vm3676_vm8, %vm3730_vm9  ;;  %v1721_v8 = vadd.f32 %v11741_v40, %v13868_v23  ;;  %v3302_v40 = vadd.s32 288, %v10892_v53 }
 0x451   : > { %v3190_v14 = vmul.f32 0.1, %v3136_v28  ;;  %vm3892_vm15 = vmand %vm3784_vm12, %vm3838_vm13 }
 0x452   : > { %v2849_v57 = vsel %vm13571_vm0, %v2806_v19, %v2807_v36  ;;  %v2971_v3 = vrot.slane %v2752_v33, 1 }
 0x453   : > { %v11823_v1 = vadd.f32 %v2849_v57, %v2490_v58  ;;  %v3244_v42 = vmax.f32 %v3136_v28, %v3190_v14  ;;  %v3355_v58 = vmul.u32 683, %v3301_v13  ;;  %v3356_v57 = vmul.u32 683, %v3302_v40 }
 0x454   : > { %v3013_v4 = vsel %vm13572_vm1, %v2970_v17, %v2971_v3  ;;  %v3461_v17 = vmul.u32 24, %v3407_v30 }
 0x455   : > { %v3079_v32 = vadd.f32 %v3013_v4, %v11773_v9  ;;  %v2145_v11 = vpop.f32.mrf.mxu2  ;;  %v3408_v9 = vshra.s32 %v3354_v18, 14  ;;  %v3945_v63 = vsel %vm3891_vm14, %v3244_v42, 0.0  ;;  %v13871_v18 = vld [vmem:[#allocation113_spill] sm:$0xff] }
 0x456   : > { %v2228_v59 = vadd.f32 %v2145_v11, %v13866_v5  ;;  %v2408_v43 = vpop.f32.mrf.mxu3  ;;  %v3515_v27 = vsub.s32 %v11803_v61, %v3461_v17  ;;  %v1724_v14 = vadd.f32 %v11765_v44, %v13871_v18  ;;  %v13873_v44 = vld [vmem:[#allocation112_spill] sm:$0xff] }
 0x457   : > { %v3137_v41 = vadd.f32 %v11815_v29, %v3079_v32  ;;  %v2669_v34 = vpop.f32.mrf.mxu0  ;;  %v2491_v60 = vadd.f32 %v2408_v43, %v13867_v0  ;;  %v3462_v26 = vmul.u32 24, %v3408_v9  ;;  %v11853_v46 = vpop.f32.mrf.mxu1  ;;  %vm3570_vm4 = vcmp.ge.s32.totalorder %v3408_v9, 1  ;;  %v13872_v32 = vld [vmem:[#allocation18_spill] sm:$0xff] }
 0x458   : > { %v2808_v24 = vrot.slane %v2228_v59, 7  ;;  %v2753_v19 = vadd.f32 %v2669_v34, %v1719_v21  ;;  %vm3624_vm5 = vcmp.le.s32.totalorder %v3408_v9, 16  ;;  %vm3731_vm7 = vcmp.ge.s32.totalorder %v3515_v27, 1 }
 0x459   : > { %v3191_v12 = vmul.f32 0.1, %v3137_v41  ;;  %vm3678_vm8 = vmand %vm3570_vm4, %vm3624_vm5  ;;  %vm3839_vm11 = vcmp.le.s32.totalorder %v3515_v27, 16  ;;  %v3409_v59 = vshra.s32 %v3355_v58, 14  ;;  %v3410_v34 = vshra.s32 %v3356_v57, 14 }
 0x45a   : > { %v2848_v56 = vsel %vm13571_vm0, %v2807_v36, %v2808_v24  ;;  %v2972_v31 = vrot.slane %v2753_v19, 1  ;;  %2187 = vmatmul.bf16.gmra.mxu2 %v11836_v16  ;;  %2708 = vmatmul.bf16.gmra.mxu0 %v11783_v55  ;;  %v13869_v55 = vld [vmem:[#allocation16_spill] sm:$0xff]  ;;  %v3516_v36 = vsub.s32 %v11807_v47, %v3462_v26  ;;  %vm3785_vm10 = vmand %vm3677_vm6, %vm3731_vm7 }
 0x45b   : > { %v3245_v7 = vmax.f32 %v3137_v41, %v3191_v12  ;;  %v11844_v15 = vadd.f32 %v2848_v56, %v2491_v60  ;;  %2450 = vmatmul.bf16.gmra.mxu3 %v11836_v16  ;;  %vm3893_vm14 = vmand %vm3785_vm10, %vm3839_vm11  ;;  %v3463_v60 = vmul.u32 24, %v3409_v59  ;;  %vm3571_vm2 = vcmp.ge.s32.totalorder %v3409_v59, 1 }
 0x45c   : > { %v3012_v51 = vsel %vm13572_vm1, %v2971_v3, %v2972_v31  ;;  %vm3732_vm9 = vcmp.ge.s32.totalorder %v3516_v36, 1  ;;  %vm3840_vm13 = vcmp.le.s32.totalorder %v3516_v36, 16  ;;  %vm3625_vm3 = vcmp.le.s32.totalorder %v3409_v59, 16  ;;  %v13879_v59 = vld [vmem:[#allocation116_spill] sm:$0xff] }
 0x45d   : > { %v3946_v39 = vsel %vm3892_vm15, %v3245_v7, 0.0  ;;  %v3080_v22 = vadd.f32 %v3012_v51, %v11793_v62  ;;  %v2148_v25 = vpop.f32.mrf.mxu2  ;;  %vm3786_vm12 = vmand %vm3678_vm8, %vm3732_vm9  ;;  %vm3572_vm4 = vcmp.ge.s32.totalorder %v3410_v34, 1  ;;  %vm3626_vm5 = vcmp.le.s32.totalorder %v3410_v34, 16 }
 0x45e   : > { %v8886_v45 = vpack.c.bf16 %v3946_v39, %v3945_v63  ;;  %v2229_v49 = vadd.f32 %v2148_v25, %v13869_v55  ;;  %v2411_v2 = vpop.f32.mrf.mxu3  ;;  %vm3894_vm15 = vmand %vm3786_vm12, %vm3840_vm13  ;;  %v13874_v63 = vld [vmem:[#allocation115_spill] sm:$0xff]  ;;  %v13875_v25 = vld [vmem:[#allocation20_spill] sm:$0xff]  ;;  %v3303_v55 = vadd.s32 296, %v10892_v53 }
 0x45f   : > { %v2671_v52 = vpop.f32.mrf.mxu0  ;;  %v3138_v33 = vadd.f32 %v11815_v29, %v3080_v22  ;;  %v2492_v37 = vadd.f32 %v2411_v2, %v13870_v38  ;;  %v11873_v30 = vpop.f32.mrf.mxu1  ;;  %v1726_v39 = vadd.f32 %v11791_v20, %v13874_v63  ;;  %vm3679_vm6 = vmand %vm3571_vm2, %vm3625_vm3 }
 0x460   : > { %9322 = vst [vmem:[#allocation2 + $0x88] sm:$0xff] %v8886_v45   ;;  %v2809_v50 = vrot.slane %v2229_v49, 7  ;;  %v2754_v62 = vadd.f32 %v2671_v52, %v1721_v8  ;;  %v3517_v8 = vsub.s32 %v3301_v13, %v3463_v60  ;;  %vm3680_vm8 = vmand %vm3572_vm4, %vm3626_vm5 }
 0x461   : > { %v3192_v3 = vmul.f32 0.1, %v3138_v33 }
 0x462   : > { %v2847_v61 = vsel %vm13571_vm0, %v2808_v24, %v2809_v50  ;;  %v2973_v28 = vrot.slane %v2754_v62, 1  ;;  %vm3733_vm7 = vcmp.ge.s32.totalorder %v3517_v8, 1  ;;  %vm3841_vm11 = vcmp.le.s32.totalorder %v3517_v8, 16 }
 0x463   : > { %v11864_v10 = vadd.f32 %v2847_v61, %v2492_v37  ;;  %vm3787_vm10 = vmand %vm3679_vm6, %vm3733_vm7 }
 0x464   : > { %v3011_v47 = vsel %vm13572_vm1, %v2972_v31, %v2973_v28  ;;  %v3464_v31 = vmul.u32 24, %v3410_v34 }
 0x465   : > { %v3081_v54 = vadd.f32 %v3011_v47, %v11823_v1  ;;  %v2150_v4 = vpop.f32.mrf.mxu2  ;;  %v3246_v1 = vmax.f32 %v3138_v33, %v3192_v3  ;;  %v13877_v47 = vld [vmem:[#allocation117_spill] sm:$0xff]  ;;  %v13878_v3 = vld [vmem:[#allocation22_spill] sm:$0xff] }
 0x466   : > { %v2230_v11 = vadd.f32 %v2150_v4, %v13872_v32  ;;  %v2413_v48 = vpop.f32.mrf.mxu3  ;;  %v3518_v27 = vsub.s32 %v3302_v40, %v3464_v31  ;;  %v3357_v40 = vmul.u32 683, %v3303_v55  ;;  %v1729_v57 = vadd.f32 %v11829_v35, %v13877_v47  ;;  %v13880_v31 = vld [vmem:[#allocation120_spill] sm:$0xff] }
 0x467   : > { %v3139_v21 = vadd.f32 %v11815_v29, %v3081_v54  ;;  %v2674_v5 = vpop.f32.mrf.mxu0  ;;  %v2493_v19 = vadd.f32 %v2413_v48, %v13873_v44  ;;  %v3947_v7 = vsel %vm3893_vm14, %v3246_v1, 0.0  ;;  %v11893_v36 = vpop.f32.mrf.mxu1  ;;  %vm3895_vm14 = vmand %vm3787_vm10, %vm3841_vm11 }
 0x468   : > { %v2810_v43 = vrot.slane %v2230_v11, 7  ;;  %v2755_v41 = vadd.f32 %v2674_v5, %v1724_v14  ;;  %vm3734_vm9 = vcmp.ge.s32.totalorder %v3518_v27, 1  ;;  %vm3842_vm13 = vcmp.le.s32.totalorder %v3518_v27, 16 }
 0x469   : > { %v3193_v24 = vmul.f32 0.1, %v3139_v21  ;;  %vm3788_vm12 = vmand %vm3680_vm8, %vm3734_vm9  ;;  %v3411_v32 = vshra.s32 %v3357_v40, 14 }
 0x46a   : > { %v2846_v9 = vsel %vm13571_vm0, %v2809_v50, %v2810_v43  ;;  %v2974_v42 = vrot.slane %v2755_v41, 1  ;;  %2713 = vmatmul.bf16.gmra.mxu0 %v11836_v16  ;;  %v13876_v50 = vld [vmem:[#allocation114_spill] sm:$0xff] }
 0x46b   : > { %v3247_v12 = vmax.f32 %v3139_v21, %v3193_v24  ;;  %v11879_v0 = vadd.f32 %v2846_v9, %v2493_v19  ;;  %v3465_v24 = vmul.u32 24, %v3411_v32  ;;  %vm3573_vm2 = vcmp.ge.s32.totalorder %v3411_v32, 1 }
 0x46c   : > { %v3010_v56 = vsel %vm13572_vm1, %v2973_v28, %v2974_v42  ;;  %vm3627_vm3 = vcmp.le.s32.totalorder %v3411_v32, 16 }
 0x46d   : > { %v3948_v17 = vsel %vm3894_vm15, %v3247_v12, 0.0  ;;  %v3082_v51 = vadd.f32 %v3010_v56, %v11844_v15  ;;  %v2153_v26 = vpop.f32.mrf.mxu2  ;;  %v3304_v15 = vadd.s32 304, %v10892_v53  ;;  %vm3896_vm15 = vmand %vm3788_vm12, %vm3842_vm13 }
 0x46e   : > { %v8891_v22 = vpack.c.bf16 %v3948_v17, %v3947_v7  ;;  %v2231_v23 = vadd.f32 %v2153_v26, %v13875_v25  ;;  %v2416_v16 = vpop.f32.mrf.mxu3  ;;  %v1731_v7 = vadd.f32 %v11853_v46, %v13880_v31  ;;  %v3305_v25 = vadd.s32 312, %v10892_v53  ;;  %v8630_v46 = vld [vmem:[%s13565_s3 + $0xc8] sm:$0xff]  ;;  %vm3681_vm6 = vmand %vm3573_vm2, %vm3627_vm3 }
 0x46f   : > { %v2676_v45 = vpop.f32.mrf.mxu0  ;;  %v3140_v52 = vadd.f32 %v11815_v29, %v3082_v51  ;;  %v2494_v20 = vadd.f32 %v2416_v16, %v13876_v50  ;;  %v3358_v37 = vmul.u32 683, %v3304_v15  ;;  %v11913_v9 = vpop.f32.mrf.mxu1  ;;  %v13881_v51 = vld [vmem:[#allocation24_spill] sm:$0xff]  ;;  %4416 = vmatpush.bf16.msra.mxu1 %v8630_v46 }
 0x470   : > { %9323 = vst [vmem:[#allocation2 + $0x90] sm:$0xff] %v8891_v22   ;;  %v2811_v49 = vrot.slane %v2231_v23, 7  ;;  %v2756_v2 = vadd.f32 %v2676_v45, %v1726_v39  ;;  %v3519_v39 = vsub.s32 %v3303_v55, %v3465_v24 }
 0x471   : > { %v3194_v61 = vmul.f32 0.1, %v3140_v52  ;;  %v3412_v21 = vshra.s32 %v3358_v37, 14 }
 0x472   : > { %v2845_v13 = vsel %vm13571_vm0, %v2810_v43, %v2811_v49  ;;  %v2975_v62 = vrot.slane %v2756_v2, 1  ;;  %vm3735_vm7 = vcmp.ge.s32.totalorder %v3519_v39, 1  ;;  %vm3843_vm11 = vcmp.le.s32.totalorder %v3519_v39, 16 }
 0x473   : > { %v11897_v33 = vadd.f32 %v2845_v13, %v2494_v20  ;;  %v3248_v5 = vmax.f32 %v3140_v52, %v3194_v61  ;;  %v3466_v19 = vmul.u32 24, %v3412_v21  ;;  %vm3574_vm4 = vcmp.ge.s32.totalorder %v3412_v21, 1  ;;  %vm3789_vm10 = vmand %vm3681_vm6, %vm3735_vm7  ;;  %v13884_v61 = vld [vmem:[#allocation26_spill] sm:$0xff] }
 0x474   : > { %v3009_v38 = vsel %vm13572_vm1, %v2974_v42, %v2975_v62  ;;  %vm3628_vm5 = vcmp.le.s32.totalorder %v3412_v21, 16  ;;  %v3359_v52 = vmul.u32 683, %v3305_v25 }
 0x475   : > { %v3083_v28 = vadd.f32 %v3009_v38, %v11864_v10  ;;  %v2155_v58 = vpop.f32.mrf.mxu2  ;;  %v3949_v42 = vsel %vm3895_vm14, %v3248_v5, 0.0  ;;  %v3520_v8 = vsub.s32 %v3304_v15, %v3466_v19  ;;  %vm3682_vm8 = vmand %vm3574_vm4, %vm3628_vm5  ;;  %v13883_v38 = vld [vmem:[#allocation123_spill] sm:$0xff]  ;;  %v13886_v19 = vld [vmem:[#allocation126_spill] sm:$0xff] }
 0x476   : > { %v2232_v54 = vadd.f32 %v2155_v58, %v13878_v3  ;;  %v2418_v4 = vpop.f32.mrf.mxu3  ;;  %v1734_v37 = vadd.f32 %v11873_v30, %v13883_v38  ;;  %vm3897_vm14 = vmand %vm3789_vm10, %vm3843_vm11  ;;  %v13885_v30 = vld [vmem:[#allocation122_spill] sm:$0xff] }
 0x477   : > { %v3141_v18 = vadd.f32 %v11815_v29, %v3083_v28  ;;  %v2679_v14 = vpop.f32.mrf.mxu0  ;;  %v2495_v43 = vadd.f32 %v2418_v4, %v13879_v59  ;;  %vm3736_vm9 = vcmp.ge.s32.totalorder %v3520_v8, 1  ;;  %v11938_v47 = vpop.f32.mrf.mxu1  ;;  %vm3844_vm13 = vcmp.le.s32.totalorder %v3520_v8, 16 }
 0x478   : > { %v2812_v11 = vrot.slane %v2232_v54, 7  ;;  %v2757_v48 = vadd.f32 %v2679_v14, %v1729_v57  ;;  %vm3790_vm12 = vmand %vm3682_vm8, %vm3736_vm9  ;;  %v3413_v54 = vshra.s32 %v3359_v52, 14  ;;  %v13889_v52 = vld [vmem:[#allocation129_spill] sm:$0xff] }
 0x479   : > { %v3195_v10 = vmul.f32 0.1, %v3141_v18 }
 0x47a   : > { %v2844_v35 = vsel %vm13571_vm0, %v2811_v49, %v2812_v11  ;;  %v2976_v41 = vrot.slane %v2757_v48, 1  ;;  %v13882_v49 = vld [vmem:[#allocation119_spill] sm:$0xff]  ;;  %v3467_v59 = vmul.u32 24, %v3413_v54  ;;  %vm3575_vm2 = vcmp.ge.s32.totalorder %v3413_v54, 1 }
 0x47b   : > { %v3249_v34 = vmax.f32 %v3141_v18, %v3195_v10  ;;  %v11909_v1 = vadd.f32 %v2844_v35, %v2495_v43  ;;  %vm3629_vm3 = vcmp.le.s32.totalorder %v3413_v54, 16 }
 0x47c   : > { %v3008_v44 = vsel %vm13572_vm1, %v2975_v62, %v2976_v41  ;;  %vm3683_vm6 = vmand %vm3575_vm2, %vm3629_vm3 }
 0x47d   : > { %v3950_v12 = vsel %vm3896_vm15, %v3249_v34, 0.0  ;;  %v3084_v60 = vadd.f32 %v3008_v44, %v11879_v0  ;;  %v2158_v56 = vpop.f32.mrf.mxu2  ;;  %v3306_v0 = vadd.s32 320, %v10892_v53  ;;  %vm3898_vm15 = vmand %vm3790_vm12, %vm3844_vm13 }
 0x47e   : > { %v8896_v17 = vpack.c.bf16 %v3950_v12, %v3949_v42  ;;  %v2233_v26 = vadd.f32 %v2158_v56, %v13881_v51  ;;  %v2421_v63 = vpop.f32.mrf.mxu3  ;;  %v1736_v42 = vadd.f32 %v11893_v36, %v13886_v19  ;;  %v3307_v51 = vadd.s32 328, %v10892_v53 }
 0x47f   : > { %v2681_v22 = vpop.f32.mrf.mxu0  ;;  %v3142_v45 = vadd.f32 %v11815_v29, %v3084_v60  ;;  %v2496_v2 = vadd.f32 %v2421_v63, %v13882_v49  ;;  %v3360_v20 = vmul.u32 683, %v3306_v0  ;;  %v13887_v60 = vld [vmem:[#allocation28_spill] sm:$0xff] }
 0x480   : > { %9324 = vst [vmem:[#allocation2 + $0x98] sm:$0xff] %v8896_v17   ;;  %v2813_v23 = vrot.slane %v2233_v26, 7  ;;  %v2758_v16 = vadd.f32 %v2681_v22, %v1731_v7  ;;  %v3521_v7 = vsub.s32 %v3305_v25, %v3467_v59  ;;  %v11954_v22 = vpop.f32.mrf.mxu1 }
 0x481   : > { %v3196_v13 = vmul.f32 0.1, %v3142_v45 }
 0x482   : > { %v2843_v55 = vsel %vm13571_vm0, %v2812_v11, %v2813_v23  ;;  %v2977_v27 = vrot.slane %v2758_v16, 1  ;;  %vm3737_vm7 = vcmp.ge.s32.totalorder %v3521_v7, 1  ;;  %vm3845_vm11 = vcmp.le.s32.totalorder %v3521_v7, 16 }
 0x483   : > { %v11930_v15 = vadd.f32 %v2843_v55, %v2496_v2  ;;  %v3250_v14 = vmax.f32 %v3142_v45, %v3196_v13  ;;  %vm3791_vm10 = vmand %vm3683_vm6, %vm3737_vm7 }
 0x484   : > { %v3007_v50 = vsel %vm13572_vm1, %v2976_v41, %v2977_v27 }
 0x485   : > { %v3085_v62 = vadd.f32 %v3007_v50, %v11897_v33  ;;  %v2160_v40 = vpop.f32.mrf.mxu2  ;;  %v3414_v33 = vshra.s32 %v3360_v20, 14  ;;  %v3951_v41 = vsel %vm3897_vm14, %v3250_v14, 0.0  ;;  %v1739_v50 = vadd.f32 %v11913_v9, %v13889_v52  ;;  %v13890_v20 = vld [vmem:[#allocation30_spill] sm:$0xff]  ;;  %vm3899_vm14 = vmand %vm3791_vm10, %vm3845_vm11 }
 0x486   : > { %v2234_v28 = vadd.f32 %v2160_v40, %v13884_v61  ;;  %v2423_v58 = vpop.f32.mrf.mxu3 }
 0x487   : > { %v3143_v57 = vadd.f32 %v11815_v29, %v3085_v62  ;;  %v2684_v3 = vpop.f32.mrf.mxu0  ;;  %v2497_v11 = vadd.f32 %v2423_v58, %v13885_v30  ;;  %v3468_v35 = vmul.u32 24, %v3414_v33  ;;  %vm3576_vm4 = vcmp.ge.s32.totalorder %v3414_v33, 1 }
 0x488   : > { %v2814_v4 = vrot.slane %v2234_v28, 7  ;;  %v2759_v18 = vadd.f32 %v2684_v3, %v1734_v37  ;;  %vm3630_vm5 = vcmp.le.s32.totalorder %v3414_v33, 16  ;;  %v13891_v3 = vld [vmem:[#allocation128_spill] sm:$0xff] }
 0x489   : > { %v3197_v32 = vmul.f32 0.1, %v3143_v57  ;;  %v3522_v39 = vsub.s32 %v3306_v0, %v3468_v35  ;;  %v3361_v0 = vmul.u32 683, %v3307_v51  ;;  %vm3684_vm8 = vmand %vm3576_vm4, %vm3630_vm5 }
 0x48a   : > { %v2842_v48 = vsel %vm13571_vm0, %v2813_v23, %v2814_v4  ;;  %v2978_v21 = vrot.slane %v2759_v18, 1  ;;  %v13888_v23 = vld [vmem:[#allocation125_spill] sm:$0xff]  ;;  %v11974_v18 = vpop.f32.mrf.mxu1 }
 0x48b   : > { %v3251_v5 = vmax.f32 %v3143_v57, %v3197_v32  ;;  %v11944_v10 = vadd.f32 %v2842_v48, %v2497_v11  ;;  %vm3738_vm9 = vcmp.ge.s32.totalorder %v3522_v39, 1  ;;  %vm3846_vm13 = vcmp.le.s32.totalorder %v3522_v39, 16 }
 0x48c   : > { %v3006_v43 = vsel %vm13572_vm1, %v2977_v27, %v2978_v21  ;;  %vm3792_vm12 = vmand %vm3684_vm8, %vm3738_vm9  ;;  %v3415_v37 = vshra.s32 %v3361_v0, 14  ;;  %v13895_v0 = vld [vmem:[#allocation135_spill] sm:$0xff] }
 0x48d   : > { %v3952_v34 = vsel %vm3898_vm15, %v3251_v5, 0.0  ;;  %v3086_v24 = vadd.f32 %v3006_v43, %v11909_v1  ;;  %v2163_v44 = vpop.f32.mrf.mxu2  ;;  %v3308_v1 = vadd.s32 336, %v10892_v53  ;;  %vm3900_vm15 = vmand %vm3792_vm12, %vm3846_vm13  ;;  %v13892_v43 = vld [vmem:[#allocation132_spill] sm:$0xff] }
 0x48e   : > { %v8901_v12 = vpack.c.bf16 %v3952_v34, %v3951_v41  ;;  %v2235_v56 = vadd.f32 %v2163_v44, %v13887_v60  ;;  %v2426_v31 = vpop.f32.mrf.mxu3  ;;  %v3469_v32 = vmul.u32 24, %v3415_v37  ;;  %v1741_v35 = vadd.f32 %v11938_v47, %v13892_v43  ;;  %v13893_v34 = vld [vmem:[#allocation32_spill] sm:$0xff] }
 0x48f   : > { %v2686_v17 = vpop.f32.mrf.mxu0  ;;  %v3144_v36 = vadd.f32 %v11815_v29, %v3086_v24  ;;  %v2498_v16 = vadd.f32 %v2426_v31, %v13888_v23  ;;  %v3362_v49 = vmul.u32 683, %v3308_v1  ;;  %vm3577_vm2 = vcmp.ge.s32.totalorder %v3415_v37, 1 }
 0x490   : > { %9325 = vst [vmem:[#allocation2 + $0xa0] sm:$0xff] %v8901_v12   ;;  %v2815_v26 = vrot.slane %v2235_v56, 7  ;;  %v2760_v63 = vadd.f32 %v2686_v17, %v1736_v42  ;;  %v3523_v19 = vsub.s32 %v3307_v51, %v3469_v32  ;;  %vm3631_vm3 = vcmp.le.s32.totalorder %v3415_v37, 16  ;;  %v13894_v17 = vld [vmem:[#allocation131_spill] sm:$0xff]  ;;  %v13898_v32 = vld [vmem:[#allocation137_spill] sm:$0xff] }
 0x491   : > { %v3198_v2 = vmul.f32 0.1, %v3144_v36  ;;  %v3416_v58 = vshra.s32 %v3362_v49, 14  ;;  %v3309_v12 = vadd.s32 344, %v10892_v53  ;;  %vm3685_vm6 = vmand %vm3577_vm2, %vm3631_vm3  ;;  %v13896_v49 = vld [vmem:[#allocation34_spill] sm:$0xff] }
 0x492   : > { %v2841_v25 = vsel %vm13571_vm0, %v2814_v4, %v2815_v26  ;;  %v2979_v8 = vrot.slane %v2760_v63, 1  ;;  %vm3739_vm7 = vcmp.ge.s32.totalorder %v3523_v19, 1  ;;  %v11995_v23 = vpop.f32.mrf.mxu1  ;;  %vm3847_vm11 = vcmp.le.s32.totalorder %v3523_v19, 16  ;;  %v8619_v19 = vld [vmem:[%s13565_s3 + $0x78] sm:$0xff] }
 0x493   : > { %v11962_v46 = vadd.f32 %v2841_v25, %v2498_v16  ;;  %v3252_v57 = vmax.f32 %v3144_v36, %v3198_v2  ;;  %v3470_v11 = vmul.u32 24, %v3416_v58  ;;  %vm3578_vm4 = vcmp.ge.s32.totalorder %v3416_v58, 1  ;;  %vm3793_vm10 = vmand %vm3685_vm6, %vm3739_vm7  ;;  %5063 = vmatpush.bf16.msrb.mxu0 %v8619_v19 }
 0x494   : > { %v3005_v45 = vsel %vm13572_vm1, %v2978_v21, %v2979_v8  ;;  %vm3632_vm5 = vcmp.le.s32.totalorder %v3416_v58, 16  ;;  %v3363_v39 = vmul.u32 683, %v3309_v12 }
 0x495   : > { %v3087_v55 = vadd.f32 %v3005_v45, %v11930_v15  ;;  %v2165_v27 = vpop.f32.mrf.mxu2  ;;  %v3953_v48 = vsel %vm3899_vm14, %v3252_v57, 0.0  ;;  %v3524_v31 = vsub.s32 %v3308_v1, %v3470_v11  ;;  %vm3686_vm8 = vmand %vm3578_vm4, %vm3632_vm5  ;;  %v1744_v45 = vadd.f32 %v11954_v22, %v13895_v0  ;;  %v13905_v0 = vld [vmem:[#allocation139_spill] sm:$0xff] }
 0x496   : > { %v2236_v13 = vadd.f32 %v2165_v27, %v13890_v20  ;;  %v2428_v62 = vpop.f32.mrf.mxu3  ;;  %vm3901_vm14 = vmand %vm3793_vm10, %vm3847_vm11 }
 0x497   : > { %v3145_v40 = vadd.f32 %v11815_v29, %v3087_v55  ;;  %v2689_v38 = vpop.f32.mrf.mxu0  ;;  %v2499_v54 = vadd.f32 %v2428_v62, %v13891_v3  ;;  %vm3740_vm9 = vcmp.ge.s32.totalorder %v3524_v31, 1  ;;  %vm3848_vm13 = vcmp.le.s32.totalorder %v3524_v31, 16 }
 0x498   : > { %v2816_v61 = vrot.slane %v2236_v13, 7  ;;  %v2761_v28 = vadd.f32 %v2689_v38, %v1739_v50  ;;  %vm3794_vm12 = vmand %vm3686_vm8, %vm3740_vm9  ;;  %v3417_v50 = vshra.s32 %v3363_v39, 14  ;;  %v13897_v38 = vld [vmem:[#allocation134_spill] sm:$0xff]  ;;  %v8610_v39 = vld [vmem:[%s13565_s3 + $0x30] sm:$0xff] }
 0x499   : > { %v3199_v15 = vmul.f32 0.1, %v3145_v40 }
 0x49a   : > { %v2840_v9 = vsel %vm13571_vm0, %v2815_v26, %v2816_v61  ;;  %v2980_v4 = vrot.slane %v2761_v28, 1  ;;  %v3471_v57 = vmul.u32 24, %v3417_v50  ;;  %vm3579_vm2 = vcmp.ge.s32.totalorder %v3417_v50, 1 }
 0x49b   : > { %v3253_v33 = vmax.f32 %v3145_v40, %v3199_v15  ;;  %v11976_v14 = vadd.f32 %v2840_v9, %v2499_v54  ;;  %vm3633_vm3 = vcmp.le.s32.totalorder %v3417_v50, 16 }
 0x49c   : > { %v3004_v30 = vsel %vm13572_vm1, %v2979_v8, %v2980_v4  ;;  %v3525_v43 = vsub.s32 %v3309_v12, %v3471_v57  ;;  %v13900_v12 = vld [vmem:[#allocation136_spill] sm:$0xff]  ;;  %vm12036_vm6 = vmand %vm3579_vm2, %vm3633_vm3 }
 0x49d   : > { %v3954_v21 = vsel %vm3900_vm15, %v3253_v33, 0.0  ;;  %v3088_v5 = vadd.f32 %v3004_v30, %v11944_v10  ;;  %v2168_v59 = vpop.f32.mrf.mxu2  ;;  %v3310_v10 = vadd.s32 352, %v10892_v53  ;;  %vm3902_vm15 = vmand %vm3794_vm12, %vm3848_vm13  ;;  %v1746_v30 = vadd.f32 %v11974_v18, %v13898_v32  ;;  %v8608_v32 = vld [vmem:[%s13565_s3 + $0x20] sm:$0xff] }
 0x49e   : > { %v8906_v41 = vpack.c.bf16 %v3954_v21, %v3953_v48  ;;  %v2237_v24 = vadd.f32 %v2168_v59, %v13893_v34  ;;  %v2431_v44 = vpop.f32.mrf.mxu3  ;;  %v13899_v48 = vld [vmem:[#allocation36_spill] sm:$0xff]  ;;  %v12015_v59 = vpop.f32.mrf.mxu1  ;;  %v12022_v18 = vadd.s32 368, %v10892_v53  ;;  %vm3741_vm7 = vcmp.ge.s32.totalorder %v3525_v43, 1 }
 0x49f   : > { %v2691_v42 = vpop.f32.mrf.mxu0  ;;  %v3146_v7 = vadd.f32 %v11815_v29, %v3088_v5  ;;  %v2500_v47 = vadd.f32 %v2431_v44, %v13894_v17  ;;  %v3364_v36 = vmul.u32 683, %v3310_v10  ;;  %v8611_v44 = vld [vmem:[%s13565_s3 + $0x38] sm:$0xff]  ;;  %vm12064_vm10 = vmand %vm12036_vm6, %vm3741_vm7  ;;  %vm3849_vm11 = vcmp.le.s32.totalorder %v3525_v43, 16  ;;  %v13912_v43 = vld [vmem:[#allocation141_spill] sm:$0xff] }
 0x4a0   : > { %9326 = vst [vmem:[#allocation2 + $0xa8] sm:$0xff] %v8906_v41   ;;  %v2817_v60 = vrot.slane %v2237_v24, 7  ;;  %v2762_v56 = vadd.f32 %v2691_v42, %v1741_v35  ;;  %v12018_v41 = vadd.s32 360, %v10892_v53  ;;  %4662 = vmatpush.bf16.msrb.mxu2 %v8611_v44 }
 0x4a1   : > { %v3200_v16 = vmul.f32 0.1, %v3146_v7  ;;  %v3418_v62 = vshra.s32 %v3364_v36, 14 }
 0x4a2   : > { %v2839_v51 = vsel %vm13571_vm0, %v2816_v61, %v2817_v60  ;;  %v2981_v26 = vrot.slane %v2762_v56, 1  ;;  %v3365_v17 = vmul.u32 683, %v12018_v41 }
 0x4a3   : > { %v11991_v63 = vadd.f32 %v2839_v51, %v2500_v47  ;;  %v3254_v40 = vmax.f32 %v3146_v7, %v3200_v16  ;;  %v3472_v3 = vmul.u32 24, %v3418_v62  ;;  %vm3580_vm4 = vcmp.ge.s32.totalorder %v3418_v62, 1 }
 0x4a4   : > { %v3003_v1 = vsel %vm13572_vm1, %v2980_v4, %v2981_v26  ;;  %vm3634_vm5 = vcmp.le.s32.totalorder %v3418_v62, 16  ;;  %4663 = vmatpush.bf16.msrb.mxu2 %v8610_v39  ;;  %v3419_v50 = vshra.s32 %v3365_v17, 14  ;;  %v13914_v17 = vld [vmem:[#allocation140_spill] sm:$0xff] }
 0x4a5   : > { %v3089_v25 = vadd.f32 %v3003_v1, %v11962_v46  ;;  %v2170_v8 = vpop.f32.mrf.mxu2  ;;  %v3955_v54 = vsel %vm3901_vm14, %v3254_v40, 0.0  ;;  %v3526_v24 = vsub.s32 %v3310_v10, %v3472_v3  ;;  %vm12045_vm8 = vmand %vm3580_vm4, %vm3634_vm5  ;;  %v8618_v1 = vld [vmem:[%s13565_s3 + $0x70] sm:$0xff]  ;;  %v8609_v40 = vld [vmem:[%s13565_s3 + $0x28] sm:$0xff] }
 0x4a6   : > { %v2238_v2 = vadd.f32 %v2170_v8, %v13896_v49  ;;  %v2433_v55 = vpop.f32.mrf.mxu3  ;;  %v8629_v8 = vld [vmem:[%s13565_s3 + $0xc0] sm:$0xff]  ;;  %5064 = vmatpush.bf16.msrb.mxu0 %v8618_v1  ;;  %vm3903_vm14 = vmand %vm12064_vm10, %vm3849_vm11  ;;  %vm3581_vm2 = vcmp.ge.s32.totalorder %v3419_v50, 1  ;;  %vm3635_vm3 = vcmp.le.s32.totalorder %v3419_v50, 16  ;;  %v8614_v49 = vld [vmem:[%s13565_s3 + $0x50] sm:$0xff] }
 0x4a7   : > { %v3147_v27 = vadd.f32 %v11815_v29, %v3089_v25  ;;  %v2694_v52 = vpop.f32.mrf.mxu0  ;;  %v2501_v37 = vadd.f32 %v2433_v55, %v13897_v38  ;;  %vm3742_vm9 = vcmp.ge.s32.totalorder %v3526_v24, 1  ;;  %vm3850_vm13 = vcmp.le.s32.totalorder %v3526_v24, 16  ;;  %4417 = vmatpush.bf16.msra.mxu1 %v8629_v8  ;;  %v12083_v38 = vpop.f32.mrf.mxu1  ;;  %vm12138_vm6 = vmand %vm3581_vm2, %vm3635_vm3  ;;  %v13930_v8 = vld [vmem:[#allocation144_spill] sm:$0xff] }
 0x4a8   : > { %v2818_v20 = vrot.slane %v2238_v2, 7  ;;  %v2763_v13 = vadd.f32 %v2694_v52, %v1744_v45  ;;  %v1749_v45 = vadd.f32 %v11995_v23, %v13905_v0  ;;  %v13908_v2 = vld [vmem:[#allocation38_spill] sm:$0xff]  ;;  %vm12073_vm12 = vmand %vm12045_vm8, %vm3742_vm9  ;;  %4664 = vmatpush.bf16.msrb.mxu2 %v8609_v40  ;;  %v13919_v52 = vld [vmem:[#allocation143_spill] sm:$0xff] }
 0x4a9   : > { %v3201_v46 = vmul.f32 0.1, %v3147_v27  ;;  %v13934_v40 = vld [vmem:[#allocation46_spill] sm:$0xff] }
 0x4aa   : > { %v2838_v22 = vsel %vm13571_vm0, %v2817_v60, %v2818_v20  ;;  %v2982_v61 = vrot.slane %v2763_v13, 1 }
 0x4ab   : > { %v3255_v28 = vmax.f32 %v3147_v27, %v3201_v46  ;;  %v12005_v58 = vadd.f32 %v2838_v22, %v2501_v37  ;;  %v8617_v46 = vld [vmem:[%s13565_s3 + $0x68] sm:$0xff] }
 0x4ac   : > { %v3002_v15 = vsel %vm13572_vm1, %v2981_v26, %v2982_v61  ;;  %v3366_v26 = vmul.u32 683, %v12022_v18  ;;  %5065 = vmatpush.bf16.msrb.mxu0 %v8617_v46  ;;  %4665 = vmatpush.bf16.msrb.mxu2 %v8608_v32 }
 0x4ad   : > { %v3956_v9 = vsel %vm3902_vm15, %v3255_v28, 0.0  ;;  %v3090_v4 = vadd.f32 %v3002_v15, %v11976_v14  ;;  %v2173_v33 = vpop.f32.mrf.mxu2  ;;  %vm3904_vm15 = vmand %vm12073_vm12, %vm3850_vm13 }
 0x4ae   : > { %v8911_v11 = vpack.c.bf16 %v3956_v9, %v3955_v54  ;;  %v12013_v21 = vadd.f32 %v2173_v33, %v13899_v48  ;;  %v2436_v5 = vpop.f32.mrf.mxu3  ;;  %v3420_v62 = vshra.s32 %v3366_v26, 14  ;;  %v3473_v9 = vmul.u32 24, %v3419_v50 }
 0x4af   : > { %v2696_v35 = vpop.f32.mrf.mxu0  ;;  %v3148_v42 = vadd.f32 %v11815_v29, %v3090_v4  ;;  %v2502_v60 = vadd.f32 %v2436_v5, %v13900_v12  ;;  %v12111_v12 = vadd.s32 376, %v10892_v53  ;;  %v1755_v39 = vpop.f32.mrf.mxu1 }
 0x4b0   : > { %9327 = vst [vmem:[#allocation2 + $0xb0] sm:$0xff] %v8911_v11   ;;  %v2819_v14 = vrot.slane %v12013_v21, 7  ;;  %v2764_v34 = vadd.f32 %v2696_v35, %v1746_v30  ;;  %v3474_v33 = vmul.u32 24, %v3420_v62  ;;  %v8616_v30 = vld [vmem:[%s13565_s3 + $0x60] sm:$0xff]  ;;  %v1751_v35 = vadd.f32 %v12015_v59, %v13912_v43 }
 0x4b1   : > { %v3202_v36 = vmul.f32 0.1, %v3148_v42  ;;  %5066 = vmatpush.bf16.msrb.mxu0 %v8616_v30  ;;  %v3527_v19 = vsub.s32 %v12018_v41, %v3473_v9  ;;  %v8607_v41 = vld [vmem:[%s13565_s3 + $0x18] sm:$0xff]  ;;  %vm3582_vm4 = vcmp.ge.s32.totalorder %v3420_v62, 1  ;;  %vm3636_vm5 = vcmp.le.s32.totalorder %v3420_v62, 16  ;;  %v13927_v9 = vld [vmem:[#allocation142_spill] sm:$0xff] }
 0x4b2   : > { %v2837_v56 = vsel %vm13571_vm0, %v2818_v20, %v2819_v14  ;;  %v2983_v31 = vrot.slane %v2764_v34, 1  ;;  %v13913_v34 = vld [vmem:[#allocation40_spill] sm:$0xff]  ;;  %v3528_v59 = vsub.s32 %v12022_v18, %v3474_v33  ;;  %4666 = vmatpush.bf16.msrb.mxu2 %v8607_v41  ;;  %vm12147_vm8 = vmand %vm3582_vm4, %vm3636_vm5  ;;  %v8642_v33 = vld [vmem:[%s13565_s3 + $0x128] sm:$0xff] }
 0x4b3   : > { %v12040_v7 = vadd.f32 %v2837_v56, %v2502_v60  ;;  %v3256_v37 = vmax.f32 %v3148_v42, %v3202_v36  ;;  %v12118_v56 = vadd.s32 384, %v10892_v53  ;;  %v8644_v18 = vld [vmem:[%s13565_s3 + $0x138] sm:$0xff]  ;;  %vm3743_vm7 = vcmp.ge.s32.totalorder %v3527_v19, 1 }
 0x4b4   : > { %v3001_v47 = vsel %vm13572_vm1, %v2982_v61, %v2983_v31  ;;  %v13911_v61 = vld [vmem:[#allocation138_spill] sm:$0xff]  ;;  %4871 = vmatpush.bf16.msrb.mxu3 %v8644_v18  ;;  %vm3744_vm9 = vcmp.ge.s32.totalorder %v3528_v59, 1  ;;  %vm12168_vm10 = vmand %vm12138_vm6, %vm3743_vm7  ;;  %vm3851_vm11 = vcmp.le.s32.totalorder %v3527_v19, 16  ;;  %vm3852_vm13 = vcmp.le.s32.totalorder %v3528_v59, 16 }
 0x4b5   : > { %v3091_v16 = vadd.f32 %v3001_v47, %v11991_v63  ;;  %v2175_v25 = vpop.f32.mrf.mxu2  ;;  %v3957_v11 = vsel %vm3903_vm14, %v3256_v37, 0.0  ;;  %v3368_v0 = vmul.u32 683, %v12118_v56  ;;  %vm12179_vm12 = vmand %vm12147_vm8, %vm3744_vm9 }
 0x4b6   : > { %v2240_v55 = vadd.f32 %v2175_v25, %v13908_v2  ;;  %v2438_v27 = vpop.f32.mrf.mxu3  ;;  %vm12198_vm14 = vmand %vm12168_vm10, %vm3851_vm11 }
 0x4b7   : > { %v3149_v63 = vadd.f32 %v11815_v29, %v3091_v16  ;;  %v2699_v23 = vpop.f32.mrf.mxu0  ;;  %v2503_v28 = vadd.f32 %v2438_v27, %v13911_v61  ;;  %v3367_v16 = vmul.u32 683, %v12111_v12  ;;  %v12186_v61 = vshra.s32 %v3368_v0, 14 }
 0x4b8   : > { %v2820_v20 = vrot.slane %v2240_v55, 7  ;;  %v2765_v13 = vadd.f32 %v2699_v23, %v1749_v45  ;;  %v8606_v45 = vld [vmem:[%s13565_s3 + $0x10] sm:$0xff]  ;;  %v1754_v23 = vadd.f32 %v12083_v38, %v13919_v52 }
 0x4b9   : > { %v3203_v22 = vmul.f32 0.1, %v3149_v63  ;;  %4667 = vmatpush.bf16.msrb.mxu2 %v8606_v45  ;;  %v3421_v38 = vshra.s32 %v3367_v16, 14  ;;  %v3476_v43 = vmul.u32 24, %v12186_v61  ;;  %vm3584_vm4 = vcmp.ge.s32.totalorder %v12186_v61, 1  ;;  %v8640_v45 = vld [vmem:[%s13565_s3 + $0x118] sm:$0xff] }
 0x4ba   : > { %v2836_v57 = vsel %vm13571_vm0, %v2819_v14, %v2820_v20  ;;  %v2984_v15 = vrot.slane %v2765_v13, 1  ;;  %vm3638_vm5 = vcmp.le.s32.totalorder %v12186_v61, 16 }
 0x4bb   : > { %v3257_v3 = vmax.f32 %v3149_v63, %v3203_v22  ;;  %v12093_v54 = vadd.f32 %v2836_v57, %v2503_v28  ;;  %v8643_v63 = vld [vmem:[%s13565_s3 + $0x130] sm:$0xff]  ;;  %v8613_v28 = vld [vmem:[%s13565_s3 + $0x48] sm:$0xff]  ;;  %vm3583_vm2 = vcmp.ge.s32.totalorder %v3421_v38, 1  ;;  %vm3637_vm3 = vcmp.le.s32.totalorder %v3421_v38, 16  ;;  %vm3692_vm8 = vmand %vm3584_vm4, %vm3638_vm5 }
 0x4bc   : > { %v3000_v4 = vsel %vm13572_vm1, %v2983_v31, %v2984_v15  ;;  %v8615_v31 = vld [vmem:[%s13565_s3 + $0x58] sm:$0xff]  ;;  %4872 = vmatpush.bf16.msrb.mxu3 %v8643_v63  ;;  %v3530_v16 = vsub.s32 %v12118_v56, %v3476_v43  ;;  %vm3691_vm6 = vmand %vm3583_vm2, %vm3637_vm3 }
 0x4bd   : > { %v3958_v48 = vsel %vm3904_vm15, %v3257_v3, 0.0  ;;  %v3092_v21 = vadd.f32 %v3000_v4, %v12005_v58  ;;  %v2178_v5 = vpop.f32.mrf.mxu2  ;;  %5067 = vmatpush.bf16.msrb.mxu0 %v8615_v31  ;;  %vm3906_vm15 = vmand %vm12179_vm12, %vm3852_vm13  ;;  %v13929_v31 = vld [vmem:[#allocation44_spill] sm:$0xff] }
 0x4be   : > { %v8916_v14 = vpack.c.bf16 %v3958_v48, %v3957_v11  ;;  %v12107_v24 = vadd.f32 %v2178_v5, %v13913_v34  ;;  %v2441_v44 = vpop.f32.mrf.mxu3  ;;  %v1758_v34 = vpop.f32.mrf.mxu1  ;;  %vm3746_vm9 = vcmp.ge.s32.totalorder %v3530_v16, 1  ;;  %vm3854_vm13 = vcmp.le.s32.totalorder %v3530_v16, 16 }
 0x4bf   : > { %v2701_v42 = vpop.f32.mrf.mxu0  ;;  %v12127_v10 = vadd.f32 %v11815_v29, %v3092_v21  ;;  %v2504_v47 = vadd.f32 %v2441_v44, %v13914_v17  ;;  %v3475_v21 = vmul.u32 24, %v3421_v38  ;;  %vm3800_vm12 = vmand %vm3692_vm8, %vm3746_vm9 }
 0x4c0   : > { %9328 = vst [vmem:[#allocation2 + $0xb8] sm:$0xff] %v8916_v14   ;;  %v2821_v58 = vrot.slane %v12107_v24, 7  ;;  %v12114_v60 = vadd.f32 %v2701_v42, %v1751_v35  ;;  %4873 = vmatpush.bf16.msrb.mxu3 %v8642_v33  ;;  %v8604_v35 = vld [vmem:[%s13565_s3] sm:$0xff]  ;;  %v8638_v33 = vld [vmem:[%s13565_s3 + $0x108] sm:$0xff] }
 0x4c1   : > { %v3204_v2 = vmul.f32 0.1, %v12127_v10  ;;  %5068 = vmatpush.bf16.msrb.mxu0 %v8614_v49  ;;  %v8612_v14 = vld [vmem:[%s13565_s3 + $0x40] sm:$0xff]  ;;  %v3529_v18 = vsub.s32 %v12111_v12, %v3475_v21  ;;  %v3320_v21 = vmul.u32 683, %v10892_v53 }
 0x4c2   : > { %v2835_v51 = vsel %vm13571_vm0, %v2820_v20, %v2821_v58  ;;  %v2985_v26 = vrot.slane %v12114_v60, 1  ;;  %v13922_v20 = vld [vmem:[#allocation42_spill] sm:$0xff]  ;;  %v13928_v60 = vld [vmem:[#allocation145_spill] sm:$0xff] }
 0x4c3   : > { %v12142_v36 = vadd.f32 %v2835_v51, %v2504_v47  ;;  %v3258_v57 = vmax.f32 %v12127_v10, %v3204_v2  ;;  %v1756_v59 = vadd.f32 %v1755_v39, %v13928_v60  ;;  %v12231_v47 = vadd.s32 392, %v10892_v53 }
 0x4c4   : > { %v2999_v25 = vsel %vm13572_vm1, %v2984_v15, %v2985_v26  ;;  %v12235_v51 = vadd.s32 400, %v10892_v53  ;;  %vm3745_vm7 = vcmp.ge.s32.totalorder %v3529_v18, 1  ;;  %vm3853_vm11 = vcmp.le.s32.totalorder %v3529_v18, 16 }
 0x4c5   : > { %v3093_v55 = vadd.f32 %v2999_v25, %v12040_v7  ;;  %v2180_v27 = vpop.f32.mrf.mxu2  ;;  %5069 = vmatpush.bf16.msrb.mxu0 %v8613_v28  ;;  %v3959_v24 = vsel %vm12198_vm14, %v3258_v57, 0.0  ;;  %v12241_v25 = vld [vmem:[%s13564_s2] ss:$0 sm:$0xff]  ;;  %v3369_v2 = vmul.u32 683, %v12231_v47  ;;  %vm12265_vm10 = vmand %vm3691_vm6, %vm3745_vm7  ;;  %v12287_v60 = vadd.s32 408, %v10892_v53 }
 0x4c6   : > { %v12173_v13 = vadd.f32 %v2180_v27, %v13922_v20  ;;  %v2443_v7 = vpop.f32.mrf.mxu3  ;;  %v3370_v27 = vmul.u32 683, %v12235_v51  ;;  %v8639_v20 = vld [vmem:[%s13565_s3 + $0x110] sm:$0xff]  ;;  %vm3907_vm14 = vmand %vm12265_vm10, %vm3853_vm11 }
 0x4c7   : > { %v3151_v62 = vadd.f32 %v11815_v29, %v3093_v55  ;;  %v2704_v46 = vpop.f32.mrf.mxu0  ;;  %v8605_v29 = vld [vmem:[%s13565_s3 + $0x8] sm:$0xff]  ;;  %v2505_v4 = vadd.f32 %v2443_v7, %v13927_v9 }
 0x4c8   : > { %v2822_v37 = vrot.slane %v12173_v13, 7  ;;  %v12184_v22 = vadd.f32 %v2704_v46, %v1754_v23  ;;  %4668 = vmatpush.bf16.msrb.mxu2 %v8605_v29  ;;  %v13931_v13 = vld [vmem:[#allocation147_spill] sm:$0xff]  ;;  %v3424_v29 = vshra.s32 %v3370_v27, 14  ;;  %v13935_v9 = vld [vmem:[#allocation146_spill] sm:$0xff] }
 0x4c9   : > { %v3205_v3 = vmul.f32 0.1, %v3151_v62  ;;  %5070 = vmatpush.bf16.msrb.mxu0 %v8612_v14  ;;  %v1759_v7 = vadd.f32 %v1758_v34, %v13931_v13  ;;  %v13936_v14 = vld [vmem:[#allocation149_spill] sm:$0xff] }
 0x4ca   : > { %v2834_v32 = vsel %vm13571_vm0, %v2821_v58, %v2822_v37  ;;  %v2986_v30 = vrot.slane %v12184_v22, 1  ;;  %v8641_v58 = vld [vmem:[%s13565_s3 + $0x120] sm:$0xff]  ;;  %v1760_v22 = vpop.f32.mrf.mxu1  ;;  %vm3586_vm4 = vcmp.ge.s32.totalorder %v3424_v29, 1  ;;  %vm3640_vm5 = vcmp.le.s32.totalorder %v3424_v29, 16 }
 0x4cb   : > { %v3259_v11 = vmax.f32 %v3151_v62, %v3205_v3  ;;  %v12211_v48 = vadd.f32 %v2834_v32, %v2505_v4  ;;  %4874 = vmatpush.bf16.msrb.mxu3 %v8641_v58  ;;  %v1761_v34 = vadd.f32 %v1760_v22, %v13936_v14  ;;  %vm3694_vm8 = vmand %vm3586_vm4, %vm3640_vm5 }
 0x4cc   : > { %v2998_v5 = vsel %vm13572_vm1, %v2985_v26, %v2986_v30  ;;  %4669 = vmatpush.bf16.msrb.mxu2 %v8604_v35  ;;  %v8603_v26 = vld [vmem:[#allocation2] sm:$0xff]  ;;  %v3478_v35 = vmul.u32 24, %v3424_v29 }
 0x4cd   : > { %v3960_v44 = vsel %vm3906_vm15, %v3259_v11, 0.0  ;;  %v3094_v19 = vadd.f32 %v2998_v5, %v12093_v54  ;;  %v2183_v42 = vpop.f32.mrf.mxu2  ;;  %5071 = vmatmul.bf16.vlgmr.msrb.gmra.mxu0 %v8603_v26  ;;  %vm3908_vm15 = vmand %vm3800_vm12, %vm3854_vm13 }
 0x4ce   : > { %v8921_v41 = vpack.c.bf16 %v3960_v44, %v3959_v24  ;;  %v2243_v10 = vadd.f32 %v2183_v42, %v13929_v31  ;;  %v2446_v17 = vpop.f32.mrf.mxu3 }
 0x4cf   : > { %v2706_v54 = vpop.f32.mrf.mxu0  ;;  %v3152_v12 = vadd.f32 %v12241_v25, %v3094_v19  ;;  %v2506_v0 = vadd.f32 %v2446_v17, %v13930_v8  ;;  %4670 = vmatmul.bf16.vlgmr.msrb.gmra.mxu2 %v8603_v26  ;;  %4875 = vmatpush.bf16.msrb.mxu3 %v8640_v45 }
 0x4d0   : > { %9329 = vst [vmem:[#allocation2 + $0xc0] sm:$0xff] %v8921_v41   ;;  %v2823_v39 = vrot.slane %v2243_v10, 7  ;;  %v2768_v1 = vadd.f32 %v2706_v54, %v1756_v59  ;;  %v8637_v59 = vld [vmem:[%s13565_s3 + $0x100] sm:$0xff]  ;;  %v13937_v10 = vld [vmem:[#allocation48_spill] sm:$0xff]  ;;  %v12294_v54 = vshra.s32 %v3320_v21, 14  ;;  %v13946_v21 = vrot.slane %v10896_v6, 7 }
 0x4d1   : > { %v3206_v52 = vmul.f32 0.1, %v3152_v12 }
 0x4d2   : > { %v2833_v56 = vsel %vm13571_vm0, %v2822_v37, %v2823_v39  ;;  %v2987_v49 = vrot.slane %v2768_v1, 1  ;;  %v3423_v37 = vshra.s32 %v3369_v2, 14  ;;  %v3428_v27 = vmul.u32 24, %v12294_v54 }
 0x4d3   : > { %v12255_v55 = vadd.f32 %v2833_v56, %v2506_v0  ;;  %4876 = vmatpush.bf16.msrb.mxu3 %v8639_v20  ;;  %v3260_v15 = vmax.f32 %v3152_v12, %v3206_v52  ;;  %v1763_v12 = vpop.f32.mrf.mxu1  ;;  %v13938_v0 = vld [vmem:[#allocation148_spill] sm:$0xff]  ;;  %v3371_v56 = vmul.u32 683, %v12287_v60 }
 0x4d4   : > { %v2997_v63 = vsel %vm13572_vm1, %v2986_v30, %v2987_v49  ;;  %v3477_v11 = vmul.u32 24, %v3423_v37  ;;  %vm3585_vm2 = vcmp.ge.s32.totalorder %v3423_v37, 1  ;;  %vm3639_vm3 = vcmp.le.s32.totalorder %v3423_v37, 16  ;;  %v13942_v37 = vld [vmem:[#allocation50_spill] sm:$0xff] }
 0x4d5   : > { %v3095_v23 = vadd.f32 %v2997_v63, %v12142_v36  ;;  %v2185_v50 = vpop.f32.mrf.mxu2  ;;  %v3961_v44 = vsel %vm3907_vm14, %v3260_v15, 0.0  ;;  %vm3693_vm6 = vmand %vm3585_vm2, %vm3639_vm3  ;;  %v3425_v62 = vshra.s32 %v3371_v56, 14  ;;  %vm3536_vm14 = vcmp.ge.s32.totalorder %v12294_v54, 1 }
 0x4d6   : > { %v2244_v46 = vadd.f32 %v2185_v50, %v13934_v40  ;;  %v2448_v38 = vpop.f32.mrf.mxu3  ;;  %v3531_v31 = vsub.s32 %v12231_v47, %v3477_v11  ;;  %v12301_v47 = vadd.s32 424, %v10892_v53  ;;  %v13939_v40 = vld [vmem:[#allocation151_spill] sm:$0xff] }
 0x4d7   : > { %v3153_v61 = vadd.f32 %v12241_v25, %v3095_v23  ;;  %v2709_v36 = vpop.f32.mrf.mxu0  ;;  %v2507_v4 = vadd.f32 %v2448_v38, %v13935_v9  ;;  %4877 = vmatpush.bf16.msrb.mxu3 %v8638_v33  ;;  %v3479_v11 = vmul.u32 24, %v3425_v62 }
 0x4d8   : > { %v2824_v28 = vrot.slane %v2244_v46, 7  ;;  %v2769_v57 = vadd.f32 %v2709_v36, %v1759_v7  ;;  %vm3747_vm7 = vcmp.ge.s32.totalorder %v3531_v31, 1  ;;  %v3373_v50 = vmul.u32 683, %v12301_v47 }
 0x4d9   : > { %v3207_v3 = vmul.f32 0.1, %v3153_v61  ;;  %v1764_v46 = vadd.f32 %v1763_v12, %v13939_v40  ;;  %vm12323_vm10 = vmand %vm3693_vm6, %vm3747_vm7  ;;  %vm3855_vm11 = vcmp.le.s32.totalorder %v3531_v31, 16 }
 0x4da   : > { %v2832_v32 = vsel %vm13571_vm0, %v2823_v39, %v2824_v28  ;;  %v2988_v30 = vrot.slane %v2769_v57, 1  ;;  %v12298_v39 = vadd.s32 416, %v10892_v53  ;;  %vm12335_vm2 = vmand %vm12323_vm10, %vm3855_vm11 }
 0x4db   : > { %v3261_v5 = vmax.f32 %v3153_v61, %v3207_v3  ;;  %v12280_v43 = vadd.f32 %v2832_v32, %v2507_v4  ;;  %4878 = vmatpush.bf16.msrb.mxu3 %v8637_v59  ;;  %v3482_v61 = vsub.s32 %v10892_v53, %v3428_v27  ;;  %v3427_v3 = vshra.s32 %v3373_v50, 14  ;;  %v13945_v32 = vld [vmem:[#allocation150_spill] sm:$0xff]  ;;  %v12401_v4 = vld [vmem:[#allocation2 + $0x20] sm:$0xff]  }
 0x4dc   : > { %v2996_v24 = vsel %vm13572_vm1, %v2987_v49, %v2988_v30  ;;  %v3372_v52 = vmul.u32 683, %v12298_v39 }
 0x4dd   : > { %v3962_v19 = vsel %vm3908_vm15, %v3261_v5, 0.0  ;;  %v3096_v42 = vadd.f32 %v2996_v24, %v12211_v48  ;;  %v2188_v58 = vpop.f32.mrf.mxu2  ;;  %v3532_v48 = vsub.s32 %v12235_v51, %v3478_v35  ;;  %v8652_v51 = vld [vmem:[%s13565_s3 + $0x178] sm:$0xff]  ;;  %vm3590_vm15 = vcmp.le.s32.totalorder %v12294_v54, 16 }
 0x4de   : > { %v8926_v41 = vpack.c.bf16 %v3962_v19, %v3961_v44  ;;  %v2245_v17 = vadd.f32 %v2188_v58, %v13937_v10  ;;  %v2451_v18 = vpop.f32.mrf.mxu3  ;;  %5272 = vmatpush.bf16.msrb.mxu1 %v8652_v51  ;;  %vm3698_vm4 = vcmp.ge.s32.totalorder %v3482_v61, 1  ;;  %v13947_v44 = vld [vmem:[#allocation152_spill] sm:$0xff]  ;;  %vm3644_vm5 = vmand %vm3536_vm14, %vm3590_vm15  ;;  %v3481_v59 = vmul.u32 24, %v3427_v3  ;;  %v13948_v10 = vld [vmem:[#allocation155_spill] sm:$0xff] }
 0x4df   : > { %v2711_v26 = vpop.f32.mrf.mxu0  ;;  %v3154_v8 = vadd.f32 %v12241_v25, %v3096_v42  ;;  %v2508_v45 = vadd.f32 %v2451_v18, %v13938_v0  ;;  %vm3748_vm9 = vcmp.ge.s32.totalorder %v3532_v48, 1  ;;  %vm3856_vm13 = vcmp.le.s32.totalorder %v3532_v48, 16  ;;  %vm3752_vm6 = vmand %vm3644_vm5, %vm3698_vm4 }
 0x4e0   : > { %9330 = vst [vmem:[#allocation2 + $0xc8] sm:$0xff] %v8926_v41   ;;  %v2825_v1 = vrot.slane %v2245_v17, 7  ;;  %v2770_v16 = vadd.f32 %v2711_v26, %v1761_v34  ;;  %vm3802_vm12 = vmand %vm3694_vm8, %vm3748_vm9  ;;  %v1765_v34 = vpop.f32.mrf.mxu1  ;;  %v13949_v26 = vld [vmem:[#allocation153_spill] sm:$0xff]  ;;  %vm3806_vm7 = vcmp.le.s32.totalorder %v3482_v61, 16  ;;  %v3533_v54 = vsub.s32 %v12287_v60, %v3479_v11  ;;  %v8650_v11 = vld [vmem:[%s13565_s3 + $0x168] sm:$0xff] }
 0x4e1   : > { %v3208_v20 = vmul.f32 0.1, %v3154_v8  ;;  %vm3910_vm3 = vmand %vm3802_vm12, %vm3856_vm13  ;;  %v1766_v48 = vadd.f32 %v1765_v34, %v13949_v26  ;;  %vm3587_vm8 = vcmp.ge.s32.totalorder %v3425_v62, 1  ;;  %vm3641_vm9 = vcmp.le.s32.totalorder %v3425_v62, 16 }
 0x4e2   : > { %v2831_v49 = vsel %vm13571_vm0, %v2824_v28, %v2825_v1  ;;  %v2989_v2 = vrot.slane %v2770_v16, 1  ;;  %v3426_v28 = vshra.s32 %v3372_v52, 14  ;;  %vm3860_vm12 = vmand %vm3752_vm6, %vm3806_vm7  ;;  %vm3589_vm13 = vcmp.ge.s32.totalorder %v3427_v3, 1 }
 0x4e3   : > { %v12314_v63 = vadd.f32 %v2831_v49, %v2508_v45  ;;  %v3262_v9 = vmax.f32 %v3154_v8, %v3208_v20  ;;  %v3535_v45 = vsub.s32 %v12301_v47, %v3481_v59  ;;  %vm3643_vm14 = vcmp.le.s32.totalorder %v3427_v3, 16  ;;  %vm3695_vm15 = vmand %vm3587_vm8, %vm3641_vm9  ;;  %v13950_v49 = vld [vmem:[#allocation154_spill] sm:$0xff]  ;;  %v12393_v3 = vld [vmem:[#allocation2 + $0x18] sm:$0xff]  }
 0x4e4   : > { %v2995_v23 = vsel %vm13572_vm1, %v2988_v30, %v2989_v2  ;;  %v3480_v58 = vmul.u32 24, %v3426_v28  ;;  %vm3588_vm10 = vcmp.ge.s32.totalorder %v3426_v28, 1  ;;  %vm3642_vm11 = vcmp.le.s32.totalorder %v3426_v28, 16  ;;  %vm3697_vm6 = vmand %vm3589_vm13, %vm3643_vm14  ;;  %v12382_v28 = vld [vmem:[#allocation2 + $0x10] sm:$0xff]  }
 0x4e5   : > { %v3097_v13 = vadd.f32 %v2995_v23, %v12255_v55  ;;  %v2190_v7 = vpop.f32.mrf.mxu2  ;;  %v3963_v41 = vsel %vm12335_vm2, %v3262_v9, 0.0  ;;  %vm3749_vm2 = vcmp.ge.s32.totalorder %v3533_v54, 1  ;;  %vm3857_vm5 = vcmp.le.s32.totalorder %v3533_v54, 16  ;;  %v12395_v9 = vld [vmem:[#allocation2 + $0x1c] sm:$0xff]  }
 0x4e6   : > { %v2246_v22 = vadd.f32 %v2190_v7, %v13942_v37  ;;  %v2453_v36 = vpop.f32.mrf.mxu3  ;;  %v3534_v8 = vsub.s32 %v12298_v39, %v3480_v58  ;;  %v13951_v47 = vrot.slane %v13950_v49, 1  ;;  %vm3751_vm7 = vcmp.ge.s32.totalorder %v3535_v45, 1 }
 0x4e7   : > { %v3155_v29 = vadd.f32 %v12241_v25, %v3097_v13  ;;  %v2714_v55 = vpop.f32.mrf.mxu0  ;;  %v2509_v30 = vadd.f32 %v2453_v36, %v13945_v32  ;;  %v12409_v32 = vld [vmem:[#allocation2 + $0x28] sm:$0xff]  }
 0x4e8   : > { %v2826_v57 = vrot.slane %v2246_v22, 7  ;;  %v2771_v15 = vadd.f32 %v2714_v55, %v1764_v46  ;;  %vm3750_vm4 = vcmp.ge.s32.totalorder %v3534_v8, 1  ;;  %vm3858_vm9 = vcmp.le.s32.totalorder %v3534_v8, 16 }
 0x4e9   : > { %v3209_v33 = vmul.f32 0.1, %v3155_v29 }
 0x4ea   : > { %v2883_v5 = vsel %vm13571_vm0, %v2826_v57, %v13946_v21  ;;  %v2830_v35 = vsel %vm13571_vm0, %v2825_v1, %v2826_v57  ;;  %v2990_v14 = vrot.slane %v2771_v15, 1  ;;  %vm3803_vm0 = vmand %vm3695_vm15, %vm3749_vm2  ;;  %v12384_v57 = vld [vmem:[#allocation2 + $0x14] sm:$0xff]  }
 0x4eb   : > { %v3263_v24 = vmax.f32 %v3155_v29, %v3209_v33  ;;  %v2884_v19 = vadd.f32 %v2883_v5, %v13947_v44  ;;  %v2937_v42 = vadd.f32 %v2830_v35, %v2509_v30  ;;  %v8651_v15 = vld [vmem:[%s13565_s3 + $0x170] sm:$0xff]  ;;  %v12403_v33 = vld [vmem:[#allocation2 + $0x24] sm:$0xff]   ;;  %v9339_v35 = vld [vmem:[#allocation2 + $0x38] sm:$0xff]  }
 0x4ec   : > { %v2994_v6 = vsel %vm13572_vm1, %v2989_v2, %v2990_v14  ;;  %5273 = vmatpush.bf16.msrb.mxu1 %v8651_v15  ;;  %v12411_v30 = vld [vmem:[#allocation2 + $0x2c] sm:$0xff]   ;;  %v9751_v5 = vld [vmem:[#allocation2 + $0x34] sm:$0xff]   ;;  %v9755_v44 = vld [vmem:[#allocation2 + $0x44] sm:$0xff]  }
 0x4ed   : > { %v3964_v31 = vsel %vm3910_vm3, %v3263_v24, 0.0  ;;  %v3047_v17 = vadd.f32 %v13948_v10, %v2884_v19  ;;  %v3098_v18 = vadd.f32 %v2994_v6, %v12280_v43  ;;  %vm3696_vm3 = vmand %vm3588_vm10, %vm3642_vm11  ;;  %vm3859_vm11 = vcmp.le.s32.totalorder %v3535_v45, 16  ;;  %v9338_v21 = vld [vmem:[#allocation2 + $0x30] sm:$0xff]   ;;  %v9340_v24 = vld [vmem:[#allocation2 + $0x40] sm:$0xff]  }
 0x4ee   : > { %v8931_v1 = vpack.c.bf16 %v3964_v31, %v3963_v41  ;;  %vm3804_vm8 = vmand %vm3696_vm3, %vm3750_vm4  ;;  %v9341_v31 = vld [vmem:[#allocation2 + $0x48] sm:$0xff]  }
 0x4ef   : > { %v3105_v16 = vadd.f32 %v12241_v25, %v3047_v17  ;;  %v2716_v12 = vpop.f32.mrf.mxu0  ;;  %v3156_v56 = vadd.f32 %v12241_v25, %v3098_v18  ;;  %vm3805_vm10 = vmand %vm3697_vm6, %vm3751_vm7  ;;  %v9757_v10 = vld [vmem:[#allocation2 + $0x4c] sm:$0xff]   ;;  %v8649_v18 = vld [vmem:[%s13565_s3 + $0x160] sm:$0xff] }
 0x4f0   : > { %9331 = vst [vmem:[#allocation2 + $0xd0] sm:$0xff] %v8931_v1   ;;  %v2772_v0 = vadd.f32 %v2716_v12, %v1766_v48  ;;  %vm3913_vm13 = vmand %vm3805_vm10, %vm3859_vm11  ;;  %5274 = vmatpush.bf16.msrb.mxu1 %v8650_v11 }
 0x4f1   : > { %v3159_v43 = vmul.f32 0.1, %v3105_v16  ;;  %v3210_v52 = vmul.f32 0.1, %v3156_v56 }
 0x4f2   : > { %v2991_v60 = vrot.slane %v2772_v0, 1 }
 0x4f3   : > { %v3213_v51 = vmax.f32 %v3105_v16, %v3159_v43  ;;  %v3264_v62 = vmax.f32 %v3156_v56, %v3210_v52 }
 0x4f4   : > { %v2993_v39 = vsel %vm13572_vm1, %v2990_v14, %v2991_v60  ;;  %v3046_v2 = vsel %vm13572_vm1, %v2991_v60, %v13951_v47  ;;  %vm3911_vm1 = vmand %vm3803_vm0, %vm3857_vm5  ;;  %v9753_v14 = vld [vmem:[#allocation2 + $0x3c] sm:$0xff]   ;;  %5275 = vmatpush.bf16.msrb.mxu1 %v8649_v18  ;;  %v9342_v60 = vld [vmem:[#allocation2 + $0x50] sm:$0xff]   ;;  %vm14017_vm0 = vcmp.lt.s32.totalorder %v10892_v53, 1 }
 0x4f5   : > { %v3914_v27 = vsel %vm3860_vm12, %v3213_v51, 0.0  ;;  %v3099_v23 = vadd.f32 %v2993_v39, %v12314_v63  ;;  %v3100_v50 = vadd.f32 %v3046_v2, %v2937_v42  ;;  %vm3912_vm12 = vmand %vm3804_vm8, %vm3858_vm9  ;;  %v3965_v37 = vsel %vm3911_vm1, %v3264_v62, 0.0  ;;  %v9759_v51 = vld [vmem:[#allocation2 + $0x54] sm:$0xff]  }
 0x4f6   : > { %v3968_v20 = vpack.c.bf16 %v3914_v27, %v3914_v27  ;;  %vm14019_vm1 = vmmov %vm14017_vm0 }
 0x4f7   : > { %v3157_v13 = vadd.f32 %v12241_v25, %v3099_v23  ;;  %v3158_v7 = vadd.f32 %v12241_v25, %v3100_v50  ;;  %vm14020_vm14 = vmmov %vm14017_vm0 }
 0x4f8   : > { %4022 = vst [vmem:[#allocation2 + $0xc] sm:$0xf] %v3968_v20  ;;  %vm14021_vm15 = vmmov %vm14017_vm0 }
 0x4f9   : > { %v3211_v40 = vmul.f32 0.1, %v3157_v13  ;;  %v3212_v46 = vmul.f32 0.1, %v3158_v7  ;;  %vm14022_vm2 = vmmov %vm14017_vm0 }
 0x4fa   : > { %vm14023_vm3 = vmmov %vm14017_vm0 }
 0x4fb   : > { %v3265_v38 = vmax.f32 %v3157_v13, %v3211_v40  ;;  %v3266_v63 = vmax.f32 %v3158_v7, %v3212_v46  ;;  %v9343_v40 = vld [vmem:[#allocation2 + $0x58] sm:$0xff]   ;;  %vm14024_vm4 = vmmov %vm14017_vm0 }
 0x4fc   : > { %v9761_v46 = vld [vmem:[#allocation2 + $0x5c] sm:$0xff]   ;;  %vm14025_vm5 = vmmov %vm14017_vm0 }
 0x4fd   : > { %v3966_v22 = vsel %vm3912_vm12, %v3265_v38, 0.0  ;;  %v3967_v61 = vsel %vm3913_vm13, %v3266_v63, 0.0  ;;  %vm14026_vm6 = vmmov %vm14017_vm0 }
 0x4fe   : > { %v4021_v36 = vpack.c.bf16 %v3967_v61, %v3967_v61  ;;  %v8936_v29 = vpack.c.bf16 %v3966_v22, %v3965_v37  ;;  %vm14027_vm7 = vmmov %vm14017_vm0 }
 0x4ff   : > { %v12374_v55 = vld [vmem:[#allocation2 + $0x8] sm:$0xff]   ;;  %vm14028_vm8 = vmmov %vm14017_vm0 }
 0x500   : > { %v12376_v25 = vld [vmem:[#allocation2 + $0xc] sm:$0xff]   ;;  %9332 = vst [vmem:[#allocation2 + $0xd8] sm:$0xff] %v8936_v29   ;;  %4675 = vmatmul.bf16.gmra.mxu2 %v12374_v55  ;;  %5076 = vmatmul.bf16.gmra.mxu0 %v12374_v55  ;;  %vm14029_vm9 = vmmov %vm14017_vm0 }
 0x501   : > { %4075 = vst [vmem:[#allocation2 + $0xe0] sm:$0xf] %v4021_v36  ;;  %4418 = vmatmul.bf16.vlgmr.msra.gmra.mxu1 %v12376_v25  ;;  %4879 = vmatmul.bf16.vlgmr.msrb.gmra.mxu3 %v12376_v25  ;;  %vm14031_vm10 = vmmov %vm14017_vm0 }
 0x502   : > { %vm14034_vm11 = vmmov %vm14017_vm0 }
 0x503   : > { %vm14039_vm12 = vmmov %vm14017_vm0 }
 0x504   : > { %vm14044_vm13 = vmmov %vm14017_vm0 }
 0x510   : > { %4680 = vmatmul.bf16.gmra.mxu2 %v12382_v28  ;;  %5081 = vmatmul.bf16.gmra.mxu0 %v12382_v28 }
 0x511   : > { %4423 = vmatmul.bf16.gmra.mxu1 %v12384_v57  ;;  %4884 = vmatmul.bf16.gmra.mxu3 %v12384_v57 }
 0x520   : > { %4685 = vmatmul.bf16.gmra.mxu2 %v12393_v3  ;;  %5086 = vmatmul.bf16.gmra.mxu0 %v12393_v3 }
 0x521   : > { %4428 = vmatmul.bf16.gmra.mxu1 %v12395_v9  ;;  %4889 = vmatmul.bf16.gmra.mxu3 %v12395_v9 }
 0x530   : > { %4690 = vmatmul.bf16.gmra.mxu2 %v12401_v4  ;;  %5091 = vmatmul.bf16.gmra.mxu0 %v12401_v4 }
 0x531   : > { %4433 = vmatmul.bf16.gmra.mxu1 %v12403_v33  ;;  %4894 = vmatmul.bf16.gmra.mxu3 %v12403_v33 }
 0x540   : > { %4695 = vmatmul.bf16.gmra.mxu2 %v12409_v32  ;;  %5096 = vmatmul.bf16.gmra.mxu0 %v12409_v32 }
 0x541   : > { %4438 = vmatmul.bf16.gmra.mxu1 %v12411_v30  ;;  %4899 = vmatmul.bf16.gmra.mxu3 %v12411_v30 }
 0x54a   : > { %v5072_v34 = vpop.f32.mrf.mxu0 }
 0x550   : > { %4700 = vmatmul.bf16.gmra.mxu2 %v9338_v21  ;;  %5101 = vmatmul.bf16.gmra.mxu0 %v9338_v21 }
 0x551   : > { %4443 = vmatmul.bf16.gmra.mxu1 %v9751_v5  ;;  %4904 = vmatmul.bf16.gmra.mxu3 %v9751_v5 }
 0x552   : > { %v4671_v19 = vpop.f32.mrf.mxu2  ;;  %v5074_v42 = vpop.f32.mrf.mxu0 }
 0x55a   : > { %v4673_v58 = vpop.f32.mrf.mxu2 }
 0x560   : > { %4705 = vmatmul.bf16.gmra.mxu2 %v9339_v35  ;;  %5106 = vmatmul.bf16.gmra.mxu0 %v9339_v35 }
 0x561   : > { %4448 = vmatmul.bf16.gmra.mxu1 %v9753_v14  ;;  %4909 = vmatmul.bf16.gmra.mxu3 %v9753_v14  ;;  %v9344_v14 = vld [vmem:[#allocation2 + $0x60] sm:$0xff]  }
 0x570   : > { %4710 = vmatmul.bf16.gmra.mxu2 %v9340_v24  ;;  %5111 = vmatmul.bf16.gmra.mxu0 %v9340_v24 }
 0x571   : > { %4453 = vmatmul.bf16.gmra.mxu1 %v9755_v44  ;;  %4914 = vmatmul.bf16.gmra.mxu3 %v9755_v44 }
 0x57d   : > { %v5077_v6 = vpop.f32.mrf.mxu0 }
 0x57e   : > { %v4419_v59 = vpop.f32.mrf.mxu1 }
 0x57f   : > { %v12420_v41 = vadd.f32 %v4671_v19, %v4419_v59  ;;  %v8648_v59 = vld [vmem:[%s13565_s3 + $0x158] sm:$0xff] }
 0x580   : > { %4715 = vmatmul.bf16.gmra.mxu2 %v9341_v31  ;;  %5116 = vmatmul.bf16.gmra.mxu0 %v9341_v31 }
 0x581   : > { %4458 = vmatmul.bf16.gmra.mxu1 %v9757_v10  ;;  %4919 = vmatmul.bf16.gmra.mxu3 %v9757_v10 }
 0x582   : > { %5276 = vmatpush.bf16.msrb.mxu1 %v8648_v59 }
 0x583   : > { %v4676_v17 = vpop.f32.mrf.mxu2 }
 0x584   : > { %v4880_v26 = vpop.f32.mrf.mxu3 }
 0x585   : > { %v12425_v48 = vadd.f32 %v5072_v34, %v4880_v26  ;;  %v5079_v1 = vpop.f32.mrf.mxu0  ;;  %v9763_v34 = vld [vmem:[#allocation2 + $0x64] sm:$0xff]  }
 0x586   : > { %v4421_v54 = vpop.f32.mrf.mxu1 }
 0x587   : > { %v12427_v16 = vadd.f32 %v4673_v58, %v4421_v54  ;;  %v9345_v54 = vld [vmem:[#allocation2 + $0x68] sm:$0xff]  }
 0x58b   : > { %v4678_v12 = vpop.f32.mrf.mxu2 }
 0x58c   : > { %v4882_v8 = vpop.f32.mrf.mxu3 }
 0x58d   : > { %v12429_v0 = vadd.f32 %v5074_v42, %v4882_v8  ;;  %v5082_v45 = vpop.f32.mrf.mxu0 }
 0x58e   : > { %v4424_v43 = vpop.f32.mrf.mxu1 }
 0x58f   : > { %v12431_v56 = vadd.f32 %v4676_v17, %v4424_v43 }
 0x590   : > { %4720 = vmatmul.bf16.gmra.mxu2 %v9342_v60  ;;  %5121 = vmatmul.bf16.gmra.mxu0 %v9342_v60 }
 0x591   : > { %4463 = vmatmul.bf16.gmra.mxu1 %v9759_v51  ;;  %4924 = vmatmul.bf16.gmra.mxu3 %v9759_v51 }
 0x593   : > { %v4681_v39 = vpop.f32.mrf.mxu2 }
 0x594   : > { %v4885_v49 = vpop.f32.mrf.mxu3 }
 0x595   : > { %v12433_v47 = vadd.f32 %v5077_v6, %v4885_v49  ;;  %v5084_v2 = vpop.f32.mrf.mxu0 }
 0x596   : > { %v4426_v27 = vpop.f32.mrf.mxu1 }
 0x597   : > { %v12435_v52 = vadd.f32 %v4678_v12, %v4426_v27  ;;  %v9765_v12 = vld [vmem:[#allocation2 + $0x6c] sm:$0xff]  }
 0x59b   : > { %v4683_v23 = vpop.f32.mrf.mxu2 }
 0x59c   : > { %v4887_v50 = vpop.f32.mrf.mxu3 }
 0x59d   : > { %v12437_v20 = vadd.f32 %v5079_v1, %v4887_v50  ;;  %v5087_v13 = vpop.f32.mrf.mxu0 }
 0x59e   : > { %v4429_v7 = vpop.f32.mrf.mxu1 }
 0x59f   : > { %v12439_v62 = vadd.f32 %v4681_v39, %v4429_v7  ;;  %v9346_v7 = vld [vmem:[#allocation2 + $0x70] sm:$0xff]  }
 0x5a0   : > { %4725 = vmatmul.bf16.gmra.mxu2 %v9343_v40  ;;  %5126 = vmatmul.bf16.gmra.mxu0 %v9343_v40  ;;  %v9767_v40 = vld [vmem:[#allocation2 + $0x74] sm:$0xff]  }
 0x5a1   : > { %4468 = vmatmul.bf16.gmra.mxu1 %v9761_v46  ;;  %4929 = vmatmul.bf16.gmra.mxu3 %v9761_v46 }
 0x5a3   : > { %v4686_v38 = vpop.f32.mrf.mxu2 }
 0x5a4   : > { %v4890_v63 = vpop.f32.mrf.mxu3 }
 0x5a5   : > { %v12441_v37 = vadd.f32 %v5082_v45, %v4890_v63  ;;  %v5089_v22 = vpop.f32.mrf.mxu0 }
 0x5a6   : > { %v4431_v61 = vpop.f32.mrf.mxu1 }
 0x5a7   : > { %v12443_v36 = vadd.f32 %v4683_v23, %v4431_v61 }
 0x5ab   : > { %v4688_v29 = vpop.f32.mrf.mxu2 }
 0x5ac   : > { %v4892_v15 = vpop.f32.mrf.mxu3 }
 0x5ad   : > { %v12445_v11 = vadd.f32 %v5084_v2, %v4892_v15  ;;  %v5092_v21 = vpop.f32.mrf.mxu0 }
 0x5ae   : > { %v4434_v5 = vpop.f32.mrf.mxu1 }
 0x5af   : > { %v12447_v35 = vadd.f32 %v4686_v38, %v4434_v5 }
 0x5b0   : > { %4730 = vmatmul.bf16.gmra.mxu2 %v9344_v14  ;;  %5131 = vmatmul.bf16.gmra.mxu0 %v9344_v14 }
 0x5b1   : > { %4473 = vmatmul.bf16.gmra.mxu1 %v9763_v34  ;;  %4934 = vmatmul.bf16.gmra.mxu3 %v9763_v34 }
 0x5b3   : > { %v4691_v24 = vpop.f32.mrf.mxu2 }
 0x5b4   : > { %v4895_v44 = vpop.f32.mrf.mxu3 }
 0x5b5   : > { %v12449_v19 = vadd.f32 %v5087_v13, %v4895_v44  ;;  %v5094_v42 = vpop.f32.mrf.mxu0  ;;  %v9347_v44 = vld [vmem:[#allocation2 + $0x78] sm:$0xff]  }
 0x5b6   : > { %v4436_v58 = vpop.f32.mrf.mxu1 }
 0x5b7   : > { %v12451_v6 = vadd.f32 %v4688_v29, %v4436_v58 }
 0x5bb   : > { %v4693_v31 = vpop.f32.mrf.mxu2 }
 0x5bc   : > { %v4897_v10 = vpop.f32.mrf.mxu3 }
 0x5bd   : > { %v12456_v17 = vadd.f32 %v5089_v22, %v4897_v10  ;;  %v5097_v18 = vpop.f32.mrf.mxu0 }
 0x5be   : > { %v4439_v26 = vpop.f32.mrf.mxu1 }
 0x5bf   : > { %v12458_v1 = vadd.f32 %v4691_v24, %v4439_v26 }
 0x5c0   : > { %4735 = vmatmul.bf16.gmra.mxu2 %v9345_v54  ;;  %5136 = vmatmul.bf16.gmra.mxu0 %v9345_v54 }
 0x5c1   : > { %4478 = vmatmul.bf16.gmra.mxu1 %v9765_v12  ;;  %4939 = vmatmul.bf16.gmra.mxu3 %v9765_v12 }
 0x5c3   : > { %v4696_v8 = vpop.f32.mrf.mxu2 }
 0x5c4   : > { %v4900_v45 = vpop.f32.mrf.mxu3 }
 0x5c5   : > { %v12460_v43 = vadd.f32 %v5092_v21, %v4900_v45  ;;  %v5099_v60 = vpop.f32.mrf.mxu0 }
 0x5c6   : > { %v4441_v51 = vpop.f32.mrf.mxu1 }
 0x5c7   : > { %v12462_v39 = vadd.f32 %v4693_v31, %v4441_v51 }
 0x5cb   : > { %v4698_v49 = vpop.f32.mrf.mxu2 }
 0x5cc   : > { %v4902_v2 = vpop.f32.mrf.mxu3 }
 0x5cd   : > { %v12464_v27 = vadd.f32 %v5094_v42, %v4902_v2  ;;  %v5102_v23 = vpop.f32.mrf.mxu0  ;;  %v9769_v42 = vld [vmem:[#allocation2 + $0x7c] sm:$0xff]   ;;  %v9771_v2 = vld [vmem:[#allocation2 + $0x84] sm:$0xff]  }
 0x5ce   : > { %v4444_v50 = vpop.f32.mrf.mxu1 }
 0x5cf   : > { %v12466_v13 = vadd.f32 %v4696_v8, %v4444_v50 }
 0x5d0   : > { %4740 = vmatmul.bf16.gmra.mxu2 %v9346_v7  ;;  %5141 = vmatmul.bf16.gmra.mxu0 %v9346_v7 }
 0x5d1   : > { %4483 = vmatmul.bf16.gmra.mxu1 %v9767_v40  ;;  %4944 = vmatmul.bf16.gmra.mxu3 %v9767_v40 }
 0x5d3   : > { %v4701_v46 = vpop.f32.mrf.mxu2 }
 0x5d4   : > { %v4905_v38 = vpop.f32.mrf.mxu3 }
 0x5d5   : > { %v12468_v63 = vadd.f32 %v5097_v18, %v4905_v38  ;;  %v5104_v22 = vpop.f32.mrf.mxu0 }
 0x5d6   : > { %v4446_v61 = vpop.f32.mrf.mxu1 }
 0x5d7   : > { %v12470_v29 = vadd.f32 %v4698_v49, %v4446_v61  ;;  %v9348_v49 = vld [vmem:[#allocation2 + $0x80] sm:$0xff]  }
 0x5db   : > { %v4703_v15 = vpop.f32.mrf.mxu2 }
 0x5dc   : > { %v4907_v21 = vpop.f32.mrf.mxu3 }
 0x5dd   : > { %v12472_v5 = vadd.f32 %v5099_v60, %v4907_v21  ;;  %v5107_v14 = vpop.f32.mrf.mxu0 }
 0x5de   : > { %v4449_v34 = vpop.f32.mrf.mxu1 }
 0x5df   : > { %v12474_v24 = vadd.f32 %v4701_v46, %v4449_v34 }
 0x5e0   : > { %4745 = vmatmul.bf16.gmra.mxu2 %v9347_v44  ;;  %5146 = vmatmul.bf16.gmra.mxu0 %v9347_v44 }
 0x5e1   : > { %4488 = vmatmul.bf16.gmra.mxu1 %v9769_v42  ;;  %4949 = vmatmul.bf16.gmra.mxu3 %v9769_v42 }
 0x5e3   : > { %v4706_v58 = vpop.f32.mrf.mxu2 }
 0x5e4   : > { %v4910_v59 = vpop.f32.mrf.mxu3 }
 0x5e5   : > { %v12476_v31 = vadd.f32 %v5102_v23, %v4910_v59  ;;  %v5109_v10 = vpop.f32.mrf.mxu0  ;;  %v8647_v23 = vld [vmem:[%s13565_s3 + $0x150] sm:$0xff] }
 0x5e6   : > { %v4451_v18 = vpop.f32.mrf.mxu1  ;;  %5277 = vmatpush.bf16.msrb.mxu1 %v8647_v23  ;;  %v9773_v59 = vld [vmem:[#allocation2 + $0x8c] sm:$0xff]  }
 0x5e7   : > { %v12478_v26 = vadd.f32 %v4703_v15, %v4451_v18 }
 0x5eb   : > { %v4708_v54 = vpop.f32.mrf.mxu2 }
 0x5ec   : > { %v4912_v12 = vpop.f32.mrf.mxu3 }
 0x5ed   : > { %v12480_v8 = vadd.f32 %v5104_v22, %v4912_v12  ;;  %v5112_v45 = vpop.f32.mrf.mxu0 }
 0x5ee   : > { %v4454_v60 = vpop.f32.mrf.mxu1 }
 0x5ef   : > { %v12482_v51 = vadd.f32 %v4706_v58, %v4454_v60  ;;  %v9349_v58 = vld [vmem:[#allocation2 + $0x88] sm:$0xff]  }
 0x5f0   : > { %4750 = vmatmul.bf16.gmra.mxu2 %v9348_v49  ;;  %5151 = vmatmul.bf16.gmra.mxu0 %v9348_v49 }
 0x5f1   : > { %4493 = vmatmul.bf16.gmra.mxu1 %v9771_v2  ;;  %4954 = vmatmul.bf16.gmra.mxu3 %v9771_v2 }
 0x5f3   : > { %v4711_v50 = vpop.f32.mrf.mxu2 }
 0x5f4   : > { %v4915_v7 = vpop.f32.mrf.mxu3 }
 0x5f5   : > { %v12487_v40 = vadd.f32 %v5107_v14, %v4915_v7  ;;  %v5114_v46 = vpop.f32.mrf.mxu0 }
 0x5f6   : > { %v4456_v38 = vpop.f32.mrf.mxu1 }
 0x5f7   : > { %v12489_v22 = vadd.f32 %v4708_v54, %v4456_v38 }
 0x5f9   : > { %13952 = vst [vmem:[#allocation7_spill] sm:$0xff] %v12489_v22  ;;  %v9820_v22 = vld [vmem:[#allocation2] sm:$0xff] }
 0x5fb   : > { %v4713_v61 = vpop.f32.mrf.mxu2 }
 0x5fc   : > { %v4917_v15 = vpop.f32.mrf.mxu3 }
 0x5fd   : > { %v12491_v21 = vadd.f32 %v5109_v10, %v4917_v15  ;;  %v5117_v34 = vpop.f32.mrf.mxu0  ;;  %v9350_v15 = vld [vmem:[#allocation2 + $0x90] sm:$0xff]  }
 0x5fe   : > { %v4459_v44 = vpop.f32.mrf.mxu1 }
 0x5ff   : > { %v12493_v42 = vadd.f32 %v4711_v50, %v4459_v44  ;;  %v9775_v44 = vld [vmem:[#allocation2 + $0x94] sm:$0xff]  }
 0x600   : > { %4755 = vmatmul.bf16.gmra.mxu2 %v9349_v58  ;;  %5156 = vmatmul.bf16.gmra.mxu0 %v9349_v58 }
 0x601   : > { %13953 = vst [vmem:[#allocation53_spill] sm:$0xff] %v12493_v42  ;;  %4498 = vmatmul.bf16.gmra.mxu1 %v9773_v59  ;;  %4959 = vmatmul.bf16.gmra.mxu3 %v9773_v59  ;;  %v9351_v42 = vld [vmem:[#allocation2 + $0x98] sm:$0xff]  }
 0x603   : > { %v4716_v14 = vpop.f32.mrf.mxu2 }
 0x604   : > { %v4920_v18 = vpop.f32.mrf.mxu3 }
 0x605   : > { %v12495_v12 = vadd.f32 %v5112_v45, %v4920_v18  ;;  %v5119_v54 = vpop.f32.mrf.mxu0 }
 0x606   : > { %v4461_v60 = vpop.f32.mrf.mxu1 }
 0x607   : > { %v12497_v49 = vadd.f32 %v4713_v61, %v4461_v60 }
 0x609   : > { %13954 = vst [vmem:[#allocation9_spill] sm:$0xff] %v12497_v49 }
 0x60b   : > { %v4718_v10 = vpop.f32.mrf.mxu2 }
 0x60c   : > { %v4922_v2 = vpop.f32.mrf.mxu3 }
 0x60d   : > { %v12499_v23 = vadd.f32 %v5114_v46, %v4922_v2  ;;  %v5122_v50 = vpop.f32.mrf.mxu0 }
 0x60e   : > { %v4464_v7 = vpop.f32.mrf.mxu1 }
 0x60f   : > { %v12501_v38 = vadd.f32 %v4716_v14, %v4464_v7 }
 0x610   : > { %4760 = vmatmul.bf16.gmra.mxu2 %v9350_v15  ;;  %5161 = vmatmul.bf16.gmra.mxu0 %v9350_v15  ;;  %v9777_v15 = vld [vmem:[#allocation2 + $0x9c] sm:$0xff]  }
 0x611   : > { %13955 = vst [vmem:[#allocation55_spill] sm:$0xff] %v12501_v38  ;;  %4503 = vmatmul.bf16.gmra.mxu1 %v9775_v44  ;;  %4964 = vmatmul.bf16.gmra.mxu3 %v9775_v44 }
 0x613   : > { %v4721_v45 = vpop.f32.mrf.mxu2 }
 0x614   : > { %v4925_v58 = vpop.f32.mrf.mxu3 }
 0x615   : > { %v12503_v59 = vadd.f32 %v5117_v34, %v4925_v58  ;;  %v5124_v61 = vpop.f32.mrf.mxu0 }
 0x616   : > { %v4466_v18 = vpop.f32.mrf.mxu1 }
 0x617   : > { %13956 = vst [vmem:[#allocation54_spill] sm:$0xff] %v12503_v59  ;;  %v12505_v60 = vadd.f32 %v4718_v10, %v4466_v18 }
 0x619   : > { %13957 = vst [vmem:[#allocation11_spill] sm:$0xff] %v12505_v60 }
 0x61b   : > { %v4723_v46 = vpop.f32.mrf.mxu2 }
 0x61c   : > { %v4927_v2 = vpop.f32.mrf.mxu3 }
 0x61d   : > { %v12507_v49 = vadd.f32 %v5119_v54, %v4927_v2  ;;  %v5127_v14 = vpop.f32.mrf.mxu0  ;;  %v8646_v54 = vld [vmem:[%s13565_s3 + $0x148] sm:$0xff] }
 0x61e   : > { %v4469_v7 = vpop.f32.mrf.mxu1  ;;  %5278 = vmatpush.bf16.msrb.mxu1 %v8646_v54 }
 0x61f   : > { %13958 = vst [vmem:[#allocation57_spill] sm:$0xff] %v12507_v49  ;;  %v12509_v38 = vadd.f32 %v4721_v45, %v4469_v7  ;;  %v9352_v49 = vld [vmem:[#allocation2 + $0xa0] sm:$0xff]  }
 0x620   : > { %4765 = vmatmul.bf16.gmra.mxu2 %v9351_v42  ;;  %5166 = vmatmul.bf16.gmra.mxu0 %v9351_v42 }
 0x621   : > { %13959 = vst [vmem:[#allocation56_spill] sm:$0xff] %v12509_v38  ;;  %4508 = vmatmul.bf16.gmra.mxu1 %v9777_v15  ;;  %4969 = vmatmul.bf16.gmra.mxu3 %v9777_v15 }
 0x623   : > { %v4726_v34 = vpop.f32.mrf.mxu2 }
 0x624   : > { %v4930_v44 = vpop.f32.mrf.mxu3 }
 0x625   : > { %v12511_v58 = vadd.f32 %v5122_v50, %v4930_v44  ;;  %v5129_v10 = vpop.f32.mrf.mxu0  ;;  %v9779_v50 = vld [vmem:[#allocation2 + $0xa4] sm:$0xff]  }
 0x626   : > { %v4471_v18 = vpop.f32.mrf.mxu1 }
 0x627   : > { %13960 = vst [vmem:[#allocation13_spill] sm:$0xff] %v12511_v58  ;;  %v12516_v2 = vadd.f32 %v4723_v46, %v4471_v18 }
 0x629   : > { %13961 = vst [vmem:[#allocation59_spill] sm:$0xff] %v12516_v2 }
 0x62b   : > { %v4728_v45 = vpop.f32.mrf.mxu2 }
 0x62c   : > { %v4932_v7 = vpop.f32.mrf.mxu3 }
 0x62d   : > { %v12518_v38 = vadd.f32 %v5124_v61, %v4932_v7  ;;  %v5132_v42 = vpop.f32.mrf.mxu0 }
 0x62e   : > { %v4474_v60 = vpop.f32.mrf.mxu1 }
 0x62f   : > { %13962 = vst [vmem:[#allocation58_spill] sm:$0xff] %v12518_v38  ;;  %v12520_v15 = vadd.f32 %v4726_v34, %v4474_v60  ;;  %v9353_v38 = vld [vmem:[#allocation2 + $0xa8] sm:$0xff]  }
 0x630   : > { %4770 = vmatmul.bf16.gmra.mxu2 %v9352_v49  ;;  %5171 = vmatmul.bf16.gmra.mxu0 %v9352_v49  ;;  %v9781_v49 = vld [vmem:[#allocation2 + $0xac] sm:$0xff]  }
 0x631   : > { %13963 = vst [vmem:[#allocation15_spill] sm:$0xff] %v12520_v15  ;;  %4513 = vmatmul.bf16.gmra.mxu1 %v9779_v50  ;;  %4974 = vmatmul.bf16.gmra.mxu3 %v9779_v50 }
 0x633   : > { %v4731_v44 = vpop.f32.mrf.mxu2 }
 0x634   : > { %v4935_v58 = vpop.f32.mrf.mxu3 }
 0x635   : > { %v12522_v59 = vadd.f32 %v5127_v14, %v4935_v58  ;;  %v5134_v46 = vpop.f32.mrf.mxu0 }
 0x636   : > { %v4476_v54 = vpop.f32.mrf.mxu1 }
 0x637   : > { %13964 = vst [vmem:[#allocation61_spill] sm:$0xff] %v12522_v59  ;;  %v12524_v18 = vadd.f32 %v4728_v45, %v4476_v54  ;;  %v9354_v59 = vld [vmem:[#allocation2 + $0xb0] sm:$0xff]  }
 0x639   : > { %13965 = vst [vmem:[#allocation60_spill] sm:$0xff] %v12524_v18 }
 0x63b   : > { %v4733_v61 = vpop.f32.mrf.mxu2 }
 0x63c   : > { %v4937_v7 = vpop.f32.mrf.mxu3 }
 0x63d   : > { %v12526_v2 = vadd.f32 %v5129_v10, %v4937_v7  ;;  %v5137_v60 = vpop.f32.mrf.mxu0 }
 0x63e   : > { %v4479_v34 = vpop.f32.mrf.mxu1 }
 0x63f   : > { %13966 = vst [vmem:[#allocation17_spill] sm:$0xff] %v12526_v2  ;;  %v12528_v15 = vadd.f32 %v4731_v44, %v4479_v34 }
 0x640   : > { %4775 = vmatmul.bf16.gmra.mxu2 %v9353_v38  ;;  %5176 = vmatmul.bf16.gmra.mxu0 %v9353_v38  ;;  %v9783_v38 = vld [vmem:[#allocation2 + $0xb4] sm:$0xff]  }
 0x641   : > { %13967 = vst [vmem:[#allocation63_spill] sm:$0xff] %v12528_v15  ;;  %4518 = vmatmul.bf16.gmra.mxu1 %v9781_v49  ;;  %4979 = vmatmul.bf16.gmra.mxu3 %v9781_v49 }
 0x643   : > { %v4736_v14 = vpop.f32.mrf.mxu2 }
 0x644   : > { %v4940_v58 = vpop.f32.mrf.mxu3 }
 0x645   : > { %v12530_v50 = vadd.f32 %v5132_v42, %v4940_v58  ;;  %v5139_v45 = vpop.f32.mrf.mxu0 }
 0x646   : > { %v4481_v54 = vpop.f32.mrf.mxu1 }
 0x647   : > { %13968 = vst [vmem:[#allocation62_spill] sm:$0xff] %v12530_v50  ;;  %v12532_v18 = vadd.f32 %v4733_v61, %v4481_v54  ;;  %v8628_v50 = vld [vmem:[#allocation2 + $0xdc] sm:$0xff] }
 0x649   : > { %13969 = vst [vmem:[#allocation19_spill] sm:$0xff] %v12532_v18 }
 0x64b   : > { %v4738_v10 = vpop.f32.mrf.mxu2 }
 0x64c   : > { %v4942_v7 = vpop.f32.mrf.mxu3 }
 0x64d   : > { %v12534_v2 = vadd.f32 %v5134_v46, %v4942_v7  ;;  %v5142_v44 = vpop.f32.mrf.mxu0 }
 0x64e   : > { %v4484_v34 = vpop.f32.mrf.mxu1 }
 0x64f   : > { %13970 = vst [vmem:[#allocation65_spill] sm:$0xff] %v12534_v2  ;;  %v12536_v15 = vadd.f32 %v4736_v14, %v4484_v34  ;;  %v8645_v14 = vld [vmem:[%s13565_s3 + $0x140] sm:$0xff]  ;;  %v9355_v2 = vld [vmem:[#allocation2 + $0xb8] sm:$0xff]  }
 0x650   : > { %4780 = vmatmul.bf16.gmra.mxu2 %v9354_v59  ;;  %5181 = vmatmul.bf16.gmra.mxu0 %v9354_v59 }
 0x651   : > { %13971 = vst [vmem:[#allocation64_spill] sm:$0xff] %v12536_v15  ;;  %4523 = vmatmul.bf16.gmra.mxu1 %v9783_v38  ;;  %4984 = vmatmul.bf16.gmra.mxu3 %v9783_v38 }
 0x652   : > { %5279 = vmatpush.bf16.msrb.mxu1 %v8645_v14 }
 0x653   : > { %v4741_v42 = vpop.f32.mrf.mxu2 }
 0x654   : > { %v4945_v49 = vpop.f32.mrf.mxu3 }
 0x655   : > { %v12538_v58 = vadd.f32 %v5137_v60, %v4945_v49  ;;  %v5144_v61 = vpop.f32.mrf.mxu0  ;;  %v9785_v60 = vld [vmem:[#allocation2 + $0xbc] sm:$0xff]  }
 0x656   : > { %v4486_v54 = vpop.f32.mrf.mxu1  ;;  %v8695_v49 = vld [vmem:[%s13565_s3 + $0x1f8] sm:$0xff] }
 0x657   : > { %13972 = vst [vmem:[#allocation21_spill] sm:$0xff] %v12538_v58  ;;  %v12540_v18 = vadd.f32 %v4738_v10, %v4486_v54  ;;  %v8627_v10 = vld [vmem:[%s13565_s3 + $0xb8] sm:$0xff]  ;;  %6152 = vmatpush.bf16.msra.mxu0 %v8695_v49 }
 0x658   : > { %5464 = vmatpush.bf16.msra.mxu2 %v8627_v10  ;;  %v8693_v10 = vld [vmem:[%s13565_s3 + $0x1e8] sm:$0xff] }
 0x659   : > { %13973 = vst [vmem:[#allocation23_spill] sm:$0xff] %v12540_v18 }
 0x65b   : > { %v4743_v46 = vpop.f32.mrf.mxu2 }
 0x65c   : > { %v4947_v7 = vpop.f32.mrf.mxu3 }
 0x65d   : > { %v12545_v34 = vadd.f32 %v5139_v45, %v4947_v7  ;;  %v5147_v15 = vpop.f32.mrf.mxu0 }
 0x65e   : > { %v4489_v59 = vpop.f32.mrf.mxu1 }
 0x65f   : > { %13974 = vst [vmem:[#allocation25_spill] sm:$0xff] %v12545_v34  ;;  %v12547_v38 = vadd.f32 %v4741_v42, %v4489_v59  ;;  %v8626_v42 = vld [vmem:[%s13565_s3 + $0xb0] sm:$0xff] }
 0x660   : > { %4785 = vmatmul.bf16.gmra.mxu2 %v9355_v2  ;;  %5186 = vmatmul.bf16.gmra.mxu0 %v9355_v2  ;;  %v8694_v2 = vld [vmem:[%s13565_s3 + $0x1f0] sm:$0xff] }
 0x661   : > { %13975 = vst [vmem:[#allocation67_spill] sm:$0xff] %v12547_v38  ;;  %4528 = vmatmul.bf16.gmra.mxu1 %v9785_v60  ;;  %4989 = vmatmul.bf16.gmra.mxu3 %v9785_v60  ;;  %v8625_v60 = vld [vmem:[%s13565_s3 + $0xa8] sm:$0xff] }
 0x662   : > { %5465 = vmatpush.bf16.msra.mxu2 %v8626_v42  ;;  %6153 = vmatpush.bf16.msra.mxu0 %v8694_v2 }
 0x663   : > { %v4746_v45 = vpop.f32.mrf.mxu2 }
 0x664   : > { %v4950_v54 = vpop.f32.mrf.mxu3 }
 0x665   : > { %v12561_v14 = vadd.f32 %v5142_v44, %v4950_v54  ;;  %v5149_v7 = vpop.f32.mrf.mxu0  ;;  %v8624_v44 = vld [vmem:[%s13565_s3 + $0xa0] sm:$0xff] }
 0x666   : > { %v4491_v59 = vpop.f32.mrf.mxu1  ;;  %5466 = vmatpush.bf16.msra.mxu2 %v8625_v60  ;;  %6154 = vmatpush.bf16.msra.mxu0 %v8693_v10  ;;  %v9356_v60 = vld [vmem:[#allocation2 + $0xc0] sm:$0xff]  }
 0x667   : > { %13976 = vst [vmem:[#allocation66_spill] sm:$0xff] %v12561_v14  ;;  %v12563_v38 = vadd.f32 %v4743_v46, %v4491_v59  ;;  %v8692_v46 = vld [vmem:[%s13565_s3 + $0x1e0] sm:$0xff]  ;;  %v8691_v14 = vld [vmem:[%s13565_s3 + $0x1d8] sm:$0xff] }
 0x668   : > { %v9787_v10 = vld [vmem:[#allocation2 + $0xc4] sm:$0xff]  }
 0x669   : > { %13977 = vst [vmem:[#allocation27_spill] sm:$0xff] %v12563_v38  ;;  %v8623_v38 = vld [vmem:[%s13565_s3 + $0x98] sm:$0xff] }
 0x66a   : > { %5467 = vmatpush.bf16.msra.mxu2 %v8624_v44  ;;  %6155 = vmatpush.bf16.msra.mxu0 %v8692_v46  ;;  %v8622_v44 = vld [vmem:[%s13565_s3 + $0x90] sm:$0xff] }
 0x66b   : > { %v4748_v49 = vpop.f32.mrf.mxu2  ;;  %v8690_v46 = vld [vmem:[%s13565_s3 + $0x1d0] sm:$0xff] }
 0x66c   : > { %v4952_v18 = vpop.f32.mrf.mxu3 }
 0x66d   : > { %v12577_v54 = vadd.f32 %v5144_v61, %v4952_v18  ;;  %v5152_v42 = vpop.f32.mrf.mxu0  ;;  %v8687_v18 = vld [vmem:[%s13565_s3 + $0x1b8] sm:$0xff] }
 0x66e   : > { %v4494_v2 = vpop.f32.mrf.mxu1  ;;  %5468 = vmatpush.bf16.msra.mxu2 %v8623_v38  ;;  %6156 = vmatpush.bf16.msra.mxu0 %v8691_v14 }
 0x66f   : > { %13978 = vst [vmem:[#allocation69_spill] sm:$0xff] %v12577_v54  ;;  %v12579_v59 = vadd.f32 %v4746_v45, %v4494_v2  ;;  %5889 = vmatpush.bf16.msra.mxu3 %v8687_v18  ;;  %v8621_v18 = vld [vmem:[%s13565_s3 + $0x88] sm:$0xff] }
 0x670   : > { %4790 = vmatmul.bf16.gmra.mxu2 %v9356_v60  ;;  %5191 = vmatmul.bf16.gmra.mxu0 %v9356_v60 }
 0x671   : > { %13979 = vst [vmem:[#allocation68_spill] sm:$0xff] %v12579_v59  ;;  %4533 = vmatmul.bf16.gmra.mxu1 %v9787_v10  ;;  %4994 = vmatmul.bf16.gmra.mxu3 %v9787_v10  ;;  %v8686_v10 = vld [vmem:[%s13565_s3 + $0x1b0] sm:$0xff] }
 0x672   : > { %5469 = vmatpush.bf16.msra.mxu2 %v8622_v44  ;;  %6157 = vmatpush.bf16.msra.mxu0 %v8690_v46  ;;  %v8688_v46 = vld [vmem:[%s13565_s3 + $0x1c0] sm:$0xff]  ;;  %v9789_v59 = vld [vmem:[#allocation2 + $0xcc] sm:$0xff]  }
 0x673   : > { %v4751_v61 = vpop.f32.mrf.mxu2  ;;  %5890 = vmatpush.bf16.msra.mxu3 %v8686_v10 }
 0x674   : > { %v4955_v45 = vpop.f32.mrf.mxu3 }
 0x675   : > { %v12596_v2 = vadd.f32 %v5147_v15, %v4955_v45  ;;  %v5154_v60 = vpop.f32.mrf.mxu0  ;;  %v8689_v15 = vld [vmem:[%s13565_s3 + $0x1c8] sm:$0xff] }
 0x676   : > { %v4496_v38 = vpop.f32.mrf.mxu1  ;;  %v8685_v45 = vld [vmem:[%s13565_s3 + $0x1a8] sm:$0xff]  ;;  %5470 = vmatpush.bf16.msra.mxu2 %v8621_v18  ;;  %6158 = vmatpush.bf16.msra.mxu0 %v8689_v15 }
 0x677   : > { %13980 = vst [vmem:[#allocation29_spill] sm:$0xff] %v12596_v2  ;;  %v12601_v14 = vadd.f32 %v4748_v49, %v4496_v38  ;;  %5891 = vmatpush.bf16.msra.mxu3 %v8685_v45  ;;  %v8620_v49 = vld [vmem:[%s13565_s3 + $0x80] sm:$0xff]  ;;  %v9357_v45 = vld [vmem:[#allocation2 + $0xc8] sm:$0xff]  }
 0x679   : > { %13981 = vst [vmem:[#allocation31_spill] sm:$0xff] %v12601_v14  ;;  %v8684_v14 = vld [vmem:[%s13565_s3 + $0x1a0] sm:$0xff] }
 0x67a   : > { %5471 = vmatpush.bf16.msra.mxu2 %v8620_v49  ;;  %6159 = vmatpush.bf16.msra.mxu0 %v8688_v46 }
 0x67b   : > { %v4753_v2 = vpop.f32.mrf.mxu2  ;;  %5892 = vmatpush.bf16.msra.mxu3 %v8684_v14 }
 0x67c   : > { %v4957_v44 = vpop.f32.mrf.mxu3 }
 0x67d   : > { %v12618_v10 = vadd.f32 %v5149_v7, %v4957_v44  ;;  %v5157_v38 = vpop.f32.mrf.mxu0  ;;  %v8683_v7 = vld [vmem:[%s13565_s3 + $0x198] sm:$0xff] }
 0x67e   : > { %v4499_v18 = vpop.f32.mrf.mxu1 }
 0x67f   : > { %13982 = vst [vmem:[#allocation71_spill] sm:$0xff] %v12618_v10  ;;  %v12623_v15 = vadd.f32 %v4751_v61, %v4499_v18  ;;  %5893 = vmatpush.bf16.msra.mxu3 %v8683_v7  ;;  %v8682_v61 = vld [vmem:[%s13565_s3 + $0x190] sm:$0xff] }
 0x680   : > { %4795 = vmatmul.bf16.gmra.mxu2 %v9357_v45  ;;  %5196 = vmatmul.bf16.gmra.mxu0 %v9357_v45 }
 0x681   : > { %13983 = vst [vmem:[#allocation70_spill] sm:$0xff] %v12623_v15  ;;  %4538 = vmatmul.bf16.gmra.mxu1 %v9789_v59  ;;  %4999 = vmatmul.bf16.gmra.mxu3 %v9789_v59  ;;  %v8681_v59 = vld [vmem:[%s13565_s3 + $0x188] sm:$0xff] }
 0x683   : > { %v4756_v44 = vpop.f32.mrf.mxu2  ;;  %5894 = vmatpush.bf16.msra.mxu3 %v8682_v61 }
 0x684   : > { %v4960_v10 = vpop.f32.mrf.mxu3 }
 0x685   : > { %v12628_v54 = vadd.f32 %v5152_v42, %v4960_v10  ;;  %v5159_v49 = vpop.f32.mrf.mxu0  ;;  %v8680_v10 = vld [vmem:[%s13565_s3 + $0x180] sm:$0xff] }
 0x686   : > { %v4501_v46 = vpop.f32.mrf.mxu1 }
 0x687   : > { %13984 = vst [vmem:[#allocation33_spill] sm:$0xff] %v12628_v54  ;;  %v12633_v14 = vadd.f32 %v4753_v2, %v4501_v46  ;;  %5895 = vmatpush.bf16.msra.mxu3 %v8681_v59  ;;  %v9358_v2 = vld [vmem:[#allocation2 + $0xd0] sm:$0xff]  }
 0x688   : > { %v9790_v46 = vld [vmem:[#allocation2 + $0xd4] sm:$0xff] }
 0x689   : > { %13985 = vst [vmem:[#allocation73_spill] sm:$0xff] %v12633_v14 }
 0x68b   : > { %v4758_v18 = vpop.f32.mrf.mxu2  ;;  %5896 = vmatpush.bf16.msra.mxu3 %v8680_v10 }
 0x68c   : > { %v4962_v45 = vpop.f32.mrf.mxu3 }
 0x68d   : > { %v12638_v7 = vadd.f32 %v5154_v60, %v4962_v45  ;;  %v5162_v42 = vpop.f32.mrf.mxu0  ;;  %v8703_v60 = vld [vmem:[%s13565_s3 + $0x238] sm:$0xff] }
 0x68e   : > { %v4504_v54 = vpop.f32.mrf.mxu1  ;;  %6415 = vmatpush.bf16.msra.mxu1 %v8703_v60 }
 0x68f   : > { %13986 = vst [vmem:[#allocation72_spill] sm:$0xff] %v12638_v7  ;;  %v12643_v15 = vadd.f32 %v4756_v44, %v4504_v54 }
 0x690   : > { %4800 = vmatmul.bf16.gmra.mxu2 %v9358_v2  ;;  %5201 = vmatmul.bf16.gmra.mxu0 %v9358_v2 }
 0x691   : > { %13987 = vst [vmem:[#allocation35_spill] sm:$0xff] %v12643_v15  ;;  %4543 = vmatmul.bf16.gmra.mxu1 %v9790_v46  ;;  %5004 = vmatmul.bf16.gmra.mxu3 %v9790_v46  ;;  %v8653_v46 = vld [vmem:[#allocation2 + $0x18] sm:$0xff] }
 0x693   : > { %v4761_v61 = vpop.f32.mrf.mxu2 }
 0x694   : > { %v4965_v59 = vpop.f32.mrf.mxu3 }
 0x695   : > { %v12648_v45 = vadd.f32 %v5157_v38, %v4965_v59  ;;  %v5164_v7 = vpop.f32.mrf.mxu0 }
 0x696   : > { %v4506_v14 = vpop.f32.mrf.mxu1 }
 0x697   : > { %13988 = vst [vmem:[#allocation75_spill] sm:$0xff] %v12648_v45  ;;  %v12650_v54 = vadd.f32 %v4758_v18, %v4506_v14 }
 0x699   : > { %13989 = vst [vmem:[#allocation74_spill] sm:$0xff] %v12650_v54 }
 0x69b   : > { %v4763_v44 = vpop.f32.mrf.mxu2 }
 0x69c   : > { %v4967_v15 = vpop.f32.mrf.mxu3 }
 0x69d   : > { %v12652_v10 = vadd.f32 %v5159_v49, %v4967_v15  ;;  %v5167_v2 = vpop.f32.mrf.mxu0 }
 0x69e   : > { %v4509_v34 = vpop.f32.mrf.mxu1 }
 0x69f   : > { %13990 = vst [vmem:[#allocation37_spill] sm:$0xff] %v12652_v10  ;;  %v12654_v58 = vadd.f32 %v4761_v61, %v4509_v34 }
 0x6a0   : > { %5472 = vmatmul.bf16.vlgmr.msra.gmra.mxu2 %v9820_v22  ;;  %6160 = vmatmul.bf16.vlgmr.msra.gmra.mxu0 %v8653_v46 }
 0x6a1   : > { %13991 = vst [vmem:[#allocation77_spill] sm:$0xff] %v12654_v58  ;;  %4548 = vmatmul.bf16.gmra.mxu1 %v8628_v50  ;;  %5009 = vmatmul.bf16.gmra.mxu3 %v8628_v50  ;;  %v8654_v58 = vld [vmem:[#allocation2 + $0x20] sm:$0xff] }
 0x6a3   : > { %v4766_v38 = vpop.f32.mrf.mxu2 }
 0x6a4   : > { %v4970_v60 = vpop.f32.mrf.mxu3 }
 0x6a5   : > { %v12656_v59 = vadd.f32 %v5162_v42, %v4970_v60  ;;  %v5169_v14 = vpop.f32.mrf.mxu0 }
 0x6a6   : > { %v4511_v18 = vpop.f32.mrf.mxu1 }
 0x6a7   : > { %v12658_v54 = vadd.f32 %v4763_v44, %v4511_v18 }
 0x6ab   : > { %v4768_v15 = vpop.f32.mrf.mxu2 }
 0x6ac   : > { %v4972_v49 = vpop.f32.mrf.mxu3 }
 0x6ad   : > { %v12660_v10 = vadd.f32 %v5164_v7, %v4972_v49  ;;  %v5172_v34 = vpop.f32.mrf.mxu0 }
 0x6ae   : > { %v4514_v61 = vpop.f32.mrf.mxu1 }
 0x6af   : > { %13992 = vst [vmem:[#allocation76_spill] sm:$0xff] %v12660_v10  ;;  %v12662_v45 = vadd.f32 %v4766_v38, %v4514_v61 }
 0x6b0   : > { %5477 = vmatmul.bf16.gmra.mxu2 %v12374_v55  ;;  %6165 = vmatmul.bf16.gmra.mxu0 %v8654_v58 }
 0x6b1   : > { %13993 = vst [vmem:[#allocation39_spill] sm:$0xff] %v12662_v45  ;;  %5280 = vmatmul.bf16.vlgmr.msrb.gmra.mxu1 %v12376_v25  ;;  %5897 = vmatmul.bf16.vlgmr.msra.gmra.mxu3 %v8653_v46  ;;  %v8655_v45 = vld [vmem:[#allocation2 + $0x28] sm:$0xff] }
 0x6b3   : > { %v4771_v22 = vpop.f32.mrf.mxu2 }
 0x6b4   : > { %v4975_v50 = vpop.f32.mrf.mxu3 }
 0x6b5   : > { %v12666_v42 = vadd.f32 %v5167_v2, %v4975_v50  ;;  %v5174_v44 = vpop.f32.mrf.mxu0 }
 0x6b6   : > { %v4516_v60 = vpop.f32.mrf.mxu1 }
 0x6b7   : > { %v12668_v18 = vadd.f32 %v4768_v15, %v4516_v60 }
 0x6bb   : > { %v4773_v7 = vpop.f32.mrf.mxu2 }
 0x6bc   : > { %v4977_v49 = vpop.f32.mrf.mxu3 }
 0x6bd   : > { %v12670_v10 = vadd.f32 %v5169_v14, %v4977_v49  ;;  %v5177_v38 = vpop.f32.mrf.mxu0  ;;  %v8702_v14 = vld [vmem:[%s13565_s3 + $0x230] sm:$0xff] }
 0x6be   : > { %v4519_v61 = vpop.f32.mrf.mxu1  ;;  %6416 = vmatpush.bf16.msra.mxu1 %v8702_v14 }
 0x6bf   : > { %v12672_v55 = vadd.f32 %v4771_v22, %v4519_v61 }
 0x6c0   : > { %5482 = vmatmul.bf16.gmra.mxu2 %v12382_v28  ;;  %6170 = vmatmul.bf16.gmra.mxu0 %v8655_v45 }
 0x6c1   : > { %13994 = vst [vmem:[#allocation79_spill] sm:$0xff] %v12672_v55  ;;  %5285 = vmatmul.bf16.gmra.mxu1 %v12384_v57  ;;  %5902 = vmatmul.bf16.gmra.mxu3 %v8654_v58  ;;  %v8656_v58 = vld [vmem:[#allocation2 + $0x30] sm:$0xff] }
 0x6c3   : > { %v4776_v25 = vpop.f32.mrf.mxu2 }
 0x6c4   : > { %v4980_v2 = vpop.f32.mrf.mxu3 }
 0x6c5   : > { %v12676_v46 = vadd.f32 %v5172_v34, %v4980_v2  ;;  %v5179_v15 = vpop.f32.mrf.mxu0 }
 0x6c6   : > { %v4521_v50 = vpop.f32.mrf.mxu1 }
 0x6c7   : > { %v12678_v60 = vadd.f32 %v4773_v7, %v4521_v50 }
 0x6c9   : > { %13995 = vst [vmem:[#allocation78_spill] sm:$0xff] %v12678_v60 }
 0x6cb   : > { %v4778_v22 = vpop.f32.mrf.mxu2 }
 0x6cc   : > { %v4982_v49 = vpop.f32.mrf.mxu3 }
 0x6cd   : > { %v12683_v28 = vadd.f32 %v5174_v44, %v4982_v49  ;;  %v5182_v61 = vpop.f32.mrf.mxu0 }
 0x6ce   : > { %v4524_v57 = vpop.f32.mrf.mxu1 }
 0x6cf   : > { %13996 = vst [vmem:[#allocation41_spill] sm:$0xff] %v12683_v28  ;;  %v12685_v55 = vadd.f32 %v4776_v25, %v4524_v57 }
 0x6d0   : > { %5487 = vmatmul.bf16.gmra.mxu2 %v12393_v3  ;;  %6175 = vmatmul.bf16.gmra.mxu0 %v8656_v58 }
 0x6d1   : > { %13997 = vst [vmem:[#allocation81_spill] sm:$0xff] %v12685_v55  ;;  %5290 = vmatmul.bf16.gmra.mxu1 %v12395_v9  ;;  %5907 = vmatmul.bf16.gmra.mxu3 %v8655_v45  ;;  %v8657_v55 = vld [vmem:[#allocation2 + $0x38] sm:$0xff] }
 0x6d3   : > { %v4781_v34 = vpop.f32.mrf.mxu2 }
 0x6d4   : > { %v4985_v7 = vpop.f32.mrf.mxu3 }
 0x6d5   : > { %v12689_v2 = vadd.f32 %v5177_v38, %v4985_v7  ;;  %v5184_v50 = vpop.f32.mrf.mxu0 }
 0x6d6   : > { %v4526_v14 = vpop.f32.mrf.mxu1 }
 0x6d7   : > { %v12691_v60 = vadd.f32 %v4778_v22, %v4526_v14 }
 0x6db   : > { %v4783_v44 = vpop.f32.mrf.mxu2 }
 0x6dc   : > { %v4987_v49 = vpop.f32.mrf.mxu3 }
 0x6dd   : > { %v12693_v28 = vadd.f32 %v5179_v15, %v4987_v49  ;;  %v5187_v25 = vpop.f32.mrf.mxu0 }
 0x6de   : > { %v4529_v57 = vpop.f32.mrf.mxu1 }
 0x6df   : > { %13998 = vst [vmem:[#allocation80_spill] sm:$0xff] %v12693_v28  ;;  %v12695_v3 = vadd.f32 %v4781_v34, %v4529_v57 }
 0x6e0   : > { %5492 = vmatmul.bf16.gmra.mxu2 %v12401_v4  ;;  %6180 = vmatmul.bf16.gmra.mxu0 %v8657_v55 }
 0x6e1   : > { %13999 = vst [vmem:[#allocation43_spill] sm:$0xff] %v12695_v3  ;;  %5295 = vmatmul.bf16.gmra.mxu1 %v12403_v33  ;;  %5912 = vmatmul.bf16.gmra.mxu3 %v8656_v58  ;;  %v8658_v3 = vld [vmem:[#allocation2 + $0x40] sm:$0xff] }
 0x6e3   : > { %v4786_v9 = vpop.f32.mrf.mxu2 }
 0x6e4   : > { %v4990_v45 = vpop.f32.mrf.mxu3 }
 0x6e5   : > { %v12699_v38 = vadd.f32 %v5182_v61, %v4990_v45  ;;  %v5189_v22 = vpop.f32.mrf.mxu0 }
 0x6e6   : > { %v4531_v7 = vpop.f32.mrf.mxu1 }
 0x6e7   : > { %v12701_v14 = vadd.f32 %v4783_v44, %v4531_v7 }
 0x6e9   : > { %14000 = vst [vmem:[#allocation118_spill] sm:$0xff] %v12701_v14 }
 0x6eb   : > { %v4788_v15 = vpop.f32.mrf.mxu2 }
 0x6ec   : > { %v4992_v49 = vpop.f32.mrf.mxu3 }
 0x6ed   : > { %v12703_v28 = vadd.f32 %v5184_v50, %v4992_v49  ;;  %v5192_v34 = vpop.f32.mrf.mxu0 }
 0x6ee   : > { %v4534_v57 = vpop.f32.mrf.mxu1 }
 0x6ef   : > { %14001 = vst [vmem:[#allocation83_spill] sm:$0xff] %v12703_v28  ;;  %v12705_v4 = vadd.f32 %v4786_v9, %v4534_v57 }
 0x6f0   : > { %5497 = vmatmul.bf16.gmra.mxu2 %v12409_v32  ;;  %6185 = vmatmul.bf16.gmra.mxu0 %v8658_v3  ;;  %v8701_v32 = vld [vmem:[%s13565_s3 + $0x228] sm:$0xff] }
 0x6f1   : > { %14002 = vst [vmem:[#allocation82_spill] sm:$0xff] %v12705_v4  ;;  %5300 = vmatmul.bf16.gmra.mxu1 %v12411_v30  ;;  %5917 = vmatmul.bf16.gmra.mxu3 %v8657_v55  ;;  %v8659_v4 = vld [vmem:[#allocation2 + $0x48] sm:$0xff]  ;;  %v9821_v55 = vld [vmem:[#allocation2 + $0x30] sm:$0xff]  }
 0x6f2   : > { %6417 = vmatpush.bf16.msra.mxu1 %v8701_v32 }
 0x6f3   : > { %v4791_v33 = vpop.f32.mrf.mxu2 }
 0x6f4   : > { %v4995_v61 = vpop.f32.mrf.mxu3 }
 0x6f5   : > { %v12709_v58 = vadd.f32 %v5187_v25, %v4995_v61  ;;  %v5194_v44 = vpop.f32.mrf.mxu0  ;;  %v9822_v25 = vld [vmem:[#allocation2 + $0x34] sm:$0xff]  }
 0x6f6   : > { %v4536_v45 = vpop.f32.mrf.mxu1 }
 0x6f7   : > { %14003 = vst [vmem:[#allocation45_spill] sm:$0xff] %v12709_v58  ;;  %v12711_v7 = vadd.f32 %v4788_v15, %v4536_v45 }
 0x6f9   : > { %14004 = vst [vmem:[#allocation121_spill] sm:$0xff] %v12711_v7 }
 0x6fb   : > { %v4793_v50 = vpop.f32.mrf.mxu2 }
 0x6fc   : > { %v4997_v49 = vpop.f32.mrf.mxu3 }
 0x6fd   : > { %v12713_v28 = vadd.f32 %v5189_v22, %v4997_v49  ;;  %v5197_v9 = vpop.f32.mrf.mxu0 }
 0x6fe   : > { %v4539_v57 = vpop.f32.mrf.mxu1 }
 0x6ff   : > { %14005 = vst [vmem:[#allocation85_spill] sm:$0xff] %v12713_v28  ;;  %v12718_v30 = vadd.f32 %v4791_v33, %v4539_v57 }
 0x700   : > { %5502 = vmatmul.bf16.gmra.mxu2 %v9821_v55  ;;  %6190 = vmatmul.bf16.gmra.mxu0 %v8659_v4  ;;  %v8660_v55 = vld [vmem:[#allocation2 + $0x50] sm:$0xff] }
 0x701   : > { %14006 = vst [vmem:[#allocation84_spill] sm:$0xff] %v12718_v30  ;;  %5305 = vmatmul.bf16.gmra.mxu1 %v9822_v25  ;;  %5922 = vmatmul.bf16.gmra.mxu3 %v8658_v3  ;;  %v9823_v25 = vld [vmem:[#allocation2 + $0x38] sm:$0xff]  }
 0x702   : > { %v9824_v3 = vld [vmem:[#allocation2 + $0x3c] sm:$0xff]  }
 0x703   : > { %v4796_v15 = vpop.f32.mrf.mxu2 }
 0x704   : > { %v5000_v61 = vpop.f32.mrf.mxu3 }
 0x705   : > { %v12720_v22 = vadd.f32 %v5192_v34, %v5000_v61  ;;  %v5199_v45 = vpop.f32.mrf.mxu0 }
 0x706   : > { %v4541_v49 = vpop.f32.mrf.mxu1 }
 0x707   : > { %v12722_v28 = vadd.f32 %v4793_v50, %v4541_v49 }
 0x709   : > { %14007 = vst [vmem:[#allocation47_spill] sm:$0xff] %v12722_v28 }
 0x70b   : > { %v4798_v7 = vpop.f32.mrf.mxu2 }
 0x70c   : > { %v5002_v58 = vpop.f32.mrf.mxu3 }
 0x70d   : > { %v12724_v14 = vadd.f32 %v5194_v44, %v5002_v58  ;;  %v5202_v33 = vpop.f32.mrf.mxu0 }
 0x70e   : > { %v4544_v57 = vpop.f32.mrf.mxu1 }
 0x70f   : > { %14008 = vst [vmem:[#allocation124_spill] sm:$0xff] %v12724_v14  ;;  %v12726_v30 = vadd.f32 %v4796_v15, %v4544_v57 }
 0x710   : > { %5507 = vmatmul.bf16.gmra.mxu2 %v9823_v25  ;;  %6195 = vmatmul.bf16.gmra.mxu0 %v8660_v55 }
 0x711   : > { %14009 = vst [vmem:[#allocation87_spill] sm:$0xff] %v12726_v30  ;;  %5310 = vmatmul.bf16.gmra.mxu1 %v9824_v3  ;;  %5927 = vmatmul.bf16.gmra.mxu3 %v8659_v4  ;;  %v8661_v30 = vld [vmem:[#allocation2 + $0x58] sm:$0xff]  ;;  %v9825_v4 = vld [vmem:[#allocation2 + $0x40] sm:$0xff]  }
 0x713   : > { %v4801_v34 = vpop.f32.mrf.mxu2 }
 0x714   : > { %v5005_v32 = vpop.f32.mrf.mxu3 }
 0x715   : > { %v12728_v61 = vadd.f32 %v5197_v9, %v5005_v32  ;;  %v5204_v50 = vpop.f32.mrf.mxu0  ;;  %v9826_v9 = vld [vmem:[#allocation2 + $0x44] sm:$0xff]  }
 0x716   : > { %v4546_v49 = vpop.f32.mrf.mxu1 }
 0x717   : > { %v12730_v28 = vadd.f32 %v4798_v7, %v4546_v49 }
 0x719   : > { %14010 = vst [vmem:[#allocation86_spill] sm:$0xff] %v12730_v28  ;;  %v9827_v28 = vld [vmem:[#allocation2 + $0x48] sm:$0xff]  }
 0x71b   : > { %v4803_v58 = vpop.f32.mrf.mxu2 }
 0x71c   : > { %v5007_v44 = vpop.f32.mrf.mxu3 }
 0x71d   : > { %v12732_v14 = vadd.f32 %v5199_v45, %v5007_v44  ;;  %v6161_v15 = vpop.f32.mrf.mxu0 }
 0x71e   : > { %v12735_v57 = vadd.f32 %v6161_v15, %v12425_v48  ;;  %v4549_v25 = vpop.f32.mrf.mxu1 }
 0x71f   : > { %14011 = vst [vmem:[#allocation49_spill] sm:$0xff] %v12732_v14  ;;  %v12737_v3 = vadd.f32 %v4801_v34, %v4549_v25 }
 0x720   : > { %14012 = vst [vmem:[#allocation127_spill] sm:$0xff] %v12735_v57  ;;  %5512 = vmatmul.bf16.gmra.mxu2 %v9825_v4  ;;  %6200 = vmatmul.bf16.gmra.mxu0 %v8661_v30 }
 0x721   : > { %14013 = vst [vmem:[#allocation89_spill] sm:$0xff] %v12737_v3  ;;  %5315 = vmatmul.bf16.gmra.mxu1 %v9826_v9  ;;  %5932 = vmatmul.bf16.gmra.mxu3 %v8660_v55  ;;  %v8662_v9 = vld [vmem:[#allocation2 + $0x60] sm:$0xff] }
 0x723   : > { %v5473_v7 = vpop.f32.mrf.mxu2 }
 0x724   : > { %v5010_v32 = vpop.f32.mrf.mxu3 }
 0x725   : > { %v12739_v49 = vadd.f32 %v5202_v33, %v5010_v32  ;;  %v6163_v45 = vpop.f32.mrf.mxu0  ;;  %v9828_v33 = vld [vmem:[#allocation2 + $0x4c] sm:$0xff]  }
 0x726   : > { %v6297_v44 = vadd.f32 %v6163_v45, %v12429_v0  ;;  %v4551_v14 = vpop.f32.mrf.mxu1 }
 0x727   : > { %v12742_v48 = vadd.f32 %v4803_v58, %v4551_v14  ;;  %v8700_v14 = vld [vmem:[%s13565_s3 + $0x220] sm:$0xff] }
 0x728   : > { %6418 = vmatpush.bf16.msra.mxu1 %v8700_v14  ;;  %v9829_v14 = vld [vmem:[#allocation2 + $0x50] sm:$0xff]  }
 0x72b   : > { %v5475_v15 = vpop.f32.mrf.mxu2 }
 0x72c   : > { %v5012_v57 = vpop.f32.mrf.mxu3 }
 0x72d   : > { %v12744_v34 = vadd.f32 %v5204_v50, %v5012_v57  ;;  %v6166_v25 = vpop.f32.mrf.mxu0 }
 0x72e   : > { %v6298_v4 = vadd.f32 %v6166_v25, %v12433_v47  ;;  %v5281_v3 = vpop.f32.mrf.mxu1 }
 0x72f   : > { %14014 = vst [vmem:[#allocation88_spill] sm:$0xff] %v12744_v34  ;;  %v12747_v55 = vadd.f32 %v5473_v7, %v5281_v3 }
 0x730   : > { %5517 = vmatmul.bf16.gmra.mxu2 %v9827_v28  ;;  %6205 = vmatmul.bf16.gmra.mxu0 %v8662_v9 }
 0x731   : > { %14015 = vst [vmem:[#allocation51_spill] sm:$0xff] %v12747_v55  ;;  %5320 = vmatmul.bf16.gmra.mxu1 %v9828_v33  ;;  %5937 = vmatmul.bf16.gmra.mxu3 %v8661_v30  ;;  %v8663_v55 = vld [vmem:[#allocation2 + $0x68] sm:$0xff] }
 0x733   : > { %v5478_v0 = vpop.f32.mrf.mxu2 }
 0x734   : > { %v5898_v50 = vpop.f32.mrf.mxu3 }
 0x735   : > { %v12753_v58 = vadd.f32 %v5898_v50, %v12420_v41  ;;  %v6168_v47 = vpop.f32.mrf.mxu0 }
 0x736   : > { %v6299_v57 = vadd.f32 %v6168_v47, %v12437_v20  ;;  %v5283_v3 = vpop.f32.mrf.mxu1 }
 0x737   : > { %v12756_v7 = vadd.f32 %v5475_v15, %v5283_v3  ;;  %v13573_v34 = vrot.slane %v12753_v58, 7  ;;  %v9830_v15 = vld [vmem:[#allocation2 + $0x54] sm:$0xff]  }
 0x73b   : > { %v5480_v28 = vpop.f32.mrf.mxu2 }
 0x73c   : > { %v5900_v32 = vpop.f32.mrf.mxu3 }
 0x73d   : > { %v6034_v30 = vadd.f32 %v5900_v32, %v12427_v16  ;;  %v6171_v45 = vpop.f32.mrf.mxu0 }
 0x73e   : > { %v6300_v25 = vadd.f32 %v6171_v45, %v12441_v37  ;;  %v5286_v33 = vpop.f32.mrf.mxu1 }
 0x73f   : > { %v6614_v41 = vrot.slane %v6034_v30, 7  ;;  %v12761_v50 = vadd.f32 %v5478_v0, %v5286_v33 }
 0x740   : > { %5522 = vmatmul.bf16.gmra.mxu2 %v9829_v14  ;;  %6210 = vmatmul.bf16.gmra.mxu0 %v8663_v55 }
 0x741   : > { %14016 = vst [vmem:[#allocation130_spill] sm:$0xff] %v12761_v50  ;;  %v6719_v20 = vsel %vm14017_vm0, %v13573_v34, %v6614_v41  ;;  %5325 = vmatmul.bf16.gmra.mxu1 %v9830_v15  ;;  %5942 = vmatmul.bf16.gmra.mxu3 %v8662_v9 }
 0x742   : > { %v12767_v16 = vadd.f32 %v6719_v20, %v6297_v44 }
 0x743   : > { %v5483_v37 = vpop.f32.mrf.mxu2 }
 0x744   : > { %14018 = vst [vmem:[#allocation91_spill] sm:$0xff] %v12767_v16  ;;  %v5903_v47 = vpop.f32.mrf.mxu3 }
 0x745   : > { %v6035_v3 = vadd.f32 %v5903_v47, %v12431_v56  ;;  %v6173_v32 = vpop.f32.mrf.mxu0  ;;  %v8664_v47 = vld [vmem:[#allocation2 + $0x70] sm:$0xff] }
 0x746   : > { %v6301_v0 = vadd.f32 %v6173_v32, %v12445_v11  ;;  %v5288_v30 = vpop.f32.mrf.mxu1 }
 0x747   : > { %v6615_v45 = vrot.slane %v6035_v3, 7  ;;  %v12771_v33 = vadd.f32 %v5480_v28, %v5288_v30  ;;  %v9831_v3 = vld [vmem:[#allocation2 + $0x58] sm:$0xff]  }
 0x749   : > { %v6718_v14 = vsel %vm14019_vm1, %v6614_v41, %v6615_v45  ;;  %vm14053_vm1 = vmmov %vm14017_vm0 }
 0x74a   : > { %v12775_v34 = vadd.f32 %v6718_v14, %v6298_v4  ;;  %v9832_v4 = vld [vmem:[#allocation2 + $0x5c] sm:$0xff]  }
 0x74b   : > { %v5485_v15 = vpop.f32.mrf.mxu2 }
 0x74c   : > { %v5905_v9 = vpop.f32.mrf.mxu3 }
 0x74d   : > { %v6036_v44 = vadd.f32 %v5905_v9, %v12435_v52  ;;  %v6176_v20 = vpop.f32.mrf.mxu0 }
 0x74e   : > { %v6302_v16 = vadd.f32 %v6176_v20, %v12449_v19  ;;  %v5291_v56 = vpop.f32.mrf.mxu1 }
 0x74f   : > { %v6616_v50 = vrot.slane %v6036_v44, 7  ;;  %v12779_v11 = vadd.f32 %v5483_v37, %v5291_v56 }
 0x750   : > { %5527 = vmatmul.bf16.gmra.mxu2 %v9831_v3  ;;  %6215 = vmatmul.bf16.gmra.mxu0 %v8664_v47 }
 0x751   : > { %v6717_v28 = vsel %vm14020_vm14, %v6615_v45, %v6616_v50  ;;  %5330 = vmatmul.bf16.gmra.mxu1 %v9832_v4  ;;  %5947 = vmatmul.bf16.gmra.mxu3 %v8663_v55  ;;  %v8665_v4 = vld [vmem:[#allocation2 + $0x78] sm:$0xff]  ;;  %vm14058_vm14 = vmmov %vm14017_vm0 }
 0x752   : > { %v12783_v41 = vadd.f32 %v6717_v28, %v6299_v57 }
 0x753   : > { %v5488_v52 = vpop.f32.mrf.mxu2 }
 0x754   : > { %v5908_v32 = vpop.f32.mrf.mxu3 }
 0x755   : > { %v6037_v19 = vadd.f32 %v5908_v32, %v12439_v62  ;;  %v6178_v30 = vpop.f32.mrf.mxu0 }
 0x756   : > { %v6303_v14 = vadd.f32 %v6178_v30, %v12456_v17  ;;  %v5293_v37 = vpop.f32.mrf.mxu1 }
 0x757   : > { %v6617_v9 = vrot.slane %v6037_v19, 7  ;;  %v12787_v44 = vadd.f32 %v5485_v15, %v5293_v37  ;;  %v9833_v19 = vld [vmem:[#allocation2 + $0x60] sm:$0xff]  }
 0x759   : > { %v6716_v20 = vsel %vm14021_vm15, %v6616_v50, %v6617_v9  ;;  %vm14063_vm15 = vmmov %vm14017_vm0 }
 0x75a   : > { %v12791_v45 = vadd.f32 %v6716_v20, %v6300_v25  ;;  %v9834_v25 = vld [vmem:[#allocation2 + $0x64] sm:$0xff]  }
 0x75b   : > { %v5490_v56 = vpop.f32.mrf.mxu2 }
 0x75c   : > { %v5910_v55 = vpop.f32.mrf.mxu3 }
 0x75d   : > { %v6038_v57 = vadd.f32 %v5910_v55, %v12443_v36  ;;  %v6181_v3 = vpop.f32.mrf.mxu0 }
 0x75e   : > { %v6304_v28 = vadd.f32 %v6181_v3, %v12460_v43  ;;  %v5296_v62 = vpop.f32.mrf.mxu1 }
 0x75f   : > { %v6618_v32 = vrot.slane %v6038_v57, 7  ;;  %v12795_v17 = vadd.f32 %v5488_v52, %v5296_v62 }
 0x760   : > { %5532 = vmatmul.bf16.gmra.mxu2 %v9833_v19  ;;  %6220 = vmatmul.bf16.gmra.mxu0 %v8665_v4 }
 0x761   : > { %v6715_v50 = vsel %vm14022_vm2, %v6617_v9, %v6618_v32  ;;  %5335 = vmatmul.bf16.gmra.mxu1 %v9834_v25  ;;  %5952 = vmatmul.bf16.gmra.mxu3 %v8664_v47  ;;  %vm14068_vm2 = vmmov %vm14017_vm0 }
 0x762   : > { %v12799_v15 = vadd.f32 %v6715_v50, %v6301_v0  ;;  %v8699_v0 = vld [vmem:[%s13565_s3 + $0x218] sm:$0xff] }
 0x763   : > { %v5493_v36 = vpop.f32.mrf.mxu2  ;;  %6419 = vmatpush.bf16.msra.mxu1 %v8699_v0 }
 0x764   : > { %v5913_v30 = vpop.f32.mrf.mxu3 }
 0x765   : > { %v6039_v43 = vadd.f32 %v5913_v30, %v12447_v35  ;;  %v6183_v37 = vpop.f32.mrf.mxu0 }
 0x766   : > { %v6305_v20 = vadd.f32 %v6183_v37, %v12464_v27  ;;  %v5298_v52 = vpop.f32.mrf.mxu1 }
 0x767   : > { %v6619_v55 = vrot.slane %v6039_v43, 7  ;;  %v12803_v57 = vadd.f32 %v5490_v56, %v5298_v52  ;;  %v8666_v56 = vld [vmem:[#allocation2 + $0x80] sm:$0xff]  ;;  %v9836_v43 = vld [vmem:[#allocation2 + $0x6c] sm:$0xff]  }
 0x769   : > { %v6714_v3 = vsel %vm14023_vm3, %v6618_v32, %v6619_v55  ;;  %v9835_v32 = vld [vmem:[#allocation2 + $0x68] sm:$0xff]   ;;  %vm14072_vm3 = vmmov %vm14017_vm0 }
 0x76a   : > { %v12807_v9 = vadd.f32 %v6714_v3, %v6302_v16 }
 0x76b   : > { %v5495_v47 = vpop.f32.mrf.mxu2 }
 0x76c   : > { %v5915_v62 = vpop.f32.mrf.mxu3 }
 0x76d   : > { %v6040_v35 = vadd.f32 %v5915_v62, %v12451_v6  ;;  %v6186_v19 = vpop.f32.mrf.mxu0 }
 0x76e   : > { %v6306_v27 = vadd.f32 %v6186_v19, %v12468_v63  ;;  %v5301_v50 = vpop.f32.mrf.mxu1 }
 0x76f   : > { %v6620_v25 = vrot.slane %v6040_v35, 7  ;;  %v12814_v30 = vadd.f32 %v5493_v36, %v5301_v50 }
 0x770   : > { %5537 = vmatmul.bf16.gmra.mxu2 %v9835_v32  ;;  %6225 = vmatmul.bf16.gmra.mxu0 %v8666_v56 }
 0x771   : > { %v6713_v16 = vsel %vm14024_vm4, %v6619_v55, %v6620_v25  ;;  %5340 = vmatmul.bf16.gmra.mxu1 %v9836_v43  ;;  %5957 = vmatmul.bf16.gmra.mxu3 %v8665_v4  ;;  %v8667_v43 = vld [vmem:[#allocation2 + $0x88] sm:$0xff]  ;;  %vm14077_vm4 = vmmov %vm14017_vm0 }
 0x772   : > { %v12818_v37 = vadd.f32 %v6713_v16, %v6303_v14 }
 0x773   : > { %v5498_v6 = vpop.f32.mrf.mxu2 }
 0x774   : > { %v5918_v52 = vpop.f32.mrf.mxu3 }
 0x775   : > { %v6041_v63 = vadd.f32 %v5918_v52, %v12458_v1  ;;  %v6188_v3 = vpop.f32.mrf.mxu0 }
 0x776   : > { %v6307_v0 = vadd.f32 %v6188_v3, %v12472_v5  ;;  %v5303_v36 = vpop.f32.mrf.mxu1 }
 0x777   : > { %v6621_v62 = vrot.slane %v6041_v63, 7  ;;  %v12822_v35 = vadd.f32 %v5495_v47, %v5303_v36  ;;  %v9837_v63 = vld [vmem:[#allocation2 + $0x70] sm:$0xff]  }
 0x779   : > { %v6712_v19 = vsel %vm14025_vm5, %v6620_v25, %v6621_v62  ;;  %vm14081_vm5 = vmmov %vm14017_vm0 }
 0x77a   : > { %v12826_v55 = vadd.f32 %v6712_v19, %v6304_v28  ;;  %v9838_v28 = vld [vmem:[#allocation2 + $0x74] sm:$0xff]  }
 0x77b   : > { %v5500_v50 = vpop.f32.mrf.mxu2 }
 0x77c   : > { %v5920_v4 = vpop.f32.mrf.mxu3 }
 0x77d   : > { %v6042_v14 = vadd.f32 %v5920_v4, %v12462_v39  ;;  %v6191_v32 = vpop.f32.mrf.mxu0 }
 0x77e   : > { %v6308_v16 = vadd.f32 %v6191_v32, %v12476_v31  ;;  %v5306_v1 = vpop.f32.mrf.mxu1 }
 0x77f   : > { %v6622_v52 = vrot.slane %v6042_v14, 7  ;;  %v12830_v5 = vadd.f32 %v5498_v6, %v5306_v1 }
 0x780   : > { %5542 = vmatmul.bf16.gmra.mxu2 %v9837_v63  ;;  %6230 = vmatmul.bf16.gmra.mxu0 %v8667_v43 }
 0x781   : > { %v6711_v47 = vsel %vm14026_vm6, %v6621_v62, %v6622_v52  ;;  %5345 = vmatmul.bf16.gmra.mxu1 %v9838_v28  ;;  %5962 = vmatmul.bf16.gmra.mxu3 %v8666_v56  ;;  %v8668_v28 = vld [vmem:[#allocation2 + $0x90] sm:$0xff]  ;;  %vm14085_vm6 = vmmov %vm14017_vm0 }
 0x782   : > { %v12834_v25 = vadd.f32 %v6711_v47, %v6305_v20 }
 0x783   : > { %v5503_v39 = vpop.f32.mrf.mxu2 }
 0x784   : > { %v5923_v3 = vpop.f32.mrf.mxu3 }
 0x785   : > { %v6043_v31 = vadd.f32 %v5923_v3, %v12466_v13  ;;  %v6193_v36 = vpop.f32.mrf.mxu0 }
 0x786   : > { %v6309_v19 = vadd.f32 %v6193_v36, %v12480_v8  ;;  %v5308_v6 = vpop.f32.mrf.mxu1 }
 0x787   : > { %v6623_v4 = vrot.slane %v6043_v31, 7  ;;  %v12838_v14 = vadd.f32 %v5500_v50, %v5308_v6  ;;  %v9839_v31 = vld [vmem:[#allocation2 + $0x78] sm:$0xff]  }
 0x789   : > { %v6710_v32 = vsel %vm14027_vm7, %v6622_v52, %v6623_v4  ;;  %vm14090_vm7 = vmmov %vm14017_vm0 }
 0x78a   : > { %v12842_v62 = vadd.f32 %v6710_v32, %v6306_v27  ;;  %v9840_v27 = vld [vmem:[#allocation2 + $0x7c] sm:$0xff]  }
 0x78b   : > { %v5505_v1 = vpop.f32.mrf.mxu2 }
 0x78c   : > { %v5925_v56 = vpop.f32.mrf.mxu3 }
 0x78d   : > { %v6044_v20 = vadd.f32 %v5925_v56, %v12470_v29  ;;  %v6196_v63 = vpop.f32.mrf.mxu0 }
 0x78e   : > { %v6310_v47 = vadd.f32 %v6196_v63, %v12487_v40  ;;  %v5311_v13 = vpop.f32.mrf.mxu1 }
 0x78f   : > { %v6624_v3 = vrot.slane %v6044_v20, 7  ;;  %v12846_v8 = vadd.f32 %v5503_v39, %v5311_v13 }
 0x790   : > { %5547 = vmatmul.bf16.gmra.mxu2 %v9839_v31  ;;  %6235 = vmatmul.bf16.gmra.mxu0 %v8668_v28 }
 0x791   : > { %v6709_v50 = vsel %vm14028_vm8, %v6623_v4, %v6624_v3  ;;  %5350 = vmatmul.bf16.gmra.mxu1 %v9840_v27  ;;  %5967 = vmatmul.bf16.gmra.mxu3 %v8667_v43  ;;  %v8669_v27 = vld [vmem:[#allocation2 + $0x98] sm:$0xff]  ;;  %vm14094_vm8 = vmmov %vm14017_vm0 }
 0x792   : > { %v12850_v52 = vadd.f32 %v6709_v50, %v6307_v0 }
 0x793   : > { %v5508_v29 = vpop.f32.mrf.mxu2 }
 0x794   : > { %v5928_v36 = vpop.f32.mrf.mxu3 }
 0x795   : > { %v6045_v40 = vadd.f32 %v5928_v36, %v12474_v24  ;;  %v6198_v6 = vpop.f32.mrf.mxu0 }
 0x796   : > { %v6311_v32 = vadd.f32 %v6198_v6, %v12491_v21  ;;  %v5313_v39 = vpop.f32.mrf.mxu1 }
 0x797   : > { %v6625_v56 = vrot.slane %v6045_v40, 7  ;;  %v12854_v20 = vadd.f32 %v5505_v1, %v5313_v39  ;;  %v9841_v40 = vld [vmem:[#allocation2 + $0x80] sm:$0xff]  }
 0x799   : > { %v6708_v63 = vsel %vm14029_vm9, %v6624_v3, %v6625_v56  ;;  %vm14098_vm9 = vmmov %vm14017_vm0 }
 0x79a   : > { %v12858_v4 = vadd.f32 %v6708_v63, %v6308_v16  ;;  %v9842_v16 = vld [vmem:[#allocation2 + $0x84] sm:$0xff]  }
 0x79b   : > { %v5510_v13 = vpop.f32.mrf.mxu2 }
 0x79c   : > { %v5930_v43 = vpop.f32.mrf.mxu3 }
 0x79d   : > { %v6046_v0 = vadd.f32 %v5930_v43, %v12478_v26  ;;  %v6201_v31 = vpop.f32.mrf.mxu0  ;;  %v8698_v26 = vld [vmem:[%s13565_s3 + $0x210] sm:$0xff] }
 0x79e   : > { %v6312_v50 = vadd.f32 %v6201_v31, %v12495_v12  ;;  %v5316_v24 = vpop.f32.mrf.mxu1  ;;  %6420 = vmatpush.bf16.msra.mxu1 %v8698_v26  ;;  %v14037_v26 = vld [vmem:[#allocation54_spill] sm:$0xff] }
 0x79f   : > { %v6626_v36 = vrot.slane %v6046_v0, 7  ;;  %v12862_v21 = vadd.f32 %v5508_v29, %v5316_v24 }
 0x7a0   : > { %5552 = vmatmul.bf16.gmra.mxu2 %v9841_v40  ;;  %6240 = vmatmul.bf16.gmra.mxu0 %v8669_v27  ;;  %v14036_v40 = vld [vmem:[#allocation7_spill] sm:$0xff] }
 0x7a1   : > { %14030 = vst [vmem:[#allocation90_spill] sm:$0xff] %v12862_v21  ;;  %v6707_v1 = vsel %vm14031_vm10, %v6625_v56, %v6626_v36  ;;  %5355 = vmatmul.bf16.gmra.mxu1 %v9842_v16  ;;  %5972 = vmatmul.bf16.gmra.mxu3 %v8668_v28  ;;  %vm14102_vm10 = vmmov %vm14017_vm0 }
 0x7a2   : > { %v12866_v3 = vadd.f32 %v6707_v1, %v6309_v19 }
 0x7a3   : > { %v5513_v12 = vpop.f32.mrf.mxu2 }
 0x7a4   : > { %14032 = vst [vmem:[#allocation52_spill] sm:$0xff] %v12866_v3  ;;  %v5933_v6 = vpop.f32.mrf.mxu3 }
 0x7a5   : > { %v6047_v29 = vadd.f32 %v5933_v6, %v12482_v51  ;;  %v6203_v39 = vpop.f32.mrf.mxu0  ;;  %v8670_v6 = vld [vmem:[#allocation2 + $0xa0] sm:$0xff] }
 0x7a6   : > { %v6313_v63 = vadd.f32 %v6203_v39, %v12499_v23  ;;  %v5318_v43 = vpop.f32.mrf.mxu1 }
 0x7a7   : > { %v6627_v0 = vrot.slane %v6047_v29, 7  ;;  %v12873_v56 = vadd.f32 %v5510_v13, %v5318_v43  ;;  %v9843_v29 = vld [vmem:[#allocation2 + $0x88] sm:$0xff]  }
 0x7a9   : > { %14033 = vst [vmem:[#allocation133_spill] sm:$0xff] %v12873_v56  ;;  %v6706_v19 = vsel %vm14034_vm11, %v6626_v36, %v6627_v0  ;;  %vm14107_vm11 = vmmov %vm14017_vm0 }
 0x7aa   : > { %v12877_v28 = vadd.f32 %v6706_v19, %v6310_v47  ;;  %v9844_v47 = vld [vmem:[#allocation2 + $0x8c] sm:$0xff]   ;;  %v14041_v19 = vld [vmem:[#allocation53_spill] sm:$0xff] }
 0x7ab   : > { %v5515_v31 = vpop.f32.mrf.mxu2 }
 0x7ac   : > { %14035 = vst [vmem:[#allocation93_spill] sm:$0xff] %v12877_v28  ;;  %v5935_v24 = vpop.f32.mrf.mxu3 }
 0x7ad   : > { %v6048_v1 = vadd.f32 %v5935_v24, %v14036_v40  ;;  %v6206_v16 = vpop.f32.mrf.mxu0 }
 0x7ae   : > { %v6314_v3 = vadd.f32 %v6206_v16, %v14037_v26  ;;  %v5321_v51 = vpop.f32.mrf.mxu1  ;;  %v14042_v16 = vld [vmem:[#allocation57_spill] sm:$0xff] }
 0x7af   : > { %v6628_v21 = vrot.slane %v6048_v1, 7  ;;  %v12881_v23 = vadd.f32 %v5513_v12, %v5321_v51 }
 0x7b0   : > { %5557 = vmatmul.bf16.gmra.mxu2 %v9843_v29  ;;  %6245 = vmatmul.bf16.gmra.mxu0 %v8670_v6 }
 0x7b1   : > { %14038 = vst [vmem:[#allocation92_spill] sm:$0xff] %v12881_v23  ;;  %v6705_v13 = vsel %vm14039_vm12, %v6627_v0, %v6628_v21  ;;  %5360 = vmatmul.bf16.gmra.mxu1 %v9844_v47  ;;  %5977 = vmatmul.bf16.gmra.mxu3 %v8669_v27  ;;  %v14047_v23 = vld [vmem:[#allocation13_spill] sm:$0xff]  ;;  %vm14112_vm12 = vmmov %vm14017_vm0 }
 0x7b2   : > { %v12885_v36 = vadd.f32 %v6705_v13, %v6311_v32  ;;  %v14046_v32 = vld [vmem:[#allocation9_spill] sm:$0xff] }
 0x7b3   : > { %v5518_v39 = vpop.f32.mrf.mxu2 }
 0x7b4   : > { %14040 = vst [vmem:[#allocation95_spill] sm:$0xff] %v12885_v36  ;;  %v5938_v43 = vpop.f32.mrf.mxu3 }
 0x7b5   : > { %v6049_v24 = vadd.f32 %v5938_v43, %v14041_v19  ;;  %v6208_v40 = vpop.f32.mrf.mxu0  ;;  %v8671_v19 = vld [vmem:[#allocation2 + $0xa8] sm:$0xff] }
 0x7b6   : > { %v6315_v1 = vadd.f32 %v6208_v40, %v14042_v16  ;;  %v5323_v12 = vpop.f32.mrf.mxu1 }
 0x7b7   : > { %v6629_v26 = vrot.slane %v6049_v24, 7  ;;  %v12889_v51 = vadd.f32 %v5515_v31, %v5323_v12  ;;  %v9845_v24 = vld [vmem:[#allocation2 + $0x90] sm:$0xff]  }
 0x7b9   : > { %14043 = vst [vmem:[#allocation3_spill] sm:$0xff] %v12889_v51  ;;  %v6704_v29 = vsel %vm14044_vm13, %v6628_v21, %v6629_v26  ;;  %vm14116_vm13 = vmmov %vm14017_vm0 }
 0x7ba   : > { %v12893_v0 = vadd.f32 %v6704_v29, %v6312_v50  ;;  %v9846_v50 = vld [vmem:[#allocation2 + $0x94] sm:$0xff]  }
 0x7bb   : > { %v5520_v47 = vpop.f32.mrf.mxu2  ;;  %v14050_v29 = vld [vmem:[#allocation55_spill] sm:$0xff] }
 0x7bc   : > { %14045 = vst [vmem:[#allocation94_spill] sm:$0xff] %v12893_v0  ;;  %v5940_v27 = vpop.f32.mrf.mxu3 }
 0x7bd   : > { %v6050_v13 = vadd.f32 %v5940_v27, %v14046_v32  ;;  %v6211_v36 = vpop.f32.mrf.mxu0  ;;  %v14051_v27 = vld [vmem:[#allocation58_spill] sm:$0xff] }
 0x7be   : > { %v6316_v28 = vadd.f32 %v6211_v36, %v14047_v23  ;;  %v5326_v43 = vpop.f32.mrf.mxu1 }
 0x7bf   : > { %v6630_v56 = vrot.slane %v6050_v13, 7  ;;  %v12897_v40 = vadd.f32 %v5518_v39, %v5326_v43 }
 0x7c0   : > { %5562 = vmatmul.bf16.gmra.mxu2 %v9845_v24  ;;  %6250 = vmatmul.bf16.gmra.mxu0 %v8671_v19 }
 0x7c1   : > { %14048 = vst [vmem:[#allocation97_spill] sm:$0xff] %v12897_v40  ;;  %v6703_v21 = vsel %vm14017_vm0, %v6629_v26, %v6630_v56  ;;  %5365 = vmatmul.bf16.gmra.mxu1 %v9846_v50  ;;  %5982 = vmatmul.bf16.gmra.mxu3 %v8670_v6  ;;  %v14056_v40 = vld [vmem:[#allocation61_spill] sm:$0xff] }
 0x7c2   : > { %v12901_v31 = vadd.f32 %v6703_v21, %v6313_v63  ;;  %v14055_v63 = vld [vmem:[#allocation11_spill] sm:$0xff] }
 0x7c3   : > { %v5523_v16 = vpop.f32.mrf.mxu2 }
 0x7c4   : > { %14049 = vst [vmem:[#allocation4_spill] sm:$0xff] %v12901_v31  ;;  %v5943_v12 = vpop.f32.mrf.mxu3 }
 0x7c5   : > { %v6051_v23 = vadd.f32 %v5943_v12, %v14050_v29  ;;  %v6213_v36 = vpop.f32.mrf.mxu0  ;;  %v8672_v29 = vld [vmem:[#allocation2 + $0xb0] sm:$0xff] }
 0x7c6   : > { %v6317_v32 = vadd.f32 %v6213_v36, %v14051_v27  ;;  %v5328_v39 = vpop.f32.mrf.mxu1 }
 0x7c7   : > { %v6631_v13 = vrot.slane %v6051_v23, 7  ;;  %v12905_v43 = vadd.f32 %v5520_v47, %v5328_v39  ;;  %v9847_v23 = vld [vmem:[#allocation2 + $0x98] sm:$0xff]  }
 0x7c9   : > { %14052 = vst [vmem:[#allocation96_spill] sm:$0xff] %v12905_v43  ;;  %v6702_v24 = vsel %vm14053_vm1, %v6630_v56, %v6631_v13  ;;  %vm14124_vm1 = vmmov %vm14017_vm0 }
 0x7ca   : > { %v12909_v26 = vadd.f32 %v6702_v24, %v6314_v3  ;;  %v9848_v3 = vld [vmem:[#allocation2 + $0x9c] sm:$0xff]  }
 0x7cb   : > { %v5525_v50 = vpop.f32.mrf.mxu2  ;;  %v14060_v24 = vld [vmem:[#allocation56_spill] sm:$0xff] }
 0x7cc   : > { %14054 = vst [vmem:[#allocation99_spill] sm:$0xff] %v12909_v26  ;;  %v5945_v6 = vpop.f32.mrf.mxu3 }
 0x7cd   : > { %v6052_v21 = vadd.f32 %v5945_v6, %v14055_v63  ;;  %v6216_v31 = vpop.f32.mrf.mxu0  ;;  %v14061_v6 = vld [vmem:[#allocation17_spill] sm:$0xff] }
 0x7ce   : > { %v6318_v0 = vadd.f32 %v6216_v31, %v14056_v40  ;;  %v5331_v12 = vpop.f32.mrf.mxu1 }
 0x7cf   : > { %v6632_v51 = vrot.slane %v6052_v21, 7  ;;  %v12913_v36 = vadd.f32 %v5523_v16, %v5331_v12 }
 0x7d0   : > { %5567 = vmatmul.bf16.gmra.mxu2 %v9847_v23  ;;  %6255 = vmatmul.bf16.gmra.mxu0 %v8672_v29 }
 0x7d1   : > { %14057 = vst [vmem:[#allocation5_spill] sm:$0xff] %v12913_v36  ;;  %v6701_v56 = vsel %vm14058_vm14, %v6631_v13, %v6632_v51  ;;  %5370 = vmatmul.bf16.gmra.mxu1 %v9848_v3  ;;  %5987 = vmatmul.bf16.gmra.mxu3 %v8671_v19  ;;  %v14065_v3 = vld [vmem:[#allocation59_spill] sm:$0xff]  ;;  %v14075_v36 = vld [vmem:[#allocation21_spill] sm:$0xff]  ;;  %vm14128_vm14 = vmmov %vm14017_vm0 }
 0x7d2   : > { %v12917_v47 = vadd.f32 %v6701_v56, %v6315_v1  ;;  %v8697_v1 = vld [vmem:[%s13565_s3 + $0x208] sm:$0xff] }
 0x7d3   : > { %v5528_v27 = vpop.f32.mrf.mxu2  ;;  %6421 = vmatpush.bf16.msra.mxu1 %v8697_v1 }
 0x7d4   : > { %14059 = vst [vmem:[#allocation98_spill] sm:$0xff] %v12917_v47  ;;  %v5948_v39 = vpop.f32.mrf.mxu3  ;;  %v14071_v47 = vld [vmem:[#allocation65_spill] sm:$0xff] }
 0x7d5   : > { %v6053_v40 = vadd.f32 %v5948_v39, %v14060_v24  ;;  %v6218_v31 = vpop.f32.mrf.mxu0 }
 0x7d6   : > { %v6319_v63 = vadd.f32 %v6218_v31, %v14061_v6  ;;  %v5333_v16 = vpop.f32.mrf.mxu1  ;;  %v14066_v31 = vld [vmem:[#allocation62_spill] sm:$0xff] }
 0x7d7   : > { %v6633_v21 = vrot.slane %v6053_v40, 7  ;;  %v12921_v12 = vadd.f32 %v5525_v50, %v5333_v16  ;;  %v8673_v50 = vld [vmem:[#allocation2 + $0xb8] sm:$0xff] }
 0x7d9   : > { %14062 = vst [vmem:[#allocation101_spill] sm:$0xff] %v12921_v12  ;;  %v6700_v23 = vsel %vm14063_vm15, %v6632_v51, %v6633_v21  ;;  %v9849_v51 = vld [vmem:[#allocation2 + $0xa0] sm:$0xff]   ;;  %vm14130_vm15 = vmmov %vm14017_vm0 }
 0x7da   : > { %v12925_v13 = vadd.f32 %v6700_v23, %v6316_v28  ;;  %v9850_v23 = vld [vmem:[#allocation2 + $0xa4] sm:$0xff]  }
 0x7db   : > { %v5530_v19 = vpop.f32.mrf.mxu2 }
 0x7dc   : > { %14064 = vst [vmem:[#allocation6_spill] sm:$0xff] %v12925_v13  ;;  %v5950_v56 = vpop.f32.mrf.mxu3  ;;  %v14070_v13 = vld [vmem:[#allocation15_spill] sm:$0xff] }
 0x7dd   : > { %v6054_v39 = vadd.f32 %v5950_v56, %v14065_v3  ;;  %v6221_v24 = vpop.f32.mrf.mxu0 }
 0x7de   : > { %v6320_v6 = vadd.f32 %v6221_v24, %v14066_v31  ;;  %v5336_v40 = vpop.f32.mrf.mxu1 }
 0x7df   : > { %v6634_v16 = vrot.slane %v6054_v39, 7  ;;  %v12932_v12 = vadd.f32 %v5528_v27, %v5336_v40 }
 0x7e0   : > { %5572 = vmatmul.bf16.gmra.mxu2 %v9849_v51  ;;  %6260 = vmatmul.bf16.gmra.mxu0 %v8673_v50 }
 0x7e1   : > { %14067 = vst [vmem:[#allocation100_spill] sm:$0xff] %v12932_v12  ;;  %v6699_v28 = vsel %vm14068_vm2, %v6633_v21, %v6634_v16  ;;  %5375 = vmatmul.bf16.gmra.mxu1 %v9850_v23  ;;  %5992 = vmatmul.bf16.gmra.mxu3 %v8672_v29  ;;  %v14074_v29 = vld [vmem:[#allocation60_spill] sm:$0xff]  ;;  %vm14133_vm2 = vmmov %vm14017_vm0 }
 0x7e2   : > { %v12936_v1 = vadd.f32 %v6699_v28, %v6317_v32 }
 0x7e3   : > { %v5533_v56 = vpop.f32.mrf.mxu2 }
 0x7e4   : > { %14069 = vst [vmem:[#allocation103_spill] sm:$0xff] %v12936_v1  ;;  %v5953_v3 = vpop.f32.mrf.mxu3 }
 0x7e5   : > { %v6055_v24 = vadd.f32 %v5953_v3, %v14070_v13  ;;  %v6223_v31 = vpop.f32.mrf.mxu0  ;;  %v8674_v3 = vld [vmem:[#allocation2 + $0xc0] sm:$0xff] }
 0x7e6   : > { %v6321_v39 = vadd.f32 %v6223_v31, %v14071_v47  ;;  %v5338_v27 = vpop.f32.mrf.mxu1 }
 0x7e7   : > { %v6635_v40 = vrot.slane %v6055_v24, 7  ;;  %v12940_v12 = vadd.f32 %v5530_v19, %v5338_v27  ;;  %v9851_v24 = vld [vmem:[#allocation2 + $0xa8] sm:$0xff]   ;;  %v14079_v27 = vld [vmem:[#allocation63_spill] sm:$0xff] }
 0x7e9   : > { %v6698_v51 = vsel %vm14072_vm3, %v6634_v16, %v6635_v40  ;;  %vm14135_vm3 = vmmov %vm14017_vm0 }
 0x7ea   : > { %v12944_v21 = vadd.f32 %v6698_v51, %v6318_v0  ;;  %v9852_v0 = vld [vmem:[#allocation2 + $0xac] sm:$0xff]  }
 0x7eb   : > { %v5535_v1 = vpop.f32.mrf.mxu2 }
 0x7ec   : > { %14073 = vst [vmem:[#allocation8_spill] sm:$0xff] %v12944_v21  ;;  %v5955_v23 = vpop.f32.mrf.mxu3 }
 0x7ed   : > { %v6056_v32 = vadd.f32 %v5955_v23, %v14074_v29  ;;  %v6226_v28 = vpop.f32.mrf.mxu0  ;;  %v14080_v23 = vld [vmem:[#allocation25_spill] sm:$0xff] }
 0x7ee   : > { %v6322_v26 = vadd.f32 %v6226_v28, %v14075_v36  ;;  %v5341_v13 = vpop.f32.mrf.mxu1 }
 0x7ef   : > { %v6636_v43 = vrot.slane %v6056_v32, 7  ;;  %v12948_v47 = vadd.f32 %v5533_v56, %v5341_v13 }
 0x7f0   : > { %5577 = vmatmul.bf16.gmra.mxu2 %v9851_v24  ;;  %6265 = vmatmul.bf16.gmra.mxu0 %v8674_v3 }
 0x7f1   : > { %14076 = vst [vmem:[#allocation102_spill] sm:$0xff] %v12948_v47  ;;  %v6697_v19 = vsel %vm14077_vm4, %v6635_v40, %v6636_v43  ;;  %5380 = vmatmul.bf16.gmra.mxu1 %v9852_v0  ;;  %5997 = vmatmul.bf16.gmra.mxu3 %v8673_v50  ;;  %v14082_v50 = vld [vmem:[#allocation19_spill] sm:$0xff]  ;;  %vm14138_vm4 = vmmov %vm14017_vm0 }
 0x7f2   : > { %v12952_v16 = vadd.f32 %v6697_v19, %v6319_v63 }
 0x7f3   : > { %v5538_v13 = vpop.f32.mrf.mxu2 }
 0x7f4   : > { %14078 = vst [vmem:[#allocation105_spill] sm:$0xff] %v12952_v16  ;;  %v5958_v31 = vpop.f32.mrf.mxu3  ;;  %v14083_v16 = vld [vmem:[#allocation66_spill] sm:$0xff] }
 0x7f5   : > { %v6057_v51 = vadd.f32 %v5958_v31, %v14079_v27  ;;  %v6228_v36 = vpop.f32.mrf.mxu0  ;;  %v8675_v27 = vld [vmem:[#allocation2 + $0xc8] sm:$0xff] }
 0x7f6   : > { %v6323_v29 = vadd.f32 %v6228_v36, %v14080_v23  ;;  %v5343_v32 = vpop.f32.mrf.mxu1 }
 0x7f7   : > { %v6637_v56 = vrot.slane %v6057_v51, 7  ;;  %v12956_v28 = vadd.f32 %v5535_v1, %v5343_v32  ;;  %v9853_v51 = vld [vmem:[#allocation2 + $0xb0] sm:$0xff]  }
 0x7f9   : > { %v6696_v24 = vsel %vm14081_vm5, %v6636_v43, %v6637_v56  ;;  %v9854_v43 = vld [vmem:[#allocation2 + $0xb4] sm:$0xff]   ;;  %vm14141_vm5 = vmmov %vm14017_vm0 }
 0x7fa   : > { %v12960_v40 = vadd.f32 %v6696_v24, %v6320_v6  ;;  %v14087_v24 = vld [vmem:[#allocation64_spill] sm:$0xff] }
 0x7fb   : > { %v5540_v6 = vpop.f32.mrf.mxu2 }
 0x7fc   : > { %v5960_v0 = vpop.f32.mrf.mxu3 }
 0x7fd   : > { %v6058_v63 = vadd.f32 %v5960_v0, %v14082_v50  ;;  %v6231_v19 = vpop.f32.mrf.mxu0  ;;  %v14088_v50 = vld [vmem:[#allocation69_spill] sm:$0xff] }
 0x7fe   : > { %v6324_v47 = vadd.f32 %v6231_v19, %v14083_v16  ;;  %v5346_v31 = vpop.f32.mrf.mxu1 }
 0x7ff   : > { %v6638_v21 = vrot.slane %v6058_v63, 7  ;;  %v12964_v36 = vadd.f32 %v5538_v13, %v5346_v31 }
 0x800   : > { %5582 = vmatmul.bf16.gmra.mxu2 %v9853_v51  ;;  %6270 = vmatmul.bf16.gmra.mxu0 %v8675_v27 }
 0x801   : > { %14084 = vst [vmem:[#allocation10_spill] sm:$0xff] %v12964_v36  ;;  %v6695_v1 = vsel %vm14085_vm6, %v6637_v56, %v6638_v21  ;;  %5385 = vmatmul.bf16.gmra.mxu1 %v9854_v43  ;;  %6002 = vmatmul.bf16.gmra.mxu3 %v8674_v3  ;;  %v14092_v43 = vld [vmem:[#allocation23_spill] sm:$0xff]  ;;  %v9859_v36 = vld [vmem:[#allocation2 + $0xc8] sm:$0xff]   ;;  %vm14145_vm6 = vmmov %vm14017_vm0 }
 0x802   : > { %v12968_v23 = vadd.f32 %v6695_v1, %v6321_v39  ;;  %v8696_v39 = vld [vmem:[%s13565_s3 + $0x200] sm:$0xff] }
 0x803   : > { %v5543_v3 = vpop.f32.mrf.mxu2  ;;  %6422 = vmatpush.bf16.msra.mxu1 %v8696_v39 }
 0x804   : > { %14086 = vst [vmem:[#allocation104_spill] sm:$0xff] %v12968_v23  ;;  %v5963_v32 = vpop.f32.mrf.mxu3 }
 0x805   : > { %v6059_v16 = vadd.f32 %v5963_v32, %v14087_v24  ;;  %v6233_v0 = vpop.f32.mrf.mxu0 }
 0x806   : > { %v6325_v63 = vadd.f32 %v6233_v0, %v14088_v50  ;;  %v5348_v13 = vpop.f32.mrf.mxu1  ;;  %v8676_v50 = vld [vmem:[#allocation2 + $0xd0] sm:$0xff] }
 0x807   : > { %v6639_v19 = vrot.slane %v6059_v16, 7  ;;  %v12972_v31 = vadd.f32 %v5540_v6, %v5348_v13  ;;  %v9855_v13 = vld [vmem:[#allocation2 + $0xb8] sm:$0xff]  }
 0x809   : > { %14089 = vst [vmem:[#allocation107_spill] sm:$0xff] %v12972_v31  ;;  %v6694_v51 = vsel %vm14090_vm7, %v6638_v21, %v6639_v19  ;;  %v9856_v21 = vld [vmem:[#allocation2 + $0xbc] sm:$0xff]   ;;  %vm14148_vm7 = vmmov %vm14017_vm0 }
 0x80a   : > { %v12976_v56 = vadd.f32 %v6694_v51, %v6322_v26 }
 0x80b   : > { %v5545_v31 = vpop.f32.mrf.mxu2 }
 0x80c   : > { %14091 = vst [vmem:[#allocation12_spill] sm:$0xff] %v12976_v56  ;;  %v5965_v1 = vpop.f32.mrf.mxu3 }
 0x80d   : > { %v6060_v32 = vadd.f32 %v5965_v1, %v14092_v43  ;;  %v6236_v24 = vpop.f32.mrf.mxu0  ;;  %v14096_v1 = vld [vmem:[#allocation67_spill] sm:$0xff] }
 0x80e   : > { %v5351_v0 = vpop.f32.mrf.mxu1 }
 0x80f   : > { %v6640_v16 = vrot.slane %v6060_v32, 7  ;;  %v12982_v6 = vadd.f32 %v5543_v3, %v5351_v0 }
 0x810   : > { %5587 = vmatmul.bf16.gmra.mxu2 %v9855_v13  ;;  %6275 = vmatmul.bf16.gmra.mxu0 %v8676_v50 }
 0x811   : > { %14093 = vst [vmem:[#allocation106_spill] sm:$0xff] %v12982_v6  ;;  %v6693_v26 = vsel %vm14094_vm8, %v6639_v19, %v6640_v16  ;;  %5390 = vmatmul.bf16.gmra.mxu1 %v9856_v21  ;;  %6007 = vmatmul.bf16.gmra.mxu3 %v8675_v27  ;;  %v14100_v6 = vld [vmem:[#allocation27_spill] sm:$0xff]  ;;  %vm14151_vm8 = vmmov %vm14017_vm0 }
 0x812   : > { %v12986_v51 = vadd.f32 %v6693_v26, %v6323_v29  ;;  %v8677_v26 = vld [vmem:[#allocation2 + $0xd8] sm:$0xff] }
 0x814   : > { %14095 = vst [vmem:[#allocation109_spill] sm:$0xff] %v12986_v51  ;;  %v5968_v56 = vpop.f32.mrf.mxu3 }
 0x815   : > { %v6061_v43 = vadd.f32 %v5968_v56, %v14096_v1  ;;  %v6238_v39 = vpop.f32.mrf.mxu0  ;;  %v9857_v56 = vld [vmem:[#allocation2 + $0xc0] sm:$0xff]   ;;  %v14104_v1 = vld [vmem:[#allocation68_spill] sm:$0xff] }
 0x816   : > { %v5353_v23 = vpop.f32.mrf.mxu1 }
 0x817   : > { %v6641_v32 = vrot.slane %v6061_v43, 7  ;;  %v12989_v3 = vadd.f32 %v5545_v31, %v5353_v23  ;;  %v9858_v31 = vld [vmem:[#allocation2 + $0xc4] sm:$0xff]  }
 0x819   : > { %14097 = vst [vmem:[#allocation14_spill] sm:$0xff] %v12989_v3  ;;  %v6692_v0 = vsel %vm14098_vm9, %v6640_v16, %v6641_v32  ;;  %v14109_v3 = vld [vmem:[#allocation31_spill] sm:$0xff]  ;;  %vm14155_vm9 = vmmov %vm14017_vm0 }
 0x81a   : > { %v12993_v13 = vadd.f32 %v6692_v0, %v6324_v47 }
 0x81c   : > { %14099 = vst [vmem:[#allocation108_spill] sm:$0xff] %v12993_v13  ;;  %v5970_v19 = vpop.f32.mrf.mxu3 }
 0x81d   : > { %v6062_v21 = vadd.f32 %v5970_v19, %v14100_v6  ;;  %v6241_v27 = vpop.f32.mrf.mxu0 }
 0x81e   : > { %v12996_v29 = vpop.f32.mrf.mxu1 }
 0x81f   : > { %14101 = vst [vmem:[#allocation111_spill] sm:$0xff] %v12996_v29  ;;  %v6642_v51 = vrot.slane %v6062_v21, 7  ;;  %v14106_v29 = vld [vmem:[#allocation29_spill] sm:$0xff] }
 0x820   : > { %5592 = vmatmul.bf16.gmra.mxu2 %v9857_v56  ;;  %6280 = vmatmul.bf16.gmra.mxu0 %v8677_v26  ;;  %v6326_v21 = vadd.f32 %v6236_v24, %v14106_v29  ;;  %v9860_v29 = vld [vmem:[#allocation2 + $0xcc] sm:$0xff]  }
 0x821   : > { %v6691_v23 = vsel %vm14102_vm10, %v6641_v32, %v6642_v51  ;;  %5395 = vmatmul.bf16.gmra.mxu1 %v9858_v31  ;;  %6012 = vmatmul.bf16.gmra.mxu3 %v8676_v50  ;;  %vm14160_vm10 = vmmov %vm14017_vm0 }
 0x822   : > { %v13000_v16 = vadd.f32 %v6691_v23, %v6325_v63  ;;  %v8678_v23 = vld [vmem:[#allocation2 + $0xe0] sm:$0xff] }
 0x824   : > { %14103 = vst [vmem:[#allocation16_spill] sm:$0xff] %v13000_v16  ;;  %v5973_v47 = vpop.f32.mrf.mxu3 }
 0x825   : > { %v6063_v43 = vadd.f32 %v5973_v47, %v14104_v1  ;;  %v6243_v6 = vpop.f32.mrf.mxu0  ;;  %v14111_v47 = vld [vmem:[#allocation71_spill] sm:$0xff] }
 0x826   : > { %v13003_v0 = vpop.f32.mrf.mxu1  ;;  %v6327_v1 = vadd.f32 %v6238_v39, %v14111_v47 }
 0x827   : > { %14105 = vst [vmem:[#allocation110_spill] sm:$0xff] %v13003_v0  ;;  %v6643_v19 = vrot.slane %v6063_v43, 7  ;;  %v9861_v0 = vld [vmem:[#allocation2 + $0xd0] sm:$0xff]  }
 0x829   : > { %v6690_v56 = vsel %vm14107_vm11, %v6642_v51, %v6643_v19  ;;  %vm14164_vm11 = vmmov %vm14017_vm0 }
 0x82a   : > { %v13008_v13 = vadd.f32 %v6690_v56, %v6326_v21 }
 0x82c   : > { %14108 = vst [vmem:[#allocation113_spill] sm:$0xff] %v13008_v13  ;;  %v5975_v32 = vpop.f32.mrf.mxu3  ;;  %v8679_v13 = vld [vmem:[#allocation2 + $0xe8] sm:$0xff] }
 0x82d   : > { %v6064_v31 = vadd.f32 %v5975_v32, %v14109_v3  ;;  %v6246_v50 = vpop.f32.mrf.mxu0  ;;  %v14114_v3 = vld [vmem:[#allocation70_spill] sm:$0xff] }
 0x82e   : > { %v13011_v63 = vpop.f32.mrf.mxu1 }
 0x82f   : > { %14110 = vst [vmem:[#allocation18_spill] sm:$0xff] %v13011_v63  ;;  %v6644_v16 = vrot.slane %v6064_v31, 7  ;;  %v14115_v63 = vld [vmem:[#allocation33_spill] sm:$0xff] }
 0x830   : > { %5597 = vmatmul.bf16.gmra.mxu2 %v9859_v36  ;;  %6285 = vmatmul.bf16.gmra.mxu0 %v8678_v23  ;;  %v6328_v39 = vadd.f32 %v6241_v27, %v14115_v63  ;;  %v9862_v63 = vld [vmem:[#allocation2 + $0xd4] sm:$0xff] }
 0x831   : > { %v6689_v24 = vsel %vm14112_vm12, %v6643_v19, %v6644_v16  ;;  %5400 = vmatmul.bf16.gmra.mxu1 %v9860_v29  ;;  %6017 = vmatmul.bf16.gmra.mxu3 %v8677_v26  ;;  %v14118_v29 = vld [vmem:[#allocation73_spill] sm:$0xff]  ;;  %vm14169_vm12 = vmmov %vm14017_vm0 }
 0x832   : > { %v13016_v51 = vadd.f32 %v6689_v24, %v6327_v1 }
 0x834   : > { %14113 = vst [vmem:[#allocation112_spill] sm:$0xff] %v13016_v51  ;;  %v5978_v43 = vpop.f32.mrf.mxu3 }
 0x835   : > { %v6065_v21 = vadd.f32 %v5978_v43, %v14114_v3  ;;  %v6248_v56 = vpop.f32.mrf.mxu0  ;;  %v14120_v43 = vld [vmem:[#allocation72_spill] sm:$0xff] }
 0x836   : > { %v13019_v32 = vpop.f32.mrf.mxu1  ;;  %v6329_v3 = vadd.f32 %v6243_v6, %v14120_v43 }
 0x837   : > { %v6645_v31 = vrot.slane %v6065_v21, 7 }
 0x839   : > { %v6688_v36 = vsel %vm14116_vm13, %v6644_v16, %v6645_v31  ;;  %vm14172_vm13 = vmmov %vm14017_vm0 }
 0x83a   : > { %v13024_v47 = vadd.f32 %v6688_v36, %v6328_v39  ;;  %v14122_v39 = vld [vmem:[#allocation35_spill] sm:$0xff] }
 0x83c   : > { %14117 = vst [vmem:[#allocation115_spill] sm:$0xff] %v13024_v47  ;;  %v5980_v19 = vpop.f32.mrf.mxu3  ;;  %v14126_v47 = vld [vmem:[#allocation74_spill] sm:$0xff] }
 0x83d   : > { %v6066_v26 = vadd.f32 %v5980_v19, %v14118_v29  ;;  %v6251_v1 = vpop.f32.mrf.mxu0 }
 0x83e   : > { %v13027_v24 = vpop.f32.mrf.mxu1 }
 0x83f   : > { %14119 = vst [vmem:[#allocation20_spill] sm:$0xff] %v13027_v24  ;;  %v6646_v51 = vrot.slane %v6066_v26, 7  ;;  %v14123_v24 = vld [vmem:[#allocation75_spill] sm:$0xff] }
 0x840   : > { %5602 = vmatmul.bf16.gmra.mxu2 %v9861_v0  ;;  %6290 = vmatmul.bf16.gmra.mxu0 %v8679_v13  ;;  %v6330_v6 = vadd.f32 %v6246_v50, %v14123_v24  ;;  %v14129_v24 = vld [vmem:[#allocation77_spill] sm:$0xff] }
 0x841   : > { %v6687_v27 = vsel %vm14017_vm0, %v6645_v31, %v6646_v51  ;;  %5405 = vmatmul.bf16.gmra.mxu1 %v9862_v63  ;;  %6022 = vmatmul.bf16.gmra.mxu3 %v8678_v23 }
 0x842   : > { %v13032_v16 = vadd.f32 %v6687_v27, %v6329_v3 }
 0x844   : > { %14121 = vst [vmem:[#allocation114_spill] sm:$0xff] %v13032_v16  ;;  %v5983_v21 = vpop.f32.mrf.mxu3  ;;  %v14127_v16 = vld [vmem:[#allocation37_spill] sm:$0xff] }
 0x845   : > { %v6067_v36 = vadd.f32 %v5983_v21, %v14122_v39  ;;  %v6253_v19 = vpop.f32.mrf.mxu0  ;;  %v6331_v21 = vadd.f32 %v6248_v56, %v14127_v16 }
 0x846   : > { %v13035_v29 = vpop.f32.mrf.mxu1 }
 0x847   : > { %v6647_v26 = vrot.slane %v6067_v36, 7  ;;  %v9863_v36 = vld [vmem:[#allocation2 + $0xdc] sm:$0xff] }
 0x849   : > { %v6686_v0 = vsel %vm14124_vm1, %v6646_v51, %v6647_v26  ;;  %vm14178_vm1 = vmmov %vm14017_vm0 }
 0x84a   : > { %v13040_v43 = vadd.f32 %v6686_v0, %v6330_v6 }
 0x84c   : > { %14125 = vst [vmem:[#allocation117_spill] sm:$0xff] %v13040_v43  ;;  %v5985_v31 = vpop.f32.mrf.mxu3 }
 0x84d   : > { %v6068_v63 = vadd.f32 %v5985_v31, %v14126_v47  ;;  %v6256_v23 = vpop.f32.mrf.mxu0  ;;  %v6332_v31 = vadd.f32 %v6251_v1, %v12656_v59 }
 0x84e   : > { %v13043_v3 = vpop.f32.mrf.mxu1 }
 0x84f   : > { %v6648_v27 = vrot.slane %v6068_v63, 7 }
 0x851   : > { %v6685_v39 = vsel %vm14128_vm14, %v6647_v26, %v6648_v27  ;;  %5410 = vmatmul.bf16.gmra.mxu1 %v9863_v36  ;;  %6027 = vmatmul.bf16.gmra.mxu3 %v8679_v13  ;;  %v14132_v36 = vld [vmem:[#allocation76_spill] sm:$0xff]  ;;  %vm14182_vm14 = vmmov %vm14017_vm0 }
 0x852   : > { %v13048_v50 = vadd.f32 %v6685_v39, %v6331_v21 }
 0x854   : > { %v5988_v51 = vpop.f32.mrf.mxu3 }
 0x855   : > { %v6069_v6 = vadd.f32 %v5988_v51, %v14129_v24  ;;  %v6258_v0 = vpop.f32.mrf.mxu0  ;;  %v6333_v51 = vadd.f32 %v6253_v19, %v14132_v36 }
 0x856   : > { %v13051_v43 = vpop.f32.mrf.mxu1 }
 0x857   : > { %v6649_v47 = vrot.slane %v6069_v6, 7  ;;  %v9864_v6 = vld [vmem:[#allocation2 + $0x18] sm:$0xff] }
 0x859   : > { %v6684_v56 = vsel %vm14130_vm15, %v6648_v27, %v6649_v47  ;;  %v14134_v27 = vld [vmem:[#allocation39_spill] sm:$0xff]  ;;  %vm14186_vm15 = vmmov %vm14017_vm0 }
 0x85a   : > { %v13056_v16 = vadd.f32 %v6684_v56, %v6332_v31 }
 0x85c   : > { %14131 = vst [vmem:[#allocation22_spill] sm:$0xff] %v13056_v16  ;;  %v5990_v26 = vpop.f32.mrf.mxu3 }
 0x85d   : > { %v6070_v63 = vadd.f32 %v5990_v26, %v12658_v54  ;;  %v6261_v13 = vpop.f32.mrf.mxu0  ;;  %v6334_v26 = vadd.f32 %v6256_v23, %v12666_v42 }
 0x85e   : > { %v13059_v21 = vpop.f32.mrf.mxu1 }
 0x85f   : > { %v6650_v39 = vrot.slane %v6070_v63, 7 }
 0x861   : > { %v6683_v24 = vsel %vm14133_vm2, %v6649_v47, %v6650_v39  ;;  %6423 = vmatmul.bf16.vlgmr.msra.gmra.mxu1 %v9864_v6  ;;  %vm14189_vm2 = vmmov %vm14017_vm0 }
 0x862   : > { %v13064_v59 = vadd.f32 %v6683_v24, %v6333_v51 }
 0x864   : > { %v5993_v1 = vpop.f32.mrf.mxu3 }
 0x865   : > { %v6071_v31 = vadd.f32 %v5993_v1, %v14134_v27  ;;  %v6263_v56 = vpop.f32.mrf.mxu0  ;;  %v6335_v1 = vadd.f32 %v6258_v0, %v12670_v10 }
 0x866   : > { %v13067_v16 = vpop.f32.mrf.mxu1 }
 0x867   : > { %v6651_v54 = vrot.slane %v6071_v31, 7  ;;  %v9865_v31 = vld [vmem:[#allocation2 + $0x20] sm:$0xff] }
 0x869   : > { %v6682_v63 = vsel %vm14135_vm3, %v6650_v39, %v6651_v54  ;;  %v14140_v39 = vld [vmem:[#allocation79_spill] sm:$0xff]  ;;  %vm14191_vm3 = vmmov %vm14017_vm0 }
 0x86a   : > { %v13072_v19 = vadd.f32 %v6682_v63, %v6334_v26 }
 0x86c   : > { %14136 = vst [vmem:[#allocation116_spill] sm:$0xff] %v13072_v19  ;;  %v5995_v36 = vpop.f32.mrf.mxu3 }
 0x86d   : > { %v6072_v47 = vadd.f32 %v5995_v36, %v12668_v18  ;;  %v6266_v24 = vpop.f32.mrf.mxu0  ;;  %v6336_v18 = vadd.f32 %v6261_v13, %v12676_v46 }
 0x86e   : > { %v13075_v6 = vpop.f32.mrf.mxu1 }
 0x86f   : > { %14137 = vst [vmem:[#allocation120_spill] sm:$0xff] %v13075_v6  ;;  %v6652_v51 = vrot.slane %v6072_v47, 7 }
 0x871   : > { %v6681_v27 = vsel %vm14138_vm4, %v6651_v54, %v6652_v51  ;;  %6428 = vmatmul.bf16.gmra.mxu1 %v9865_v31  ;;  %v14143_v54 = vld [vmem:[#allocation78_spill] sm:$0xff]  ;;  %vm14196_vm4 = vcmp.lt.s32.totalorder %v10892_v53, 7 }
 0x872   : > { %v13080_v42 = vadd.f32 %v6681_v27, %v6335_v1  ;;  %v14144_v27 = vld [vmem:[#allocation41_spill] sm:$0xff] }
 0x874   : > { %14139 = vst [vmem:[#allocation24_spill] sm:$0xff] %v13080_v42  ;;  %v5998_v23 = vpop.f32.mrf.mxu3  ;;  %v6337_v42 = vadd.f32 %v6263_v56, %v14144_v27 }
 0x875   : > { %v6073_v26 = vadd.f32 %v5998_v23, %v14140_v39  ;;  %v6268_v47 = vpop.f32.mrf.mxu0  ;;  %v9866_v39 = vld [vmem:[#allocation2 + $0x28] sm:$0xff] }
 0x876   : > { %v13083_v63 = vpop.f32.mrf.mxu1 }
 0x877   : > { %v6653_v19 = vrot.slane %v6073_v26, 7  ;;  %v14147_v26 = vld [vmem:[#allocation81_spill] sm:$0xff] }
 0x879   : > { %v6680_v36 = vsel %vm14141_vm5, %v6652_v51, %v6653_v19  ;;  %vm14198_vm5 = vmmov %vm14196_vm4 }
 0x87a   : > { %v13088_v10 = vadd.f32 %v6680_v36, %v6336_v18 }
 0x87c   : > { %14142 = vst [vmem:[#allocation119_spill] sm:$0xff] %v13088_v10  ;;  %v6000_v0 = vpop.f32.mrf.mxu3 }
 0x87d   : > { %v6074_v6 = vadd.f32 %v6000_v0, %v14143_v54  ;;  %v6271_v13 = vpop.f32.mrf.mxu0  ;;  %v6338_v0 = vadd.f32 %v6266_v24, %v12689_v2 }
 0x87e   : > { %v13091_v31 = vpop.f32.mrf.mxu1 }
 0x87f   : > { %v6654_v1 = vrot.slane %v6074_v6, 7 }
 0x881   : > { %v6679_v23 = vsel %vm14145_vm6, %v6653_v19, %v6654_v1  ;;  %6433 = vmatmul.bf16.gmra.mxu1 %v9866_v39  ;;  %v14150_v39 = vld [vmem:[#allocation80_spill] sm:$0xff]  ;;  %vm14200_vm6 = vmmov %vm14196_vm4 }
 0x882   : > { %v13096_v46 = vadd.f32 %v6679_v23, %v6337_v42 }
 0x884   : > { %14146 = vst [vmem:[#allocation123_spill] sm:$0xff] %v13096_v46  ;;  %v6003_v51 = vpop.f32.mrf.mxu3  ;;  %v6339_v46 = vadd.f32 %v6268_v47, %v14150_v39 }
 0x885   : > { %v6075_v18 = vadd.f32 %v6003_v51, %v14147_v26  ;;  %v6273_v19 = vpop.f32.mrf.mxu0  ;;  %v9867_v26 = vld [vmem:[#allocation2 + $0x30] sm:$0xff] }
 0x886   : > { %v13099_v36 = vpop.f32.mrf.mxu1 }
 0x887   : > { %v6655_v10 = vrot.slane %v6075_v18, 7 }
 0x889   : > { %v6678_v6 = vsel %vm14148_vm7, %v6654_v1, %v6655_v10  ;;  %v14153_v1 = vld [vmem:[#allocation43_spill] sm:$0xff]  ;;  %vm14201_vm7 = vmmov %vm14196_vm4 }
 0x88a   : > { %v13104_v56 = vadd.f32 %v6678_v6, %v6338_v0 }
 0x88c   : > { %14149 = vst [vmem:[#allocation26_spill] sm:$0xff] %v13104_v56  ;;  %v6005_v54 = vpop.f32.mrf.mxu3 }
 0x88d   : > { %v6076_v27 = vadd.f32 %v6005_v54, %v12691_v60  ;;  %v6276_v6 = vpop.f32.mrf.mxu0  ;;  %v6340_v60 = vadd.f32 %v6271_v13, %v12699_v38 }
 0x88e   : > { %v13107_v42 = vpop.f32.mrf.mxu1 }
 0x88f   : > { %v6656_v23 = vrot.slane %v6076_v27, 7 }
 0x891   : > { %v6677_v51 = vsel %vm14151_vm8, %v6655_v10, %v6656_v23  ;;  %6438 = vmatmul.bf16.gmra.mxu1 %v9867_v26  ;;  %v14157_v10 = vld [vmem:[#allocation118_spill] sm:$0xff]  ;;  %vm14202_vm8 = vmmov %vm14196_vm4 }
 0x892   : > { %v13112_v2 = vadd.f32 %v6677_v51, %v6339_v46  ;;  %v14159_v51 = vld [vmem:[#allocation83_spill] sm:$0xff] }
 0x894   : > { %14152 = vst [vmem:[#allocation122_spill] sm:$0xff] %v13112_v2  ;;  %v6008_v24 = vpop.f32.mrf.mxu3  ;;  %v6341_v2 = vadd.f32 %v6273_v19, %v14159_v51 }
 0x895   : > { %v6077_v18 = vadd.f32 %v6008_v24, %v14153_v1  ;;  %v6278_v24 = vpop.f32.mrf.mxu0 }
 0x896   : > { %v13115_v0 = vpop.f32.mrf.mxu1 }
 0x897   : > { %14154 = vst [vmem:[#allocation126_spill] sm:$0xff] %v13115_v0  ;;  %v6657_v56 = vrot.slane %v6077_v18, 7  ;;  %v9868_v18 = vld [vmem:[#allocation2 + $0x38] sm:$0xff] }
 0x899   : > { %v6676_v54 = vsel %vm14155_vm9, %v6656_v23, %v6657_v56  ;;  %v14162_v23 = vld [vmem:[#allocation82_spill] sm:$0xff]  ;;  %vm14203_vm9 = vmmov %vm14196_vm4 }
 0x89a   : > { %v13120_v47 = vadd.f32 %v6676_v54, %v6340_v60 }
 0x89c   : > { %14156 = vst [vmem:[#allocation28_spill] sm:$0xff] %v13120_v47  ;;  %v6010_v27 = vpop.f32.mrf.mxu3 }
 0x89d   : > { %v6078_v39 = vadd.f32 %v6010_v27, %v14157_v10  ;;  %v14163_v27 = vld [vmem:[#allocation45_spill] sm:$0xff]  ;;  %v6281_v51 = vpop.f32.mrf.mxu0 }
 0x89e   : > { %v13123_v26 = vpop.f32.mrf.mxu1  ;;  %v6342_v10 = vadd.f32 %v6276_v6, %v14163_v27  ;;  %v14171_v27 = vld [vmem:[#allocation84_spill] sm:$0xff] }
 0x89f   : > { %14158 = vst [vmem:[#allocation125_spill] sm:$0xff] %v13123_v26  ;;  %v6658_v46 = vrot.slane %v6078_v39, 7 }
 0x8a1   : > { %v6675_v1 = vsel %vm14160_vm10, %v6657_v56, %v6658_v46  ;;  %6443 = vmatmul.bf16.gmra.mxu1 %v9868_v18  ;;  %v14166_v56 = vld [vmem:[#allocation121_spill] sm:$0xff]  ;;  %vm14204_vm10 = vmmov %vm14196_vm4 }
 0x8a2   : > { %v13128_v38 = vadd.f32 %v6675_v1, %v6341_v2  ;;  %v14168_v1 = vld [vmem:[#allocation85_spill] sm:$0xff] }
 0x8a4   : > { %14161 = vst [vmem:[#allocation129_spill] sm:$0xff] %v13128_v38  ;;  %v6013_v13 = vpop.f32.mrf.mxu3  ;;  %v6343_v38 = vadd.f32 %v6278_v24, %v14168_v1 }
 0x8a5   : > { %v6079_v60 = vadd.f32 %v6013_v13, %v14162_v23  ;;  %v9869_v23 = vld [vmem:[#allocation2 + $0x40] sm:$0xff] }
 0x8a6   : > { %v13131_v54 = vpop.f32.mrf.mxu1 }
 0x8a7   : > { %v6659_v47 = vrot.slane %v6079_v60, 7 }
 0x8a9   : > { %v6674_v39 = vsel %vm14164_vm11, %v6658_v46, %v6659_v47  ;;  %v6283_v46 = vpop.f32.mrf.mxu0  ;;  %vm14205_vm11 = vmmov %vm14196_vm4 }
 0x8aa   : > { %v13136_v19 = vadd.f32 %v6674_v39, %v6342_v10 }
 0x8ac   : > { %14165 = vst [vmem:[#allocation30_spill] sm:$0xff] %v13136_v19  ;;  %v6015_v26 = vpop.f32.mrf.mxu3 }
 0x8ad   : > { %v6080_v0 = vadd.f32 %v6015_v26, %v14166_v56  ;;  %v6344_v26 = vadd.f32 %v6281_v51, %v12720_v22 }
 0x8ae   : > { %v13139_v18 = vpop.f32.mrf.mxu1 }
 0x8af   : > { %14167 = vst [vmem:[#allocation128_spill] sm:$0xff] %v13139_v18  ;;  %v6660_v2 = vrot.slane %v6080_v0, 7 }
 0x8b1   : > { %v6673_v13 = vsel %vm14169_vm12, %v6659_v47, %v6660_v2  ;;  %6448 = vmatmul.bf16.gmra.mxu1 %v9869_v23  ;;  %v14173_v47 = vld [vmem:[#allocation47_spill] sm:$0xff]  ;;  %vm14206_vm12 = vmmov %vm14196_vm4 }
 0x8b2   : > { %v13144_v6 = vadd.f32 %v6673_v13, %v6343_v38  ;;  %v6286_v38 = vpop.f32.mrf.mxu0 }
 0x8b4   : > { %14170 = vst [vmem:[#allocation132_spill] sm:$0xff] %v13144_v6  ;;  %v6018_v60 = vpop.f32.mrf.mxu3  ;;  %v14175_v6 = vld [vmem:[#allocation124_spill] sm:$0xff] }
 0x8b5   : > { %v6081_v10 = vadd.f32 %v6018_v60, %v14171_v27  ;;  %v6345_v18 = vadd.f32 %v6283_v46, %v14175_v6  ;;  %v9870_v27 = vld [vmem:[#allocation2 + $0x48] sm:$0xff] }
 0x8b6   : > { %v13147_v39 = vpop.f32.mrf.mxu1 }
 0x8b7   : > { %v6661_v19 = vrot.slane %v6081_v10, 7 }
 0x8b9   : > { %v6672_v0 = vsel %vm14172_vm13, %v6660_v2, %v6661_v19  ;;  %v14177_v2 = vld [vmem:[#allocation87_spill] sm:$0xff]  ;;  %vm14207_vm13 = vmmov %vm14196_vm4 }
 0x8ba   : > { %v13152_v24 = vadd.f32 %v6672_v0, %v6344_v26 }
 0x8bc   : > { %v6020_v56 = vpop.f32.mrf.mxu3 }
 0x8bd   : > { %v6082_v1 = vadd.f32 %v6020_v56, %v14173_v47  ;;  %v6346_v56 = vadd.f32 %v6286_v38, %v12728_v61  ;;  %v6288_v47 = vpop.f32.mrf.mxu0 }
 0x8be   : > { %v13155_v23 = vpop.f32.mrf.mxu1 }
 0x8bf   : > { %14174 = vst [vmem:[#allocation32_spill] sm:$0xff] %v13155_v23  ;;  %v6662_v13 = vrot.slane %v6082_v1, 7 }
 0x8c1   : > { %v6671_v60 = vsel %vm14017_vm0, %v6661_v19, %v6662_v13  ;;  %6453 = vmatmul.bf16.gmra.mxu1 %v9870_v27  ;;  %v14180_v19 = vld [vmem:[#allocation86_spill] sm:$0xff]  ;;  %vm14208_vm0 = vmmov %vm14196_vm4 }
 0x8c2   : > { %v13160_v22 = vadd.f32 %v6671_v60, %v6345_v18  ;;  %v14181_v60 = vld [vmem:[#allocation49_spill] sm:$0xff] }
 0x8c4   : > { %14176 = vst [vmem:[#allocation131_spill] sm:$0xff] %v13160_v22  ;;  %v6023_v51 = vpop.f32.mrf.mxu3  ;;  %v6347_v22 = vadd.f32 %v6288_v47, %v14181_v60 }
 0x8c5   : > { %v6083_v10 = vadd.f32 %v6023_v51, %v14177_v2  ;;  %v9871_v2 = vld [vmem:[#allocation2 + $0x50] sm:$0xff]  ;;  %v6291_v38 = vpop.f32.mrf.mxu0 }
 0x8c6   : > { %v13163_v26 = vpop.f32.mrf.mxu1 }
 0x8c7   : > { %v6663_v0 = vrot.slane %v6083_v10, 7 }
 0x8c9   : > { %v6670_v1 = vsel %vm14178_vm1, %v6662_v13, %v6663_v0  ;;  %v14184_v13 = vld [vmem:[#allocation89_spill] sm:$0xff]  ;;  %vm14209_vm1 = vmmov %vm14208_vm0 }
 0x8ca   : > { %v13168_v6 = vadd.f32 %v6670_v1, %v6346_v56 }
 0x8cc   : > { %14179 = vst [vmem:[#allocation135_spill] sm:$0xff] %v13168_v6  ;;  %v6025_v46 = vpop.f32.mrf.mxu3 }
 0x8cd   : > { %v6084_v23 = vadd.f32 %v6025_v46, %v14180_v19  ;;  %v6348_v46 = vadd.f32 %v6291_v38, %v12739_v49  ;;  %v14192_v38 = vld [vmem:[#allocation127_spill] sm:$0xff] }
 0x8ce   : > { %v13171_v27 = vpop.f32.mrf.mxu1 }
 0x8cf   : > { %v6664_v18 = vrot.slane %v6084_v23, 7 }
 0x8d1   : > { %v6669_v51 = vsel %vm14182_vm14, %v6663_v0, %v6664_v18  ;;  %6458 = vmatmul.bf16.gmra.mxu1 %v9871_v2  ;;  %v6293_v0 = vpop.f32.mrf.mxu0  ;;  %v14188_v2 = vld [vmem:[#allocation88_spill] sm:$0xff]  ;;  %vm14210_vm14 = vmmov %vm14208_vm0 }
 0x8d2   : > { %v13176_v61 = vadd.f32 %v6669_v51, %v6347_v22 }
 0x8d4   : > { %14183 = vst [vmem:[#allocation34_spill] sm:$0xff] %v13176_v61  ;;  %v6028_v10 = vpop.f32.mrf.mxu3  ;;  %v6349_v61 = vadd.f32 %v6293_v0, %v14188_v2  ;;  %v6995_v2 = vld [vmem:[%s9942_s25 + $0xc] sm:$0xf] }
 0x8d5   : > { %v6085_v56 = vadd.f32 %v6028_v10, %v14184_v13  ;;  %v14190_v13 = vrot.slane %v12753_v58, 7 }
 0x8d6   : > { %v13179_v1 = vpop.f32.mrf.mxu1 }
 0x8d7   : > { %14185 = vst [vmem:[#allocation134_spill] sm:$0xff] %v13179_v1  ;;  %v6665_v6 = vrot.slane %v6085_v56, 7  ;;  %v9360_v1 = vld [vmem:[%s9942_s25 + $0x18] sm:$0xff]  }
 0x8d9   : > { %v6668_v23 = vsel %vm14186_vm15, %v6664_v18, %v6665_v6  ;;  %v9872_v18 = vld [vmem:[#allocation2 + $0x58] sm:$0xff]  ;;  %vm14212_vm15 = vmmov %vm14208_vm0 }
 0x8da   : > { %v13184_v47 = vadd.f32 %v6668_v23, %v6348_v46 }
 0x8dc   : > { %14187 = vst [vmem:[#allocation137_spill] sm:$0xff] %v13184_v47  ;;  %v6030_v19 = vpop.f32.mrf.mxu3 }
 0x8dd   : > { %v6086_v60 = vadd.f32 %v6030_v19, %v12742_v48  ;;  %v14194_v48 = vld [vmem:[#allocation51_spill] sm:$0xff] }
 0x8de   : > { %v6424_v22 = vpop.f32.mrf.mxu1 }
 0x8df   : > { %v6666_v51 = vrot.slane %v6086_v60, 7  ;;  %v13198_v23 = vadd.f32 %v6424_v22, %v14194_v48  ;;  %v9873_v48 = vld [vmem:[#allocation2 + $0x60] sm:$0xff] }
 0x8e1   : > { %v6667_v10 = vsel %vm14189_vm2, %v6665_v6, %v6666_v51  ;;  %v6720_v49 = vsel %vm14191_vm3, %v6666_v51, %v14190_v13  ;;  %6463 = vmatmul.bf16.gmra.mxu1 %v9872_v18  ;;  %14195 = vst [vmem:[#allocation136_spill] sm:$0xff] %v13198_v23  ;;  %v13574_v6 = vrot.slane %v13198_v23, 1  ;;  %vm14215_vm2 = vmmov %vm14208_vm0 }
 0x8e2   : > { %v6721_v56 = vadd.f32 %v6720_v49, %v14192_v38  ;;  %v13195_v46 = vadd.f32 %v6667_v10, %v6349_v61  ;;  %v13209_v61 = vld [vmem:[%s13566_s4] ss:$0 sm:$0xff]  ;;  %v14197_v10 = vld [vmem:[#allocation130_spill] sm:$0xff]  ;;  %v7049_v49 = vunpack.c.l.bf16 %v6995_v2  ;;  %v9359_v38 = vld [vmem:[%s9942_s25 + $0x10] sm:$0xff]  }
 0x8e3   : > { %vm14218_vm3 = vmmov %vm14208_vm0 }
 0x8e4   : > { %14193 = vst [vmem:[#allocation36_spill] sm:$0xff] %v13195_v46 }
 0x8e6   : > { %v6426_v19 = vpop.f32.mrf.mxu1 }
 0x8e7   : > { %v6560_v0 = vadd.f32 %v6426_v19, %v12756_v7 }
 0x8e9   : > { %v6776_v60 = vrot.slane %v6560_v0, 1  ;;  %v14199_v0 = vld [vmem:[#allocation91_spill] sm:$0xff] }
 0x8eb   : > { %v6881_v58 = vsel %vm14196_vm4, %v13574_v6, %v6776_v60  ;;  %v9044_v6 = vunpack.c.l.bf16 %v9359_v38  ;;  %vm14221_vm4 = vmmov %vm14208_vm0 }
 0x8ec   : > { %v6883_v51 = vadd.f32 %v6881_v58, %v6721_v56 }
 0x8ee   : > { %v6429_v22 = vpop.f32.mrf.mxu1  ;;  %v6941_v7 = vadd.f32 %v13209_v61, %v6883_v51 }
 0x8ef   : > { %v6561_v13 = vadd.f32 %v6429_v22, %v14197_v10 }
 0x8f0   : > { %v7103_v56 = vadd.f32 %v7049_v49, %v6941_v7 }
 0x8f1   : > { %v6777_v18 = vrot.slane %v6561_v13, 1  ;;  %6468 = vmatmul.bf16.gmra.mxu1 %v9873_v48 }
 0x8f2   : > { %v7157_v51 = vmul.f32 0.1, %v7103_v56 }
 0x8f3   : > { %v6880_v19 = vsel %vm14198_vm5, %v6776_v60, %v6777_v18  ;;  %vm14224_vm5 = vmmov %vm14208_vm0 }
 0x8f4   : > { %v6884_v58 = vadd.f32 %v6880_v19, %v14199_v0  ;;  %v7211_v23 = vmax.f32 %v7103_v56, %v7157_v51 }
 0x8f6   : > { %v6942_v46 = vadd.f32 %v13209_v61, %v6884_v58  ;;  %v6431_v47 = vpop.f32.mrf.mxu1 }
 0x8f7   : > { %v6562_v22 = vadd.f32 %v6431_v47, %v12771_v33  ;;  %v9045_v33 = vunpack.c.h.bf16 %v9359_v38 }
 0x8f8   : > { %v7104_v2 = vadd.f32 %v9044_v6, %v6942_v46  ;;  %v9874_v46 = vld [vmem:[#allocation2 + $0x68] sm:$0xff] }
 0x8f9   : > { %v6778_v10 = vrot.slane %v6562_v22, 1 }
 0x8fa   : > { %v7158_v13 = vmul.f32 0.1, %v7104_v2 }
 0x8fb   : > { %v6879_v48 = vsel %vm14200_vm6, %v6777_v18, %v6778_v10  ;;  %vm14227_vm6 = vmmov %vm14208_vm0 }
 0x8fc   : > { %v7212_v60 = vmax.f32 %v7104_v2, %v7158_v13  ;;  %v6885_v7 = vadd.f32 %v6879_v48, %v12775_v34  ;;  %v9048_v34 = vunpack.c.l.bf16 %v9360_v1 }
 0x8fe   : > { %v9149_v49 = vpack.c.bf16 %v7212_v60, %v7211_v23  ;;  %v6434_v19 = vpop.f32.mrf.mxu1  ;;  %v6943_v58 = vadd.f32 %v13209_v61, %v6885_v7 }
 0x8ff   : > { %v6563_v0 = vadd.f32 %v6434_v19, %v12779_v11 }
 0x900   : > { %9150 = vst [vmem:[%s9947_s28] sm:$0xff] %v9149_v49   ;;  %v7105_v18 = vadd.f32 %v9045_v33, %v6943_v58  ;;  %v9361_v33 = vld [vmem:[%s9942_s25 + $0x20] sm:$0xff]  }
 0x901   : > { %v6779_v47 = vrot.slane %v6563_v0, 1  ;;  %6473 = vmatmul.bf16.gmra.mxu1 %v9874_v46  ;;  %v9875_v46 = vld [vmem:[#allocation2 + $0x70] sm:$0xff] }
 0x902   : > { %v7159_v51 = vmul.f32 0.1, %v7105_v18 }
 0x903   : > { %v6878_v6 = vsel %vm14201_vm7, %v6778_v10, %v6779_v47  ;;  %vm14230_vm7 = vmmov %vm14208_vm0 }
 0x904   : > { %v6886_v56 = vadd.f32 %v6878_v6, %v12783_v41  ;;  %v7213_v60 = vmax.f32 %v7105_v18, %v7159_v51 }
 0x906   : > { %v6944_v23 = vadd.f32 %v13209_v61, %v6886_v56  ;;  %v6436_v22 = vpop.f32.mrf.mxu1 }
 0x907   : > { %v6564_v11 = vadd.f32 %v6436_v22, %v12787_v44  ;;  %v9049_v44 = vunpack.c.h.bf16 %v9360_v1 }
 0x908   : > { %v7106_v38 = vadd.f32 %v9048_v34, %v6944_v23 }
 0x909   : > { %v6780_v2 = vrot.slane %v6564_v11, 1 }
 0x90a   : > { %v7160_v13 = vmul.f32 0.1, %v7106_v38 }
 0x90b   : > { %v6877_v48 = vsel %vm14202_vm8, %v6779_v47, %v6780_v2  ;;  %vm14233_vm8 = vmmov %vm14208_vm0 }
 0x90c   : > { %v7214_v10 = vmax.f32 %v7106_v38, %v7160_v13  ;;  %v6887_v7 = vadd.f32 %v6877_v48, %v12791_v45  ;;  %v9052_v45 = vunpack.c.l.bf16 %v9361_v33 }
 0x90e   : > { %v9154_v41 = vpack.c.bf16 %v7214_v10, %v7213_v60  ;;  %v6439_v49 = vpop.f32.mrf.mxu1  ;;  %v6945_v0 = vadd.f32 %v13209_v61, %v6887_v7 }
 0x90f   : > { %v6565_v19 = vadd.f32 %v6439_v49, %v12795_v17  ;;  %v9876_v49 = vld [vmem:[#allocation2 + $0x78] sm:$0xff] }
 0x910   : > { %9385 = vst [vmem:[%s9947_s28 + $0x8] sm:$0xff] %v9154_v41   ;;  %v7107_v47 = vadd.f32 %v9049_v44, %v6945_v0  ;;  %v9362_v41 = vld [vmem:[%s9942_s25 + $0x28] sm:$0xff]  }
 0x911   : > { %v6781_v58 = vrot.slane %v6565_v19, 1  ;;  %6478 = vmatmul.bf16.gmra.mxu1 %v9875_v46 }
 0x912   : > { %v7161_v23 = vmul.f32 0.1, %v7107_v47 }
 0x913   : > { %v6876_v6 = vsel %vm14203_vm9, %v6780_v2, %v6781_v58  ;;  %vm14236_vm9 = vmmov %vm14208_vm0 }
 0x914   : > { %v6888_v18 = vadd.f32 %v6876_v6, %v12799_v15  ;;  %v7215_v38 = vmax.f32 %v7107_v47, %v7161_v23 }
 0x916   : > { %v6946_v56 = vadd.f32 %v13209_v61, %v6888_v18  ;;  %v6441_v34 = vpop.f32.mrf.mxu1 }
 0x917   : > { %v6566_v17 = vadd.f32 %v6441_v34, %v12803_v57  ;;  %v9053_v57 = vunpack.c.h.bf16 %v9361_v33 }
 0x918   : > { %v7108_v1 = vadd.f32 %v9052_v45, %v6946_v56 }
 0x919   : > { %v6782_v22 = vrot.slane %v6566_v17, 1 }
 0x91a   : > { %v7162_v11 = vmul.f32 0.1, %v7108_v1 }
 0x91b   : > { %v6875_v51 = vsel %vm14204_vm10, %v6781_v58, %v6782_v22  ;;  %vm14238_vm10 = vmmov %vm14208_vm0 }
 0x91c   : > { %v7216_v2 = vmax.f32 %v7108_v1, %v7162_v11  ;;  %v6889_v13 = vadd.f32 %v6875_v51, %v12807_v9  ;;  %v9056_v9 = vunpack.c.l.bf16 %v9362_v41  ;;  %v9363_v51 = vld [vmem:[%s9942_s25 + $0x30] sm:$0xff]  }
 0x91e   : > { %v9159_v15 = vpack.c.bf16 %v7216_v2, %v7215_v38  ;;  %v6444_v48 = vpop.f32.mrf.mxu1  ;;  %v6947_v10 = vadd.f32 %v13209_v61, %v6889_v13  ;;  %v9877_v38 = vld [vmem:[#allocation2 + $0x80] sm:$0xff] }
 0x91f   : > { %v6567_v60 = vadd.f32 %v6444_v48, %v12814_v30 }
 0x920   : > { %9386 = vst [vmem:[%s9947_s28 + $0x10] sm:$0xff] %v9159_v15   ;;  %v7109_v0 = vadd.f32 %v9053_v57, %v6947_v10 }
 0x921   : > { %v6783_v7 = vrot.slane %v6567_v60, 1  ;;  %6483 = vmatmul.bf16.gmra.mxu1 %v9876_v49 }
 0x922   : > { %v7163_v6 = vmul.f32 0.1, %v7109_v0 }
 0x923   : > { %v6874_v19 = vsel %vm14205_vm11, %v6782_v22, %v6783_v7  ;;  %vm14241_vm11 = vmmov %vm14208_vm0 }
 0x924   : > { %v6890_v44 = vadd.f32 %v6874_v19, %v12818_v37  ;;  %v7217_v56 = vmax.f32 %v7109_v0, %v7163_v6  ;;  %v9364_v6 = vld [vmem:[%s9942_s25 + $0x38] sm:$0xff]  }
 0x926   : > { %v6948_v58 = vadd.f32 %v13209_v61, %v6890_v44  ;;  %v6446_v46 = vpop.f32.mrf.mxu1 }
 0x927   : > { %v6568_v30 = vadd.f32 %v6446_v46, %v12822_v35  ;;  %v9057_v35 = vunpack.c.h.bf16 %v9362_v41 }
 0x928   : > { %v7110_v33 = vadd.f32 %v9056_v9, %v6948_v58 }
 0x929   : > { %v6784_v47 = vrot.slane %v6568_v30, 1 }
 0x92a   : > { %v7164_v18 = vmul.f32 0.1, %v7110_v33 }
 0x92b   : > { %v6873_v45 = vsel %vm14206_vm12, %v6783_v7, %v6784_v47  ;;  %vm14243_vm12 = vmmov %vm14208_vm0 }
 0x92c   : > { %v7218_v34 = vmax.f32 %v7110_v33, %v7164_v18  ;;  %v6891_v17 = vadd.f32 %v6873_v45, %v12826_v55  ;;  %v9060_v55 = vunpack.c.l.bf16 %v9363_v51  ;;  %v9878_v33 = vld [vmem:[#allocation2 + $0x88] sm:$0xff] }
 0x92e   : > { %v9164_v37 = vpack.c.bf16 %v7218_v34, %v7217_v56  ;;  %v6449_v23 = vpop.f32.mrf.mxu1  ;;  %v6949_v22 = vadd.f32 %v13209_v61, %v6891_v17 }
 0x92f   : > { %v6569_v1 = vadd.f32 %v6449_v23, %v12830_v5 }
 0x930   : > { %9387 = vst [vmem:[%s9947_s28 + $0x18] sm:$0xff] %v9164_v37   ;;  %v7111_v13 = vadd.f32 %v9057_v35, %v6949_v22 }
 0x931   : > { %v6785_v11 = vrot.slane %v6569_v1, 1  ;;  %6488 = vmatmul.bf16.gmra.mxu1 %v9877_v38 }
 0x932   : > { %v7165_v10 = vmul.f32 0.1, %v7111_v13 }
 0x933   : > { %v6872_v2 = vsel %vm14207_vm13, %v6784_v47, %v6785_v11  ;;  %vm14245_vm13 = vmmov %vm14208_vm0 }
 0x934   : > { %v6892_v15 = vadd.f32 %v6872_v2, %v12834_v25  ;;  %v7219_v19 = vmax.f32 %v7111_v13, %v7165_v10  ;;  %v14211_v2 = vld [vmem:[#allocation90_spill] sm:$0xff] }
 0x936   : > { %v6950_v48 = vadd.f32 %v13209_v61, %v6892_v15  ;;  %v6451_v60 = vpop.f32.mrf.mxu1 }
 0x937   : > { %v6570_v5 = vadd.f32 %v6451_v60, %v12838_v14  ;;  %v9061_v14 = vunpack.c.h.bf16 %v9363_v51  ;;  %v9879_v60 = vld [vmem:[#allocation2 + $0x90] sm:$0xff] }
 0x938   : > { %v7112_v57 = vadd.f32 %v9060_v55, %v6950_v48  ;;  %v9365_v48 = vld [vmem:[%s9942_s25 + $0x40] sm:$0xff]  }
 0x939   : > { %v6786_v7 = vrot.slane %v6570_v5, 1 }
 0x93a   : > { %v7166_v41 = vmul.f32 0.1, %v7112_v57 }
 0x93b   : > { %v6871_v49 = vsel %vm14208_vm0, %v6785_v11, %v6786_v7 }
 0x93c   : > { %v7220_v0 = vmax.f32 %v7112_v57, %v7166_v41  ;;  %v6893_v44 = vadd.f32 %v6871_v49, %v12842_v62  ;;  %v9064_v62 = vunpack.c.l.bf16 %v9364_v6  ;;  %v14213_v57 = vld [vmem:[#allocation52_spill] sm:$0xff] }
 0x93e   : > { %v9169_v25 = vpack.c.bf16 %v7220_v0, %v7219_v19  ;;  %v6454_v9 = vpop.f32.mrf.mxu1  ;;  %v6951_v46 = vadd.f32 %v13209_v61, %v6893_v44  ;;  %v14214_v19 = vld [vmem:[#allocation133_spill] sm:$0xff] }
 0x93f   : > { %v6571_v58 = vadd.f32 %v6454_v9, %v12846_v8 }
 0x940   : > { %9388 = vst [vmem:[%s9947_s28 + $0x20] sm:$0xff] %v9169_v25   ;;  %v7113_v18 = vadd.f32 %v9061_v14, %v6951_v46 }
 0x941   : > { %v6787_v30 = vrot.slane %v6571_v58, 1  ;;  %6493 = vmatmul.bf16.gmra.mxu1 %v9878_v33 }
 0x942   : > { %v7167_v17 = vmul.f32 0.1, %v7113_v18 }
 0x943   : > { %v6870_v47 = vsel %vm14209_vm1, %v6786_v7, %v6787_v30  ;;  %vm14250_vm1 = vmmov %vm14208_vm0 }
 0x944   : > { %v6894_v45 = vadd.f32 %v6870_v47, %v12850_v52  ;;  %v7221_v35 = vmax.f32 %v7113_v18, %v7167_v17  ;;  %v9366_v17 = vld [vmem:[%s9942_s25 + $0x48] sm:$0xff]  }
 0x946   : > { %v6952_v56 = vadd.f32 %v13209_v61, %v6894_v45  ;;  %v6456_v34 = vpop.f32.mrf.mxu1  ;;  %v14217_v45 = vld [vmem:[#allocation92_spill] sm:$0xff] }
 0x947   : > { %v6572_v8 = vadd.f32 %v6456_v34, %v12854_v20  ;;  %v9065_v20 = vunpack.c.h.bf16 %v9364_v6  ;;  %v14216_v6 = vld [vmem:[#allocation93_spill] sm:$0xff]  ;;  %v9069_v34 = vunpack.c.h.bf16 %v9365_v48 }
 0x948   : > { %v7114_v37 = vadd.f32 %v9064_v62, %v6952_v56 }
 0x949   : > { %v6788_v23 = vrot.slane %v6572_v8, 1 }
 0x94a   : > { %v7168_v1 = vmul.f32 0.1, %v7114_v37 }
 0x94b   : > { %v6869_v22 = vsel %vm14210_vm14, %v6787_v30, %v6788_v23  ;;  %vm14253_vm14 = vmmov %vm14208_vm0 }
 0x94c   : > { %v7222_v11 = vmax.f32 %v7114_v37, %v7168_v1  ;;  %v6895_v51 = vadd.f32 %v6869_v22, %v12858_v4  ;;  %v9068_v4 = vunpack.c.l.bf16 %v9365_v48  ;;  %v9880_v37 = vld [vmem:[#allocation2 + $0x98] sm:$0xff]  ;;  %v14219_v22 = vld [vmem:[#allocation95_spill] sm:$0xff] }
 0x94e   : > { %v9174_v52 = vpack.c.bf16 %v7222_v11, %v7221_v35  ;;  %v6459_v38 = vpop.f32.mrf.mxu1  ;;  %v6953_v15 = vadd.f32 %v13209_v61, %v6895_v51  ;;  %v9072_v11 = vunpack.c.l.bf16 %v9366_v17 }
 0x94f   : > { %v6573_v13 = vadd.f32 %v6459_v38, %v14211_v2  ;;  %v14220_v38 = vld [vmem:[#allocation3_spill] sm:$0xff] }
 0x950   : > { %9389 = vst [vmem:[%s9947_s28 + $0x28] sm:$0xff] %v9174_v52   ;;  %v7115_v10 = vadd.f32 %v9065_v20, %v6953_v15 }
 0x951   : > { %v6789_v55 = vrot.slane %v6573_v13, 1  ;;  %6498 = vmatmul.bf16.gmra.mxu1 %v9879_v60 }
 0x952   : > { %v7169_v44 = vmul.f32 0.1, %v7115_v10 }
 0x953   : > { %v6868_v5 = vsel %vm14212_vm15, %v6788_v23, %v6789_v55  ;;  %vm14256_vm15 = vmmov %vm14208_vm0 }
 0x954   : > { %v6896_v7 = vadd.f32 %v6868_v5, %v14213_v57  ;;  %v7223_v14 = vmax.f32 %v7115_v10, %v7169_v44  ;;  %v14222_v10 = vld [vmem:[#allocation94_spill] sm:$0xff] }
 0x956   : > { %v6954_v41 = vadd.f32 %v13209_v61, %v6896_v7  ;;  %v6461_v49 = vpop.f32.mrf.mxu1 }
 0x957   : > { %v6574_v0 = vadd.f32 %v6461_v49, %v14214_v19 }
 0x958   : > { %v7116_v25 = vadd.f32 %v9068_v4, %v6954_v41  ;;  %v14223_v41 = vld [vmem:[#allocation97_spill] sm:$0xff] }
 0x959   : > { %v6790_v9 = vrot.slane %v6574_v0, 1  ;;  %v9073_v0 = vunpack.c.h.bf16 %v9366_v17 }
 0x95a   : > { %v7170_v58 = vmul.f32 0.1, %v7116_v25 }
 0x95b   : > { %v6867_v46 = vsel %vm14215_vm2, %v6789_v55, %v6790_v9  ;;  %vm14259_vm2 = vmmov %vm14208_vm0 }
 0x95c   : > { %v7224_v30 = vmax.f32 %v7116_v25, %v7170_v58  ;;  %v6897_v33 = vadd.f32 %v6867_v46, %v14216_v6  ;;  %v9367_v25 = vld [vmem:[%s9942_s25 + $0x50] sm:$0xff]  }
 0x95d   : > { %v9076_v6 = vunpack.c.l.bf16 %v9367_v25 }
 0x95e   : > { %v9179_v47 = vpack.c.bf16 %v7224_v30, %v7223_v14  ;;  %v6464_v18 = vpop.f32.mrf.mxu1  ;;  %v6955_v56 = vadd.f32 %v13209_v61, %v6897_v33  ;;  %v14225_v14 = vld [vmem:[#allocation4_spill] sm:$0xff] }
 0x95f   : > { %v6575_v62 = vadd.f32 %v6464_v18, %v14217_v45  ;;  %v14226_v18 = vld [vmem:[#allocation96_spill] sm:$0xff] }
 0x960   : > { %9390 = vst [vmem:[%s9947_s28 + $0x30] sm:$0xff] %v9179_v47   ;;  %v7117_v1 = vadd.f32 %v9069_v34, %v6955_v56 }
 0x961   : > { %v6791_v8 = vrot.slane %v6575_v62, 1  ;;  %6503 = vmatmul.bf16.gmra.mxu1 %v9880_v37 }
 0x962   : > { %v7171_v13 = vmul.f32 0.1, %v7117_v1 }
 0x963   : > { %v6866_v23 = vsel %vm14218_vm3, %v6790_v9, %v6791_v8  ;;  %v9881_v9 = vld [vmem:[#allocation2 + $0xa0] sm:$0xff]  ;;  %vm14262_vm3 = vmmov %vm14208_vm0 }
 0x964   : > { %v6898_v35 = vadd.f32 %v6866_v23, %v14219_v22  ;;  %v7225_v60 = vmax.f32 %v7117_v1, %v7171_v13  ;;  %v14228_v1 = vld [vmem:[#allocation99_spill] sm:$0xff] }
 0x966   : > { %v6956_v51 = vadd.f32 %v13209_v61, %v6898_v35  ;;  %v6466_v52 = vpop.f32.mrf.mxu1 }
 0x967   : > { %v6576_v2 = vadd.f32 %v6466_v52, %v14220_v38 }
 0x968   : > { %v7118_v15 = vadd.f32 %v9072_v11, %v6956_v51  ;;  %v14229_v51 = vld [vmem:[#allocation5_spill] sm:$0xff] }
 0x969   : > { %v6792_v20 = vrot.slane %v6576_v2, 1  ;;  %v9077_v2 = vunpack.c.h.bf16 %v9367_v25 }
 0x96a   : > { %v7172_v55 = vmul.f32 0.1, %v7118_v15 }
 0x96b   : > { %v6865_v48 = vsel %vm14221_vm4, %v6791_v8, %v6792_v20  ;;  %vm14264_vm4 = vmmov %vm14208_vm0 }
 0x96c   : > { %v7226_v5 = vmax.f32 %v7118_v15, %v7172_v55  ;;  %v6899_v57 = vadd.f32 %v6865_v48, %v14222_v10  ;;  %v9368_v15 = vld [vmem:[%s9942_s25 + $0x58] sm:$0xff]  }
 0x96d   : > { %v9080_v10 = vunpack.c.l.bf16 %v9368_v15 }
 0x96e   : > { %v9184_v7 = vpack.c.bf16 %v7226_v5, %v7225_v60  ;;  %v6469_v4 = vpop.f32.mrf.mxu1  ;;  %v6957_v19 = vadd.f32 %v13209_v61, %v6899_v57  ;;  %v14231_v60 = vld [vmem:[#allocation98_spill] sm:$0xff] }
 0x96f   : > { %v6577_v49 = vadd.f32 %v6469_v4, %v14223_v41  ;;  %v14232_v4 = vld [vmem:[#allocation101_spill] sm:$0xff] }
 0x970   : > { %9391 = vst [vmem:[%s9947_s28 + $0x38] sm:$0xff] %v9184_v7   ;;  %v7119_v46 = vadd.f32 %v9073_v0, %v6957_v19 }
 0x971   : > { %v6793_v44 = vrot.slane %v6577_v49, 1  ;;  %6508 = vmatmul.bf16.gmra.mxu1 %v9881_v9 }
 0x972   : > { %v7173_v62 = vmul.f32 0.1, %v7119_v46 }
 0x973   : > { %v6864_v58 = vsel %vm14224_vm5, %v6792_v20, %v6793_v44  ;;  %v9882_v20 = vld [vmem:[#allocation2 + $0xa8] sm:$0xff]  ;;  %vm14267_vm5 = vmmov %vm14208_vm0 }
 0x974   : > { %v6900_v30 = vadd.f32 %v6864_v58, %v14225_v14  ;;  %v7227_v37 = vmax.f32 %v7119_v46, %v7173_v62  ;;  %v14234_v46 = vld [vmem:[#allocation6_spill] sm:$0xff] }
 0x976   : > { %v6958_v33 = vadd.f32 %v13209_v61, %v6900_v30  ;;  %v6471_v47 = vpop.f32.mrf.mxu1 }
 0x977   : > { %v6578_v45 = vadd.f32 %v6471_v47, %v14226_v18 }
 0x978   : > { %v7120_v56 = vadd.f32 %v9076_v6, %v6958_v33  ;;  %v14235_v33 = vld [vmem:[#allocation100_spill] sm:$0xff] }
 0x979   : > { %v6794_v34 = vrot.slane %v6578_v45, 1  ;;  %v9081_v45 = vunpack.c.h.bf16 %v9368_v15 }
 0x97a   : > { %v7174_v8 = vmul.f32 0.1, %v7120_v56 }
 0x97b   : > { %v6863_v17 = vsel %vm14227_vm6, %v6793_v44, %v6794_v34  ;;  %vm14269_vm6 = vmmov %vm14208_vm0 }
 0x97c   : > { %v7228_v23 = vmax.f32 %v7120_v56, %v7174_v8  ;;  %v6901_v22 = vadd.f32 %v6863_v17, %v14228_v1  ;;  %v9369_v56 = vld [vmem:[%s9942_s25 + $0x60] sm:$0xff]  }
 0x97d   : > { %v9084_v1 = vunpack.c.l.bf16 %v9369_v56 }
 0x97e   : > { %v9189_v35 = vpack.c.bf16 %v7228_v23, %v7227_v37  ;;  %v6474_v11 = vpop.f32.mrf.mxu1  ;;  %v6959_v38 = vadd.f32 %v13209_v61, %v6901_v22  ;;  %v14237_v37 = vld [vmem:[#allocation103_spill] sm:$0xff] }
 0x97f   : > { %v6579_v52 = vadd.f32 %v6474_v11, %v14229_v51 }
 0x980   : > { %9392 = vst [vmem:[%s9947_s28 + $0x40] sm:$0xff] %v9189_v35   ;;  %v7121_v48 = vadd.f32 %v9077_v2, %v6959_v38 }
 0x981   : > { %v6795_v13 = vrot.slane %v6579_v52, 1  ;;  %6513 = vmatmul.bf16.gmra.mxu1 %v9882_v20 }
 0x982   : > { %v7175_v49 = vmul.f32 0.1, %v7121_v48 }
 0x983   : > { %v6862_v55 = vsel %vm14230_vm7, %v6794_v34, %v6795_v13  ;;  %v9883_v34 = vld [vmem:[#allocation2 + $0xb0] sm:$0xff]  ;;  %vm14271_vm7 = vmmov %vm14208_vm0 }
 0x984   : > { %v6902_v5 = vadd.f32 %v6862_v55, %v14231_v60  ;;  %v7229_v9 = vmax.f32 %v7121_v48, %v7175_v49  ;;  %v14239_v55 = vld [vmem:[#allocation8_spill] sm:$0xff]  ;;  %v13343_v60 = vpop.f32.mrf.mxu2  ;;  %v9370_v49 = vld [vmem:[%s9942_s25 + $0x68] sm:$0xff]  }
 0x986   : > { %v6960_v57 = vadd.f32 %v13209_v61, %v6902_v5  ;;  %v6476_v7 = vpop.f32.mrf.mxu1 }
 0x987   : > { %v6580_v41 = vadd.f32 %v6476_v7, %v14232_v4  ;;  %v9085_v4 = vunpack.c.h.bf16 %v9369_v56 }
 0x988   : > { %v7122_v19 = vadd.f32 %v9080_v10, %v6960_v57  ;;  %v14240_v57 = vld [vmem:[#allocation102_spill] sm:$0xff] }
 0x989   : > { %v6796_v0 = vrot.slane %v6580_v41, 1 }
 0x98a   : > { %v7176_v44 = vmul.f32 0.1, %v7122_v19 }
 0x98b   : > { %v6861_v25 = vsel %vm14233_vm8, %v6795_v13, %v6796_v0  ;;  %vm14272_vm8 = vmmov %vm14208_vm0 }
 0x98c   : > { %v7230_v58 = vmax.f32 %v7122_v19, %v7176_v44  ;;  %v6903_v14 = vadd.f32 %v6861_v25, %v14234_v46  ;;  %v9884_v19 = vld [vmem:[#allocation2 + $0xb8] sm:$0xff]  ;;  %v14242_v25 = vld [vmem:[#allocation105_spill] sm:$0xff] }
 0x98e   : > { %v9194_v30 = vpack.c.bf16 %v7230_v58, %v7229_v9  ;;  %v6479_v6 = vpop.f32.mrf.mxu1  ;;  %v6961_v18 = vadd.f32 %v13209_v61, %v6903_v14  ;;  %v9088_v58 = vunpack.c.l.bf16 %v9370_v49 }
 0x98f   : > { %v6581_v47 = vadd.f32 %v6479_v6, %v14235_v33  ;;  %v13354_v6 = vpop.f32.mrf.mxu2 }
 0x990   : > { %9393 = vst [vmem:[%s9947_s28 + $0x48] sm:$0xff] %v9194_v30   ;;  %v7123_v17 = vadd.f32 %v9081_v45, %v6961_v18 }
 0x991   : > { %v6797_v62 = vrot.slane %v6581_v47, 1  ;;  %6518 = vmatmul.bf16.gmra.mxu1 %v9883_v34 }
 0x992   : > { %v7177_v51 = vmul.f32 0.1, %v7123_v17 }
 0x993   : > { %v6860_v8 = vsel %vm14236_vm9, %v6796_v0, %v6797_v62  ;;  %vm14274_vm9 = vmmov %vm14208_vm0 }
 0x994   : > { %v6904_v23 = vadd.f32 %v6860_v8, %v14237_v37  ;;  %v7231_v15 = vmax.f32 %v7123_v17, %v7177_v51  ;;  %v9885_v51 = vld [vmem:[#allocation2 + $0xc0] sm:$0xff] }
 0x996   : > { %v6962_v22 = vadd.f32 %v13209_v61, %v6904_v23  ;;  %v6481_v35 = vpop.f32.mrf.mxu1  ;;  %v14244_v23 = vld [vmem:[#allocation10_spill] sm:$0xff] }
 0x997   : > { %v6582_v11 = vadd.f32 %v6481_v35, %v12940_v12 }
 0x998   : > { %v7124_v52 = vadd.f32 %v9084_v1, %v6962_v22  ;;  %v9089_v22 = vunpack.c.h.bf16 %v9370_v49 }
 0x999   : > { %v6798_v38 = vrot.slane %v6582_v11, 1  ;;  %v9371_v11 = vld [vmem:[%s9942_s25 + $0x70] sm:$0xff]  }
 0x99a   : > { %v7178_v2 = vmul.f32 0.1, %v7124_v52 }
 0x99b   : > { %v6859_v13 = vsel %vm14238_vm10, %v6797_v62, %v6798_v38  ;;  %vm14275_vm10 = vmmov %vm14208_vm0 }
 0x99c   : > { %v7232_v20 = vmax.f32 %v7124_v52, %v7178_v2  ;;  %v6905_v48 = vadd.f32 %v6859_v13, %v14239_v55  ;;  %v13363_v52 = vpop.f32.mrf.mxu2  ;;  %v14246_v13 = vld [vmem:[#allocation104_spill] sm:$0xff] }
 0x99e   : > { %v9199_v5 = vpack.c.bf16 %v7232_v20, %v7231_v15  ;;  %v6484_v10 = vpop.f32.mrf.mxu1  ;;  %v6963_v12 = vadd.f32 %v13209_v61, %v6905_v48  ;;  %v9092_v15 = vunpack.c.l.bf16 %v9371_v11  ;;  %v14247_v48 = vld [vmem:[#allocation107_spill] sm:$0xff] }
 0x99f   : > { %v6583_v7 = vadd.f32 %v6484_v10, %v14240_v57 }
 0x9a0   : > { %9394 = vst [vmem:[%s9947_s28 + $0x50] sm:$0xff] %v9199_v5   ;;  %v7125_v44 = vadd.f32 %v9085_v4, %v6963_v12 }
 0x9a1   : > { %v6799_v41 = vrot.slane %v6583_v7, 1  ;;  %6523 = vmatmul.bf16.gmra.mxu1 %v9884_v19 }
 0x9a2   : > { %v7179_v33 = vmul.f32 0.1, %v7125_v44 }
 0x9a3   : > { %v6858_v0 = vsel %vm14241_vm11, %v6798_v38, %v6799_v41  ;;  %vm14278_vm11 = vmmov %vm14208_vm0 }
 0x9a4   : > { %v6906_v9 = vadd.f32 %v6858_v0, %v14242_v25  ;;  %v7233_v56 = vmax.f32 %v7125_v44, %v7179_v33  ;;  %v14248_v0 = vld [vmem:[#allocation12_spill] sm:$0xff] }
 0x9a6   : > { %v6964_v46 = vadd.f32 %v13209_v61, %v6906_v9  ;;  %v6486_v14 = vpop.f32.mrf.mxu1 }
 0x9a7   : > { %v6584_v30 = vadd.f32 %v6486_v14, %v12956_v28 }
 0x9a8   : > { %v7126_v47 = vadd.f32 %v9088_v58, %v6964_v46  ;;  %v14249_v58 = vld [vmem:[#allocation106_spill] sm:$0xff] }
 0x9a9   : > { %v6800_v18 = vrot.slane %v6584_v30, 1  ;;  %v9093_v30 = vunpack.c.h.bf16 %v9371_v11 }
 0x9aa   : > { %v7180_v45 = vmul.f32 0.1, %v7126_v47 }
 0x9ab   : > { %v6857_v62 = vsel %vm14243_vm12, %v6799_v41, %v6800_v18  ;;  %v13372_v41 = vpop.f32.mrf.mxu2  ;;  %vm14280_vm12 = vmmov %vm14208_vm0 }
 0x9ac   : > { %v7234_v34 = vmax.f32 %v7126_v47, %v7180_v45  ;;  %v6907_v8 = vadd.f32 %v6857_v62, %v12960_v40  ;;  %v9372_v47 = vld [vmem:[%s9942_s25 + $0x78] sm:$0xff]  }
 0x9ae   : > { %v9204_v17 = vpack.c.bf16 %v7234_v34, %v7233_v56  ;;  %v6489_v37 = vpop.f32.mrf.mxu1  ;;  %v6965_v28 = vadd.f32 %v13209_v61, %v6907_v8  ;;  %v14251_v56 = vld [vmem:[#allocation109_spill] sm:$0xff]  ;;  %v9096_v8 = vunpack.c.l.bf16 %v9372_v47 }
 0x9af   : > { %v6585_v1 = vadd.f32 %v6489_v37, %v14244_v23 }
 0x9b0   : > { %9395 = vst [vmem:[%s9947_s28 + $0x58] sm:$0xff] %v9204_v17   ;;  %v7127_v2 = vadd.f32 %v9089_v22, %v6965_v28 }
 0x9b1   : > { %v6801_v35 = vrot.slane %v6585_v1, 1  ;;  %6528 = vmatmul.bf16.gmra.mxu1 %v9885_v51  ;;  %v14252_v1 = vld [vmem:[#allocation14_spill] sm:$0xff] }
 0x9b2   : > { %v7181_v10 = vmul.f32 0.1, %v7127_v2 }
 0x9b3   : > { %v6856_v38 = vsel %vm14245_vm13, %v6800_v18, %v6801_v35  ;;  %v9886_v18 = vld [vmem:[#allocation2 + $0xc8] sm:$0xff]  ;;  %v13382_v17 = vpop.f32.mrf.mxu2  ;;  %vm14282_vm13 = vmmov %vm14208_vm0 }
 0x9b4   : > { %v6908_v40 = vadd.f32 %v6856_v38, %v14246_v13  ;;  %v7235_v49 = vmax.f32 %v7127_v2, %v7181_v10 }
 0x9b6   : > { %v6966_v20 = vadd.f32 %v13209_v61, %v6908_v40  ;;  %v6491_v55 = vpop.f32.mrf.mxu1  ;;  %v14254_v40 = vld [vmem:[#allocation108_spill] sm:$0xff] }
 0x9b7   : > { %v6586_v5 = vadd.f32 %v6491_v55, %v14247_v48 }
 0x9b8   : > { %v7128_v57 = vadd.f32 %v9092_v15, %v6966_v20  ;;  %v14255_v20 = vld [vmem:[#allocation111_spill] sm:$0xff] }
 0x9b9   : > { %v6802_v7 = vrot.slane %v6586_v5, 1  ;;  %v5549_v55 = vadd.f32 %v13343_v60, %v14255_v20 }
 0x9ba   : > { %v7182_v12 = vmul.f32 0.1, %v7128_v57 }
 0x9bb   : > { %v6855_v4 = vsel %vm14208_vm0, %v6801_v35, %v6802_v7 }
 0x9bc   : > { %v7236_v19 = vmax.f32 %v7128_v57, %v7182_v12  ;;  %v6909_v44 = vadd.f32 %v6855_v4, %v14248_v0  ;;  %v13391_v57 = vpop.f32.mrf.mxu2  ;;  %v9097_v12 = vunpack.c.h.bf16 %v9372_v47 }
 0x9be   : > { %v9209_v25 = vpack.c.bf16 %v7236_v19, %v7235_v49  ;;  %v6494_v9 = vpop.f32.mrf.mxu1  ;;  %v6967_v14 = vadd.f32 %v13209_v61, %v6909_v44  ;;  %v9373_v49 = vld [vmem:[%s9942_s25 + $0x80] sm:$0xff]   ;;  %v9887_v19 = vld [vmem:[#allocation2 + $0xd0] sm:$0xff] }
 0x9bf   : > { %v6587_v46 = vadd.f32 %v6494_v9, %v14249_v58  ;;  %v9100_v60 = vunpack.c.l.bf16 %v9373_v49  ;;  %v14258_v58 = vld [vmem:[#allocation110_spill] sm:$0xff] }
 0x9c0   : > { %9396 = vst [vmem:[%s9947_s28 + $0x60] sm:$0xff] %v9209_v25   ;;  %v7129_v62 = vadd.f32 %v9093_v30, %v6967_v14  ;;  %v14257_v25 = vld [vmem:[#allocation16_spill] sm:$0xff] }
 0x9c1   : > { %v6803_v33 = vrot.slane %v6587_v46, 1  ;;  %6533 = vmatmul.bf16.gmra.mxu1 %v9886_v18  ;;  %v5551_v46 = vadd.f32 %v13354_v6, %v14258_v58  ;;  %v14261_v6 = vld [vmem:[#allocation18_spill] sm:$0xff]  ;;  %v14265_v58 = vld [vmem:[#allocation115_spill] sm:$0xff] }
 0x9c2   : > { %v7183_v22 = vmul.f32 0.1, %v7129_v62 }
 0x9c3   : > { %v6854_v45 = vsel %vm14250_vm1, %v6802_v7, %v6803_v33  ;;  %vm14285_vm1 = vmmov %vm14208_vm0 }
 0x9c4   : > { %v6910_v34 = vadd.f32 %v6854_v45, %v14251_v56  ;;  %v7237_v2 = vmax.f32 %v7129_v62, %v7183_v22  ;;  %v13402_v62 = vpop.f32.mrf.mxu2 }
 0x9c6   : > { %v6968_v37 = vadd.f32 %v13209_v61, %v6910_v34  ;;  %v6496_v23 = vpop.f32.mrf.mxu1 }
 0x9c7   : > { %v6588_v28 = vadd.f32 %v6496_v23, %v14252_v1  ;;  %v14260_v23 = vld [vmem:[#allocation113_spill] sm:$0xff] }
 0x9c8   : > { %v7130_v35 = vadd.f32 %v9096_v8, %v6968_v37 }
 0x9c9   : > { %v6804_v11 = vrot.slane %v6588_v28, 1  ;;  %v5554_v28 = vadd.f32 %v13363_v52, %v14261_v6  ;;  %v5556_v52 = vadd.f32 %v13372_v41, %v13019_v32 }
 0x9ca   : > { %v7184_v51 = vmul.f32 0.1, %v7130_v35 }
 0x9cb   : > { %v6853_v38 = vsel %vm14253_vm14, %v6803_v33, %v6804_v11  ;;  %vm14288_vm14 = vmmov %vm14208_vm0 }
 0x9cc   : > { %v7238_v13 = vmax.f32 %v7130_v35, %v7184_v51  ;;  %v6911_v15 = vadd.f32 %v6853_v38, %v14254_v40  ;;  %v9101_v38 = vunpack.c.h.bf16 %v9373_v49  ;;  %v9888_v40 = vld [vmem:[#allocation2 + $0xd8] sm:$0xff]  ;;  %v5565_v20 = vpop.f32.mrf.mxu2 }
 0x9ce   : > { %v9214_v48 = vpack.c.bf16 %v7238_v13, %v7237_v2  ;;  %v6499_v5 = vpop.f32.mrf.mxu1  ;;  %v6969_v7 = vadd.f32 %v13209_v61, %v6911_v15  ;;  %v9374_v13 = vld [vmem:[%s9942_s25 + $0x88] sm:$0xff]  }
 0x9cf   : > { %v6589_v10 = vadd.f32 %v6499_v5, %v5549_v55 }
 0x9d0   : > { %9397 = vst [vmem:[%s9947_s28 + $0x68] sm:$0xff] %v9214_v48   ;;  %v7131_v44 = vadd.f32 %v9097_v12, %v6969_v7  ;;  %v14263_v48 = vld [vmem:[#allocation112_spill] sm:$0xff] }
 0x9d1   : > { %v6805_v4 = vrot.slane %v6589_v10, 1  ;;  %6538 = vmatmul.bf16.gmra.mxu1 %v9887_v19  ;;  %v9104_v10 = vunpack.c.l.bf16 %v9374_v13 }
 0x9d2   : > { %v7185_v47 = vmul.f32 0.1, %v7131_v44 }
 0x9d3   : > { %v6852_v0 = vsel %vm14256_vm15, %v6804_v11, %v6805_v4  ;;  %vm14291_vm15 = vmmov %vm14208_vm0 }
 0x9d4   : > { %v6912_v9 = vadd.f32 %v6852_v0, %v14257_v25  ;;  %v7239_v8 = vmax.f32 %v7131_v44, %v7185_v47  ;;  %v5568_v41 = vpop.f32.mrf.mxu2 }
 0x9d6   : > { %v6970_v14 = vadd.f32 %v13209_v61, %v6912_v9  ;;  %v6501_v30 = vpop.f32.mrf.mxu1 }
 0x9d7   : > { %v6590_v33 = vadd.f32 %v6501_v30, %v5551_v46 }
 0x9d8   : > { %v7132_v18 = vadd.f32 %v9100_v60, %v6970_v14  ;;  %v14266_v14 = vld [vmem:[#allocation20_spill] sm:$0xff] }
 0x9d9   : > { %v6806_v45 = vrot.slane %v6590_v33, 1  ;;  %v5559_v32 = vadd.f32 %v13382_v17, %v14266_v14  ;;  %v5561_v17 = vadd.f32 %v13391_v57, %v13035_v29  ;;  %v5564_v29 = vadd.f32 %v13402_v62, %v13043_v3 }
 0x9da   : > { %v7186_v56 = vmul.f32 0.1, %v7132_v18  ;;  %v5566_v3 = vadd.f32 %v5565_v20, %v13051_v43  ;;  %v5569_v43 = vadd.f32 %v5568_v41, %v13059_v21 }
 0x9db   : > { %v6851_v34 = vsel %vm14259_vm2, %v6805_v4, %v6806_v45  ;;  %vm14293_vm2 = vmmov %vm14208_vm0 }
 0x9dc   : > { %v7240_v37 = vmax.f32 %v7132_v18, %v7186_v56  ;;  %v6913_v1 = vadd.f32 %v6851_v34, %v14260_v23  ;;  %v9375_v34 = vld [vmem:[%s9942_s25 + $0x90] sm:$0xff]  }
 0x9de   : > { %v9219_v22 = vpack.c.bf16 %v7240_v37, %v7239_v8  ;;  %v6504_v35 = vpop.f32.mrf.mxu1  ;;  %v6971_v51 = vadd.f32 %v13209_v61, %v6913_v1  ;;  %v9889_v8 = vld [vmem:[#allocation2 + $0xe0] sm:$0xff]  ;;  %v14268_v1 = vld [vmem:[#allocation114_spill] sm:$0xff] }
 0x9df   : > { %v6591_v11 = vadd.f32 %v6504_v35, %v5554_v28  ;;  %v9108_v28 = vunpack.c.l.bf16 %v9375_v34 }
 0x9e0   : > { %9398 = vst [vmem:[%s9947_s28 + $0x70] sm:$0xff] %v9219_v22   ;;  %v7133_v55 = vadd.f32 %v9101_v38, %v6971_v51  ;;  %v5570_v51 = vpop.f32.mrf.mxu2 }
 0x9e1   : > { %v6807_v2 = vrot.slane %v6591_v11, 1  ;;  %6543 = vmatmul.bf16.gmra.mxu1 %v9888_v40 }
 0x9e2   : > { %v7187_v49 = vmul.f32 0.1, %v7133_v55 }
 0x9e3   : > { %v6850_v15 = vsel %vm14262_vm3, %v6806_v45, %v6807_v2  ;;  %v9105_v45 = vunpack.c.h.bf16 %v9374_v13  ;;  %vm14296_vm3 = vmmov %vm14208_vm0 }
 0x9e4   : > { %v6914_v5 = vadd.f32 %v6850_v15, %v14263_v48  ;;  %v7241_v9 = vmax.f32 %v7133_v55, %v7187_v49 }
 0x9e6   : > { %v6972_v7 = vadd.f32 %v13209_v61, %v6914_v5  ;;  %v6506_v12 = vpop.f32.mrf.mxu1  ;;  %v14270_v5 = vld [vmem:[#allocation117_spill] sm:$0xff] }
 0x9e7   : > { %v6592_v4 = vadd.f32 %v6506_v12, %v5556_v52 }
 0x9e8   : > { %v7134_v19 = vadd.f32 %v9104_v10, %v6972_v7 }
 0x9e9   : > { %v6808_v0 = vrot.slane %v6592_v4, 1  ;;  %v9109_v4 = vunpack.c.h.bf16 %v9375_v34 }
 0x9ea   : > { %v7188_v44 = vmul.f32 0.1, %v7134_v19 }
 0x9eb   : > { %v6849_v25 = vsel %vm14264_vm4, %v6807_v2, %v6808_v0  ;;  %vm14298_vm4 = vmmov %vm14208_vm0 }
 0x9ec   : > { %v7242_v60 = vmax.f32 %v7134_v19, %v7188_v44  ;;  %v6915_v46 = vadd.f32 %v6849_v25, %v14265_v58  ;;  %v9376_v19 = vld [vmem:[%s9942_s25 + $0x98] sm:$0xff]   ;;  %v5573_v44 = vpop.f32.mrf.mxu2 }
 0x9ed   : > { %v9112_v58 = vunpack.c.l.bf16 %v9376_v19 }
 0x9ee   : > { %v9224_v30 = vpack.c.bf16 %v7242_v60, %v7241_v9  ;;  %v6509_v33 = vpop.f32.mrf.mxu1  ;;  %v6973_v18 = vadd.f32 %v13209_v61, %v6915_v46 }
 0x9ef   : > { %v6593_v47 = vadd.f32 %v6509_v33, %v5559_v32 }
 0x9f0   : > { %9399 = vst [vmem:[%s9947_s28 + $0x78] sm:$0xff] %v9224_v30   ;;  %v7135_v23 = vadd.f32 %v9105_v45, %v6973_v18 }
 0x9f1   : > { %v6809_v56 = vrot.slane %v6593_v47, 1  ;;  %6548 = vmatmul.bf16.gmra.mxu1 %v9889_v8 }
 0x9f2   : > { %v7189_v38 = vmul.f32 0.1, %v7135_v23 }
 0x9f3   : > { %v6848_v37 = vsel %vm14267_vm5, %v6808_v0, %v6809_v56  ;;  %v9890_v0 = vld [vmem:[#allocation2 + $0xe8] sm:$0xff]  ;;  %vm14300_vm5 = vmmov %vm14208_vm0 }
 0x9f4   : > { %v6916_v6 = vadd.f32 %v6848_v37, %v14268_v1  ;;  %v7243_v55 = vmax.f32 %v7135_v23, %v7189_v38  ;;  %v5575_v45 = vpop.f32.mrf.mxu2 }
 0x9f6   : > { %v6974_v22 = vadd.f32 %v13209_v61, %v6916_v6  ;;  %v6511_v35 = vpop.f32.mrf.mxu1  ;;  %v9113_v6 = vunpack.c.h.bf16 %v9376_v19 }
 0x9f7   : > { %v6594_v11 = vadd.f32 %v6511_v35, %v5561_v17  ;;  %v9377_v17 = vld [vmem:[%s9942_s25 + $0xa0] sm:$0xff]  }
 0x9f8   : > { %v7136_v2 = vadd.f32 %v9108_v28, %v6974_v22  ;;  %v9116_v38 = vunpack.c.l.bf16 %v9377_v17 }
 0x9f9   : > { %v6810_v13 = vrot.slane %v6594_v11, 1 }
 0x9fa   : > { %v7190_v40 = vmul.f32 0.1, %v7136_v2 }
 0x9fb   : > { %v6847_v15 = vsel %vm14269_vm6, %v6809_v56, %v6810_v13  ;;  %vm14302_vm6 = vmmov %vm14208_vm0 }
 0x9fc   : > { %v7244_v48 = vmax.f32 %v7136_v2, %v7190_v40  ;;  %v6917_v10 = vadd.f32 %v6847_v15, %v14270_v5  ;;  %v5571_v2 = vadd.f32 %v5570_v51, %v13067_v16 }
 0x9fe   : > { %v9229_v57 = vpack.c.bf16 %v7244_v48, %v7243_v55  ;;  %v6514_v52 = vpop.f32.mrf.mxu1  ;;  %v6975_v12 = vadd.f32 %v13209_v61, %v6917_v10 }
 0x9ff   : > { %v6595_v7 = vadd.f32 %v6514_v52, %v5564_v29 }
 0xa00   : > { %9400 = vst [vmem:[%s9947_s28 + $0x80] sm:$0xff] %v9229_v57   ;;  %v7137_v9 = vadd.f32 %v9109_v4, %v6975_v12 }
 0xa01   : > { %v6811_v49 = vrot.slane %v6595_v7, 1  ;;  %6553 = vmatmul.bf16.gmra.mxu1 %v9890_v0  ;;  %v14277_v7 = vld [vmem:[#allocation120_spill] sm:$0xff]  ;;  %v9117_v0 = vunpack.c.h.bf16 %v9377_v17 }
 0xa02   : > { %v7191_v32 = vmul.f32 0.1, %v7137_v9  ;;  %v5574_v16 = vadd.f32 %v5573_v44, %v14277_v7 }
 0xa03   : > { %v6846_v25 = vsel %vm14271_vm7, %v6810_v13, %v6811_v49  ;;  %v5578_v13 = vpop.f32.mrf.mxu2  ;;  %vm14304_vm7 = vmmov %vm14208_vm0 }
 0xa04   : > { %v6918_v60 = vadd.f32 %v6846_v25, %v13048_v50  ;;  %v7245_v56 = vmax.f32 %v7137_v9, %v7191_v32  ;;  %v14273_v50 = vld [vmem:[#allocation22_spill] sm:$0xff] }
 0xa05   : > { %v9378_v9 = vld [vmem:[%s9942_s25 + $0xa8] sm:$0xff]  }
 0xa06   : > { %v6976_v62 = vadd.f32 %v13209_v61, %v6918_v60  ;;  %v6516_v46 = vpop.f32.mrf.mxu1 }
 0xa07   : > { %v6596_v14 = vadd.f32 %v6516_v46, %v5566_v3  ;;  %v14279_v3 = vld [vmem:[#allocation24_spill] sm:$0xff]  ;;  %v9120_v46 = vunpack.c.l.bf16 %v9378_v9 }
 0xa08   : > { %v7138_v30 = vadd.f32 %v9112_v58, %v6976_v62 }
 0xa09   : > { %v6812_v33 = vrot.slane %v6596_v14, 1  ;;  %v5576_v14 = vadd.f32 %v5575_v45, %v13083_v63  ;;  %v5579_v63 = vadd.f32 %v5578_v13, %v13091_v31  ;;  %v13483_v31 = vld [vmem:[%s13566_s4] ss:$0 sm:$0xff] }
 0xa0a   : > { %v7192_v47 = vmul.f32 0.1, %v7138_v30 }
 0xa0b   : > { %v6845_v18 = vsel %vm14272_vm8, %v6811_v49, %v6812_v33  ;;  %v5580_v49 = vpop.f32.mrf.mxu2  ;;  %vm14307_vm8 = vmmov %vm14208_vm0 }
 0xa0c   : > { %v7246_v34 = vmax.f32 %v7138_v30, %v7192_v47  ;;  %v6919_v8 = vadd.f32 %v6845_v18, %v14273_v50 }
 0xa0e   : > { %v9234_v20 = vpack.c.bf16 %v7246_v34, %v7245_v56  ;;  %v6519_v37 = vpop.f32.mrf.mxu1  ;;  %v6977_v1 = vadd.f32 %v13209_v61, %v6919_v8 }
 0xa0f   : > { %v6597_v23 = vadd.f32 %v6519_v37, %v5569_v43 }
 0xa10   : > { %9401 = vst [vmem:[%s9947_s28 + $0x88] sm:$0xff] %v9234_v20   ;;  %v7139_v35 = vadd.f32 %v9113_v6, %v6977_v1  ;;  %v14281_v20 = vld [vmem:[#allocation119_spill] sm:$0xff] }
 0xa11   : > { %v6813_v28 = vrot.slane %v6597_v23, 1 }
 0xa12   : > { %v7193_v15 = vmul.f32 0.1, %v7139_v35 }
 0xa13   : > { %v6844_v22 = vsel %vm14274_vm9, %v6812_v33, %v6813_v28  ;;  %v5583_v56 = vpop.f32.mrf.mxu2  ;;  %vm14310_vm9 = vmmov %vm14208_vm0 }
 0xa14   : > { %v6920_v11 = vadd.f32 %v6844_v22, %v13064_v59  ;;  %v7247_v29 = vmax.f32 %v7139_v35, %v7193_v15  ;;  %v14276_v59 = vld [vmem:[#allocation116_spill] sm:$0xff]  ;;  %v9379_v22 = vld [vmem:[%s9942_s25 + $0xb0] sm:$0xff]   ;;  %v5584_v7 = vadd.f32 %v5583_v56, %v13107_v42 }
 0xa16   : > { %v6978_v21 = vadd.f32 %v13209_v61, %v6920_v11  ;;  %v6521_v41 = vpop.f32.mrf.mxu1 }
 0xa17   : > { %v6598_v40 = vadd.f32 %v6521_v41, %v5571_v2  ;;  %v14283_v2 = vld [vmem:[#allocation123_spill] sm:$0xff]  ;;  %v9124_v41 = vunpack.c.l.bf16 %v9379_v22 }
 0xa18   : > { %v7140_v55 = vadd.f32 %v9116_v38, %v6978_v21 }
 0xa19   : > { %v6814_v48 = vrot.slane %v6598_v40, 1  ;;  %v5581_v40 = vadd.f32 %v5580_v49, %v13099_v36 }
 0xa1a   : > { %v7194_v5 = vmul.f32 0.1, %v7140_v55 }
 0xa1b   : > { %v6843_v10 = vsel %vm14275_vm10, %v6813_v28, %v6814_v48  ;;  %v9121_v28 = vunpack.c.h.bf16 %v9378_v9  ;;  %v5585_v11 = vpop.f32.mrf.mxu2 }
 0xa1c   : > { %v7248_v57 = vmax.f32 %v7140_v55, %v7194_v5  ;;  %v6921_v52 = vadd.f32 %v6843_v10, %v14276_v59  ;;  %v14284_v59 = vld [vmem:[#allocation26_spill] sm:$0xff] }
 0xa1e   : > { %v9239_v51 = vpack.c.bf16 %v7248_v57, %v7247_v29  ;;  %v6524_v12 = vpop.f32.mrf.mxu1  ;;  %v6979_v19 = vadd.f32 %v13209_v61, %v6921_v52 }
 0xa1f   : > { %v6599_v4 = vadd.f32 %v6524_v12, %v5574_v16 }
 0xa20   : > { %9402 = vst [vmem:[%s9947_s28 + $0x90] sm:$0xff] %v9239_v51   ;;  %v7141_v58 = vadd.f32 %v9117_v0, %v6979_v19  ;;  %v9125_v19 = vunpack.c.h.bf16 %v9379_v22  ;;  %v9381_v22 = vld [vmem:[%s9942_s25 + $0xc0] sm:$0xff]  }
 0xa21   : > { %v6815_v25 = vrot.slane %v6599_v4, 1 }
 0xa22   : > { %v7195_v33 = vmul.f32 0.1, %v7141_v58 }
 0xa23   : > { %v6842_v60 = vsel %vm14278_vm11, %v6814_v48, %v6815_v25  ;;  %v5588_v16 = vpop.f32.mrf.mxu2 }
 0xa24   : > { %v6922_v62 = vadd.f32 %v6842_v60, %v14279_v3  ;;  %v7249_v8 = vmax.f32 %v7141_v58, %v7195_v33  ;;  %v14286_v58 = vld [vmem:[#allocation122_spill] sm:$0xff] }
 0xa26   : > { %v6980_v44 = vadd.f32 %v13209_v61, %v6922_v62  ;;  %v6526_v32 = vpop.f32.mrf.mxu1 }
 0xa27   : > { %v6600_v30 = vadd.f32 %v6526_v32, %v5576_v14 }
 0xa28   : > { %v7142_v47 = vadd.f32 %v9120_v46, %v6980_v44  ;;  %v14287_v46 = vld [vmem:[#allocation126_spill] sm:$0xff] }
 0xa29   : > { %v6816_v18 = vrot.slane %v6600_v30, 1  ;;  %v5586_v14 = vadd.f32 %v5585_v11, %v14287_v46 }
 0xa2a   : > { %v7196_v34 = vmul.f32 0.1, %v7142_v47 }
 0xa2b   : > { %v6841_v50 = vsel %vm14280_vm12, %v6815_v25, %v6816_v18  ;;  %v9380_v25 = vld [vmem:[%s9942_s25 + $0xb8] sm:$0xff]   ;;  %v5590_v30 = vpop.f32.mrf.mxu2 }
 0xa2c   : > { %v7250_v43 = vmax.f32 %v7142_v47, %v7196_v34  ;;  %v6923_v37 = vadd.f32 %v6841_v50, %v14281_v20  ;;  %v9128_v62 = vunpack.c.l.bf16 %v9380_v25 }
 0xa2e   : > { %v9244_v45 = vpack.c.bf16 %v7250_v43, %v7249_v8  ;;  %v6529_v23 = vpop.f32.mrf.mxu1  ;;  %v6981_v6 = vadd.f32 %v13209_v61, %v6923_v37  ;;  %v14289_v43 = vld [vmem:[#allocation28_spill] sm:$0xff]  ;;  %v14290_v37 = vld [vmem:[#allocation125_spill] sm:$0xff] }
 0xa2f   : > { %v6601_v1 = vadd.f32 %v6529_v23, %v5579_v63  ;;  %v5589_v63 = vadd.f32 %v5588_v16, %v14290_v37  ;;  %v14295_v16 = vld [vmem:[#allocation128_spill] sm:$0xff] }
 0xa30   : > { %9403 = vst [vmem:[%s9947_s28 + $0x98] sm:$0xff] %v9244_v45   ;;  %v7143_v38 = vadd.f32 %v9121_v28, %v6981_v6  ;;  %v9129_v28 = vunpack.c.h.bf16 %v9380_v25  ;;  %v9382_v25 = vld [vmem:[%s9942_s25 + $0xc8] sm:$0xff]  }
 0xa31   : > { %v6817_v17 = vrot.slane %v6601_v1, 1 }
 0xa32   : > { %v7197_v55 = vmul.f32 0.1, %v7143_v38 }
 0xa33   : > { %v6840_v35 = vsel %vm14282_vm13, %v6816_v18, %v6817_v17 }
 0xa34   : > { %v6924_v21 = vadd.f32 %v6840_v35, %v14283_v2  ;;  %v7251_v57 = vmax.f32 %v7143_v38, %v7197_v55  ;;  %v5593_v35 = vpop.f32.mrf.mxu2  ;;  %v14292_v2 = vld [vmem:[#allocation129_spill] sm:$0xff] }
 0xa36   : > { %v6982_v61 = vadd.f32 %v13483_v31, %v6924_v21  ;;  %v6531_v13 = vpop.f32.mrf.mxu1 }
 0xa37   : > { %v6602_v15 = vadd.f32 %v6531_v13, %v5581_v40  ;;  %v5591_v40 = vadd.f32 %v5590_v30, %v13131_v54  ;;  %v5594_v54 = vadd.f32 %v5593_v35, %v14295_v16  ;;  %v14301_v35 = vld [vmem:[#allocation131_spill] sm:$0xff] }
 0xa38   : > { %v7144_v48 = vadd.f32 %v9124_v41, %v6982_v61  ;;  %v9132_v41 = vunpack.c.l.bf16 %v9381_v22 }
 0xa39   : > { %v6818_v5 = vrot.slane %v6602_v15, 1 }
 0xa3a   : > { %v7198_v10 = vmul.f32 0.1, %v7144_v48 }
 0xa3b   : > { %v6839_v29 = vsel %vm14208_vm0, %v6817_v17, %v6818_v5 }
 0xa3c   : > { %v7252_v36 = vmax.f32 %v7144_v48, %v7198_v10  ;;  %v6925_v52 = vadd.f32 %v6839_v29, %v14284_v59 }
 0xa3e   : > { %v9249_v51 = vpack.c.bf16 %v7252_v36, %v7251_v57  ;;  %v6534_v12 = vpop.f32.mrf.mxu1  ;;  %v6983_v49 = vadd.f32 %v13483_v31, %v6925_v52  ;;  %v5595_v57 = vpop.f32.mrf.mxu2  ;;  %v14294_v52 = vld [vmem:[#allocation30_spill] sm:$0xff] }
 0xa3f   : > { %v6603_v4 = vadd.f32 %v6534_v12, %v5584_v7  ;;  %v5596_v46 = vadd.f32 %v5595_v57, %v13147_v39 }
 0xa40   : > { %9404 = vst [vmem:[%s9947_s28 + $0xa0] sm:$0xff] %v9249_v51   ;;  %v7145_v60 = vadd.f32 %v9125_v19, %v6983_v49  ;;  %v9133_v19 = vunpack.c.h.bf16 %v9381_v22 }
 0xa41   : > { %v6819_v0 = vrot.slane %v6603_v4, 1 }
 0xa42   : > { %v7199_v33 = vmul.f32 0.1, %v7145_v60 }
 0xa43   : > { %v6838_v9 = vsel %vm14285_vm1, %v6818_v5, %v6819_v0 }
 0xa44   : > { %v6926_v3 = vadd.f32 %v6838_v9, %v14286_v58  ;;  %v7253_v50 = vmax.f32 %v7145_v60, %v7199_v33  ;;  %v14297_v58 = vld [vmem:[#allocation132_spill] sm:$0xff] }
 0xa46   : > { %v6984_v42 = vadd.f32 %v13483_v31, %v6926_v3  ;;  %v6536_v44 = vpop.f32.mrf.mxu1 }
 0xa47   : > { %v6604_v32 = vadd.f32 %v6536_v44, %v5586_v14  ;;  %v5598_v14 = vpop.f32.mrf.mxu2 }
 0xa48   : > { %v7146_v47 = vadd.f32 %v9128_v62, %v6984_v42  ;;  %v9136_v62 = vunpack.c.l.bf16 %v9382_v25 }
 0xa49   : > { %v6820_v18 = vrot.slane %v6604_v32, 1 }
 0xa4a   : > { %v7200_v56 = vmul.f32 0.1, %v7146_v47 }
 0xa4b   : > { %v6837_v34 = vsel %vm14288_vm14, %v6819_v0, %v6820_v18 }
 0xa4c   : > { %v7254_v8 = vmax.f32 %v7146_v47, %v7200_v56  ;;  %v6927_v20 = vadd.f32 %v6837_v34, %v14289_v43  ;;  %v14299_v43 = vld [vmem:[#allocation32_spill] sm:$0xff] }
 0xa4d   : > { %v5599_v39 = vadd.f32 %v5598_v14, %v14299_v43  ;;  %v7048_v14 = vld [vmem:[%s9942_s25 + $0xe0] sm:$0xf] }
 0xa4e   : > { %v9254_v45 = vpack.c.bf16 %v7254_v8, %v7253_v50  ;;  %v6539_v23 = vpop.f32.mrf.mxu1  ;;  %v6985_v6 = vadd.f32 %v13483_v31, %v6927_v20 }
 0xa4f   : > { %v6605_v1 = vadd.f32 %v6539_v23, %v5589_v63 }
 0xa50   : > { %9405 = vst [vmem:[%s9947_s28 + $0xa8] sm:$0xff] %v9254_v45   ;;  %v7147_v38 = vadd.f32 %v9129_v28, %v6985_v6  ;;  %v5600_v45 = vpop.f32.mrf.mxu2  ;;  %v9383_v28 = vld [vmem:[%s9942_s25 + $0xd0] sm:$0xff]  }
 0xa51   : > { %v6821_v17 = vrot.slane %v6605_v1, 1  ;;  %v9137_v1 = vunpack.c.h.bf16 %v9382_v25  ;;  %v9141_v16 = vunpack.c.h.bf16 %v9383_v28 }
 0xa52   : > { %v7201_v55 = vmul.f32 0.1, %v7147_v38 }
 0xa53   : > { %v6836_v11 = vsel %vm14291_vm15, %v6820_v18, %v6821_v17 }
 0xa54   : > { %v6928_v21 = vadd.f32 %v6836_v11, %v14292_v2  ;;  %v7255_v36 = vmax.f32 %v7147_v38, %v7201_v55  ;;  %v9140_v38 = vunpack.c.l.bf16 %v9383_v28 }
 0xa56   : > { %v6986_v61 = vadd.f32 %v13483_v31, %v6928_v21  ;;  %v6541_v13 = vpop.f32.mrf.mxu1 }
 0xa57   : > { %v6606_v15 = vadd.f32 %v6541_v13, %v5591_v40 }
 0xa58   : > { %v7148_v48 = vadd.f32 %v9132_v41, %v6986_v61 }
 0xa59   : > { %v6822_v5 = vrot.slane %v6606_v15, 1  ;;  %v5603_v15 = vpop.f32.mrf.mxu2 }
 0xa5a   : > { %v7202_v10 = vmul.f32 0.1, %v7148_v48 }
 0xa5b   : > { %v6835_v29 = vsel %vm14293_vm2, %v6821_v17, %v6822_v5 }
 0xa5c   : > { %v7256_v59 = vmax.f32 %v7148_v48, %v7202_v10  ;;  %v6929_v7 = vadd.f32 %v6835_v29, %v14294_v52  ;;  %v14303_v29 = vld [vmem:[#allocation135_spill] sm:$0xff] }
 0xa5e   : > { %v9259_v51 = vpack.c.bf16 %v7256_v59, %v7255_v36  ;;  %v6544_v12 = vpop.f32.mrf.mxu1  ;;  %v6987_v49 = vadd.f32 %v13483_v31, %v6929_v7 }
 0xa5f   : > { %v6607_v4 = vadd.f32 %v6544_v12, %v5594_v54 }
 0xa60   : > { %9406 = vst [vmem:[%s9947_s28 + $0xb0] sm:$0xff] %v9259_v51   ;;  %v7149_v60 = vadd.f32 %v9133_v19, %v6987_v49  ;;  %v9384_v51 = vld [vmem:[%s9942_s25 + $0xd8] sm:$0xff]   ;;  %v14305_v19 = vld [vmem:[#allocation34_spill] sm:$0xff] }
 0xa61   : > { %v6823_v0 = vrot.slane %v6607_v4, 1  ;;  %v5605_v4 = vpop.f32.mrf.mxu2  ;;  %v9144_v25 = vunpack.c.l.bf16 %v9384_v51 }
 0xa62   : > { %v7203_v30 = vmul.f32 0.1, %v7149_v60 }
 0xa63   : > { %v6834_v9 = vsel %vm14296_vm3, %v6822_v5, %v6823_v0 }
 0xa64   : > { %v6930_v3 = vadd.f32 %v6834_v9, %v14297_v58  ;;  %v7257_v34 = vmax.f32 %v7149_v60, %v7203_v30  ;;  %v14306_v9 = vld [vmem:[#allocation134_spill] sm:$0xff]  ;;  %v14308_v30 = vld [vmem:[#allocation136_spill] sm:$0xff] }
 0xa66   : > { %v6988_v42 = vadd.f32 %v13483_v31, %v6930_v3  ;;  %v6546_v44 = vpop.f32.mrf.mxu1 }
 0xa67   : > { %v6608_v32 = vadd.f32 %v6546_v44, %v5596_v46 }
 0xa68   : > { %v7150_v33 = vadd.f32 %v9136_v62, %v6988_v42 }
 0xa69   : > { %v6824_v47 = vrot.slane %v6608_v32, 1 }
 0xa6a   : > { %v7204_v18 = vmul.f32 0.1, %v7150_v33 }
 0xa6b   : > { %v6833_v56 = vsel %vm14298_vm4, %v6823_v0, %v6824_v47 }
 0xa6c   : > { %v7258_v50 = vmax.f32 %v7150_v33, %v7204_v18  ;;  %v6931_v8 = vadd.f32 %v6833_v56, %v13152_v24  ;;  %v5601_v24 = vadd.f32 %v5600_v45, %v13163_v26  ;;  %v5604_v26 = vadd.f32 %v5603_v15, %v13171_v27 }
 0xa6d   : > { %v5606_v27 = vadd.f32 %v5605_v4, %v14306_v9  ;;  %v14309_v33 = vrot.slane %v14308_v30, 1  ;;  %v9145_v18 = vunpack.c.h.bf16 %v9384_v51  ;;  %v7102_v56 = vunpack.c.l.bf16 %v7048_v14 }
 0xa6e   : > { %v9264_v20 = vpack.c.bf16 %v7258_v50, %v7257_v34  ;;  %v6549_v37 = vpop.f32.mrf.mxu1  ;;  %v6989_v23 = vadd.f32 %v13483_v31, %v6931_v8  ;;  %v14311_v8 = vld [vmem:[#allocation137_spill] sm:$0xff] }
 0xa6f   : > { %v6609_v63 = vadd.f32 %v6549_v37, %v5599_v39  ;;  %v14312_v39 = vld [vmem:[#allocation36_spill] sm:$0xff] }
 0xa70   : > { %9407 = vst [vmem:[%s9947_s28 + $0xb8] sm:$0xff] %v9264_v20   ;;  %v7151_v22 = vadd.f32 %v9137_v1, %v6989_v23 }
 0xa71   : > { %v6825_v6 = vrot.slane %v6609_v63, 1 }
 0xa72   : > { %v7205_v40 = vmul.f32 0.1, %v7151_v22 }
 0xa73   : > { %v6832_v17 = vsel %vm14300_vm5, %v6824_v47, %v6825_v6 }
 0xa74   : > { %v6932_v11 = vadd.f32 %v6832_v17, %v14301_v35  ;;  %v7259_v5 = vmax.f32 %v7151_v22, %v7205_v40 }
 0xa76   : > { %v6990_v2 = vadd.f32 %v13483_v31, %v6932_v11  ;;  %v6551_v21 = vpop.f32.mrf.mxu1 }
 0xa77   : > { %v6610_v41 = vadd.f32 %v6551_v21, %v5601_v24 }
 0xa78   : > { %v7152_v61 = vadd.f32 %v9140_v38, %v6990_v2 }
 0xa79   : > { %v6826_v13 = vrot.slane %v6610_v41, 1 }
 0xa7a   : > { %v7206_v55 = vmul.f32 0.1, %v7152_v61 }
 0xa7b   : > { %v6831_v48 = vsel %vm14302_vm6, %v6825_v6, %v6826_v13 }
 0xa7c   : > { %v7260_v10 = vmax.f32 %v7152_v61, %v7206_v55  ;;  %v6933_v57 = vadd.f32 %v6831_v48, %v14303_v29 }
 0xa7e   : > { %v9269_v36 = vpack.c.bf16 %v7260_v10, %v7259_v5  ;;  %v6554_v59 = vpop.f32.mrf.mxu1  ;;  %v6991_v7 = vadd.f32 %v13483_v31, %v6933_v57 }
 0xa7f   : > { %v6611_v52 = vadd.f32 %v6554_v59, %v5604_v26 }
 0xa80   : > { %9408 = vst [vmem:[%s9947_s28 + $0xc0] sm:$0xff] %v9269_v36   ;;  %v7153_v49 = vadd.f32 %v9141_v16, %v6991_v7 }
 0xa81   : > { %v6827_v54 = vrot.slane %v6611_v52, 1 }
 0xa82   : > { %v7207_v62 = vmul.f32 0.1, %v7153_v49 }
 0xa83   : > { %v6830_v12 = vsel %vm14304_vm7, %v6826_v13, %v6827_v54 }
 0xa84   : > { %v6934_v0 = vadd.f32 %v6830_v12, %v14305_v19  ;;  %v7261_v34 = vmax.f32 %v7153_v49, %v7207_v62 }
 0xa86   : > { %v6992_v60 = vadd.f32 %v13483_v31, %v6934_v0  ;;  %v6556_v58 = vpop.f32.mrf.mxu1 }
 0xa87   : > { %v6612_v3 = vadd.f32 %v6556_v58, %v5606_v27 }
 0xa88   : > { %v7154_v46 = vadd.f32 %v9144_v25, %v6992_v60 }
 0xa89   : > { %v6828_v42 = vrot.slane %v6612_v3, 1 }
 0xa8a   : > { %v7208_v44 = vmul.f32 0.1, %v7154_v46 }
 0xa8b   : > { %v6829_v32 = vsel %vm14307_vm8, %v6827_v54, %v6828_v42  ;;  %v6882_v47 = vsel %vm14310_vm9, %v6828_v42, %v14309_v33 }
 0xa8c   : > { %v7262_v50 = vmax.f32 %v7154_v46, %v7208_v44  ;;  %v6935_v43 = vadd.f32 %v6829_v32, %v14311_v8  ;;  %v6936_v20 = vadd.f32 %v6882_v47, %v14312_v39 }
 0xa8e   : > { %v9274_v37 = vpack.c.bf16 %v7262_v50, %v7261_v34  ;;  %v6993_v63 = vadd.f32 %v13483_v31, %v6935_v43  ;;  %v6994_v45 = vadd.f32 %v13483_v31, %v6936_v20 }
 0xa90   : > { %9409 = vst [vmem:[%s9947_s28 + $0xc8] sm:$0xff] %v9274_v37   ;;  %v7155_v23 = vadd.f32 %v9145_v18, %v6993_v63  ;;  %v7156_v1 = vadd.f32 %v7102_v56, %v6994_v45 }
 0xa92   : > { %v7209_v6 = vmul.f32 0.1, %v7155_v23  ;;  %v7210_v53 = vmul.f32 0.1, %v7156_v1 }
 0xa94   : > { %v7263_v28 = vmax.f32 %v7155_v23, %v7209_v6  ;;  %v7264_v17 = vmax.f32 %v7156_v1, %v7210_v53 }
 0xa96   : > { %v9279_v22 = vpack.c.bf16 %v7264_v17, %v7263_v28 }
 0xa98   : > { %9410 = vst [vmem:[%s9947_s28 + $0xd0] sm:$0xff] %v9279_v22  }
 0xa99 PF: > { %s15_s18 = sadd.s32 1, %s9898_s18  }
 0xa9a   : > { %p12_p5 = scmp.ge.s32.totalorder %s15_s18, 4  }
 0xa9c   :  { %14 = sbr.rel (!%p12_p5) target bundleno = 1 (0x1), region = 90 }

</bundles_post_ra>
